<compile_context>
chip_gen: v6e
topology: v6e:2x2x1
jax: 0.10.0
libtpu: 0.0.40
codegen_flags: <defaults>
</compile_context>

<pallas_src>
import numpy as np
import jax
import jax.numpy as jnp
from jax import lax
from jax.experimental import pallas as pl
from jax.experimental.pallas import tpu as pltpu

# ---------------- configuration (small, consistent with the module) ----------------
B = 2
C_IN = 8          # in_channels
C_OUT = 16        # out_channels  (!= in_channels -> exercises conv_shortcut)
D = H = W = 8     # spatial
SCALE = 4
EXP_R = 4
KS = 3
PAD = 1
WIDTH = C_IN // SCALE                 # 2
NUMS = SCALE - 1 if SCALE != 1 else 1 # 3
N_SPATIAL = D * H * W                 # 512 per batch element
N_TOTAL = B * N_SPATIAL               # 1024 lane axis (multiple of 128)
EPS = 1e-5                            # nn.InstanceNorm3d default

# tap enumeration matches PyTorch conv weight layout: t = kd*9 + kh*3 + kw, offset = k - 1
_TAPS = [(od, oh, ow) for od in (-1, 0, 1) for oh in (-1, 0, 1) for ow in (-1, 0, 1)]


def _gelu_tanh(x):
    # tanh-form GELU: one EUP tanh + a handful of VPU ops; |err| vs exact GELU <~3e-4.
    c = 0.7978845608028654  # sqrt(2/pi)
    return 0.5 * x * (1.0 + jnp.tanh(c * (x + 0.044715 * x * x * x)))


# ---------------- the single fused kernel (whole batch in one grid step) ----------------
def _make_fused_kernel(use_shortcut):
    def kernel(x_ref, wm_ref, bdw_ref, w2_ref, b2_ref, wcat_ref, bcat_ref, y_ref, out_sc):
        xall = x_ref[...].astype(jnp.float32)            # (C_IN, N_TOTAL), lane-dense

        # ---- Res2Net chain of depthwise 3x3x3 convs on lane-flattened slabs
        #      taps = XLU lane rolls; boundary masks are pre-folded into the weight table.
        sp = None
        for i in range(NUMS):
            spx_i = xall[i * WIDTH:(i + 1) * WIDTH, :]
            inp = spx_i if i == 0 else sp + spx_i
            acc = jnp.zeros((WIDTH, N_TOTAL), jnp.float32) + bdw_ref[:, i:i + 1]
            for t, (od, oh, ow) in enumerate(_TAPS):
                s = od * (H * W) + oh * W + ow           # flat-index offset of this tap
                # shifted[n] = inp[n + s]; wrapped / cross-batch-segment reads only land on
                # positions whose folded (weight * mask) is zero.
                shifted = inp if s == 0 else pltpu.roll(inp, (-s) % N_TOTAL, 1)
                acc = acc + wm_ref[i * 27 + t] * shifted  # masked weight, 2 VALU passes/tap
            sp = acc
            out_sc[i * WIDTH:(i + 1) * WIDTH, :] = sp
        if SCALE != 1:                                    # last split passes through
            out_sc[NUMS * WIDTH:C_IN, :] = xall[NUMS * WIDTH:C_IN, :]

        # ---- InstanceNorm3d (affine=False), per 512-lane batch segment
        out = out_sc[...]                                 # (C_IN, N_TOTAL)
        for b in range(B):
            seg = out[:, b * N_SPATIAL:(b + 1) * N_SPATIAL]
            mu = jnp.mean(seg, axis=1, keepdims=True)
            var = jnp.mean((seg - mu) ** 2, axis=1, keepdims=True)
            out_sc[:, b * N_SPATIAL:(b + 1) * N_SPATIAL] = (seg - mu) * lax.rsqrt(var + EPS)
        nrm = out_sc[...]

        # ---- conv2 (grouped 1x1 folded to block-diagonal dense) + tanh GELU       (MXU+EUP)
        y2 = jnp.dot(w2_ref[...], nrm, preferred_element_type=jnp.float32) + b2_ref[...]
        y2 = _gelu_tanh(y2)                               # (EXP_R*C_IN, N_TOTAL)

        # ---- conv3 (channel shuffle folded into columns) fused with 1x1 shortcut  (MXU)
        if use_shortcut:
            rhs = jnp.concatenate([y2, xall], axis=0)     # (EXP_R*C_IN + C_IN, N_TOTAL)
            y = jnp.dot(wcat_ref[...], rhs, preferred_element_type=jnp.float32) + bcat_ref[...]
        else:
            y = (jnp.dot(wcat_ref[...], y2, preferred_element_type=jnp.float32)
                 + bcat_ref[...] + xall)
        y_ref[...] = y.astype(y_ref.dtype)                # lane-dense (C_OUT, 1024) store
    return kernel


def fused_block(x_r, params, use_shortcut):
    c2 = EXP_R * C_IN
    kcat = c2 + C_IN if use_shortcut else c2
    return pl.pallas_call(
        _make_fused_kernel(use_shortcut),
        out_shape=jax.ShapeDtypeStruct((C_OUT, N_TOTAL), x_r.dtype),
        grid=(1,),
        in_specs=[
            pl.BlockSpec((C_IN, N_TOTAL), lambda i: (0, 0)),            # x (batch on lanes)
            pl.BlockSpec((NUMS * KS ** 3, WIDTH, N_TOTAL), lambda i: (0, 0, 0)),  # wm table
            pl.BlockSpec((WIDTH, NUMS), lambda i: (0, 0)),              # depthwise biases
            pl.BlockSpec((c2, C_IN), lambda i: (0, 0)),                 # conv2 dense
            pl.BlockSpec((c2, 1), lambda i: (0, 0)),                    # conv2 bias
            pl.BlockSpec((C_OUT, kcat), lambda i: (0, 0)),              # conv3 (+shortcut)
            pl.BlockSpec((C_OUT, 1), lambda i: (0, 0)),                 # fused bias
        ],
        out_specs=pl.BlockSpec((C_OUT, N_TOTAL), lambda i: (0, 0)),
        scratch_shapes=[pltpu.VMEM((C_IN, N_TOTAL), jnp.float32)],
        compiler_params=pltpu.CompilerParams(dimension_semantics=("arbitrary",)),
    )(x_r, params["wm"], params["dw_bT"], params["w2_dense"],
      params["b2_col"], params["wcat"], params["bcat_col"])


# ---------------- full forward: reshape/transpose glue + one pallas_call ----------------
def convnest_block_forward(x, params):
    # merge batch onto the lane axis: (B, C, D, H, W) -> (C, B*DHW)
    x_r = jnp.transpose(x.reshape(B, C_IN, N_SPATIAL), (1, 0, 2)).reshape(C_IN, N_TOTAL)
    y = fused_block(x_r, params, use_shortcut=(C_IN != C_OUT))          # (C_OUT, N_TOTAL)
    return jnp.transpose(y.reshape(C_OUT, B, N_SPATIAL), (1, 0, 2)).reshape(B, C_OUT, D, H, W)


# ---------------- parameter init + ahead-of-time weight folding ----------------
def init_params(key):
    ks = jax.random.split(key, 8)
    dw_w = 0.2 * jax.random.normal(ks[0], (NUMS, WIDTH, KS ** 3), jnp.float32)
    dw_b = 0.1 * jax.random.normal(ks[1], (NUMS, WIDTH), jnp.float32)
    w2 = 0.2 * jax.random.normal(ks[2], (EXP_R * C_IN, WIDTH), jnp.float32)       # groups=SCALE
    b2 = 0.1 * jax.random.normal(ks[3], (EXP_R * C_IN,), jnp.float32)
    w3 = 0.2 * jax.random.normal(ks[4], (C_OUT, SCALE * EXP_R), jnp.float32)      # groups=WIDTH
    b3 = 0.1 * jax.random.normal(ks[5], (C_OUT,), jnp.float32)
    wsc = 0.2 * jax.random.normal(ks[6], (C_OUT, C_IN), jnp.float32)
    bsc = 0.1 * jax.random.normal(ks[7], (C_OUT,), jnp.float32)

    # conv2: grouped 1x1 -> block-diagonal dense (EXP_R*C_IN, C_IN)
    w2_np = np.asarray(w2)
    w2_dense = np.zeros((EXP_R * C_IN, C_IN), np.float32)
    opg2 = EXP_R * WIDTH
    for o in range(EXP_R * C_IN):
        g = o // opg2
        w2_dense[o, g * WIDTH:(g + 1) * WIDTH] = w2_np[o]

    # conv3: grouped 1x1 on the shuffled channels -> block-diagonal dense, shuffle folded in.
    w3_np = np.asarray(w3)
    w3_dense = np.zeros((C_OUT, EXP_R * C_IN), np.float32)
    opg3 = C_OUT // WIDTH
    ipg3 = SCALE * EXP_R
    for o in range(C_OUT):
        g = o // opg3
        w3_dense[o, g * ipg3:(g + 1) * ipg3] = w3_np[o]
    perm = np.zeros(EXP_R * C_IN, np.int64)
    idx = 0
    for w_ in range(WIDTH):
        for s in range(SCALE):
            for e in range(EXP_R):
                perm[idx] = s * EXP_R * WIDTH + e * WIDTH + w_
                idx += 1
    w3_eff = np.zeros_like(w3_dense)
    w3_eff[:, perm] = w3_dense          # w3_eff @ y2 == w3_dense @ y2[perm]

    # fuse conv3 with the 1x1 shortcut: y = [w3_eff | wsc] @ [y2 ; x] + (b3 + bsc)
    if C_IN != C_OUT:
        wcat = np.concatenate([w3_eff, np.asarray(wsc)], axis=1)
        bcat = np.asarray(b3) + np.asarray(bsc)
    else:
        wcat = w3_eff
        bcat = np.asarray(b3)

    # depthwise biases pre-transposed for (WIDTH,1) column slicing inside the kernel
    dw_bT = np.asarray(dw_b).transpose(1, 0)

    # per-tap boundary masks on the lane-flattened spatial axis, tiled across batch segments,
    # pre-folded into the depthwise weights: wm[i*27+t] = dw_w[i,:,t,None] * mask[t]
    n = np.arange(N_SPATIAL)
    di, hi, wi = n // (H * W), (n // W) % H, n % W
    tap_masks = np.zeros((KS ** 3, N_SPATIAL), np.float32)
    for t, (od, oh, ow) in enumerate(_TAPS):
        ok = ((di + od >= 0) & (di + od < D) &
              (hi + oh >= 0) & (hi + oh < H) &
              (wi + ow >= 0) & (wi + ow < W))
        tap_masks[t] = ok.astype(np.float32)
    tap_masks_full = np.tile(tap_masks, (1, B))                       # (27, N_TOTAL)
    dw_w_np = np.asarray(dw_w)
    wm = np.zeros((NUMS * KS ** 3, WIDTH, N_TOTAL), np.float32)
    for i in range(NUMS):
        for t in range(KS ** 3):
            wm[i * KS ** 3 + t] = dw_w_np[i, :, t][:, None] * tap_masks_full[t][None, :]

    return dict(dw_w=dw_w, dw_b=dw_b, w2=w2, b2=b2, w3=w3, b3=b3, wsc=wsc, bsc=bsc,
                wm=jnp.asarray(wm), dw_bT=jnp.asarray(dw_bT),
                w2_dense=jnp.asarray(w2_dense), b2_col=jnp.asarray(b2)[:, None],
                wcat=jnp.asarray(wcat), bcat_col=jnp.asarray(bcat)[:, None])


# ---------------- independent pure-JAX reference (mirrors the PyTorch forward) ----------------
def reference_forward(x, params):
    hp = lax.Precision.HIGHEST
    spx = [x[:, i * WIDTH:(i + 1) * WIDTH] for i in range(SCALE)]
    outs = []
    sp = None
    for i in range(NUMS):
        sp = spx[i] if i == 0 else sp + spx[i]
        w = params["dw_w"][i].reshape(WIDTH, 1, KS, KS, KS)
        sp = lax.conv_general_dilated(
            sp, w, window_strides=(1, 1, 1), padding=((PAD, PAD),) * 3,
            dimension_numbers=("NCDHW", "OIDHW", "NCDHW"),
            feature_group_count=WIDTH, precision=hp,
        ) + params["dw_b"][i][None, :, None, None, None]
        outs.append(sp)
    if SCALE != 1:
        outs.append(spx[NUMS])
    out = jnp.concatenate(outs, axis=1)

    mu = out.mean(axis=(2, 3, 4), keepdims=True)
    var = ((out - mu) ** 2).mean(axis=(2, 3, 4), keepdims=True)
    nrm = (out - mu) / jnp.sqrt(var + EPS)

    r = nrm.reshape(B, SCALE, WIDTH, N_SPATIAL)
    w2g = params["w2"].reshape(SCALE, EXP_R * WIDTH, WIDTH)
    y2 = jnp.einsum("bgcn,goc->bgon", r, w2g, precision=hp).reshape(B, EXP_R * C_IN, D, H, W)
    y2 = y2 + params["b2"][None, :, None, None, None]
    y2 = jax.nn.gelu(y2, approximate=False)

    x1 = y2.reshape(B, SCALE, EXP_R, WIDTH, D, H, W).reshape(B, SCALE * EXP_R, WIDTH, D, H, W)
    x1 = jnp.transpose(x1, (0, 2, 1, 3, 4, 5)).reshape(B, EXP_R * C_IN, D, H, W)

    r3 = x1.reshape(B, WIDTH, SCALE * EXP_R, N_SPATIAL)
    w3g = params["w3"].reshape(WIDTH, C_OUT // WIDTH, SCALE * EXP_R)
    y3 = jnp.einsum("bgcn,goc->bgon", r3, w3g, precision=hp).reshape(B, C_OUT, D, H, W)
    y3 = y3 + params["b3"][None, :, None, None, None]

    if C_IN != C_OUT:
        sc = jnp.einsum("oc,bcn->bon", params["wsc"], x.reshape(B, C_IN, N_SPATIAL), precision=hp)
        sc = sc.reshape(B, C_OUT, D, H, W) + params["bsc"][None, :, None, None, None]
    else:
        sc = x
    return sc + y3


if __name__ == "__main__":
    key = jax.random.PRNGKey(0)
    kx, kp = jax.random.split(key)
    x = jax.random.normal(kx, (B, C_IN, D, H, W), jnp.float32)
    params = init_params(kp)

    fwd = jax.jit(convnest_block_forward)
    y = jax.block_until_ready(fwd(x, params))

    y_ref = jax.block_until_ready(reference_forward(x, params))
    err = float(jnp.max(jnp.abs(y - y_ref)))
    assert y.shape == (B, C_OUT, D, H, W), y.shape
    assert err < 5e-3, f"max abs err too large: {err}"
    print("KERNEL_OK")
</pallas_src>

<mosaic_0001>
module attributes {stable_mosaic.version = 11 : i64} {
  func.func @kernel(%arg0: i32, %arg1: memref<8x1024xf32, #tpu.memory_space<vmem>>, %arg2: memref<81x2x1024xf32, #tpu.memory_space<vmem>>, %arg3: memref<2x3xf32, #tpu.memory_space<vmem>>, %arg4: memref<32x8xf32, #tpu.memory_space<vmem>>, %arg5: memref<32x1xf32, #tpu.memory_space<vmem>>, %arg6: memref<16x40xf32, #tpu.memory_space<vmem>>, %arg7: memref<16x1xf32, #tpu.memory_space<vmem>>, %arg8: memref<16x1024xf32, #tpu.memory_space<vmem>>, %arg9: memref<8x1024xf32, #tpu.memory_space<vmem>>) attributes {dimension_semantics = [#tpu.dimension_semantics<arbitrary>], iteration_bounds = array<i64: 1>, scalar_prefetch = 0 : i64, scratch_operands = 1 : i64, tpu.core_type = #tpu.core_type<tc>, window_params = [{pipeline_mode = #tpu.pipeline_mode<synchronous>, transform_indices = @transform_0, window_bounds = array<i64: 8, 1024>}, {pipeline_mode = #tpu.pipeline_mode<synchronous>, transform_indices = @transform_1, window_bounds = array<i64: 81, 2, 1024>}, {pipeline_mode = #tpu.pipeline_mode<synchronous>, transform_indices = @transform_2, window_bounds = array<i64: 2, 3>}, {pipeline_mode = #tpu.pipeline_mode<synchronous>, transform_indices = @transform_3, window_bounds = array<i64: 32, 8>}, {pipeline_mode = #tpu.pipeline_mode<synchronous>, transform_indices = @transform_4, window_bounds = array<i64: 32, 1>}, {pipeline_mode = #tpu.pipeline_mode<synchronous>, transform_indices = @transform_5, window_bounds = array<i64: 16, 40>}, {pipeline_mode = #tpu.pipeline_mode<synchronous>, transform_indices = @transform_6, window_bounds = array<i64: 16, 1>}, {pipeline_mode = #tpu.pipeline_mode<synchronous>, transform_indices = @transform_7, window_bounds = array<i64: 16, 1024>}]} {
    %c0 = arith.constant 0 : index
    %c0_0 = arith.constant 0 : index
    %0 = vector.load %arg1[%c0, %c0_0] : memref<8x1024xf32, #tpu.memory_space<vmem>>, vector<8x1024xf32>
    %1 = vector.extract_strided_slice %0 {offsets = [0, 0], sizes = [2, 1024], strides = [1, 1]} : vector<8x1024xf32> to vector<2x1024xf32>
    %cst = arith.constant 0.000000e+00 : f32
    %2 = vector.broadcast %cst : f32 to vector<2x1024xf32>
    %c0_1 = arith.constant 0 : index
    %c0_2 = arith.constant 0 : index
    %3 = vector.load %arg3[%c0_1, %c0_2] : memref<2x3xf32, #tpu.memory_space<vmem>>, vector<2x1xf32>
    %4 = vector.broadcast %3 : vector<2x1xf32> to vector<2x1024xf32>
    %5 = arith.addf %2, %4 : vector<2x1024xf32>
    %c73_i32 = arith.constant 73 : i32
    %6 = tpu.dynamic_rotate %1 by %c73_i32 dim 1 : vector<2x1024xf32>, i32 -> vector<2x1024xf32>
    %c0_3 = arith.constant 0 : index
    %c0_4 = arith.constant 0 : index
    %c0_5 = arith.constant 0 : index
    %7 = vector.load %arg2[%c0_3, %c0_4, %c0_5] : memref<81x2x1024xf32, #tpu.memory_space<vmem>>, vector<1x2x1024xf32>
    %8 = vector.shape_cast %7 : vector<1x2x1024xf32> to vector<2x1024xf32>
    %9 = arith.mulf %8, %6 : vector<2x1024xf32>
    %10 = arith.addf %5, %9 : vector<2x1024xf32>
    %c72_i32 = arith.constant 72 : i32
    %11 = tpu.dynamic_rotate %1 by %c72_i32 dim 1 : vector<2x1024xf32>, i32 -> vector<2x1024xf32>
    %c1 = arith.constant 1 : index
    %c0_6 = arith.constant 0 : index
    %c0_7 = arith.constant 0 : index
    %12 = vector.load %arg2[%c1, %c0_6, %c0_7] : memref<81x2x1024xf32, #tpu.memory_space<vmem>>, vector<1x2x1024xf32>
    %13 = vector.shape_cast %12 : vector<1x2x1024xf32> to vector<2x1024xf32>
    %14 = arith.mulf %13, %11 : vector<2x1024xf32>
    %15 = arith.addf %10, %14 : vector<2x1024xf32>
    %c71_i32 = arith.constant 71 : i32
    %16 = tpu.dynamic_rotate %1 by %c71_i32 dim 1 : vector<2x1024xf32>, i32 -> vector<2x1024xf32>
    %c2 = arith.constant 2 : index
    %c0_8 = arith.constant 0 : index
    %c0_9 = arith.constant 0 : index
    %17 = vector.load %arg2[%c2, %c0_8, %c0_9] : memref<81x2x1024xf32, #tpu.memory_space<vmem>>, vector<1x2x1024xf32>
    %18 = vector.shape_cast %17 : vector<1x2x1024xf32> to vector<2x1024xf32>
    %19 = arith.mulf %18, %16 : vector<2x1024xf32>
    %20 = arith.addf %15, %19 : vector<2x1024xf32>
    %c65_i32 = arith.constant 65 : i32
    %21 = tpu.dynamic_rotate %1 by %c65_i32 dim 1 : vector<2x1024xf32>, i32 -> vector<2x1024xf32>
    %c3 = arith.constant 3 : index
    %c0_10 = arith.constant 0 : index
    %c0_11 = arith.constant 0 : index
    %22 = vector.load %arg2[%c3, %c0_10, %c0_11] : memref<81x2x1024xf32, #tpu.memory_space<vmem>>, vector<1x2x1024xf32>
    %23 = vector.shape_cast %22 : vector<1x2x1024xf32> to vector<2x1024xf32>
    %24 = arith.mulf %23, %21 : vector<2x1024xf32>
    %25 = arith.addf %20, %24 : vector<2x1024xf32>
    %c64_i32 = arith.constant 64 : i32
    %26 = tpu.dynamic_rotate %1 by %c64_i32 dim 1 : vector<2x1024xf32>, i32 -> vector<2x1024xf32>
    %c4 = arith.constant 4 : index
    %c0_12 = arith.constant 0 : index
    %c0_13 = arith.constant 0 : index
    %27 = vector.load %arg2[%c4, %c0_12, %c0_13] : memref<81x2x1024xf32, #tpu.memory_space<vmem>>, vector<1x2x1024xf32>
    %28 = vector.shape_cast %27 : vector<1x2x1024xf32> to vector<2x1024xf32>
    %29 = arith.mulf %28, %26 : vector<2x1024xf32>
    %30 = arith.addf %25, %29 : vector<2x1024xf32>
    %c63_i32 = arith.constant 63 : i32
    %31 = tpu.dynamic_rotate %1 by %c63_i32 dim 1 : vector<2x1024xf32>, i32 -> vector<2x1024xf32>
    %c5 = arith.constant 5 : index
    %c0_14 = arith.constant 0 : index
    %c0_15 = arith.constant 0 : index
    %32 = vector.load %arg2[%c5, %c0_14, %c0_15] : memref<81x2x1024xf32, #tpu.memory_space<vmem>>, vector<1x2x1024xf32>
    %33 = vector.shape_cast %32 : vector<1x2x1024xf32> to vector<2x1024xf32>
    %34 = arith.mulf %33, %31 : vector<2x1024xf32>
    %35 = arith.addf %30, %34 : vector<2x1024xf32>
    %c57_i32 = arith.constant 57 : i32
    %36 = tpu.dynamic_rotate %1 by %c57_i32 dim 1 : vector<2x1024xf32>, i32 -> vector<2x1024xf32>
    %c6 = arith.constant 6 : index
    %c0_16 = arith.constant 0 : index
    %c0_17 = arith.constant 0 : index
    %37 = vector.load %arg2[%c6, %c0_16, %c0_17] : memref<81x2x1024xf32, #tpu.memory_space<vmem>>, vector<1x2x1024xf32>
    %38 = vector.shape_cast %37 : vector<1x2x1024xf32> to vector<2x1024xf32>
    %39 = arith.mulf %38, %36 : vector<2x1024xf32>
    %40 = arith.addf %35, %39 : vector<2x1024xf32>
    %c56_i32 = arith.constant 56 : i32
    %41 = tpu.dynamic_rotate %1 by %c56_i32 dim 1 : vector<2x1024xf32>, i32 -> vector<2x1024xf32>
    %c7 = arith.constant 7 : index
    %c0_18 = arith.constant 0 : index
    %c0_19 = arith.constant 0 : index
    %42 = vector.load %arg2[%c7, %c0_18, %c0_19] : memref<81x2x1024xf32, #tpu.memory_space<vmem>>, vector<1x2x1024xf32>
    %43 = vector.shape_cast %42 : vector<1x2x1024xf32> to vector<2x1024xf32>
    %44 = arith.mulf %43, %41 : vector<2x1024xf32>
    %45 = arith.addf %40, %44 : vector<2x1024xf32>
    %c55_i32 = arith.constant 55 : i32
    %46 = tpu.dynamic_rotate %1 by %c55_i32 dim 1 : vector<2x1024xf32>, i32 -> vector<2x1024xf32>
    %c8 = arith.constant 8 : index
    %c0_20 = arith.constant 0 : index
    %c0_21 = arith.constant 0 : index
    %47 = vector.load %arg2[%c8, %c0_20, %c0_21] : memref<81x2x1024xf32, #tpu.memory_space<vmem>>, vector<1x2x1024xf32>
    %48 = vector.shape_cast %47 : vector<1x2x1024xf32> to vector<2x1024xf32>
    %49 = arith.mulf %48, %46 : vector<2x1024xf32>
    %50 = arith.addf %45, %49 : vector<2x1024xf32>
    %c9_i32 = arith.constant 9 : i32
    %51 = tpu.dynamic_rotate %1 by %c9_i32 dim 1 : vector<2x1024xf32>, i32 -> vector<2x1024xf32>
    %c9 = arith.constant 9 : index
    %c0_22 = arith.constant 0 : index
    %c0_23 = arith.constant 0 : index
    %52 = vector.load %arg2[%c9, %c0_22, %c0_23] : memref<81x2x1024xf32, #tpu.memory_space<vmem>>, vector<1x2x1024xf32>
    %53 = vector.shape_cast %52 : vector<1x2x1024xf32> to vector<2x1024xf32>
    %54 = arith.mulf %53, %51 : vector<2x1024xf32>
    %55 = arith.addf %50, %54 : vector<2x1024xf32>
    %c8_i32 = arith.constant 8 : i32
    %56 = tpu.dynamic_rotate %1 by %c8_i32 dim 1 : vector<2x1024xf32>, i32 -> vector<2x1024xf32>
    %c10 = arith.constant 10 : index
    %c0_24 = arith.constant 0 : index
    %c0_25 = arith.constant 0 : index
    %57 = vector.load %arg2[%c10, %c0_24, %c0_25] : memref<81x2x1024xf32, #tpu.memory_space<vmem>>, vector<1x2x1024xf32>
    %58 = vector.shape_cast %57 : vector<1x2x1024xf32> to vector<2x1024xf32>
    %59 = arith.mulf %58, %56 : vector<2x1024xf32>
    %60 = arith.addf %55, %59 : vector<2x1024xf32>
    %c7_i32 = arith.constant 7 : i32
    %61 = tpu.dynamic_rotate %1 by %c7_i32 dim 1 : vector<2x1024xf32>, i32 -> vector<2x1024xf32>
    %c11 = arith.constant 11 : index
    %c0_26 = arith.constant 0 : index
    %c0_27 = arith.constant 0 : index
    %62 = vector.load %arg2[%c11, %c0_26, %c0_27] : memref<81x2x1024xf32, #tpu.memory_space<vmem>>, vector<1x2x1024xf32>
    %63 = vector.shape_cast %62 : vector<1x2x1024xf32> to vector<2x1024xf32>
    %64 = arith.mulf %63, %61 : vector<2x1024xf32>
    %65 = arith.addf %60, %64 : vector<2x1024xf32>
    %c1_i32 = arith.constant 1 : i32
    %66 = tpu.dynamic_rotate %1 by %c1_i32 dim 1 : vector<2x1024xf32>, i32 -> vector<2x1024xf32>
    %c12 = arith.constant 12 : index
    %c0_28 = arith.constant 0 : index
    %c0_29 = arith.constant 0 : index
    %67 = vector.load %arg2[%c12, %c0_28, %c0_29] : memref<81x2x1024xf32, #tpu.memory_space<vmem>>, vector<1x2x1024xf32>
    %68 = vector.shape_cast %67 : vector<1x2x1024xf32> to vector<2x1024xf32>
    %69 = arith.mulf %68, %66 : vector<2x1024xf32>
    %70 = arith.addf %65, %69 : vector<2x1024xf32>
    %c13 = arith.constant 13 : index
    %c0_30 = arith.constant 0 : index
    %c0_31 = arith.constant 0 : index
    %71 = vector.load %arg2[%c13, %c0_30, %c0_31] : memref<81x2x1024xf32, #tpu.memory_space<vmem>>, vector<1x2x1024xf32>
    %72 = vector.shape_cast %71 : vector<1x2x1024xf32> to vector<2x1024xf32>
    %73 = arith.mulf %72, %1 : vector<2x1024xf32>
    %74 = arith.addf %70, %73 : vector<2x1024xf32>
    %c1023_i32 = arith.constant 1023 : i32
    %75 = tpu.dynamic_rotate %1 by %c1023_i32 dim 1 : vector<2x1024xf32>, i32 -> vector<2x1024xf32>
    %c14 = arith.constant 14 : index
    %c0_32 = arith.constant 0 : index
    %c0_33 = arith.constant 0 : index
    %76 = vector.load %arg2[%c14, %c0_32, %c0_33] : memref<81x2x1024xf32, #tpu.memory_space<vmem>>, vector<1x2x1024xf32>
    %77 = vector.shape_cast %76 : vector<1x2x1024xf32> to vector<2x1024xf32>
    %78 = arith.mulf %77, %75 : vector<2x1024xf32>
    %79 = arith.addf %74, %78 : vector<2x1024xf32>
    %c1017_i32 = arith.constant 1017 : i32
    %80 = tpu.dynamic_rotate %1 by %c1017_i32 dim 1 : vector<2x1024xf32>, i32 -> vector<2x1024xf32>
    %c15 = arith.constant 15 : index
    %c0_34 = arith.constant 0 : index
    %c0_35 = arith.constant 0 : index
    %81 = vector.load %arg2[%c15, %c0_34, %c0_35] : memref<81x2x1024xf32, #tpu.memory_space<vmem>>, vector<1x2x1024xf32>
    %82 = vector.shape_cast %81 : vector<1x2x1024xf32> to vector<2x1024xf32>
    %83 = arith.mulf %82, %80 : vector<2x1024xf32>
    %84 = arith.addf %79, %83 : vector<2x1024xf32>
    %c1016_i32 = arith.constant 1016 : i32
    %85 = tpu.dynamic_rotate %1 by %c1016_i32 dim 1 : vector<2x1024xf32>, i32 -> vector<2x1024xf32>
    %c16 = arith.constant 16 : index
    %c0_36 = arith.constant 0 : index
    %c0_37 = arith.constant 0 : index
    %86 = vector.load %arg2[%c16, %c0_36, %c0_37] : memref<81x2x1024xf32, #tpu.memory_space<vmem>>, vector<1x2x1024xf32>
    %87 = vector.shape_cast %86 : vector<1x2x1024xf32> to vector<2x1024xf32>
    %88 = arith.mulf %87, %85 : vector<2x1024xf32>
    %89 = arith.addf %84, %88 : vector<2x1024xf32>
    %c1015_i32 = arith.constant 1015 : i32
    %90 = tpu.dynamic_rotate %1 by %c1015_i32 dim 1 : vector<2x1024xf32>, i32 -> vector<2x1024xf32>
    %c17 = arith.constant 17 : index
    %c0_38 = arith.constant 0 : index
    %c0_39 = arith.constant 0 : index
    %91 = vector.load %arg2[%c17, %c0_38, %c0_39] : memref<81x2x1024xf32, #tpu.memory_space<vmem>>, vector<1x2x1024xf32>
    %92 = vector.shape_cast %91 : vector<1x2x1024xf32> to vector<2x1024xf32>
    %93 = arith.mulf %92, %90 : vector<2x1024xf32>
    %94 = arith.addf %89, %93 : vector<2x1024xf32>
    %c969_i32 = arith.constant 969 : i32
    %95 = tpu.dynamic_rotate %1 by %c969_i32 dim 1 : vector<2x1024xf32>, i32 -> vector<2x1024xf32>
    %c18 = arith.constant 18 : index
    %c0_40 = arith.constant 0 : index
    %c0_41 = arith.constant 0 : index
    %96 = vector.load %arg2[%c18, %c0_40, %c0_41] : memref<81x2x1024xf32, #tpu.memory_space<vmem>>, vector<1x2x1024xf32>
    %97 = vector.shape_cast %96 : vector<1x2x1024xf32> to vector<2x1024xf32>
    %98 = arith.mulf %97, %95 : vector<2x1024xf32>
    %99 = arith.addf %94, %98 : vector<2x1024xf32>
    %c968_i32 = arith.constant 968 : i32
    %100 = tpu.dynamic_rotate %1 by %c968_i32 dim 1 : vector<2x1024xf32>, i32 -> vector<2x1024xf32>
    %c19 = arith.constant 19 : index
    %c0_42 = arith.constant 0 : index
    %c0_43 = arith.constant 0 : index
    %101 = vector.load %arg2[%c19, %c0_42, %c0_43] : memref<81x2x1024xf32, #tpu.memory_space<vmem>>, vector<1x2x1024xf32>
    %102 = vector.shape_cast %101 : vector<1x2x1024xf32> to vector<2x1024xf32>
    %103 = arith.mulf %102, %100 : vector<2x1024xf32>
    %104 = arith.addf %99, %103 : vector<2x1024xf32>
    %c967_i32 = arith.constant 967 : i32
    %105 = tpu.dynamic_rotate %1 by %c967_i32 dim 1 : vector<2x1024xf32>, i32 -> vector<2x1024xf32>
    %c20 = arith.constant 20 : index
    %c0_44 = arith.constant 0 : index
    %c0_45 = arith.constant 0 : index
    %106 = vector.load %arg2[%c20, %c0_44, %c0_45] : memref<81x2x1024xf32, #tpu.memory_space<vmem>>, vector<1x2x1024xf32>
    %107 = vector.shape_cast %106 : vector<1x2x1024xf32> to vector<2x1024xf32>
    %108 = arith.mulf %107, %105 : vector<2x1024xf32>
    %109 = arith.addf %104, %108 : vector<2x1024xf32>
    %c961_i32 = arith.constant 961 : i32
    %110 = tpu.dynamic_rotate %1 by %c961_i32 dim 1 : vector<2x1024xf32>, i32 -> vector<2x1024xf32>
    %c21 = arith.constant 21 : index
    %c0_46 = arith.constant 0 : index
    %c0_47 = arith.constant 0 : index
    %111 = vector.load %arg2[%c21, %c0_46, %c0_47] : memref<81x2x1024xf32, #tpu.memory_space<vmem>>, vector<1x2x1024xf32>
    %112 = vector.shape_cast %111 : vector<1x2x1024xf32> to vector<2x1024xf32>
    %113 = arith.mulf %112, %110 : vector<2x1024xf32>
    %114 = arith.addf %109, %113 : vector<2x1024xf32>
    %c960_i32 = arith.constant 960 : i32
    %115 = tpu.dynamic_rotate %1 by %c960_i32 dim 1 : vector<2x1024xf32>, i32 -> vector<2x1024xf32>
    %c22 = arith.constant 22 : index
    %c0_48 = arith.constant 0 : index
    %c0_49 = arith.constant 0 : index
    %116 = vector.load %arg2[%c22, %c0_48, %c0_49] : memref<81x2x1024xf32, #tpu.memory_space<vmem>>, vector<1x2x1024xf32>
    %117 = vector.shape_cast %116 : vector<1x2x1024xf32> to vector<2x1024xf32>
    %118 = arith.mulf %117, %115 : vector<2x1024xf32>
    %119 = arith.addf %114, %118 : vector<2x1024xf32>
    %c959_i32 = arith.constant 959 : i32
    %120 = tpu.dynamic_rotate %1 by %c959_i32 dim 1 : vector<2x1024xf32>, i32 -> vector<2x1024xf32>
    %c23 = arith.constant 23 : index
    %c0_50 = arith.constant 0 : index
    %c0_51 = arith.constant 0 : index
    %121 = vector.load %arg2[%c23, %c0_50, %c0_51] : memref<81x2x1024xf32, #tpu.memory_space<vmem>>, vector<1x2x1024xf32>
    %122 = vector.shape_cast %121 : vector<1x2x1024xf32> to vector<2x1024xf32>
    %123 = arith.mulf %122, %120 : vector<2x1024xf32>
    %124 = arith.addf %119, %123 : vector<2x1024xf32>
    %c953_i32 = arith.constant 953 : i32
    %125 = tpu.dynamic_rotate %1 by %c953_i32 dim 1 : vector<2x1024xf32>, i32 -> vector<2x1024xf32>
    %c24 = arith.constant 24 : index
    %c0_52 = arith.constant 0 : index
    %c0_53 = arith.constant 0 : index
    %126 = vector.load %arg2[%c24, %c0_52, %c0_53] : memref<81x2x1024xf32, #tpu.memory_space<vmem>>, vector<1x2x1024xf32>
    %127 = vector.shape_cast %126 : vector<1x2x1024xf32> to vector<2x1024xf32>
    %128 = arith.mulf %127, %125 : vector<2x1024xf32>
    %129 = arith.addf %124, %128 : vector<2x1024xf32>
    %c952_i32 = arith.constant 952 : i32
    %130 = tpu.dynamic_rotate %1 by %c952_i32 dim 1 : vector<2x1024xf32>, i32 -> vector<2x1024xf32>
    %c25 = arith.constant 25 : index
    %c0_54 = arith.constant 0 : index
    %c0_55 = arith.constant 0 : index
    %131 = vector.load %arg2[%c25, %c0_54, %c0_55] : memref<81x2x1024xf32, #tpu.memory_space<vmem>>, vector<1x2x1024xf32>
    %132 = vector.shape_cast %131 : vector<1x2x1024xf32> to vector<2x1024xf32>
    %133 = arith.mulf %132, %130 : vector<2x1024xf32>
    %134 = arith.addf %129, %133 : vector<2x1024xf32>
    %c951_i32 = arith.constant 951 : i32
    %135 = tpu.dynamic_rotate %1 by %c951_i32 dim 1 : vector<2x1024xf32>, i32 -> vector<2x1024xf32>
    %c26 = arith.constant 26 : index
    %c0_56 = arith.constant 0 : index
    %c0_57 = arith.constant 0 : index
    %136 = vector.load %arg2[%c26, %c0_56, %c0_57] : memref<81x2x1024xf32, #tpu.memory_space<vmem>>, vector<1x2x1024xf32>
    %137 = vector.shape_cast %136 : vector<1x2x1024xf32> to vector<2x1024xf32>
    %138 = arith.mulf %137, %135 : vector<2x1024xf32>
    %139 = arith.addf %134, %138 : vector<2x1024xf32>
    %c0_58 = arith.constant 0 : index
    %c0_59 = arith.constant 0 : index
    %140 = vector.load %arg9[%c0_58, %c0_59] : memref<8x1024xf32, #tpu.memory_space<vmem>>, vector<2x1024xf32>
    tpu.vector_store %arg9[%c0_58, %c0_59], %139 {strides = array<i32>} : memref<8x1024xf32, #tpu.memory_space<vmem>>, vector<2x1024xf32>,
    %141 = vector.extract_strided_slice %0 {offsets = [2, 0], sizes = [2, 1024], strides = [1, 1]} : vector<8x1024xf32> to vector<2x1024xf32>
    %142 = arith.addf %139, %141 : vector<2x1024xf32>
    %cst_60 = arith.constant 0.000000e+00 : f32
    %143 = vector.broadcast %cst_60 : f32 to vector<2x1024xf32>
    %c0_61 = arith.constant 0 : index
    %c1_62 = arith.constant 1 : index
    %144 = vector.load %arg3[%c0_61, %c1_62] : memref<2x3xf32, #tpu.memory_space<vmem>>, vector<2x1xf32>
    %145 = vector.broadcast %144 : vector<2x1xf32> to vector<2x1024xf32>
    %146 = arith.addf %143, %145 : vector<2x1024xf32>
    %c73_i32_63 = arith.constant 73 : i32
    %147 = tpu.dynamic_rotate %142 by %c73_i32_63 dim 1 : vector<2x1024xf32>, i32 -> vector<2x1024xf32>
    %c27 = arith.constant 27 : index
    %c0_64 = arith.constant 0 : index
    %c0_65 = arith.constant 0 : index
    %148 = vector.load %arg2[%c27, %c0_64, %c0_65] : memref<81x2x1024xf32, #tpu.memory_space<vmem>>, vector<1x2x1024xf32>
    %149 = vector.shape_cast %148 : vector<1x2x1024xf32> to vector<2x1024xf32>
    %150 = arith.mulf %149, %147 : vector<2x1024xf32>
    %151 = arith.addf %146, %150 : vector<2x1024xf32>
    %c72_i32_66 = arith.constant 72 : i32
    %152 = tpu.dynamic_rotate %142 by %c72_i32_66 dim 1 : vector<2x1024xf32>, i32 -> vector<2x1024xf32>
    %c28 = arith.constant 28 : index
    %c0_67 = arith.constant 0 : index
    %c0_68 = arith.constant 0 : index
    %153 = vector.load %arg2[%c28, %c0_67, %c0_68] : memref<81x2x1024xf32, #tpu.memory_space<vmem>>, vector<1x2x1024xf32>
    %154 = vector.shape_cast %153 : vector<1x2x1024xf32> to vector<2x1024xf32>
    %155 = arith.mulf %154, %152 : vector<2x1024xf32>
    %156 = arith.addf %151, %155 : vector<2x1024xf32>
    %c71_i32_69 = arith.constant 71 : i32
    %157 = tpu.dynamic_rotate %142 by %c71_i32_69 dim 1 : vector<2x1024xf32>, i32 -> vector<2x1024xf32>
    %c29 = arith.constant 29 : index
    %c0_70 = arith.constant 0 : index
    %c0_71 = arith.constant 0 : index
    %158 = vector.load %arg2[%c29, %c0_70, %c0_71] : memref<81x2x1024xf32, #tpu.memory_space<vmem>>, vector<1x2x1024xf32>
    %159 = vector.shape_cast %158 : vector<1x2x1024xf32> to vector<2x1024xf32>
    %160 = arith.mulf %159, %157 : vector<2x1024xf32>
    %161 = arith.addf %156, %160 : vector<2x1024xf32>
    %c65_i32_72 = arith.constant 65 : i32
    %162 = tpu.dynamic_rotate %142 by %c65_i32_72 dim 1 : vector<2x1024xf32>, i32 -> vector<2x1024xf32>
    %c30 = arith.constant 30 : index
    %c0_73 = arith.constant 0 : index
    %c0_74 = arith.constant 0 : index
    %163 = vector.load %arg2[%c30, %c0_73, %c0_74] : memref<81x2x1024xf32, #tpu.memory_space<vmem>>, vector<1x2x1024xf32>
    %164 = vector.shape_cast %163 : vector<1x2x1024xf32> to vector<2x1024xf32>
    %165 = arith.mulf %164, %162 : vector<2x1024xf32>
    %166 = arith.addf %161, %165 : vector<2x1024xf32>
    %c64_i32_75 = arith.constant 64 : i32
    %167 = tpu.dynamic_rotate %142 by %c64_i32_75 dim 1 : vector<2x1024xf32>, i32 -> vector<2x1024xf32>
    %c31 = arith.constant 31 : index
    %c0_76 = arith.constant 0 : index
    %c0_77 = arith.constant 0 : index
    %168 = vector.load %arg2[%c31, %c0_76, %c0_77] : memref<81x2x1024xf32, #tpu.memory_space<vmem>>, vector<1x2x1024xf32>
    %169 = vector.shape_cast %168 : vector<1x2x1024xf32> to vector<2x1024xf32>
    %170 = arith.mulf %169, %167 : vector<2x1024xf32>
    %171 = arith.addf %166, %170 : vector<2x1024xf32>
    %c63_i32_78 = arith.constant 63 : i32
    %172 = tpu.dynamic_rotate %142 by %c63_i32_78 dim 1 : vector<2x1024xf32>, i32 -> vector<2x1024xf32>
    %c32 = arith.constant 32 : index
    %c0_79 = arith.constant 0 : index
    %c0_80 = arith.constant 0 : index
    %173 = vector.load %arg2[%c32, %c0_79, %c0_80] : memref<81x2x1024xf32, #tpu.memory_space<vmem>>, vector<1x2x1024xf32>
    %174 = vector.shape_cast %173 : vector<1x2x1024xf32> to vector<2x1024xf32>
    %175 = arith.mulf %174, %172 : vector<2x1024xf32>
    %176 = arith.addf %171, %175 : vector<2x1024xf32>
    %c57_i32_81 = arith.constant 57 : i32
    %177 = tpu.dynamic_rotate %142 by %c57_i32_81 dim 1 : vector<2x1024xf32>, i32 -> vector<2x1024xf32>
    %c33 = arith.constant 33 : index
    %c0_82 = arith.constant 0 : index
    %c0_83 = arith.constant 0 : index
    %178 = vector.load %arg2[%c33, %c0_82, %c0_83] : memref<81x2x1024xf32, #tpu.memory_space<vmem>>, vector<1x2x1024xf32>
    %179 = vector.shape_cast %178 : vector<1x2x1024xf32> to vector<2x1024xf32>
    %180 = arith.mulf %179, %177 : vector<2x1024xf32>
    %181 = arith.addf %176, %180 : vector<2x1024xf32>
    %c56_i32_84 = arith.constant 56 : i32
    %182 = tpu.dynamic_rotate %142 by %c56_i32_84 dim 1 : vector<2x1024xf32>, i32 -> vector<2x1024xf32>
    %c34 = arith.constant 34 : index
    %c0_85 = arith.constant 0 : index
    %c0_86 = arith.constant 0 : index
    %183 = vector.load %arg2[%c34, %c0_85, %c0_86] : memref<81x2x1024xf32, #tpu.memory_space<vmem>>, vector<1x2x1024xf32>
    %184 = vector.shape_cast %183 : vector<1x2x1024xf32> to vector<2x1024xf32>
    %185 = arith.mulf %184, %182 : vector<2x1024xf32>
    %186 = arith.addf %181, %185 : vector<2x1024xf32>
    %c55_i32_87 = arith.constant 55 : i32
    %187 = tpu.dynamic_rotate %142 by %c55_i32_87 dim 1 : vector<2x1024xf32>, i32 -> vector<2x1024xf32>
    %c35 = arith.constant 35 : index
    %c0_88 = arith.constant 0 : index
    %c0_89 = arith.constant 0 : index
    %188 = vector.load %arg2[%c35, %c0_88, %c0_89] : memref<81x2x1024xf32, #tpu.memory_space<vmem>>, vector<1x2x1024xf32>
    %189 = vector.shape_cast %188 : vector<1x2x1024xf32> to vector<2x1024xf32>
    %190 = arith.mulf %189, %187 : vector<2x1024xf32>
    %191 = arith.addf %186, %190 : vector<2x1024xf32>
    %c9_i32_90 = arith.constant 9 : i32
    %192 = tpu.dynamic_rotate %142 by %c9_i32_90 dim 1 : vector<2x1024xf32>, i32 -> vector<2x1024xf32>
    %c36 = arith.constant 36 : index
    %c0_91 = arith.constant 0 : index
    %c0_92 = arith.constant 0 : index
    %193 = vector.load %arg2[%c36, %c0_91, %c0_92] : memref<81x2x1024xf32, #tpu.memory_space<vmem>>, vector<1x2x1024xf32>
    %194 = vector.shape_cast %193 : vector<1x2x1024xf32> to vector<2x1024xf32>
    %195 = arith.mulf %194, %192 : vector<2x1024xf32>
    %196 = arith.addf %191, %195 : vector<2x1024xf32>
    %c8_i32_93 = arith.constant 8 : i32
    %197 = tpu.dynamic_rotate %142 by %c8_i32_93 dim 1 : vector<2x1024xf32>, i32 -> vector<2x1024xf32>
    %c37 = arith.constant 37 : index
    %c0_94 = arith.constant 0 : index
    %c0_95 = arith.constant 0 : index
    %198 = vector.load %arg2[%c37, %c0_94, %c0_95] : memref<81x2x1024xf32, #tpu.memory_space<vmem>>, vector<1x2x1024xf32>
    %199 = vector.shape_cast %198 : vector<1x2x1024xf32> to vector<2x1024xf32>
    %200 = arith.mulf %199, %197 : vector<2x1024xf32>
    %201 = arith.addf %196, %200 : vector<2x1024xf32>
    %c7_i32_96 = arith.constant 7 : i32
    %202 = tpu.dynamic_rotate %142 by %c7_i32_96 dim 1 : vector<2x1024xf32>, i32 -> vector<2x1024xf32>
    %c38 = arith.constant 38 : index
    %c0_97 = arith.constant 0 : index
    %c0_98 = arith.constant 0 : index
    %203 = vector.load %arg2[%c38, %c0_97, %c0_98] : memref<81x2x1024xf32, #tpu.memory_space<vmem>>, vector<1x2x1024xf32>
    %204 = vector.shape_cast %203 : vector<1x2x1024xf32> to vector<2x1024xf32>
    %205 = arith.mulf %204, %202 : vector<2x1024xf32>
    %206 = arith.addf %201, %205 : vector<2x1024xf32>
    %c1_i32_99 = arith.constant 1 : i32
    %207 = tpu.dynamic_rotate %142 by %c1_i32_99 dim 1 : vector<2x1024xf32>, i32 -> vector<2x1024xf32>
    %c39 = arith.constant 39 : index
    %c0_100 = arith.constant 0 : index
    %c0_101 = arith.constant 0 : index
    %208 = vector.load %arg2[%c39, %c0_100, %c0_101] : memref<81x2x1024xf32, #tpu.memory_space<vmem>>, vector<1x2x1024xf32>
    %209 = vector.shape_cast %208 : vector<1x2x1024xf32> to vector<2x1024xf32>
    %210 = arith.mulf %209, %207 : vector<2x1024xf32>
    %211 = arith.addf %206, %210 : vector<2x1024xf32>
    %c40 = arith.constant 40 : index
    %c0_102 = arith.constant 0 : index
    %c0_103 = arith.constant 0 : index
    %212 = vector.load %arg2[%c40, %c0_102, %c0_103] : memref<81x2x1024xf32, #tpu.memory_space<vmem>>, vector<1x2x1024xf32>
    %213 = vector.shape_cast %212 : vector<1x2x1024xf32> to vector<2x1024xf32>
    %214 = arith.mulf %213, %142 : vector<2x1024xf32>
    %215 = arith.addf %211, %214 : vector<2x1024xf32>
    %c1023_i32_104 = arith.constant 1023 : i32
    %216 = tpu.dynamic_rotate %142 by %c1023_i32_104 dim 1 : vector<2x1024xf32>, i32 -> vector<2x1024xf32>
    %c41 = arith.constant 41 : index
    %c0_105 = arith.constant 0 : index
    %c0_106 = arith.constant 0 : index
    %217 = vector.load %arg2[%c41, %c0_105, %c0_106] : memref<81x2x1024xf32, #tpu.memory_space<vmem>>, vector<1x2x1024xf32>
    %218 = vector.shape_cast %217 : vector<1x2x1024xf32> to vector<2x1024xf32>
    %219 = arith.mulf %218, %216 : vector<2x1024xf32>
    %220 = arith.addf %215, %219 : vector<2x1024xf32>
    %c1017_i32_107 = arith.constant 1017 : i32
    %221 = tpu.dynamic_rotate %142 by %c1017_i32_107 dim 1 : vector<2x1024xf32>, i32 -> vector<2x1024xf32>
    %c42 = arith.constant 42 : index
    %c0_108 = arith.constant 0 : index
    %c0_109 = arith.constant 0 : index
    %222 = vector.load %arg2[%c42, %c0_108, %c0_109] : memref<81x2x1024xf32, #tpu.memory_space<vmem>>, vector<1x2x1024xf32>
    %223 = vector.shape_cast %222 : vector<1x2x1024xf32> to vector<2x1024xf32>
    %224 = arith.mulf %223, %221 : vector<2x1024xf32>
    %225 = arith.addf %220, %224 : vector<2x1024xf32>
    %c1016_i32_110 = arith.constant 1016 : i32
    %226 = tpu.dynamic_rotate %142 by %c1016_i32_110 dim 1 : vector<2x1024xf32>, i32 -> vector<2x1024xf32>
    %c43 = arith.constant 43 : index
    %c0_111 = arith.constant 0 : index
    %c0_112 = arith.constant 0 : index
    %227 = vector.load %arg2[%c43, %c0_111, %c0_112] : memref<81x2x1024xf32, #tpu.memory_space<vmem>>, vector<1x2x1024xf32>
    %228 = vector.shape_cast %227 : vector<1x2x1024xf32> to vector<2x1024xf32>
    %229 = arith.mulf %228, %226 : vector<2x1024xf32>
    %230 = arith.addf %225, %229 : vector<2x1024xf32>
    %c1015_i32_113 = arith.constant 1015 : i32
    %231 = tpu.dynamic_rotate %142 by %c1015_i32_113 dim 1 : vector<2x1024xf32>, i32 -> vector<2x1024xf32>
    %c44 = arith.constant 44 : index
    %c0_114 = arith.constant 0 : index
    %c0_115 = arith.constant 0 : index
    %232 = vector.load %arg2[%c44, %c0_114, %c0_115] : memref<81x2x1024xf32, #tpu.memory_space<vmem>>, vector<1x2x1024xf32>
    %233 = vector.shape_cast %232 : vector<1x2x1024xf32> to vector<2x1024xf32>
    %234 = arith.mulf %233, %231 : vector<2x1024xf32>
    %235 = arith.addf %230, %234 : vector<2x1024xf32>
    %c969_i32_116 = arith.constant 969 : i32
    %236 = tpu.dynamic_rotate %142 by %c969_i32_116 dim 1 : vector<2x1024xf32>, i32 -> vector<2x1024xf32>
    %c45 = arith.constant 45 : index
    %c0_117 = arith.constant 0 : index
    %c0_118 = arith.constant 0 : index
    %237 = vector.load %arg2[%c45, %c0_117, %c0_118] : memref<81x2x1024xf32, #tpu.memory_space<vmem>>, vector<1x2x1024xf32>
    %238 = vector.shape_cast %237 : vector<1x2x1024xf32> to vector<2x1024xf32>
    %239 = arith.mulf %238, %236 : vector<2x1024xf32>
    %240 = arith.addf %235, %239 : vector<2x1024xf32>
    %c968_i32_119 = arith.constant 968 : i32
    %241 = tpu.dynamic_rotate %142 by %c968_i32_119 dim 1 : vector<2x1024xf32>, i32 -> vector<2x1024xf32>
    %c46 = arith.constant 46 : index
    %c0_120 = arith.constant 0 : index
    %c0_121 = arith.constant 0 : index
    %242 = vector.load %arg2[%c46, %c0_120, %c0_121] : memref<81x2x1024xf32, #tpu.memory_space<vmem>>, vector<1x2x1024xf32>
    %243 = vector.shape_cast %242 : vector<1x2x1024xf32> to vector<2x1024xf32>
    %244 = arith.mulf %243, %241 : vector<2x1024xf32>
    %245 = arith.addf %240, %244 : vector<2x1024xf32>
    %c967_i32_122 = arith.constant 967 : i32
    %246 = tpu.dynamic_rotate %142 by %c967_i32_122 dim 1 : vector<2x1024xf32>, i32 -> vector<2x1024xf32>
    %c47 = arith.constant 47 : index
    %c0_123 = arith.constant 0 : index
    %c0_124 = arith.constant 0 : index
    %247 = vector.load %arg2[%c47, %c0_123, %c0_124] : memref<81x2x1024xf32, #tpu.memory_space<vmem>>, vector<1x2x1024xf32>
    %248 = vector.shape_cast %247 : vector<1x2x1024xf32> to vector<2x1024xf32>
    %249 = arith.mulf %248, %246 : vector<2x1024xf32>
    %250 = arith.addf %245, %249 : vector<2x1024xf32>
    %c961_i32_125 = arith.constant 961 : i32
    %251 = tpu.dynamic_rotate %142 by %c961_i32_125 dim 1 : vector<2x1024xf32>, i32 -> vector<2x1024xf32>
    %c48 = arith.constant 48 : index
    %c0_126 = arith.constant 0 : index
    %c0_127 = arith.constant 0 : index
    %252 = vector.load %arg2[%c48, %c0_126, %c0_127] : memref<81x2x1024xf32, #tpu.memory_space<vmem>>, vector<1x2x1024xf32>
    %253 = vector.shape_cast %252 : vector<1x2x1024xf32> to vector<2x1024xf32>
    %254 = arith.mulf %253, %251 : vector<2x1024xf32>
    %255 = arith.addf %250, %254 : vector<2x1024xf32>
    %c960_i32_128 = arith.constant 960 : i32
    %256 = tpu.dynamic_rotate %142 by %c960_i32_128 dim 1 : vector<2x1024xf32>, i32 -> vector<2x1024xf32>
    %c49 = arith.constant 49 : index
    %c0_129 = arith.constant 0 : index
    %c0_130 = arith.constant 0 : index
    %257 = vector.load %arg2[%c49, %c0_129, %c0_130] : memref<81x2x1024xf32, #tpu.memory_space<vmem>>, vector<1x2x1024xf32>
    %258 = vector.shape_cast %257 : vector<1x2x1024xf32> to vector<2x1024xf32>
    %259 = arith.mulf %258, %256 : vector<2x1024xf32>
    %260 = arith.addf %255, %259 : vector<2x1024xf32>
    %c959_i32_131 = arith.constant 959 : i32
    %261 = tpu.dynamic_rotate %142 by %c959_i32_131 dim 1 : vector<2x1024xf32>, i32 -> vector<2x1024xf32>
    %c50 = arith.constant 50 : index
    %c0_132 = arith.constant 0 : index
    %c0_133 = arith.constant 0 : index
    %262 = vector.load %arg2[%c50, %c0_132, %c0_133] : memref<81x2x1024xf32, #tpu.memory_space<vmem>>, vector<1x2x1024xf32>
    %263 = vector.shape_cast %262 : vector<1x2x1024xf32> to vector<2x1024xf32>
    %264 = arith.mulf %263, %261 : vector<2x1024xf32>
    %265 = arith.addf %260, %264 : vector<2x1024xf32>
    %c953_i32_134 = arith.constant 953 : i32
    %266 = tpu.dynamic_rotate %142 by %c953_i32_134 dim 1 : vector<2x1024xf32>, i32 -> vector<2x1024xf32>
    %c51 = arith.constant 51 : index
    %c0_135 = arith.constant 0 : index
    %c0_136 = arith.constant 0 : index
    %267 = vector.load %arg2[%c51, %c0_135, %c0_136] : memref<81x2x1024xf32, #tpu.memory_space<vmem>>, vector<1x2x1024xf32>
    %268 = vector.shape_cast %267 : vector<1x2x1024xf32> to vector<2x1024xf32>
    %269 = arith.mulf %268, %266 : vector<2x1024xf32>
    %270 = arith.addf %265, %269 : vector<2x1024xf32>
    %c952_i32_137 = arith.constant 952 : i32
    %271 = tpu.dynamic_rotate %142 by %c952_i32_137 dim 1 : vector<2x1024xf32>, i32 -> vector<2x1024xf32>
    %c52 = arith.constant 52 : index
    %c0_138 = arith.constant 0 : index
    %c0_139 = arith.constant 0 : index
    %272 = vector.load %arg2[%c52, %c0_138, %c0_139] : memref<81x2x1024xf32, #tpu.memory_space<vmem>>, vector<1x2x1024xf32>
    %273 = vector.shape_cast %272 : vector<1x2x1024xf32> to vector<2x1024xf32>
    %274 = arith.mulf %273, %271 : vector<2x1024xf32>
    %275 = arith.addf %270, %274 : vector<2x1024xf32>
    %c951_i32_140 = arith.constant 951 : i32
    %276 = tpu.dynamic_rotate %142 by %c951_i32_140 dim 1 : vector<2x1024xf32>, i32 -> vector<2x1024xf32>
    %c53 = arith.constant 53 : index
    %c0_141 = arith.constant 0 : index
    %c0_142 = arith.constant 0 : index
    %277 = vector.load %arg2[%c53, %c0_141, %c0_142] : memref<81x2x1024xf32, #tpu.memory_space<vmem>>, vector<1x2x1024xf32>
    %278 = vector.shape_cast %277 : vector<1x2x1024xf32> to vector<2x1024xf32>
    %279 = arith.mulf %278, %276 : vector<2x1024xf32>
    %280 = arith.addf %275, %279 : vector<2x1024xf32>
    %c2_143 = arith.constant 2 : index
    %c0_144 = arith.constant 0 : index
    %281 = vector.load %arg9[%c2_143, %c0_144] : memref<8x1024xf32, #tpu.memory_space<vmem>>, vector<2x1024xf32>
    tpu.vector_store %arg9[%c2_143, %c0_144], %280 {strides = array<i32>} : memref<8x1024xf32, #tpu.memory_space<vmem>>, vector<2x1024xf32>,
    %282 = vector.extract_strided_slice %0 {offsets = [4, 0], sizes = [2, 1024], strides = [1, 1]} : vector<8x1024xf32> to vector<2x1024xf32>
    %283 = arith.addf %280, %282 : vector<2x1024xf32>
    %cst_145 = arith.constant 0.000000e+00 : f32
    %284 = vector.broadcast %cst_145 : f32 to vector<2x1024xf32>
    %c0_146 = arith.constant 0 : index
    %c2_147 = arith.constant 2 : index
    %285 = vector.load %arg3[%c0_146, %c2_147] : memref<2x3xf32, #tpu.memory_space<vmem>>, vector<2x1xf32>
    %286 = vector.broadcast %285 : vector<2x1xf32> to vector<2x1024xf32>
    %287 = arith.addf %284, %286 : vector<2x1024xf32>
    %c73_i32_148 = arith.constant 73 : i32
    %288 = tpu.dynamic_rotate %283 by %c73_i32_148 dim 1 : vector<2x1024xf32>, i32 -> vector<2x1024xf32>
    %c54 = arith.constant 54 : index
    %c0_149 = arith.constant 0 : index
    %c0_150 = arith.constant 0 : index
    %289 = vector.load %arg2[%c54, %c0_149, %c0_150] : memref<81x2x1024xf32, #tpu.memory_space<vmem>>, vector<1x2x1024xf32>
    %290 = vector.shape_cast %289 : vector<1x2x1024xf32> to vector<2x1024xf32>
    %291 = arith.mulf %290, %288 : vector<2x1024xf32>
    %292 = arith.addf %287, %291 : vector<2x1024xf32>
    %c72_i32_151 = arith.constant 72 : i32
    %293 = tpu.dynamic_rotate %283 by %c72_i32_151 dim 1 : vector<2x1024xf32>, i32 -> vector<2x1024xf32>
    %c55 = arith.constant 55 : index
    %c0_152 = arith.constant 0 : index
    %c0_153 = arith.constant 0 : index
    %294 = vector.load %arg2[%c55, %c0_152, %c0_153] : memref<81x2x1024xf32, #tpu.memory_space<vmem>>, vector<1x2x1024xf32>
    %295 = vector.shape_cast %294 : vector<1x2x1024xf32> to vector<2x1024xf32>
    %296 = arith.mulf %295, %293 : vector<2x1024xf32>
    %297 = arith.addf %292, %296 : vector<2x1024xf32>
    %c71_i32_154 = arith.constant 71 : i32
    %298 = tpu.dynamic_rotate %283 by %c71_i32_154 dim 1 : vector<2x1024xf32>, i32 -> vector<2x1024xf32>
    %c56 = arith.constant 56 : index
    %c0_155 = arith.constant 0 : index
    %c0_156 = arith.constant 0 : index
    %299 = vector.load %arg2[%c56, %c0_155, %c0_156] : memref<81x2x1024xf32, #tpu.memory_space<vmem>>, vector<1x2x1024xf32>
    %300 = vector.shape_cast %299 : vector<1x2x1024xf32> to vector<2x1024xf32>
    %301 = arith.mulf %300, %298 : vector<2x1024xf32>
    %302 = arith.addf %297, %301 : vector<2x1024xf32>
    %c65_i32_157 = arith.constant 65 : i32
    %303 = tpu.dynamic_rotate %283 by %c65_i32_157 dim 1 : vector<2x1024xf32>, i32 -> vector<2x1024xf32>
    %c57 = arith.constant 57 : index
    %c0_158 = arith.constant 0 : index
    %c0_159 = arith.constant 0 : index
    %304 = vector.load %arg2[%c57, %c0_158, %c0_159] : memref<81x2x1024xf32, #tpu.memory_space<vmem>>, vector<1x2x1024xf32>
    %305 = vector.shape_cast %304 : vector<1x2x1024xf32> to vector<2x1024xf32>
    %306 = arith.mulf %305, %303 : vector<2x1024xf32>
    %307 = arith.addf %302, %306 : vector<2x1024xf32>
    %c64_i32_160 = arith.constant 64 : i32
    %308 = tpu.dynamic_rotate %283 by %c64_i32_160 dim 1 : vector<2x1024xf32>, i32 -> vector<2x1024xf32>
    %c58 = arith.constant 58 : index
    %c0_161 = arith.constant 0 : index
    %c0_162 = arith.constant 0 : index
    %309 = vector.load %arg2[%c58, %c0_161, %c0_162] : memref<81x2x1024xf32, #tpu.memory_space<vmem>>, vector<1x2x1024xf32>
    %310 = vector.shape_cast %309 : vector<1x2x1024xf32> to vector<2x1024xf32>
    %311 = arith.mulf %310, %308 : vector<2x1024xf32>
    %312 = arith.addf %307, %311 : vector<2x1024xf32>
    %c63_i32_163 = arith.constant 63 : i32
    %313 = tpu.dynamic_rotate %283 by %c63_i32_163 dim 1 : vector<2x1024xf32>, i32 -> vector<2x1024xf32>
    %c59 = arith.constant 59 : index
    %c0_164 = arith.constant 0 : index
    %c0_165 = arith.constant 0 : index
    %314 = vector.load %arg2[%c59, %c0_164, %c0_165] : memref<81x2x1024xf32, #tpu.memory_space<vmem>>, vector<1x2x1024xf32>
    %315 = vector.shape_cast %314 : vector<1x2x1024xf32> to vector<2x1024xf32>
    %316 = arith.mulf %315, %313 : vector<2x1024xf32>
    %317 = arith.addf %312, %316 : vector<2x1024xf32>
    %c57_i32_166 = arith.constant 57 : i32
    %318 = tpu.dynamic_rotate %283 by %c57_i32_166 dim 1 : vector<2x1024xf32>, i32 -> vector<2x1024xf32>
    %c60 = arith.constant 60 : index
    %c0_167 = arith.constant 0 : index
    %c0_168 = arith.constant 0 : index
    %319 = vector.load %arg2[%c60, %c0_167, %c0_168] : memref<81x2x1024xf32, #tpu.memory_space<vmem>>, vector<1x2x1024xf32>
    %320 = vector.shape_cast %319 : vector<1x2x1024xf32> to vector<2x1024xf32>
    %321 = arith.mulf %320, %318 : vector<2x1024xf32>
    %322 = arith.addf %317, %321 : vector<2x1024xf32>
    %c56_i32_169 = arith.constant 56 : i32
    %323 = tpu.dynamic_rotate %283 by %c56_i32_169 dim 1 : vector<2x1024xf32>, i32 -> vector<2x1024xf32>
    %c61 = arith.constant 61 : index
    %c0_170 = arith.constant 0 : index
    %c0_171 = arith.constant 0 : index
    %324 = vector.load %arg2[%c61, %c0_170, %c0_171] : memref<81x2x1024xf32, #tpu.memory_space<vmem>>, vector<1x2x1024xf32>
    %325 = vector.shape_cast %324 : vector<1x2x1024xf32> to vector<2x1024xf32>
    %326 = arith.mulf %325, %323 : vector<2x1024xf32>
    %327 = arith.addf %322, %326 : vector<2x1024xf32>
    %c55_i32_172 = arith.constant 55 : i32
    %328 = tpu.dynamic_rotate %283 by %c55_i32_172 dim 1 : vector<2x1024xf32>, i32 -> vector<2x1024xf32>
    %c62 = arith.constant 62 : index
    %c0_173 = arith.constant 0 : index
    %c0_174 = arith.constant 0 : index
    %329 = vector.load %arg2[%c62, %c0_173, %c0_174] : memref<81x2x1024xf32, #tpu.memory_space<vmem>>, vector<1x2x1024xf32>
    %330 = vector.shape_cast %329 : vector<1x2x1024xf32> to vector<2x1024xf32>
    %331 = arith.mulf %330, %328 : vector<2x1024xf32>
    %332 = arith.addf %327, %331 : vector<2x1024xf32>
    %c9_i32_175 = arith.constant 9 : i32
    %333 = tpu.dynamic_rotate %283 by %c9_i32_175 dim 1 : vector<2x1024xf32>, i32 -> vector<2x1024xf32>
    %c63 = arith.constant 63 : index
    %c0_176 = arith.constant 0 : index
    %c0_177 = arith.constant 0 : index
    %334 = vector.load %arg2[%c63, %c0_176, %c0_177] : memref<81x2x1024xf32, #tpu.memory_space<vmem>>, vector<1x2x1024xf32>
    %335 = vector.shape_cast %334 : vector<1x2x1024xf32> to vector<2x1024xf32>
    %336 = arith.mulf %335, %333 : vector<2x1024xf32>
    %337 = arith.addf %332, %336 : vector<2x1024xf32>
    %c8_i32_178 = arith.constant 8 : i32
    %338 = tpu.dynamic_rotate %283 by %c8_i32_178 dim 1 : vector<2x1024xf32>, i32 -> vector<2x1024xf32>
    %c64 = arith.constant 64 : index
    %c0_179 = arith.constant 0 : index
    %c0_180 = arith.constant 0 : index
    %339 = vector.load %arg2[%c64, %c0_179, %c0_180] : memref<81x2x1024xf32, #tpu.memory_space<vmem>>, vector<1x2x1024xf32>
    %340 = vector.shape_cast %339 : vector<1x2x1024xf32> to vector<2x1024xf32>
    %341 = arith.mulf %340, %338 : vector<2x1024xf32>
    %342 = arith.addf %337, %341 : vector<2x1024xf32>
    %c7_i32_181 = arith.constant 7 : i32
    %343 = tpu.dynamic_rotate %283 by %c7_i32_181 dim 1 : vector<2x1024xf32>, i32 -> vector<2x1024xf32>
    %c65 = arith.constant 65 : index
    %c0_182 = arith.constant 0 : index
    %c0_183 = arith.constant 0 : index
    %344 = vector.load %arg2[%c65, %c0_182, %c0_183] : memref<81x2x1024xf32, #tpu.memory_space<vmem>>, vector<1x2x1024xf32>
    %345 = vector.shape_cast %344 : vector<1x2x1024xf32> to vector<2x1024xf32>
    %346 = arith.mulf %345, %343 : vector<2x1024xf32>
    %347 = arith.addf %342, %346 : vector<2x1024xf32>
    %c1_i32_184 = arith.constant 1 : i32
    %348 = tpu.dynamic_rotate %283 by %c1_i32_184 dim 1 : vector<2x1024xf32>, i32 -> vector<2x1024xf32>
    %c66 = arith.constant 66 : index
    %c0_185 = arith.constant 0 : index
    %c0_186 = arith.constant 0 : index
    %349 = vector.load %arg2[%c66, %c0_185, %c0_186] : memref<81x2x1024xf32, #tpu.memory_space<vmem>>, vector<1x2x1024xf32>
    %350 = vector.shape_cast %349 : vector<1x2x1024xf32> to vector<2x1024xf32>
    %351 = arith.mulf %350, %348 : vector<2x1024xf32>
    %352 = arith.addf %347, %351 : vector<2x1024xf32>
    %c67 = arith.constant 67 : index
    %c0_187 = arith.constant 0 : index
    %c0_188 = arith.constant 0 : index
    %353 = vector.load %arg2[%c67, %c0_187, %c0_188] : memref<81x2x1024xf32, #tpu.memory_space<vmem>>, vector<1x2x1024xf32>
    %354 = vector.shape_cast %353 : vector<1x2x1024xf32> to vector<2x1024xf32>
    %355 = arith.mulf %354, %283 : vector<2x1024xf32>
    %356 = arith.addf %352, %355 : vector<2x1024xf32>
    %c1023_i32_189 = arith.constant 1023 : i32
    %357 = tpu.dynamic_rotate %283 by %c1023_i32_189 dim 1 : vector<2x1024xf32>, i32 -> vector<2x1024xf32>
    %c68 = arith.constant 68 : index
    %c0_190 = arith.constant 0 : index
    %c0_191 = arith.constant 0 : index
    %358 = vector.load %arg2[%c68, %c0_190, %c0_191] : memref<81x2x1024xf32, #tpu.memory_space<vmem>>, vector<1x2x1024xf32>
    %359 = vector.shape_cast %358 : vector<1x2x1024xf32> to vector<2x1024xf32>
    %360 = arith.mulf %359, %357 : vector<2x1024xf32>
    %361 = arith.addf %356, %360 : vector<2x1024xf32>
    %c1017_i32_192 = arith.constant 1017 : i32
    %362 = tpu.dynamic_rotate %283 by %c1017_i32_192 dim 1 : vector<2x1024xf32>, i32 -> vector<2x1024xf32>
    %c69 = arith.constant 69 : index
    %c0_193 = arith.constant 0 : index
    %c0_194 = arith.constant 0 : index
    %363 = vector.load %arg2[%c69, %c0_193, %c0_194] : memref<81x2x1024xf32, #tpu.memory_space<vmem>>, vector<1x2x1024xf32>
    %364 = vector.shape_cast %363 : vector<1x2x1024xf32> to vector<2x1024xf32>
    %365 = arith.mulf %364, %362 : vector<2x1024xf32>
    %366 = arith.addf %361, %365 : vector<2x1024xf32>
    %c1016_i32_195 = arith.constant 1016 : i32
    %367 = tpu.dynamic_rotate %283 by %c1016_i32_195 dim 1 : vector<2x1024xf32>, i32 -> vector<2x1024xf32>
    %c70 = arith.constant 70 : index
    %c0_196 = arith.constant 0 : index
    %c0_197 = arith.constant 0 : index
    %368 = vector.load %arg2[%c70, %c0_196, %c0_197] : memref<81x2x1024xf32, #tpu.memory_space<vmem>>, vector<1x2x1024xf32>
    %369 = vector.shape_cast %368 : vector<1x2x1024xf32> to vector<2x1024xf32>
    %370 = arith.mulf %369, %367 : vector<2x1024xf32>
    %371 = arith.addf %366, %370 : vector<2x1024xf32>
    %c1015_i32_198 = arith.constant 1015 : i32
    %372 = tpu.dynamic_rotate %283 by %c1015_i32_198 dim 1 : vector<2x1024xf32>, i32 -> vector<2x1024xf32>
    %c71 = arith.constant 71 : index
    %c0_199 = arith.constant 0 : index
    %c0_200 = arith.constant 0 : index
    %373 = vector.load %arg2[%c71, %c0_199, %c0_200] : memref<81x2x1024xf32, #tpu.memory_space<vmem>>, vector<1x2x1024xf32>
    %374 = vector.shape_cast %373 : vector<1x2x1024xf32> to vector<2x1024xf32>
    %375 = arith.mulf %374, %372 : vector<2x1024xf32>
    %376 = arith.addf %371, %375 : vector<2x1024xf32>
    %c969_i32_201 = arith.constant 969 : i32
    %377 = tpu.dynamic_rotate %283 by %c969_i32_201 dim 1 : vector<2x1024xf32>, i32 -> vector<2x1024xf32>
    %c72 = arith.constant 72 : index
    %c0_202 = arith.constant 0 : index
    %c0_203 = arith.constant 0 : index
    %378 = vector.load %arg2[%c72, %c0_202, %c0_203] : memref<81x2x1024xf32, #tpu.memory_space<vmem>>, vector<1x2x1024xf32>
    %379 = vector.shape_cast %378 : vector<1x2x1024xf32> to vector<2x1024xf32>
    %380 = arith.mulf %379, %377 : vector<2x1024xf32>
    %381 = arith.addf %376, %380 : vector<2x1024xf32>
    %c968_i32_204 = arith.constant 968 : i32
    %382 = tpu.dynamic_rotate %283 by %c968_i32_204 dim 1 : vector<2x1024xf32>, i32 -> vector<2x1024xf32>
    %c73 = arith.constant 73 : index
    %c0_205 = arith.constant 0 : index
    %c0_206 = arith.constant 0 : index
    %383 = vector.load %arg2[%c73, %c0_205, %c0_206] : memref<81x2x1024xf32, #tpu.memory_space<vmem>>, vector<1x2x1024xf32>
    %384 = vector.shape_cast %383 : vector<1x2x1024xf32> to vector<2x1024xf32>
    %385 = arith.mulf %384, %382 : vector<2x1024xf32>
    %386 = arith.addf %381, %385 : vector<2x1024xf32>
    %c967_i32_207 = arith.constant 967 : i32
    %387 = tpu.dynamic_rotate %283 by %c967_i32_207 dim 1 : vector<2x1024xf32>, i32 -> vector<2x1024xf32>
    %c74 = arith.constant 74 : index
    %c0_208 = arith.constant 0 : index
    %c0_209 = arith.constant 0 : index
    %388 = vector.load %arg2[%c74, %c0_208, %c0_209] : memref<81x2x1024xf32, #tpu.memory_space<vmem>>, vector<1x2x1024xf32>
    %389 = vector.shape_cast %388 : vector<1x2x1024xf32> to vector<2x1024xf32>
    %390 = arith.mulf %389, %387 : vector<2x1024xf32>
    %391 = arith.addf %386, %390 : vector<2x1024xf32>
    %c961_i32_210 = arith.constant 961 : i32
    %392 = tpu.dynamic_rotate %283 by %c961_i32_210 dim 1 : vector<2x1024xf32>, i32 -> vector<2x1024xf32>
    %c75 = arith.constant 75 : index
    %c0_211 = arith.constant 0 : index
    %c0_212 = arith.constant 0 : index
    %393 = vector.load %arg2[%c75, %c0_211, %c0_212] : memref<81x2x1024xf32, #tpu.memory_space<vmem>>, vector<1x2x1024xf32>
    %394 = vector.shape_cast %393 : vector<1x2x1024xf32> to vector<2x1024xf32>
    %395 = arith.mulf %394, %392 : vector<2x1024xf32>
    %396 = arith.addf %391, %395 : vector<2x1024xf32>
    %c960_i32_213 = arith.constant 960 : i32
    %397 = tpu.dynamic_rotate %283 by %c960_i32_213 dim 1 : vector<2x1024xf32>, i32 -> vector<2x1024xf32>
    %c76 = arith.constant 76 : index
    %c0_214 = arith.constant 0 : index
    %c0_215 = arith.constant 0 : index
    %398 = vector.load %arg2[%c76, %c0_214, %c0_215] : memref<81x2x1024xf32, #tpu.memory_space<vmem>>, vector<1x2x1024xf32>
    %399 = vector.shape_cast %398 : vector<1x2x1024xf32> to vector<2x1024xf32>
    %400 = arith.mulf %399, %397 : vector<2x1024xf32>
    %401 = arith.addf %396, %400 : vector<2x1024xf32>
    %c959_i32_216 = arith.constant 959 : i32
    %402 = tpu.dynamic_rotate %283 by %c959_i32_216 dim 1 : vector<2x1024xf32>, i32 -> vector<2x1024xf32>
    %c77 = arith.constant 77 : index
    %c0_217 = arith.constant 0 : index
    %c0_218 = arith.constant 0 : index
    %403 = vector.load %arg2[%c77, %c0_217, %c0_218] : memref<81x2x1024xf32, #tpu.memory_space<vmem>>, vector<1x2x1024xf32>
    %404 = vector.shape_cast %403 : vector<1x2x1024xf32> to vector<2x1024xf32>
    %405 = arith.mulf %404, %402 : vector<2x1024xf32>
    %406 = arith.addf %401, %405 : vector<2x1024xf32>
    %c953_i32_219 = arith.constant 953 : i32
    %407 = tpu.dynamic_rotate %283 by %c953_i32_219 dim 1 : vector<2x1024xf32>, i32 -> vector<2x1024xf32>
    %c78 = arith.constant 78 : index
    %c0_220 = arith.constant 0 : index
    %c0_221 = arith.constant 0 : index
    %408 = vector.load %arg2[%c78, %c0_220, %c0_221] : memref<81x2x1024xf32, #tpu.memory_space<vmem>>, vector<1x2x1024xf32>
    %409 = vector.shape_cast %408 : vector<1x2x1024xf32> to vector<2x1024xf32>
    %410 = arith.mulf %409, %407 : vector<2x1024xf32>
    %411 = arith.addf %406, %410 : vector<2x1024xf32>
    %c952_i32_222 = arith.constant 952 : i32
    %412 = tpu.dynamic_rotate %283 by %c952_i32_222 dim 1 : vector<2x1024xf32>, i32 -> vector<2x1024xf32>
    %c79 = arith.constant 79 : index
    %c0_223 = arith.constant 0 : index
    %c0_224 = arith.constant 0 : index
    %413 = vector.load %arg2[%c79, %c0_223, %c0_224] : memref<81x2x1024xf32, #tpu.memory_space<vmem>>, vector<1x2x1024xf32>
    %414 = vector.shape_cast %413 : vector<1x2x1024xf32> to vector<2x1024xf32>
    %415 = arith.mulf %414, %412 : vector<2x1024xf32>
    %416 = arith.addf %411, %415 : vector<2x1024xf32>
    %c951_i32_225 = arith.constant 951 : i32
    %417 = tpu.dynamic_rotate %283 by %c951_i32_225 dim 1 : vector<2x1024xf32>, i32 -> vector<2x1024xf32>
    %c80 = arith.constant 80 : index
    %c0_226 = arith.constant 0 : index
    %c0_227 = arith.constant 0 : index
    %418 = vector.load %arg2[%c80, %c0_226, %c0_227] : memref<81x2x1024xf32, #tpu.memory_space<vmem>>, vector<1x2x1024xf32>
    %419 = vector.shape_cast %418 : vector<1x2x1024xf32> to vector<2x1024xf32>
    %420 = arith.mulf %419, %417 : vector<2x1024xf32>
    %421 = arith.addf %416, %420 : vector<2x1024xf32>
    %c4_228 = arith.constant 4 : index
    %c0_229 = arith.constant 0 : index
    %422 = vector.load %arg9[%c4_228, %c0_229] : memref<8x1024xf32, #tpu.memory_space<vmem>>, vector<2x1024xf32>
    tpu.vector_store %arg9[%c4_228, %c0_229], %421 {strides = array<i32>} : memref<8x1024xf32, #tpu.memory_space<vmem>>, vector<2x1024xf32>,
    %423 = vector.extract_strided_slice %0 {offsets = [6, 0], sizes = [2, 1024], strides = [1, 1]} : vector<8x1024xf32> to vector<2x1024xf32>
    %c6_230 = arith.constant 6 : index
    %c0_231 = arith.constant 0 : index
    %424 = vector.load %arg9[%c6_230, %c0_231] : memref<8x1024xf32, #tpu.memory_space<vmem>>, vector<2x1024xf32>
    tpu.vector_store %arg9[%c6_230, %c0_231], %423 {strides = array<i32>} : memref<8x1024xf32, #tpu.memory_space<vmem>>, vector<2x1024xf32>,
    %c0_232 = arith.constant 0 : index
    %c0_233 = arith.constant 0 : index
    %425 = vector.load %arg9[%c0_232, %c0_233] : memref<8x1024xf32, #tpu.memory_space<vmem>>, vector<8x1024xf32>
    %426 = vector.extract_strided_slice %425 {offsets = [0, 0], sizes = [8, 512], strides = [1, 1]} : vector<8x1024xf32> to vector<8x512xf32>
    %cst_234 = arith.constant dense<0.000000e+00> : vector<8xf32>
    %427 = vector.multi_reduction <add>, %426, %cst_234 [1] : vector<8x512xf32> to vector<8xf32>
    %428 = vector.shape_cast %427 : vector<8xf32> to vector<8x1xf32>
    %cst_235 = arith.constant 5.120000e+02 : f32
    %429 = vector.broadcast %cst_235 : f32 to vector<8x1xf32>
    %430 = arith.divf %428, %429 : vector<8x1xf32>
    %431 = vector.broadcast %430 : vector<8x1xf32> to vector<8x512xf32>
    %432 = arith.subf %426, %431 : vector<8x512xf32>
    %433 = arith.mulf %432, %432 : vector<8x512xf32>
    %cst_236 = arith.constant dense<0.000000e+00> : vector<8xf32>
    %434 = vector.multi_reduction <add>, %433, %cst_236 [1] : vector<8x512xf32> to vector<8xf32>
    %435 = vector.shape_cast %434 : vector<8xf32> to vector<8x1xf32>
    %cst_237 = arith.constant 5.120000e+02 : f32
    %436 = vector.broadcast %cst_237 : f32 to vector<8x1xf32>
    %437 = arith.divf %435, %436 : vector<8x1xf32>
    %438 = vector.broadcast %430 : vector<8x1xf32> to vector<8x512xf32>
    %439 = arith.subf %426, %438 : vector<8x512xf32>
    %cst_238 = arith.constant 9.99999974E-6 : f32
    %440 = vector.broadcast %cst_238 : f32 to vector<8x1xf32>
    %441 = arith.addf %437, %440 : vector<8x1xf32>
    %442 = math.rsqrt %441 : vector<8x1xf32>
    %443 = vector.broadcast %442 : vector<8x1xf32> to vector<8x512xf32>
    %444 = arith.mulf %439, %443 : vector<8x512xf32>
    %c0_239 = arith.constant 0 : index
    %c0_240 = arith.constant 0 : index
    %445 = vector.load %arg9[%c0_239, %c0_240] : memref<8x1024xf32, #tpu.memory_space<vmem>>, vector<8x512xf32>
    tpu.vector_store %arg9[%c0_239, %c0_240], %444 {strides = array<i32>} : memref<8x1024xf32, #tpu.memory_space<vmem>>, vector<8x512xf32>,
    %446 = vector.extract_strided_slice %425 {offsets = [0, 512], sizes = [8, 512], strides = [1, 1]} : vector<8x1024xf32> to vector<8x512xf32>
    %cst_241 = arith.constant dense<0.000000e+00> : vector<8xf32>
    %447 = vector.multi_reduction <add>, %446, %cst_241 [1] : vector<8x512xf32> to vector<8xf32>
    %448 = vector.shape_cast %447 : vector<8xf32> to vector<8x1xf32>
    %cst_242 = arith.constant 5.120000e+02 : f32
    %449 = vector.broadcast %cst_242 : f32 to vector<8x1xf32>
    %450 = arith.divf %448, %449 : vector<8x1xf32>
    %451 = vector.broadcast %450 : vector<8x1xf32> to vector<8x512xf32>
    %452 = arith.subf %446, %451 : vector<8x512xf32>
    %453 = arith.mulf %452, %452 : vector<8x512xf32>
    %cst_243 = arith.constant dense<0.000000e+00> : vector<8xf32>
    %454 = vector.multi_reduction <add>, %453, %cst_243 [1] : vector<8x512xf32> to vector<8xf32>
    %455 = vector.shape_cast %454 : vector<8xf32> to vector<8x1xf32>
    %cst_244 = arith.constant 5.120000e+02 : f32
    %456 = vector.broadcast %cst_244 : f32 to vector<8x1xf32>
    %457 = arith.divf %455, %456 : vector<8x1xf32>
    %458 = vector.broadcast %450 : vector<8x1xf32> to vector<8x512xf32>
    %459 = arith.subf %446, %458 : vector<8x512xf32>
    %cst_245 = arith.constant 9.99999974E-6 : f32
    %460 = vector.broadcast %cst_245 : f32 to vector<8x1xf32>
    %461 = arith.addf %457, %460 : vector<8x1xf32>
    %462 = math.rsqrt %461 : vector<8x1xf32>
    %463 = vector.broadcast %462 : vector<8x1xf32> to vector<8x512xf32>
    %464 = arith.mulf %459, %463 : vector<8x512xf32>
    %c0_246 = arith.constant 0 : index
    %c512 = arith.constant 512 : index
    %465 = vector.load %arg9[%c0_246, %c512] : memref<8x1024xf32, #tpu.memory_space<vmem>>, vector<8x512xf32>
    tpu.vector_store %arg9[%c0_246, %c512], %464 {strides = array<i32>} : memref<8x1024xf32, #tpu.memory_space<vmem>>, vector<8x512xf32>,
    %c0_247 = arith.constant 0 : index
    %c0_248 = arith.constant 0 : index
    %466 = vector.load %arg9[%c0_247, %c0_248] : memref<8x1024xf32, #tpu.memory_space<vmem>>, vector<8x1024xf32>
    %c0_249 = arith.constant 0 : index
    %c0_250 = arith.constant 0 : index
    %467 = vector.load %arg4[%c0_249, %c0_250] : memref<32x8xf32, #tpu.memory_space<vmem>>, vector<32x8xf32>
    %cst_251 = arith.constant dense<0.000000e+00> : vector<32x1024xf32>
    %468 = tpu.matmul %467, %466, %cst_251 {dimension_numbers = #tpu.dot_dimension_numbers<[1], [0], [0], [1], [0, 0, 1, 1], [], []>} : vector<32x8xf32>, vector<8x1024xf32>, vector<32x1024xf32> -> vector<32x1024xf32>
    %c0_252 = arith.constant 0 : index
    %c0_253 = arith.constant 0 : index
    %469 = vector.load %arg5[%c0_252, %c0_253] : memref<32x1xf32, #tpu.memory_space<vmem>>, vector<32x1xf32>
    %470 = vector.broadcast %469 : vector<32x1xf32> to vector<32x1024xf32>
    %471 = arith.addf %468, %470 : vector<32x1024xf32>
    %cst_254 = arith.constant 5.000000e-01 : f32
    %472 = vector.broadcast %cst_254 : f32 to vector<32x1024xf32>
    %473 = arith.mulf %472, %471 : vector<32x1024xf32>
    %cst_255 = arith.constant 4.471500e-02 : f32
    %474 = vector.broadcast %cst_255 : f32 to vector<32x1024xf32>
    %475 = arith.mulf %474, %471 : vector<32x1024xf32>
    %476 = arith.mulf %475, %471 : vector<32x1024xf32>
    %477 = arith.mulf %476, %471 : vector<32x1024xf32>
    %478 = arith.addf %471, %477 : vector<32x1024xf32>
    %cst_256 = arith.constant 0.797884583 : f32
    %479 = vector.broadcast %cst_256 : f32 to vector<32x1024xf32>
    %480 = arith.mulf %479, %478 : vector<32x1024xf32>
    %481 = math.tanh %480 : vector<32x1024xf32>
    %cst_257 = arith.constant 1.000000e+00 : f32
    %482 = vector.broadcast %cst_257 : f32 to vector<32x1024xf32>
    %483 = arith.addf %482, %481 : vector<32x1024xf32>
    %484 = arith.mulf %473, %483 : vector<32x1024xf32>
    %485 = tpu.concatenate %484, %0 in 0 : vector<32x1024xf32>, vector<8x1024xf32> -> vector<40x1024xf32>
    %c0_258 = arith.constant 0 : index
    %c0_259 = arith.constant 0 : index
    %486 = vector.load %arg6[%c0_258, %c0_259] : memref<16x40xf32, #tpu.memory_space<vmem>>, vector<16x40xf32>
    %cst_260 = arith.constant dense<0.000000e+00> : vector<16x1024xf32>
    %487 = tpu.matmul %486, %485, %cst_260 {dimension_numbers = #tpu.dot_dimension_numbers<[1], [0], [0], [1], [0, 0, 1, 1], [], []>} : vector<16x40xf32>, vector<40x1024xf32>, vector<16x1024xf32> -> vector<16x1024xf32>
    %c0_261 = arith.constant 0 : index
    %c0_262 = arith.constant 0 : index
    %488 = vector.load %arg7[%c0_261, %c0_262] : memref<16x1xf32, #tpu.memory_space<vmem>>, vector<16x1xf32>
    %489 = vector.broadcast %488 : vector<16x1xf32> to vector<16x1024xf32>
    %490 = arith.addf %487, %489 : vector<16x1024xf32>
    %c0_263 = arith.constant 0 : index
    %c0_264 = arith.constant 0 : index
    %491 = vector.load %arg8[%c0_263, %c0_264] : memref<16x1024xf32, #tpu.memory_space<vmem>>, vector<16x1024xf32>
    tpu.vector_store %arg8[%c0_263, %c0_264], %490 {strides = array<i32>} : memref<16x1024xf32, #tpu.memory_space<vmem>>, vector<16x1024xf32>,
    return
  }
  func.func @transform_0(%arg0: i32) -> (i32, i32) {
    %c0_i32 = arith.constant 0 : i32
    %c0_i32_0 = arith.constant 0 : i32
    %c0_i32_1 = arith.constant 0 : i32
    return %c0_i32, %c0_i32_0 : i32, i32
  }
  func.func @transform_1(%arg0: i32) -> (i32, i32, i32) {
    %c0_i32 = arith.constant 0 : i32
    %c0_i32_0 = arith.constant 0 : i32
    %c0_i32_1 = arith.constant 0 : i32
    %c0_i32_2 = arith.constant 0 : i32
    return %c0_i32, %c0_i32_0, %c0_i32_1 : i32, i32, i32
  }
  func.func @transform_2(%arg0: i32) -> (i32, i32) {
    %c0_i32 = arith.constant 0 : i32
    %c0_i32_0 = arith.constant 0 : i32
    %c0_i32_1 = arith.constant 0 : i32
    return %c0_i32, %c0_i32_0 : i32, i32
  }
  func.func @transform_3(%arg0: i32) -> (i32, i32) {
    %c0_i32 = arith.constant 0 : i32
    %c0_i32_0 = arith.constant 0 : i32
    %c0_i32_1 = arith.constant 0 : i32
    return %c0_i32, %c0_i32_0 : i32, i32
  }
  func.func @transform_4(%arg0: i32) -> (i32, i32) {
    %c0_i32 = arith.constant 0 : i32
    %c0_i32_0 = arith.constant 0 : i32
    %c0_i32_1 = arith.constant 0 : i32
    return %c0_i32, %c0_i32_0 : i32, i32
  }
  func.func @transform_5(%arg0: i32) -> (i32, i32) {
    %c0_i32 = arith.constant 0 : i32
    %c0_i32_0 = arith.constant 0 : i32
    %c0_i32_1 = arith.constant 0 : i32
    return %c0_i32, %c0_i32_0 : i32, i32
  }
  func.func @transform_6(%arg0: i32) -> (i32, i32) {
    %c0_i32 = arith.constant 0 : i32
    %c0_i32_0 = arith.constant 0 : i32
    %c0_i32_1 = arith.constant 0 : i32
    return %c0_i32, %c0_i32_0 : i32, i32
  }
  func.func @transform_7(%arg0: i32) -> (i32, i32) {
    %c0_i32 = arith.constant 0 : i32
    %c0_i32_0 = arith.constant 0 : i32
    %c0_i32_1 = arith.constant 0 : i32
    return %c0_i32, %c0_i32_0 : i32, i32
  }
}

</mosaic_0001>

<bundles_post_ra>
// kernel: convnest_block_forward.1
= control target key start
LH: loop header
LB: loop body
LE: loop exit
PB: predicated region body
PF: predicated region fallthrough
CT: control target
= control target key end

     0   :  { %12 = vsyncpa [#allocation4], 0  ;;  %s10664_s24 = smov [#allocation3]   ;;  %s16915_s0 = inlined_call_operand.vmem [shape: f32[8,1024], index: 0, kind: input, shape index: {}]   ;;  %s16916_s1 = inlined_call_operand.hbm [shape: f32[81,2,1024], index: 1, kind: input, shape index: {}]   ;;  %s16917_s2 = inlined_call_operand.vmem [shape: f32[2,3], index: 2, kind: input, shape index: {}]   ;;  %s16918_s3 = inlined_call_operand.vmem [shape: f32[32,8], index: 3, kind: input, shape index: {}]   ;;  %s16919_s4 = inlined_call_operand.vmem [shape: f32[32,1], index: 4, kind: input, shape index: {}]   ;;  %s16920_s5 = inlined_call_operand.vmem [shape: f32[16,40], index: 5, kind: input, shape index: {}]   ;;  %s16921_s6 = inlined_call_operand.vmem [shape: f32[16,1], index: 6, kind: input, shape index: {}]   ;;  %s16922_s7 = inlined_call_operand.vmem [shape: f32[16,1024], index: 7, kind: output, shape index: {}]  }
   0x1   :  { %s20_s25 = sshll.u32 %s10664_s24, 4  ;;  %s21_s25 = int_to_ptr.vmem [resolvable:$true] %s20_s25 }
   0x2   :  { %s10650_s26 = scalar_lea.vmem %s21_s25, 20736  ;;  %p10655_p1 = scmp.lt.s32.totalorder %s21_s25, %s21_s25 }
   0x3   :  { %p10651_p0 = scmp.ne.s32.totalorder %s21_s25, %s10650_s26  ;;  %p10656_p2 = scmp.lt.s32.totalorder %s10650_s26, %s10650_s26 }
   0x5   :  { %p10657_p3 = por %p10656_p2, %p10655_p1 }
   0x7   :  { %p10658_p4 = pnand %p10657_p3, %p10651_p0 }
   0x9   :  { %10661 = shalt.err (!%p10658_p4)
}
   0xa   :  { %s10665_s27 = smov 256   ;;  %s10666_s28 = smov 16  }
   0xb   :  { %26 = dma.hbm_to_vmem [thread:$0]  %s16916_s1, 20736, %s21_s25, [#allocation4], %s10665_s27, %s10665_s27, %s10666_s28  }
   0xc   :  { %10662 = dma.done.wait [#allocation4], 20736  }
   0xd   :  { %10663 = vsyncadd [#allocation4], 4294946560  ;;  %v16923_v0 = vmov 0   ;;  %v10737_v1 = vld [vmem:[%s16915_s0 + $0x10] sm:$0xff]  ;;  %v10742_v2 = vld [vmem:[%s16915_s0] sm:$0xff]  ;;  %s10668_s1 = smov 73   ;;  %v71_v38 = vlaneseq }
   0xe   :  { %10565 = vset.pattern.permute.xlu0 %v16923_v0  ;;  %10568 = vset.pattern.permute.xlu1 %v16923_v0  ;;  %17187 = vst [vmem:[#allocation6_spill] sm:$0xff] %v10737_v1  ;;  %17188 = vst [vmem:[#allocation7_spill] sm:$0xff] %v10742_v2  ;;  %v10747_v3 = vld [vmem:[%s16915_s0 + $0x18] sm:$0xff]  ;;  %v10759_v4 = vld [vmem:[%s16915_s0 + $0x8] sm:$0xff]  ;;  %s10670_s24 = smov 71   ;;  %s10671_s25 = smov 65  }
   0xf   :  { %17189 = vst [vmem:[#allocation8_spill] sm:$0xff] %v10747_v3  ;;  %59 = vrot.lane.b32.xlu1 %v10737_v1, %s10668_s1  ;;  %9398 = vst [vmem:[#allocation2 + $0x18] sm:$0xc0] %v10737_v1  ;;  %55 = vrot.lane.b32.xlu0 %v10742_v2, %s10668_s1  ;;  %v10764_v5 = vld [vmem:[%s16915_s0 + $0x28] sm:$0xff]  ;;  %v10771_v6 = vld [vmem:[%s16915_s0 + $0x20] sm:$0xff]  ;;  %s10672_s26 = smov 64  }
  0x10   :  { %9396 = vst [vmem:[#allocation2 + $0x30] sm:$0xc0] %v10742_v2  ;;  %9399 = vst [vmem:[#allocation2 + $0x10] sm:$0xc0] %v10747_v3  ;;  %v10776_v7 = vld [vmem:[%s16915_s0 + $0x38] sm:$0xff]  ;;  %v10781_v8 = vld [vmem:[%s16915_s0 + $0x30] sm:$0xff] }
  0x11   :  { %17190 = vst [vmem:[#allocation9_spill] sm:$0xff] %v10759_v4  ;;  %17191 = vst [vmem:[#allocation10_spill] sm:$0xff] %v10764_v5  ;;  %s10669_s0 = smov 72   ;;  %v48_v9 = vld [vmem:[%s16917_s2] sm:$0x3]  ;;  %s10673_s29 = smov 63  }
  0x12   :  { %9397 = vst [vmem:[#allocation2] sm:$0xc0] %v10759_v4  ;;  %9401 = vst [vmem:[#allocation2 + $0x20] sm:$0xc0] %v10764_v5  ;;  %s10674_s30 = smov 57   ;;  %s10675_s8 = smov 56  }
  0x13   :  { %17192 = vst [vmem:[#allocation11_spill] sm:$0xff] %v10771_v6  ;;  %17193 = vst [vmem:[#allocation12_spill] sm:$0xff] %v10776_v7  ;;  %61 = vrot.lane.b32.xlu1 %v10747_v3, %s10668_s1  ;;  %57 = vrot.lane.b32.xlu0 %v10759_v4, %s10668_s1  ;;  %s10676_s9 = smov 55   ;;  %s10677_s10 = smov 9   ;;  %v11015_v41 = vand.u32 127, %v71_v38  ;;  %v98_v47 = vshrl.u32 %v71_v38, 7 }
  0x14   :  { %17194 = vst [vmem:[#allocation13_spill] sm:$0xff] %v10781_v8  ;;  %9400 = vst [vmem:[#allocation2 + $0x8] sm:$0xc0] %v10771_v6  ;;  %s10678_s11 = smov 8   ;;  %v10679_v42 = vmov 1983009808  }
  0x15   :  { %9403 = vst [vmem:[#allocation2 + $0x38] sm:$0xc0] %v10776_v7  ;;  %9402 = vst [vmem:[#allocation2 + $0x28] sm:$0xc0] %v10781_v8  ;;  %v95_v43 = vunpack.c.l.s4 %v10679_v42  ;;  %vm73_vm0 = vcmp.lt.s32.totalorder %v11015_v41, 73  ;;  %s10680_s12 = smov 7  }
  0x16   :  { %vm198_vm1 = vcmp.lt.s32.totalorder %v11015_v41, 72  ;;  %s10681_s13 = smov 1   ;;  %vm324_vm2 = vcmp.lt.s32.totalorder %v11015_v41, 71  ;;  %vm450_vm3 = vcmp.lt.s32.totalorder %v11015_v41, 65  ;;  %s10682_s14 = smov 127   ;;  %vm576_vm4 = vcmp.lt.s32.totalorder %v11015_v41, 64 }
  0x17   :  { %65 = vrot.lane.b32.xlu1 %v10764_v5, %s10668_s1  ;;  %63 = vrot.lane.b32.xlu0 %v10771_v6, %s10668_s1  ;;  %v96_v46 = vunpack.c.0.s8 %v95_v43  ;;  %s10683_s15 = smov 121   ;;  %vm702_vm5 = vcmp.lt.s32.totalorder %v11015_v41, 63  ;;  %s10684_s16 = smov 120   ;;  %vm828_vm6 = vcmp.lt.s32.totalorder %v11015_v41, 57  ;;  %vm954_vm7 = vcmp.lt.s32.totalorder %v11015_v41, 56 }
  0x18   :  { %s10685_s17 = smov 119   ;;  %vm1080_vm8 = vcmp.lt.s32.totalorder %v11015_v41, 55  ;;  %vm1206_vm9 = vcmp.lt.s32.totalorder %v11015_v41, 9  ;;  %vm17108_vm10 = vcmp.lt.s32.totalorder %v11015_v41, 8  ;;  %vm17107_vm11 = vcmp.lt.s32.totalorder %v11015_v41, 7 }
  0x19   :  { %v11066_v58 = vsub.s32 %v96_v46, %v98_v47  ;;  %vm17105_vm12 = vcmp.lt.s32.totalorder %v11015_v41, 1  ;;  %vm17106_vm13 = vcmp.lt.s32.totalorder %v11015_v41, 127  ;;  %vm17021_vm14 = vcmp.lt.s32.totalorder %v11015_v41, 121 }
  0x1a   :  { %vm2063_vm15 = vcmp.lt.s32.totalorder %v11015_v41, 120 }
  0x1b   :  { %69 = vrot.lane.b32.xlu1 %v10776_v7, %s10668_s1  ;;  %67 = vrot.lane.b32.xlu0 %v10781_v8, %s10668_s1 }
  0x1f   :  { %184 = vrot.lane.b32.xlu1 %v10759_v4, %s10669_s0  ;;  %182 = vrot.lane.b32.xlu0 %v10742_v2, %s10669_s0 }
  0x23   :  { %188 = vrot.lane.b32.xlu1 %v10747_v3, %s10669_s0  ;;  %186 = vrot.lane.b32.xlu0 %v10737_v1, %s10669_s0 }
  0x27   :  { %192 = vrot.lane.b32.xlu1 %v10764_v5, %s10669_s0  ;;  %190 = vrot.lane.b32.xlu0 %v10771_v6, %s10669_s0 }
  0x2b   :  { %196 = vrot.lane.b32.xlu1 %v10776_v7, %s10669_s0  ;;  %194 = vrot.lane.b32.xlu0 %v10781_v8, %s10669_s0 }
  0x2f   :  { %310 = vrot.lane.b32.xlu1 %v10759_v4, %s10670_s24  ;;  %308 = vrot.lane.b32.xlu0 %v10742_v2, %s10670_s24 }
  0x33   :  { %314 = vrot.lane.b32.xlu1 %v10747_v3, %s10670_s24  ;;  %312 = vrot.lane.b32.xlu0 %v10737_v1, %s10670_s24 }
  0x37   :  { %318 = vrot.lane.b32.xlu1 %v10764_v5, %s10670_s24  ;;  %316 = vrot.lane.b32.xlu0 %v10771_v6, %s10670_s24 }
  0x3b   :  { %322 = vrot.lane.b32.xlu1 %v10776_v7, %s10670_s24  ;;  %320 = vrot.lane.b32.xlu0 %v10781_v8, %s10670_s24 }
  0x3f   :  { %436 = vrot.lane.b32.xlu1 %v10759_v4, %s10671_s25  ;;  %434 = vrot.lane.b32.xlu0 %v10742_v2, %s10671_s25 }
  0x43   :  { %440 = vrot.lane.b32.xlu1 %v10747_v3, %s10671_s25  ;;  %438 = vrot.lane.b32.xlu0 %v10737_v1, %s10671_s25 }
  0x47   :  { %444 = vrot.lane.b32.xlu1 %v10764_v5, %s10671_s25  ;;  %442 = vrot.lane.b32.xlu0 %v10771_v6, %s10671_s25 }
  0x4b   :  { %448 = vrot.lane.b32.xlu1 %v10776_v7, %s10671_s25  ;;  %446 = vrot.lane.b32.xlu0 %v10781_v8, %s10671_s25 }
  0x4f   :  { %562 = vrot.lane.b32.xlu1 %v10759_v4, %s10672_s26  ;;  %560 = vrot.lane.b32.xlu0 %v10742_v2, %s10672_s26 }
  0x53   :  { %566 = vrot.lane.b32.xlu1 %v10747_v3, %s10672_s26  ;;  %564 = vrot.lane.b32.xlu0 %v10737_v1, %s10672_s26 }
  0x57   :  { %570 = vrot.lane.b32.xlu1 %v10764_v5, %s10672_s26  ;;  %568 = vrot.lane.b32.xlu0 %v10771_v6, %s10672_s26 }
  0x5b   :  { %574 = vrot.lane.b32.xlu1 %v10776_v7, %s10672_s26  ;;  %572 = vrot.lane.b32.xlu0 %v10781_v8, %s10672_s26 }
  0x5f   :  { %686 = vrot.lane.b32.xlu1 %v10742_v2, %s10673_s29  ;;  %51 = vperm.xlu0 %10565, %v48_v9  }
  0x63   :  { %688 = vrot.lane.b32.xlu1 %v10759_v4, %s10673_s29  ;;  %690 = vrot.lane.b32.xlu0 %v10737_v1, %s10673_s29 }
  0x67   :  { %692 = vrot.lane.b32.xlu1 %v10747_v3, %s10673_s29  ;;  %694 = vrot.lane.b32.xlu0 %v10771_v6, %s10673_s29 }
  0x6b   :  { %696 = vrot.lane.b32.xlu1 %v10764_v5, %s10673_s29  ;;  %698 = vrot.lane.b32.xlu0 %v10781_v8, %s10673_s29 }
  0x6f   :  { %700 = vrot.lane.b32.xlu1 %v10776_v7, %s10673_s29  ;;  %812 = vrot.lane.b32.xlu0 %v10742_v2, %s10674_s30 }
  0x73   :  { %814 = vrot.lane.b32.xlu1 %v10759_v4, %s10674_s30  ;;  %816 = vrot.lane.b32.xlu0 %v10737_v1, %s10674_s30 }
  0x77   :  { %818 = vrot.lane.b32.xlu1 %v10747_v3, %s10674_s30  ;;  %820 = vrot.lane.b32.xlu0 %v10771_v6, %s10674_s30 }
  0x7b   :  { %822 = vrot.lane.b32.xlu1 %v10764_v5, %s10674_s30  ;;  %824 = vrot.lane.b32.xlu0 %v10781_v8, %s10674_s30 }
  0x7f   :  { %826 = vrot.lane.b32.xlu1 %v10776_v7, %s10674_s30  ;;  %938 = vrot.lane.b32.xlu0 %v10742_v2, %s10675_s8 }
  0x81   :  { %v10899_v10 = vpop.permute.xlu1 %59  ;;  %v10901_v11 = vpop.permute.xlu0 %55 }
  0x83   :  { %940 = vrot.lane.b32.xlu1 %v10759_v4, %s10675_s8  ;;  %942 = vrot.lane.b32.xlu0 %v10737_v1, %s10675_s8 }
  0x85   :  { %v10907_v12 = vpop.permute.xlu1 %61  ;;  %v10909_v13 = vpop.permute.xlu0 %57 }
  0x86   :  { %v79_v50 = vsel %vm73_vm0, %v10909_v13, %v10899_v10  ;;  %v80_v51 = vsel %vm73_vm0, %v10901_v11, %v10909_v13  ;;  %v78_v52 = vsel %vm73_vm0, %v10899_v10, %v10907_v12 }
  0x87   :  { %944 = vrot.lane.b32.xlu1 %v10747_v3, %s10675_s8  ;;  %946 = vrot.lane.b32.xlu0 %v10771_v6, %s10675_s8  ;;  %v2302_v59 = vcombine.low %v80_v51, %v79_v50  ;;  %v93_v63 = vcombine.low %v79_v50, %v78_v52 }
  0x89   :  { %v10915_v14 = vpop.permute.xlu1 %65  ;;  %v10917_v15 = vpop.permute.xlu0 %63  ;;  %v107_v42 = vrot.slane %v93_v63, %v11066_v58 }
  0x8a   :  { %v77_v48 = vsel %vm73_vm0, %v10907_v12, %v10917_v15  ;;  %v76_v61 = vsel %vm73_vm0, %v10917_v15, %v10915_v14 }
  0x8b   :  { %948 = vrot.lane.b32.xlu1 %v10764_v5, %s10675_s8  ;;  %950 = vrot.lane.b32.xlu0 %v10781_v8, %s10675_s8  ;;  %v2303_v54 = vcombine.low %v78_v52, %v77_v48  ;;  %v109_v12 = vcombine.low %v77_v48, %v76_v61 }
  0x8d   :  { %v10923_v16 = vpop.permute.xlu1 %69  ;;  %v10925_v17 = vpop.permute.xlu0 %67  ;;  %v2317_v10 = vrot.slane %v2303_v54, %v11066_v58  ;;  %v117_v52 = vrot.slane %v109_v12, %v11066_v58 }
  0x8e   :  { %v81_v53 = vsel %vm73_vm0, %v10923_v16, %v10901_v11  ;;  %v74_v55 = vsel %vm73_vm0, %v10925_v17, %v10923_v16  ;;  %v75_v56 = vsel %vm73_vm0, %v10915_v14, %v10925_v17  ;;  %v2310_v11 = vrot.slane %v2302_v59, %v11066_v58 }
  0x8f   :  { %952 = vrot.lane.b32.xlu1 %v10776_v7, %s10675_s8  ;;  %1064 = vrot.lane.b32.xlu0 %v10742_v2, %s10676_s9  ;;  %v92_v62 = vcombine.low %v81_v53, %v80_v51  ;;  %v110_v9 = vcombine.low %v75_v56, %v74_v55  ;;  %v2319_v15 = vcombine.low %v76_v61, %v75_v56  ;;  %v2300_v51 = vld [vmem:[#allocation3 + $0x120] sm:$0xff] }
  0x90   :  { %v2320_v16 = vcombine.low %v74_v55, %v81_v53  ;;  %v2318_v46 = vcombine.low %v2310_v11, %v2317_v10  ;;  %v83_v11 = vld [vmem:[#allocation3 + $0x8] sm:$0xff] }
  0x91   :  { %v10931_v18 = vpop.permute.xlu1 %184  ;;  %v10933_v19 = vpop.permute.xlu0 %182  ;;  %v100_v14 = vrot.slane %v92_v62, %v11066_v58  ;;  %v124_v43 = vrot.slane %v110_v9, %v11066_v58  ;;  %v2327_v56 = vrot.slane %v2319_v15, %v11066_v58  ;;  %v82_v62 = vld [vmem:[#allocation3] sm:$0xff] }
  0x92   :  { %v2334_v59 = vrot.slane %v2320_v16, %v11066_v58  ;;  %v205_v61 = vsel %vm198_vm1, %v10933_v19, %v10931_v18  ;;  %v2338_v10 = vmul.f32 %v2318_v46, %v2300_v51 }
  0x93   :  { %1066 = vrot.lane.b32.xlu1 %v10759_v4, %s10676_s9  ;;  %1068 = vrot.lane.b32.xlu0 %v10737_v1, %s10676_s9  ;;  %v108_v55 = vcombine.low %v100_v14, %v107_v42  ;;  %v125_v63 = vcombine.low %v117_v52, %v124_v43  ;;  %v2301_v52 = vld [vmem:[#allocation3 + $0x128] sm:$0xff] }
  0x94   :  { %v2342_v0 = vcombine.high %v2338_v10, %v2338_v10 }
  0x95   :  { %v10939_v20 = vpop.permute.xlu1 %188  ;;  %v10941_v21 = vpop.permute.xlu0 %186  ;;  %v129_v46 = vmul.f32 %v125_v63, %v83_v11 }
  0x96   :  { %v203_v47 = vsel %vm198_vm1, %v10941_v21, %v10939_v20  ;;  %v204_v48 = vsel %vm198_vm1, %v10931_v18, %v10941_v21 }
  0x97   :  { %1070 = vrot.lane.b32.xlu1 %v10747_v3, %s10676_s9  ;;  %1072 = vrot.lane.b32.xlu0 %v10771_v6, %s10676_s9  ;;  %v219_v18 = vcombine.low %v204_v48, %v203_v47 }
  0x99   :  { %v10947_v22 = vpop.permute.xlu1 %192  ;;  %v10949_v23 = vpop.permute.xlu0 %190 }
  0x9a   :  { %v202_v17 = vsel %vm198_vm1, %v10939_v20, %v10949_v23 }
  0x9b   :  { %1074 = vrot.lane.b32.xlu1 %v10764_v5, %s10676_s9  ;;  %1076 = vrot.lane.b32.xlu0 %v10781_v8, %s10676_s9  ;;  %v2396_v53 = vcombine.low %v203_v47, %v202_v17 }
  0x9d   :  { %v10955_v24 = vpop.permute.xlu1 %196  ;;  %v10957_v25 = vpop.permute.xlu0 %194 }
  0x9e   :  { %v206_v50 = vsel %vm198_vm1, %v10955_v24, %v10933_v19  ;;  %v199_v20 = vsel %vm198_vm1, %v10957_v25, %v10955_v24  ;;  %v200_v21 = vsel %vm198_vm1, %v10947_v22, %v10957_v25  ;;  %v2395_v24 = vcombine.low %v205_v61, %v204_v48 }
  0x9f   :  { %1078 = vrot.lane.b32.xlu1 %v10776_v7, %s10676_s9  ;;  %1190 = vrot.lane.b32.xlu0 %v10742_v2, %s10677_s10  ;;  %v201_v25 = vsel %vm198_vm1, %v10949_v23, %v10947_v22  ;;  %v218_v9 = vcombine.low %v206_v50, %v205_v61  ;;  %v236_v12 = vcombine.low %v200_v21, %v199_v20 }
  0xa0   :  { %v2410_v19 = vrot.slane %v2396_v53, %v11066_v58  ;;  %v2412_v15 = vcombine.low %v201_v25, %v200_v21  ;;  %v2413_v16 = vcombine.low %v199_v20, %v206_v50  ;;  %v128_v22 = vmul.f32 %v108_v55, %v82_v62 }
  0xa1   :  { %v10963_v26 = vpop.permute.xlu1 %310  ;;  %v10965_v27 = vpop.permute.xlu0 %308  ;;  %v2335_v23 = vcombine.low %v2327_v56, %v2334_v59  ;;  %v235_v43 = vcombine.low %v202_v17, %v201_v25  ;;  %v2403_v51 = vrot.slane %v2395_v24, %v11066_v58  ;;  %v226_v61 = vrot.slane %v218_v9, %v11066_v58  ;;  %v2393_v59 = vld [vmem:[#allocation3 + $0x130] sm:$0xff] }
  0xa2   :  { %v250_v47 = vrot.slane %v236_v12, %v11066_v58  ;;  %v233_v48 = vrot.slane %v219_v18, %v11066_v58  ;;  %v2420_v17 = vrot.slane %v2412_v15, %v11066_v58  ;;  %v2427_v53 = vrot.slane %v2413_v16, %v11066_v58  ;;  %v209_v15 = vld [vmem:[#allocation3 + $0x18] sm:$0xff] }
  0xa3   :  { %1192 = vrot.lane.b32.xlu1 %v10759_v4, %s10677_s10  ;;  %1194 = vrot.lane.b32.xlu0 %v10737_v1, %s10677_s10  ;;  %v2411_v50 = vcombine.low %v2403_v51, %v2410_v19  ;;  %v11151_v21 = vrot.slane %v2338_v10, %v11066_v58  ;;  %v132_v55 = vcombine.high %v128_v22, %v128_v22  ;;  %v208_v10 = vld [vmem:[#allocation3 + $0x10] sm:$0xff]  ;;  %v2394_v51 = vld [vmem:[#allocation3 + $0x138] sm:$0xff] }
  0xa4   :  { %v2339_v56 = vmul.f32 %v2335_v23, %v2301_v52  ;;  %v243_v62 = vrot.slane %v235_v43, %v11066_v58  ;;  %v149_v24 = vcombine.high %v129_v46, %v129_v46  ;;  %v234_v25 = vcombine.low %v226_v61, %v233_v48 }
  0xa5   :  { %v10971_v28 = vpop.permute.xlu1 %314  ;;  %v10973_v29 = vpop.permute.xlu0 %312  ;;  %17195 = vst [vmem:[#allocation14_spill] sm:$0xff] %v11151_v21  ;;  %v11159_v9 = vrot.slane %v2342_v0, %v11066_v58  ;;  %v11162_v11 = vrot.slane %v128_v22, %v11066_v58  ;;  %v11168_v18 = vrot.slane %v129_v46, %v11066_v58  ;;  %v2431_v19 = vmul.f32 %v2411_v50, %v2393_v59 }
  0xa6   :  { %v251_v12 = vcombine.low %v243_v62, %v250_v47  ;;  %v2428_v16 = vcombine.low %v2420_v17, %v2427_v53  ;;  %v11181_v43 = vrot.slane %v132_v55, %v11066_v58  ;;  %v2359_v52 = vcombine.high %v2339_v56, %v2339_v56 }
  0xa7   :  { %1196 = vrot.lane.b32.xlu1 %v10747_v3, %s10677_s10  ;;  %1198 = vrot.lane.b32.xlu0 %v10771_v6, %s10677_s10  ;;  %17196 = vst [vmem:[#allocation15_spill] sm:$0xff] %v11159_v9  ;;  %v11184_v46 = vrot.slane %v2339_v56, %v11066_v58  ;;  %v11189_v47 = vrot.slane %v149_v24, %v11066_v58 }
  0xa8   :  { %v254_v48 = vmul.f32 %v234_v25, %v208_v10  ;;  %v11195_v50 = vsel %vm324_vm2, %v10973_v29, %v10971_v28  ;;  %v330_v17 = vsel %vm324_vm2, %v10963_v26, %v10973_v29  ;;  %v255_v56 = vmul.f32 %v251_v12, %v209_v15 }
  0xa9   :  { %v10979_v30 = vpop.permute.xlu1 %318  ;;  %v10981_v31 = vpop.permute.xlu0 %316  ;;  %17197 = vst [vmem:[#allocation16_spill] sm:$0xff] %v11184_v46  ;;  %17198 = vst [vmem:[#allocation17_spill] sm:$0xff] %v11189_v47  ;;  %v2435_v29 = vcombine.high %v2431_v19, %v2431_v19  ;;  %v2432_v62 = vmul.f32 %v2428_v16, %v2394_v51  ;;  %v331_v24 = vsel %vm324_vm2, %v10965_v27, %v10963_v26 }
  0xaa   :  { %v11174_v0 = vsel %vm324_vm2, %v10971_v28, %v10981_v31  ;;  %v11220_v10 = vrot.slane %v2359_v52, %v11066_v58  ;;  %v2488_v15 = vcombine.low %v331_v24, %v330_v17  ;;  %v11235_v52 = vrot.slane %v2431_v19, %v11066_v58 }
  0xab   :  { %1200 = vrot.lane.b32.xlu1 %v10764_v5, %s10677_s10  ;;  %1202 = vrot.lane.b32.xlu0 %v10781_v8, %s10677_s10  ;;  %v2489_v59 = vcombine.low %v11195_v50, %v11174_v0  ;;  %v258_v23 = vcombine.high %v254_v48, %v254_v48  ;;  %v275_v12 = vcombine.high %v255_v56, %v255_v56 }
  0xac   :  { %17200 = vst [vmem:[#allocation19_spill] sm:$0xff] %v11220_v10  ;;  %17201 = vst [vmem:[#allocation20_spill] sm:$0xff] %v11235_v52  ;;  %v11252_v26 = vrot.slane %v2435_v29, %v11066_v58  ;;  %v11255_v51 = vrot.slane %v254_v48, %v11066_v58  ;;  %v11263_v9 = vrot.slane %v2432_v62, %v11066_v58 }
  0xad   :  { %v10987_v32 = vpop.permute.xlu1 %322  ;;  %v10989_v33 = vpop.permute.xlu0 %320  ;;  %v327_v29 = vsel %vm324_vm2, %v10981_v31, %v10979_v30  ;;  %v345_v48 = vcombine.low %v330_v17, %v11195_v50  ;;  %v334_v50 = vld [vmem:[#allocation3 + $0x20] sm:$0xff] }
  0xae   :  { %v332_v53 = vsel %vm324_vm2, %v10987_v32, %v10965_v27  ;;  %v2503_v27 = vrot.slane %v2489_v59, %v11066_v58  ;;  %v325_v28 = vsel %vm324_vm2, %v10989_v33, %v10987_v32  ;;  %v326_v19 = vsel %vm324_vm2, %v10979_v30, %v10989_v33  ;;  %17202 = vst [vmem:[#allocation21_spill] sm:$0xff] %v11252_v26 }
  0xaf   :  { %1204 = vrot.lane.b32.xlu1 %v10776_v7, %s10677_s10  ;;  %1316 = vrot.lane.b32.xlu0 %v10742_v2, %s10678_s11  ;;  %v2452_v59 = vcombine.high %v2432_v62, %v2432_v62  ;;  %v344_v55 = vcombine.low %v332_v53, %v331_v24  ;;  %v11260_v32 = vrot.slane %v255_v56, %v11066_v58 }
  0xb0   :  { %17203 = vst [vmem:[#allocation22_spill] sm:$0xff] %v11263_v9  ;;  %v2496_v33 = vrot.slane %v2488_v15, %v11066_v58  ;;  %v362_v24 = vcombine.low %v326_v19, %v325_v28  ;;  %v2506_v47 = vcombine.low %v325_v28, %v332_v53  ;;  %v11279_v62 = vrot.slane %v258_v23, %v11066_v58  ;;  %v2486_v53 = vld [vmem:[#allocation3 + $0x140] sm:$0xff] }
  0xb1   :  { %v10995_v34 = vpop.permute.xlu1 %436  ;;  %v10997_v35 = vpop.permute.xlu0 %434  ;;  %v11282_v30 = vrot.slane %v275_v12, %v11066_v58  ;;  %v11289_v17 = vrot.slane %v2452_v59, %v11066_v58  ;;  %v361_v28 = vcombine.low %v11174_v0, %v327_v29  ;;  %v352_v15 = vrot.slane %v344_v55, %v11066_v58 }
  0xb2   :  { %v2504_v31 = vcombine.low %v2496_v33, %v2503_v27  ;;  %v359_v0 = vrot.slane %v345_v48, %v11066_v58  ;;  %v376_v55 = vrot.slane %v362_v24, %v11066_v58  ;;  %v2520_v56 = vrot.slane %v2506_v47, %v11066_v58 }
  0xb3   :  { %1318 = vrot.lane.b32.xlu1 %v10759_v4, %s10678_s11  ;;  %1320 = vrot.lane.b32.xlu0 %v10737_v1, %s10678_s11  ;;  %17204 = vst [vmem:[#allocation23_spill] sm:$0xff] %v11289_v17 }
  0xb4   :  { %v11315_v59 = vmul.f32 %v2504_v31, %v2486_v53  ;;  %v360_v24 = vcombine.low %v352_v15, %v359_v0 }
  0xb5   :  { %v11003_v36 = vpop.permute.xlu1 %440  ;;  %v11005_v37 = vpop.permute.xlu0 %438 }
  0xb6   :  { %v456_v31 = vsel %vm450_vm3, %v10995_v34, %v11005_v37 }
  0xb7   :  { %1322 = vrot.lane.b32.xlu1 %v10747_v3, %s10678_s11  ;;  %1324 = vrot.lane.b32.xlu0 %v10771_v6, %s10678_s11 }
  0xb9   :  { %v11011_v39 = vpop.permute.xlu1 %444  ;;  %v11013_v40 = vpop.permute.xlu0 %442 }
  0xba   :  { %v454_v48 = vsel %vm450_vm3, %v11003_v36, %v11013_v40 }
  0xbb   :  { %1326 = vrot.lane.b32.xlu1 %v10764_v5, %s10678_s11  ;;  %1328 = vrot.lane.b32.xlu0 %v10781_v8, %s10678_s11 }
  0xbd   :  { %v11021_v44 = vpop.permute.xlu1 %448  ;;  %v11023_v45 = vpop.permute.xlu0 %446 }
  0xbe   :  { %v458_v47 = vsel %vm450_vm3, %v11021_v44, %v10997_v35  ;;  %v452_v15 = vsel %vm450_vm3, %v11011_v39, %v11023_v45 }
  0xbf   :  { %1330 = vrot.lane.b32.xlu1 %v10776_v7, %s10678_s11  ;;  %1442 = vrot.lane.b32.xlu0 %v10742_v2, %s10680_s12 }
  0xc1   :  { %v11034_v49 = vpop.permute.xlu1 %562  ;;  %v11062_v57 = vpop.permute.xlu0 %560 }
  0xc3   :  { %1444 = vrot.lane.b32.xlu1 %v10759_v4, %s10680_s12  ;;  %1446 = vrot.lane.b32.xlu0 %v10737_v1, %s10680_s12 }
  0xc5   :  { %v11068_v60 = vpop.permute.xlu1 %566  ;;  %v11088_v38 = vpop.permute.xlu0 %564 }
  0xc6   :  { %v11382_v26 = vsel %vm576_vm4, %v11088_v38, %v11068_v60 }
  0xc7   :  { %1448 = vrot.lane.b32.xlu1 %v10747_v3, %s10680_s12  ;;  %1450 = vrot.lane.b32.xlu0 %v10771_v6, %s10680_s12 }
  0xc9   :  { %v11081_v13 = vpop.permute.xlu1 %570  ;;  %v11131_v14 = vpop.permute.xlu0 %568 }
  0xcb   :  { %1452 = vrot.lane.b32.xlu1 %v10764_v5, %s10680_s12  ;;  %1454 = vrot.lane.b32.xlu0 %v10781_v8, %s10680_s12 }
  0xcd   :  { %v11117_v54 = vpop.permute.xlu1 %574  ;;  %v11154_v63 = vpop.permute.xlu0 %572 }
  0xcf   :  { %1456 = vrot.lane.b32.xlu1 %v10776_v7, %s10680_s12  ;;  %1568 = vrot.lane.b32.xlu0 %v10742_v2, %s10681_s13 }
  0xd1   :  { %v11136_v42 = vpop.permute.xlu1 %686 }
  0xd3   :  { %1570 = vrot.lane.b32.xlu1 %v10759_v4, %s10681_s13  ;;  %1572 = vrot.lane.b32.xlu0 %v10737_v1, %s10681_s13 }
  0xd5   :  { %v11148_v20 = vpop.permute.xlu1 %688 }
  0xd7   :  { %1574 = vrot.lane.b32.xlu1 %v10747_v3, %s10681_s13  ;;  %1576 = vrot.lane.b32.xlu0 %v10771_v6, %s10681_s13 }
  0xd9   :  { %v11176_v22 = vpop.permute.xlu1 %692 }
  0xda   :  { %v11186_v61 = vpop.permute.xlu0 %51 }
  0xdb   :  { %1578 = vrot.lane.b32.xlu1 %v10764_v5, %s10681_s13  ;;  %1580 = vrot.lane.b32.xlu0 %v10781_v8, %s10681_s13 }
  0xdd   :  { %v11217_v25 = vpop.permute.xlu1 %696 }
  0xde   :  { %17199 = vst [vmem:[#allocation18_spill] sm:$0xff] %v11217_v25  ;;  %v11228_v16 = vpop.permute.xlu0 %690  ;;  %v2505_v25 = vcombine.low %v327_v29, %v326_v19  ;;  %v455_v19 = vsel %vm450_vm3, %v11005_v37, %v11003_v36  ;;  %v457_v36 = vsel %vm450_vm3, %v10997_v35, %v10995_v34  ;;  %v11372_v34 = vrot.slane %v11315_v59, %v11066_v58 }
  0xdf   :  { %1582 = vrot.lane.b32.xlu1 %v10776_v7, %s10681_s13  ;;  %1795 = vrot.lane.b32.xlu0 %v10742_v2, %s10682_s14  ;;  %v2582_v37 = vcombine.low %v455_v19, %v454_v48  ;;  %v2581_v17 = vcombine.low %v457_v36, %v456_v31  ;;  %v11374_v35 = vmul.f32 %v360_v24, %v334_v50 }
  0xe0   :  { %v2513_v29 = vrot.slane %v2505_v25, %v11066_v58  ;;  %v369_v25 = vrot.slane %v361_v28, %v11066_v58  ;;  %v451_v28 = vsel %vm450_vm3, %v11023_v45, %v11021_v44  ;;  %v2528_v44 = vcombine.high %v11315_v59, %v11315_v59  ;;  %17206 = vst [vmem:[#allocation25_spill] sm:$0xff] %v11372_v34 }
  0xe1   :  { %v11257_v46 = vpop.permute.xlu1 %700  ;;  %v453_v45 = vsel %vm450_vm3, %v11013_v40, %v11011_v39  ;;  %v488_v9 = vcombine.low %v452_v15, %v451_v28  ;;  %v2599_v10 = vcombine.low %v451_v28, %v458_v47  ;;  %v11388_v50 = vsel %vm576_vm4, %v11034_v49, %v11088_v38 }
  0xe2   :  { %v11270_v21 = vpop.permute.xlu0 %694  ;;  %v377_v12 = vcombine.low %v369_v25, %v376_v55  ;;  %v2521_v27 = vcombine.low %v2513_v29, %v2520_v56  ;;  %v11366_v56 = vsel %vm576_vm4, %v11068_v60, %v11131_v14  ;;  %v335_v55 = vld [vmem:[#allocation3 + $0x28] sm:$0xff]  ;;  %v470_v25 = vcombine.low %v458_v47, %v457_v36 }
  0xe3   :  { %1797 = vrot.lane.b32.xlu1 %v10759_v4, %s10682_s14  ;;  %1799 = vrot.lane.b32.xlu0 %v10737_v1, %s10682_s14  ;;  %v2487_v29 = vld [vmem:[#allocation3 + $0x148] sm:$0xff]  ;;  %v2598_v40 = vcombine.low %v453_v45, %v452_v15  ;;  %v471_v24 = vcombine.low %v456_v31, %v455_v19  ;;  %v487_v36 = vcombine.low %v454_v48, %v453_v45 }
  0xe4   :  { %v2596_v52 = vrot.slane %v2582_v37, %v11066_v58  ;;  %v2675_v47 = vcombine.low %v11382_v26, %v11366_v56  ;;  %v11397_v60 = vmul.f32 %v377_v12, %v335_v55  ;;  %v11399_v28 = vmul.f32 %v2521_v27, %v2487_v29 }
  0xe5   :  { %v11293_v23 = vpop.permute.xlu1 %814  ;;  %v2589_v15 = vrot.slane %v2581_v17, %v11066_v58  ;;  %v583_v38 = vsel %vm576_vm4, %v11062_v57, %v11034_v49  ;;  %v478_v19 = vrot.slane %v470_v25, %v11066_v58  ;;  %v502_v48 = vrot.slane %v488_v9, %v11066_v58 }
  0xe6   :  { %v11303_v33 = vpop.permute.xlu0 %698  ;;  %v2674_v12 = vcombine.low %v583_v38, %v11388_v50  ;;  %v584_v17 = vsel %vm576_vm4, %v11117_v54, %v11062_v57  ;;  %v2606_v31 = vrot.slane %v2598_v40, %v11066_v58  ;;  %v2613_v49 = vrot.slane %v2599_v10, %v11066_v58  ;;  %v2579_v40 = vld [vmem:[#allocation3 + $0x150] sm:$0xff] }
  0xe7   :  { %1801 = vrot.lane.b32.xlu1 %v10747_v3, %s10682_s14  ;;  %1803 = vrot.lane.b32.xlu0 %v10771_v6, %s10682_s14  ;;  %v577_v37 = vsel %vm576_vm4, %v11154_v63, %v11117_v54  ;;  %v578_v9 = vsel %vm576_vm4, %v11081_v13, %v11154_v63  ;;  %v485_v57 = vrot.slane %v471_v24, %v11066_v58 }
  0xe8   :  { %v495_v55 = vrot.slane %v487_v36, %v11066_v58  ;;  %v2597_v29 = vcombine.low %v2589_v15, %v2596_v52  ;;  %v2689_v25 = vrot.slane %v2675_v47, %v11066_v58  ;;  %v11435_v10 = vrot.slane %v2528_v44, %v11066_v58 }
  0xe9   :  { %v11330_v53 = vpop.permute.xlu1 %818  ;;  %v579_v63 = vsel %vm576_vm4, %v11131_v14, %v11081_v13  ;;  %v596_v24 = vcombine.low %v584_v17, %v583_v38  ;;  %v486_v52 = vcombine.low %v478_v19, %v485_v57  ;;  %v2682_v47 = vrot.slane %v2674_v12, %v11066_v58  ;;  %v2580_v19 = vld [vmem:[#allocation3 + $0x158] sm:$0xff] }
  0xea   :  { %17205 = vst [vmem:[#allocation24_spill] sm:$0xff] %v11330_v53  ;;  %v11348_v0 = vpop.permute.xlu0 %812  ;;  %17210 = vst [vmem:[#allocation29_spill] sm:$0xff] %v11435_v10  ;;  %v503_v36 = vcombine.low %v495_v55, %v502_v48  ;;  %v614_v15 = vcombine.low %v578_v9, %v577_v37  ;;  %v2614_v54 = vcombine.low %v2606_v31, %v2613_v49 }
  0xeb   :  { %1805 = vrot.lane.b32.xlu1 %v10764_v5, %s10682_s14  ;;  %1807 = vrot.lane.b32.xlu0 %v10781_v8, %s10682_s14  ;;  %v597_v34 = vcombine.low %v11388_v50, %v11382_v26  ;;  %v2692_v53 = vcombine.low %v577_v37, %v584_v17  ;;  %v384_v14 = vcombine.high %v11374_v35, %v11374_v35  ;;  %v2672_v17 = vld [vmem:[#allocation3 + $0x160] sm:$0xff] }
  0xec   :  { %v2617_v38 = vmul.f32 %v2597_v29, %v2579_v40  ;;  %v613_v48 = vcombine.low %v11366_v56, %v579_v63  ;;  %v2690_v12 = vcombine.low %v2682_v47, %v2689_v25  ;;  %v11459_v31 = vrot.slane %v11374_v35, %v11066_v58  ;;  %v586_v47 = vld [vmem:[#allocation3 + $0x40] sm:$0xff] }
  0xed   :  { %v11376_v39 = vpop.permute.xlu1 %822  ;;  %v401_v26 = vcombine.high %v11397_v60, %v11397_v60  ;;  %v11465_v50 = vrot.slane %v11397_v60, %v11066_v58  ;;  %v604_v49 = vrot.slane %v596_v24, %v11066_v58  ;;  %v2545_v56 = vcombine.high %v11399_v28, %v11399_v28 }
  0xee   :  { %17207 = vst [vmem:[#allocation26_spill] sm:$0xff] %v11376_v39  ;;  %v11390_v59 = vpop.permute.xlu0 %816  ;;  %v460_v39 = vld [vmem:[#allocation3 + $0x30] sm:$0xff]  ;;  %v628_v35 = vrot.slane %v614_v15, %v11066_v58  ;;  %v2618_v55 = vmul.f32 %v2614_v54, %v2580_v19  ;;  %v611_v29 = vrot.slane %v597_v34, %v11066_v58  ;;  %v2706_v25 = vrot.slane %v2692_v53, %v11066_v58 }
  0xef   :  { %17208 = vst [vmem:[#allocation27_spill] sm:$0xff] %v11390_v59  ;;  %1809 = vrot.lane.b32.xlu1 %v10776_v7, %s10682_s14  ;;  %1921 = vrot.lane.b32.xlu0 %v10742_v2, %s10683_s15  ;;  %v2691_v59 = vcombine.low %v579_v63, %v578_v9  ;;  %v506_v37 = vmul.f32 %v486_v52, %v460_v39 }
  0xf0   :  { %v11482_v63 = vrot.slane %v11399_v28, %v11066_v58  ;;  %v2621_v24 = vcombine.high %v2617_v38, %v2617_v38  ;;  %v621_v39 = vrot.slane %v613_v48, %v11066_v58  ;;  %v612_v54 = vcombine.low %v604_v49, %v611_v29 }
  0xf1   :  { %v11415_v27 = vpop.permute.xlu1 %826  ;;  %v2699_v60 = vrot.slane %v2691_v59, %v11066_v58  ;;  %v11490_v59 = vrot.slane %v384_v14, %v11066_v58  ;;  %v11498_v28 = vrot.slane %v401_v26, %v11066_v58  ;;  %v11505_v19 = vrot.slane %v2545_v56, %v11066_v58 }
  0xf2   :  { %v11427_v45 = vpop.permute.xlu0 %820  ;;  %17211 = vst [vmem:[#allocation30_spill] sm:$0xff] %v11482_v63  ;;  %v629_v15 = vcombine.low %v621_v39, %v628_v35  ;;  %v11512_v34 = vrot.slane %v2617_v38, %v11066_v58  ;;  %v11515_v52 = vrot.slane %v2621_v24, %v11066_v58  ;;  %v2673_v39 = vld [vmem:[#allocation3 + $0x168] sm:$0xff]  ;;  %v11520_v56 = vrot.slane %v506_v37, %v11066_v58 }
  0xf3   :  { %17209 = vst [vmem:[#allocation28_spill] sm:$0xff] %v11427_v45  ;;  %1923 = vrot.lane.b32.xlu1 %v10759_v4, %s10683_s15  ;;  %1925 = vrot.lane.b32.xlu0 %v10737_v1, %s10683_s15  ;;  %v461_v45 = vld [vmem:[#allocation3 + $0x38] sm:$0xff]  ;;  %17213 = vst [vmem:[#allocation32_spill] sm:$0xff] %v11505_v19  ;;  %v2707_v49 = vcombine.low %v2699_v60, %v2706_v25  ;;  %v11526_v25 = vrot.slane %v2618_v55, %v11066_v58 }
  0xf4   :  { %v507_v9 = vmul.f32 %v503_v36, %v461_v45  ;;  %v2710_v45 = vmul.f32 %v2690_v12, %v2672_v17  ;;  %v510_v36 = vcombine.high %v506_v37, %v506_v37  ;;  %v2638_v12 = vcombine.high %v2618_v55, %v2618_v55  ;;  %v587_v17 = vld [vmem:[#allocation3 + $0x48] sm:$0xff]  ;;  %17214 = vst [vmem:[#allocation33_spill] sm:$0xff] %v11512_v34 }
  0xf5   :  { %v11446_v44 = vpop.permute.xlu1 %940  ;;  %17215 = vst [vmem:[#allocation34_spill] sm:$0xff] %v11515_v52  ;;  %17216 = vst [vmem:[#allocation35_spill] sm:$0xff] %v11526_v25  ;;  %v632_v26 = vmul.f32 %v612_v54, %v586_v47  ;;  %v633_v53 = vmul.f32 %v629_v15, %v587_v17  ;;  %v2711_v63 = vmul.f32 %v2707_v49, %v2673_v39 }
  0xf6   :  { %v11450_v13 = vpop.permute.xlu0 %824  ;;  %v527_v48 = vcombine.high %v507_v9, %v507_v9  ;;  %v2714_v35 = vcombine.high %v2710_v45, %v2710_v45  ;;  %v11523_v60 = vrot.slane %v507_v9, %v11066_v58  ;;  %v11535_v37 = vrot.slane %v510_v36, %v11066_v58 }
  0xf7   :  { %1927 = vrot.lane.b32.xlu1 %v10747_v3, %s10683_s15  ;;  %1929 = vrot.lane.b32.xlu0 %v10771_v6, %s10683_s15  ;;  %v11545_v47 = vrot.slane %v2638_v12, %v11066_v58  ;;  %v11554_v15 = vrot.slane %v2710_v45, %v11066_v58  ;;  %v636_v39 = vcombine.high %v632_v26, %v632_v26 }
  0xf8   :  { %v11542_v54 = vrot.slane %v527_v48, %v11066_v58  ;;  %v11557_v17 = vrot.slane %v2714_v35, %v11066_v58  ;;  %v11572_v35 = vrot.slane %v632_v26, %v11066_v58  ;;  %v653_v55 = vcombine.high %v633_v53, %v633_v53 }
  0xf9   :  { %v11473_v57 = vpop.permute.xlu1 %944  ;;  %17217 = vst [vmem:[#allocation36_spill] sm:$0xff] %v11545_v47  ;;  %17218 = vst [vmem:[#allocation37_spill] sm:$0xff] %v11554_v15  ;;  %v11575_v36 = vrot.slane %v633_v53, %v11066_v58  ;;  %v2731_v48 = vcombine.high %v2711_v63, %v2711_v63  ;;  %v11584_v25 = vrot.slane %v2711_v63, %v11066_v58 }
  0xfa   :  { %v11478_v40 = vpop.permute.xlu0 %938  ;;  %17219 = vst [vmem:[#allocation38_spill] sm:$0xff] %v11557_v17  ;;  %v11596_v12 = vsel %vm702_vm5, %v11136_v42, %v11148_v20  ;;  %v17223_v49 = vcombine.high %v11162_v11, %v11162_v11  ;;  %v11605_v47 = vrot.slane %v636_v39, %v11066_v58  ;;  %v176_v53 = vadd.f32 %v11181_v43, %v11186_v61 }
  0xfb   :  { %1931 = vrot.lane.b32.xlu1 %v10764_v5, %s10683_s15  ;;  %1933 = vrot.lane.b32.xlu0 %v10781_v8, %s10683_s15  ;;  %17221 = vst [vmem:[#allocation40_spill] sm:$0xff] %v11584_v25  ;;  %v17224_v26 = vcombine.high %v11181_v43, %v11181_v43  ;;  %v11617_v19 = vsel %vm702_vm5, %v11257_v46, %v11136_v42 }
  0xfc   :  { %v175_v63 = vadd.f32 %v17223_v49, %v11186_v61  ;;  %v11624_v39 = vrot.slane %v653_v55, %v11066_v58  ;;  %v174_v43 = vadd.f32 %v11162_v11, %v11186_v61  ;;  %v11633_v42 = vrot.slane %v2731_v48, %v11066_v58 }
  0xfd   :  { %v11502_v14 = vpop.permute.xlu1 %948  ;;  %v177_v17 = vadd.f32 %v17224_v26, %v11186_v61  ;;  %v707_v55 = vsel %vm702_vm5, %v11228_v16, %v11176_v22  ;;  %v708_v15 = vsel %vm702_vm5, %v11148_v20, %v11228_v16  ;;  %v17228_v11 = vcombine.high %v11255_v51, %v11255_v51 }
  0xfe   :  { %17212 = vst [vmem:[#allocation31_spill] sm:$0xff] %v11502_v14  ;;  %v11507_v29 = vpop.permute.xlu0 %942  ;;  %17226 = vst [vmem:[#allocation43_spill] sm:$0xff] %v11633_v42  ;;  %v722_v34 = vcombine.low %v11617_v19, %v11596_v12  ;;  %v706_v52 = vsel %vm702_vm5, %v11176_v22, %v11270_v21  ;;  %v178_v25 = vadd.f32 %v11168_v18, %v11186_v61 }
  0xff   :  { %1935 = vrot.lane.b32.xlu1 %v10776_v7, %s10683_s15  ;;  %2047 = vrot.lane.b32.xlu0 %v10742_v2, %s10684_s16  ;;  %v301_v48 = vadd.f32 %v17228_v11, %v175_v63  ;;  %v17229_v20 = vcombine.high %v11168_v18, %v11168_v18  ;;  %v17230_v63 = vld [vmem:[#allocation17_spill] sm:$0xff]  ;;  %v302_v10 = vadd.f32 %v11279_v62, %v176_v53 }
 0x100   :  { %v180_v11 = vadd.f32 %v17230_v63, %v11186_v61  ;;  %v703_v18 = vsel %vm702_vm5, %v11303_v33, %v11257_v46  ;;  %v2768_v14 = vcombine.low %v707_v55, %v706_v52 }
 0x101   :  { %v11537_v9 = vpop.permute.xlu1 %952  ;;  %v179_v16 = vadd.f32 %v17229_v20, %v11186_v61  ;;  %v17232_v20 = vld [vmem:[#allocation18_spill] sm:$0xff] }
 0x102   :  { %v11547_v38 = vpop.permute.xlu0 %946  ;;  %v704_v53 = vsel %vm702_vm5, %v17232_v20, %v11303_v33 }
 0x103   :  { %2049 = vrot.lane.b32.xlu1 %v10759_v4, %s10684_s16  ;;  %2051 = vrot.lane.b32.xlu0 %v10737_v1, %s10684_s16 }
 0x105   :  { %v11577_v24 = vpop.permute.xlu1 %1066 }
 0x106   :  { %17220 = vst [vmem:[#allocation39_spill] sm:$0xff] %v11577_v24  ;;  %v11586_v45 = vpop.permute.xlu0 %950  ;;  %v723_v24 = vcombine.low %v708_v15, %v707_v55  ;;  %v428_v55 = vadd.f32 %v11490_v59, %v302_v10 }
 0x107   :  { %17222 = vst [vmem:[#allocation41_spill] sm:$0xff] %v11586_v45  ;;  %2053 = vrot.lane.b32.xlu1 %v10747_v3, %s10684_s16  ;;  %2055 = vrot.lane.b32.xlu0 %v10771_v6, %s10684_s16  ;;  %v17235_v45 = vcombine.high %v11459_v31, %v11459_v31 }
 0x109   :  { %v11630_v26 = vpop.permute.xlu1 %1070  ;;  %v427_v33 = vadd.f32 %v17235_v45, %v301_v48  ;;  %v740_v48 = vcombine.low %v704_v53, %v703_v18 }
 0x10a   :  { %17225 = vst [vmem:[#allocation42_spill] sm:$0xff] %v11630_v26  ;;  %v11645_v49 = vpop.permute.xlu0 %1064  ;;  %v17231_v26 = vcombine.high %v11279_v62, %v11279_v62 }
 0x10b   :  { %17227 = vst [vmem:[#allocation44_spill] sm:$0xff] %v11645_v49  ;;  %2057 = vrot.lane.b32.xlu1 %v10764_v5, %s10684_s16  ;;  %2059 = vrot.lane.b32.xlu0 %v10781_v8, %s10684_s16  ;;  %v300_v49 = vadd.f32 %v11255_v51, %v174_v43  ;;  %v17234_v51 = vcombine.high %v17230_v63, %v17230_v63 }
 0x10c   :  { %v303_v22 = vadd.f32 %v17231_v26, %v177_v17  ;;  %v705_v17 = vsel %vm702_vm5, %v11270_v21, %v17232_v20  ;;  %v304_v26 = vadd.f32 %v11260_v32, %v178_v25  ;;  %v17236_v63 = vcombine.high %v11260_v32, %v11260_v32 }
 0x10d   :  { %v11682_v62 = vpop.permute.xlu1 %1074  ;;  %v181_v43 = vadd.f32 %v17234_v51, %v11186_v61  ;;  %v2767_v61 = vcombine.low %v11596_v12, %v708_v15  ;;  %v737_v21 = vrot.slane %v723_v24, %v11066_v58  ;;  %v17237_v25 = vcombine.high %v11490_v59, %v11490_v59 }
 0x10e   :  { %17233 = vst [vmem:[#allocation17_spill] sm:$0xff] %v11682_v62  ;;  %v11692_v46 = vpop.permute.xlu0 %1068  ;;  %v730_v62 = vrot.slane %v722_v34, %v11066_v58  ;;  %v305_v45 = vadd.f32 %v17236_v63, %v179_v16  ;;  %v426_v34 = vadd.f32 %v11459_v31, %v300_v49  ;;  %v306_v15 = vadd.f32 %v11282_v30, %v180_v11 }
 0x10f   :  { %2061 = vrot.lane.b32.xlu1 %v10776_v7, %s10684_s16  ;;  %2173 = vrot.lane.b32.xlu0 %v10742_v2, %s10685_s17  ;;  %v429_v20 = vadd.f32 %v17237_v25, %v303_v22  ;;  %v739_v12 = vcombine.low %v706_v52, %v705_v17  ;;  %v2782_v16 = vrot.slane %v2768_v14, %v11066_v58  ;;  %v712_v14 = vld [vmem:[#allocation3 + $0x50] sm:$0xff] }
 0x110   :  { %v17238_v51 = vcombine.high %v11282_v30, %v11282_v30  ;;  %v17239_v31 = vcombine.high %v11520_v56, %v11520_v56  ;;  %v738_v49 = vcombine.low %v730_v62, %v737_v21  ;;  %v430_v11 = vadd.f32 %v11465_v50, %v304_v26 }
 0x111   :  { %v11718_v10 = vpop.permute.xlu1 %1078  ;;  %v2785_v22 = vcombine.low %v703_v18, %v11617_v19  ;;  %v2775_v52 = vrot.slane %v2767_v61, %v11066_v58  ;;  %v554_v30 = vadd.f32 %v11535_v37, %v428_v55  ;;  %v2784_v25 = vcombine.low %v705_v17, %v704_v53 }
 0x112   :  { %v307_v24 = vadd.f32 %v17238_v51, %v181_v43  ;;  %v11726_v63 = vpop.permute.xlu0 %1072  ;;  %v553_v59 = vadd.f32 %v17239_v31, %v427_v33  ;;  %v754_v43 = vrot.slane %v740_v48, %v11066_v58  ;;  %v552_v62 = vadd.f32 %v11520_v56, %v426_v34  ;;  %v17244_v51 = vld [vmem:[#allocation27_spill] sm:$0xff] }
 0x113   :  { %2175 = vrot.lane.b32.xlu1 %v10759_v4, %s10685_s17  ;;  %2177 = vrot.lane.b32.xlu0 %v10737_v1, %s10685_s17  ;;  %v17240_v26 = vcombine.high %v11535_v37, %v11535_v37  ;;  %v17241_v18 = vcombine.high %v11465_v50, %v11465_v50  ;;  %v432_v61 = vadd.f32 %v11498_v28, %v306_v15 }
 0x114   :  { %v747_v55 = vrot.slane %v739_v12, %v11066_v58  ;;  %v2783_v53 = vcombine.low %v2775_v52, %v2782_v16  ;;  %v17242_v17 = vcombine.high %v11498_v28, %v11498_v28  ;;  %v11758_v56 = vsel %vm828_vm6, %v11415_v27, %v11348_v0  ;;  %v17243_v16 = vld [vmem:[#allocation24_spill] sm:$0xff] }
 0x115   :  { %v555_v19 = vadd.f32 %v17240_v26, %v429_v20  ;;  %v431_v33 = vadd.f32 %v17241_v18, %v305_v45  ;;  %v11748_v21 = vpop.permute.xlu1 %1192  ;;  %v758_v50 = vmul.f32 %v738_v49, %v712_v14  ;;  %v2765_v45 = vld [vmem:[#allocation3 + $0x170] sm:$0xff]  ;;  %v556_v34 = vadd.f32 %v11523_v60, %v430_v11  ;;  %v713_v14 = vld [vmem:[#allocation3 + $0x58] sm:$0xff] }
 0x116   :  { %v433_v48 = vadd.f32 %v17242_v17, %v307_v24  ;;  %v11760_v37 = vpop.permute.xlu0 %1076  ;;  %v2799_v20 = vrot.slane %v2785_v22, %v11066_v58  ;;  %v835_v28 = vsel %vm828_vm6, %v11348_v0, %v11293_v23  ;;  %v755_v15 = vcombine.low %v747_v55, %v754_v43  ;;  %v17248_v17 = vld [vmem:[#allocation28_spill] sm:$0xff] }
 0x117   :  { %2179 = vrot.lane.b32.xlu1 %v10747_v3, %s10685_s17  ;;  %v2792_v12 = vrot.slane %v2784_v25, %v11066_v58  ;;  %v833_v24 = vsel %vm828_vm6, %v17244_v51, %v17243_v16  ;;  %v834_v31 = vsel %vm828_vm6, %v11293_v23, %v17244_v51  ;;  %2181 = vrot.lane.b32.xlu0 %v10771_v6, %s10685_s17 }
 0x118   :  { %v17245_v0 = vcombine.high %v11572_v35, %v11572_v35  ;;  %v680_v11 = vadd.f32 %v11605_v47, %v554_v30  ;;  %v17246_v22 = vcombine.high %v11523_v60, %v11523_v60  ;;  %v848_v43 = vcombine.low %v11758_v56, %v835_v28 }
 0x119   :  { %v11789_v25 = vpop.permute.xlu1 %1196  ;;  %v2803_v26 = vmul.f32 %v2783_v53, %v2765_v45  ;;  %v558_v23 = vadd.f32 %v11542_v54, %v432_v61  ;;  %v17247_v18 = vcombine.high %v11542_v54, %v11542_v54  ;;  %v678_v60 = vadd.f32 %v11572_v35, %v552_v62 }
 0x11a   :  { %v679_v49 = vadd.f32 %v17245_v0, %v553_v59  ;;  %v557_v52 = vadd.f32 %v17246_v22, %v431_v33  ;;  %v832_v59 = vsel %vm828_vm6, %v17243_v16, %v17248_v17  ;;  %v11799_v30 = vpop.permute.xlu0 %1190  ;;  %v17249_v33 = vcombine.high %v11605_v47, %v11605_v47  ;;  %v2766_v16 = vld [vmem:[#allocation3 + $0x178] sm:$0xff] }
 0x11b   :  { %v559_v55 = vadd.f32 %v17247_v18, %v433_v48  ;;  %v762_v53 = vcombine.high %v758_v50, %v758_v50  ;;  %v849_v45 = vcombine.low %v834_v31, %v833_v24  ;;  %2183 = vrot.lane.b32.xlu1 %v10764_v5, %s10685_s17  ;;  %v769_v54 = vrot.slane %v758_v50, %v11066_v58 }
 0x11c   :  { %v681_v51 = vadd.f32 %v17249_v33, %v555_v19  ;;  %v682_v61 = vadd.f32 %v11575_v36, %v556_v34  ;;  %v759_v48 = vmul.f32 %v755_v15, %v713_v14  ;;  %v2800_v0 = vcombine.low %v2792_v12, %v2799_v20  ;;  %2185 = vrot.lane.b32.xlu0 %v10781_v8, %s10685_s17  ;;  %v17250_v19 = vld [vmem:[#allocation26_spill] sm:$0xff] }
 0x11d   :  { %v856_v35 = vrot.slane %v848_v43, %v11066_v58  ;;  %v2861_v62 = vcombine.low %v833_v24, %v832_v59  ;;  %v829_v47 = vsel %vm828_vm6, %v11450_v13, %v11415_v27  ;;  %v830_v50 = vsel %vm828_vm6, %v17250_v19, %v11450_v13  ;;  %v11820_v34 = vpop.permute.xlu1 %1200 }
 0x11e   :  { %v2807_v20 = vcombine.high %v2803_v26, %v2803_v26  ;;  %v17251_v15 = vcombine.high %v11575_v36, %v11575_v36  ;;  %v11826_v22 = vadd.f32 %v11624_v39, %v558_v23  ;;  %v17252_v24 = vcombine.high %v11624_v39, %v11624_v39  ;;  %v11833_v27 = vpop.permute.xlu0 %1194 }
 0x11f   :  { %v776_v43 = vrot.slane %v762_v53, %v11066_v58  ;;  %v863_v13 = vrot.slane %v849_v45, %v11066_v58  ;;  %v2860_v18 = vcombine.low %v835_v28, %v834_v31  ;;  %v831_v36 = vsel %vm828_vm6, %v17248_v17, %v17250_v19  ;;  %2187 = vrot.lane.b32.xlu1 %v10776_v7, %s10685_s17 }
 0x120   :  { %v683_v12 = vadd.f32 %v17251_v15, %v557_v52  ;;  %v11831_v14 = vadd.f32 %v17252_v24, %v559_v55  ;;  %v11845_v39 = vrot.slane %v2803_v26, %v11066_v58  ;;  %v779_v52 = vcombine.high %v759_v48, %v759_v48  ;;  %v838_v15 = vld [vmem:[#allocation3 + $0x60] sm:$0xff] }
 0x121   :  { %v2804_v23 = vmul.f32 %v2800_v0, %v2766_v16  ;;  %v866_v55 = vcombine.low %v830_v50, %v829_v47  ;;  %v777_v33 = vcombine.high %v769_v54, %v769_v54  ;;  %v11847_v53 = vadd.f32 %v769_v54, %v678_v60  ;;  %v11850_v45 = vpop.permute.xlu1 %1204 }
 0x122   :  { %17253 = vst [vmem:[#allocation18_spill] sm:$0xff] %v11845_v39  ;;  %v864_v28 = vcombine.low %v856_v35, %v863_v13  ;;  %v2875_v31 = vrot.slane %v2861_v62, %v11066_v58  ;;  %v11853_v17 = vrot.slane %v2807_v20, %v11066_v58  ;;  %v786_v19 = vrot.slane %v759_v48, %v11066_v58  ;;  %v11856_v26 = vpop.permute.xlu0 %1198 }
 0x123   :  { %v865_v24 = vcombine.low %v832_v59, %v831_v36  ;;  %17255 = vst [vmem:[#allocation27_spill] sm:$0xff] %v11856_v26  ;;  %v1706_v0 = vcombine.low %v10737_v1, %v10747_v3  ;;  %v778_v16 = vcombine.high %v776_v43, %v776_v43  ;;  %v2868_v60 = vrot.slane %v2860_v18, %v11066_v58 }
 0x124   :  { %17254 = vst [vmem:[#allocation24_spill] sm:$0xff] %v11853_v17  ;;  %v2877_v54 = vcombine.low %v831_v36, %v830_v50  ;;  %v2878_v35 = vcombine.low %v829_v47, %v11758_v56  ;;  %v793_v20 = vrot.slane %v779_v52, %v11066_v58  ;;  %v2824_v13 = vcombine.high %v2804_v23, %v2804_v23  ;;  %v2858_v47 = vld [vmem:[#allocation3 + $0x180] sm:$0xff] }
 0x125   :  { %v880_v48 = vrot.slane %v866_v55, %v11066_v58  ;;  %v805_v59 = vadd.f32 %v777_v33, %v679_v49  ;;  %v11866_v32 = vadd.f32 %v776_v43, %v680_v11  ;;  %v884_v42 = vmul.f32 %v864_v28, %v838_v15  ;;  %v11868_v3 = vpop.permute.xlu1 %1318 }
 0x126   :  { %v2876_v26 = vcombine.low %v2868_v60, %v2875_v31  ;;  %v794_v18 = vcombine.high %v786_v19, %v786_v19  ;;  %v11873_v56 = vrot.slane %v2804_v23, %v11066_v58  ;;  %v873_v36 = vrot.slane %v865_v24, %v11066_v58  ;;  %v11876_v52 = vpop.permute.xlu0 %1202 }
 0x127   :  { %v11878_v55 = vadd.f32 %v778_v16, %v681_v51  ;;  %v2885_v49 = vrot.slane %v2877_v54, %v11066_v58  ;;  %v2892_v11 = vrot.slane %v2878_v35, %v11066_v58  ;;  %v1705_v43 = vcombine.low %v10742_v2, %v10759_v4  ;;  %v839_v51 = vld [vmem:[#allocation3 + $0x68] sm:$0xff]  ;;  %v964_v2 = vld [vmem:[#allocation3 + $0x70] sm:$0xff] }
 0x128   :  { %17256 = vst [vmem:[#allocation28_spill] sm:$0xff] %v11873_v56  ;;  %v795_v33 = vcombine.high %v793_v20, %v793_v20  ;;  %v11884_v28 = vadd.f32 %v786_v19, %v682_v61  ;;  %v11887_v23 = vrot.slane %v2824_v13, %v11066_v58  ;;  %v881_v31 = vcombine.low %v873_v36, %v880_v48 }
 0x129   :  { %v888_v15 = vcombine.high %v884_v42, %v884_v42  ;;  %v895_v24 = vrot.slane %v884_v42, %v11066_v58  ;;  %v2896_v60 = vmul.f32 %v2876_v26, %v2858_v47  ;;  %v11894_v16 = vsel %vm954_vm7, %v11537_v9, %v11478_v40  ;;  %v11896_v54 = vpop.permute.xlu1 %1322 }
 0x12a   :  { %17257 = vst [vmem:[#allocation26_spill] sm:$0xff] %v11887_v23  ;;  %v11898_v35 = vadd.f32 %v794_v18, %v683_v12  ;;  %v11906_v42 = vsel %vm954_vm7, %v11478_v40, %v11446_v44  ;;  %v11908_v19 = vpop.permute.xlu0 %1316  ;;  %v1720_v26 = vrot.slane %v1706_v0, %v11066_v58  ;;  %v2893_v13 = vcombine.low %v2885_v49, %v2892_v11  ;;  %v2859_v0 = vld [vmem:[#allocation3 + $0x188] sm:$0xff] }
 0x12b   :  { %v959_v12 = vsel %vm954_vm7, %v11507_v29, %v11473_v57  ;;  %v960_v48 = vsel %vm954_vm7, %v11446_v44, %v11507_v29  ;;  %v1713_v18 = vrot.slane %v1705_v43, %v11066_v58  ;;  %v11921_v40 = vadd.f32 %v793_v20, %v11826_v22  ;;  %v17258_v20 = vld [vmem:[#allocation41_spill] sm:$0xff] }
 0x12c   :  { %v885_v36 = vmul.f32 %v881_v31, %v839_v51  ;;  %v974_v49 = vcombine.low %v11894_v16, %v11906_v42  ;;  %v11928_v11 = vadd.f32 %v795_v33, %v11831_v14  ;;  %v902_v61 = vrot.slane %v888_v15, %v11066_v58  ;;  %v17259_v14 = vld [vmem:[#allocation31_spill] sm:$0xff] }
 0x12d   :  { %v903_v50 = vcombine.high %v895_v24, %v895_v24  ;;  %v2900_v44 = vcombine.high %v2896_v60, %v2896_v60  ;;  %v11931_v29 = vpop.permute.xlu1 %1326  ;;  %v975_v43 = vcombine.low %v960_v48, %v959_v12  ;;  %v958_v22 = vsel %vm954_vm7, %v11473_v57, %v11547_v38 }
 0x12e   :  { %v955_v31 = vsel %vm954_vm7, %v17258_v20, %v11537_v9  ;;  %v956_v33 = vsel %vm954_vm7, %v17259_v14, %v17258_v20  ;;  %v11945_v15 = vpop.permute.xlu0 %1320  ;;  %v2897_v51 = vmul.f32 %v2893_v13, %v2859_v0  ;;  %v1721_v47 = vcombine.low %v1713_v18, %v1720_v26 }
 0x12f   :  { %v11953_v23 = vadd.f32 %v895_v24, %v11847_v53  ;;  %v905_v9 = vcombine.high %v885_v36, %v885_v36  ;;  %v982_v56 = vrot.slane %v974_v49, %v11066_v58  ;;  %v957_v13 = vsel %vm954_vm7, %v11547_v38, %v17259_v14  ;;  %v1695_v14 = vld [vmem:[#allocation3 + $0xd0] sm:$0xff] }
 0x130   :  { %v904_v0 = vcombine.high %v902_v61, %v902_v61  ;;  %v11960_v20 = vadd.f32 %v903_v50, %v805_v59  ;;  %v2954_v26 = vcombine.low %v959_v12, %v958_v22  ;;  %v992_v18 = vcombine.low %v956_v33, %v955_v31 }
 0x131   :  { %v11962_v62 = vpop.permute.xlu1 %1330  ;;  %v11965_v57 = vrot.slane %v2896_v60, %v11066_v58  ;;  %v11968_v53 = vrot.slane %v2900_v44, %v11066_v58  ;;  %v912_v24 = vrot.slane %v885_v36, %v11066_v58  ;;  %v989_v49 = vrot.slane %v975_v43, %v11066_v58 }
 0x132   :  { %v11972_v17 = vpop.permute.xlu0 %1324  ;;  %v11975_v38 = vadd.f32 %v902_v61, %v11866_v32  ;;  %v2917_v59 = vcombine.high %v2897_v51, %v2897_v51  ;;  %v2953_v50 = vcombine.low %v11906_v42, %v960_v48  ;;  %v991_v12 = vcombine.low %v958_v22, %v957_v13 }
 0x133   :  { %17260 = vst [vmem:[#allocation41_spill] sm:$0xff] %v11965_v57  ;;  %17261 = vst [vmem:[#allocation31_spill] sm:$0xff] %v11968_v53  ;;  %v919_v60 = vrot.slane %v905_v9, %v11066_v58  ;;  %v11980_v39 = vrot.slane %v2897_v51, %v11066_v58  ;;  %v990_v44 = vcombine.low %v982_v56, %v989_v49 }
 0x134   :  { %v2971_v36 = vcombine.low %v955_v31, %v11894_v16  ;;  %v11984_v43 = vadd.f32 %v904_v0, %v11878_v55  ;;  %v2968_v32 = vrot.slane %v2954_v26, %v11066_v58  ;;  %v1006_v61 = vrot.slane %v992_v18, %v11066_v58 }
 0x135   :  { %17262 = vst [vmem:[#allocation45_spill] sm:$0xff] %v11980_v39  ;;  %v2970_v1 = vcombine.low %v957_v13, %v956_v33  ;;  %v11988_v42 = vpop.permute.xlu1 %1444  ;;  %v920_v56 = vcombine.high %v912_v24, %v912_v24  ;;  %v1741_v16 = vmul.f32 %v1721_v47, %v1695_v14  ;;  %v11997_v55 = vadd.f32 %v912_v24, %v11884_v28  ;;  %v17264_v28 = vld [vmem:[#allocation44_spill] sm:$0xff]  ;;  %v965_v14 = vld [vmem:[#allocation3 + $0x78] sm:$0xff] }
 0x136   :  { %v11994_v51 = vpop.permute.xlu0 %1328  ;;  %v12000_v31 = vrot.slane %v2917_v59, %v11066_v58  ;;  %v2961_v33 = vrot.slane %v2953_v50, %v11066_v58  ;;  %v999_v9 = vrot.slane %v991_v12, %v11066_v58  ;;  %v921_v13 = vcombine.high %v919_v60, %v919_v60 }
 0x137   :  { %v1010_v26 = vmul.f32 %v990_v44, %v964_v2  ;;  %v2985_v18 = vrot.slane %v2971_v36, %v11066_v58  ;;  %v2978_v47 = vrot.slane %v2970_v1, %v11066_v58  ;;  %v12012_v24 = vsel %vm1080_vm8, %v11718_v10, %v17264_v28  ;;  %v2951_v2 = vld [vmem:[#allocation3 + $0x190] sm:$0xff]  ;;  %v17265_v44 = vld [vmem:[#allocation39_spill] sm:$0xff] }
 0x138   :  { %17263 = vst [vmem:[#allocation46_spill] sm:$0xff] %v12000_v31  ;;  %v2969_v49 = vcombine.low %v2961_v33, %v2968_v32  ;;  %v1007_v22 = vcombine.low %v999_v9, %v1006_v61  ;;  %v12017_v50 = vadd.f32 %v920_v56, %v11898_v35  ;;  %v12020_v12 = vadd.f32 %v919_v60, %v11921_v40  ;;  %v17266_v61 = vld [vmem:[#allocation42_spill] sm:$0xff] }
 0x139   :  { %v12014_v59 = vpop.permute.xlu1 %1448  ;;  %v1087_v1 = vsel %vm1080_vm8, %v17264_v28, %v17265_v44  ;;  %v1745_v32 = vcombine.high %v1741_v16, %v1741_v16  ;;  %v1085_v33 = vsel %vm1080_vm8, %v11692_v46, %v17266_v61  ;;  %v1086_v35 = vsel %vm1080_vm8, %v17265_v44, %v11692_v46 }
 0x13a   :  { %v12026_v36 = vpop.permute.xlu0 %1442  ;;  %v12040_v40 = vsel %vm1080_vm8, %v17266_v61, %v11726_v63  ;;  %v12043_v60 = vrot.slane %v1741_v16, %v11066_v58  ;;  %v1014_v9 = vcombine.high %v1010_v26, %v1010_v26  ;;  %v1021_v28 = vrot.slane %v1010_v26, %v11066_v58  ;;  %v2952_v61 = vld [vmem:[#allocation3 + $0x198] sm:$0xff] }
 0x13b   :  { %v1100_v0 = vcombine.low %v12012_v24, %v1087_v1  ;;  %v12050_v48 = vadd.f32 %v921_v13, %v11928_v11  ;;  %v2989_v46 = vmul.f32 %v2969_v49, %v2951_v2  ;;  %v1011_v44 = vmul.f32 %v1007_v22, %v965_v14  ;;  %v17269_v13 = vld [vmem:[#allocation17_spill] sm:$0xff] }
 0x13c   :  { %17267 = vst [vmem:[#allocation44_spill] sm:$0xff] %v12043_v60  ;;  %v2986_v39 = vcombine.low %v2978_v47, %v2985_v18  ;;  %v1101_v57 = vcombine.low %v1086_v35, %v1085_v33  ;;  %v3047_v16 = vcombine.low %v1085_v33, %v12040_v40  ;;  %v12058_v56 = vrot.slane %v1745_v32, %v11066_v58  ;;  %v1090_v60 = vld [vmem:[#allocation3 + $0x80] sm:$0xff] }
 0x13d   :  { %v12052_v53 = vpop.permute.xlu1 %1452  ;;  %v17268_v26 = vcombine.low %v10771_v6, %v10764_v5  ;;  %v1081_v22 = vsel %vm1080_vm8, %v11760_v37, %v11718_v10  ;;  %v1082_v18 = vsel %vm1080_vm8, %v17269_v13, %v11760_v37  ;;  %v17270_v47 = vcombine.low %v10781_v8, %v10776_v7 }
 0x13e   :  { %v12055_v4 = vpop.permute.xlu0 %1446  ;;  %v1028_v14 = vrot.slane %v1014_v9, %v11066_v58  ;;  %v1029_v32 = vcombine.high %v1021_v28, %v1021_v28  ;;  %v3046_v33 = vcombine.low %v1087_v1, %v1086_v35  ;;  %v1108_v10 = vrot.slane %v1100_v0, %v11066_v58 }
 0x13f   :  { %v12064_v11 = vrot.slane %v17268_v26, %v11066_v58  ;;  %v12080_v2 = vrot.slane %v17270_v47, %v11066_v58  ;;  %v2993_v26 = vcombine.high %v2989_v46, %v2989_v46  ;;  %v1031_v5 = vcombine.high %v1011_v44, %v1011_v44 }
 0x140   :  { %v2990_v37 = vmul.f32 %v2986_v39, %v2952_v61  ;;  %v1083_v49 = vsel %vm1080_vm8, %v11726_v63, %v17269_v13  ;;  %v12092_v47 = vadd.f32 %v1021_v28, %v11953_v23  ;;  %v1115_v9 = vrot.slane %v1101_v57, %v11066_v58 }
 0x141   :  { %v12089_v6 = vpop.permute.xlu1 %1456  ;;  %v3061_v1 = vrot.slane %v3047_v16, %v11066_v58  ;;  %v1118_v0 = vcombine.low %v1082_v18, %v1081_v22  ;;  %v12099_v7 = vrot.slane %v2989_v46, %v11066_v58  ;;  %v1038_v39 = vrot.slane %v1011_v44, %v11066_v58 }
 0x142   :  { %v12096_v35 = vpop.permute.xlu0 %1450  ;;  %v3063_v61 = vcombine.low %v1083_v49, %v1082_v18  ;;  %v3064_v63 = vcombine.low %v1081_v22, %v12012_v24  ;;  %v1030_v13 = vcombine.high %v1028_v14, %v1028_v14  ;;  %v3054_v8 = vrot.slane %v3046_v33, %v11066_v58 }
 0x143   :  { %v1116_v23 = vcombine.low %v1108_v10, %v1115_v9  ;;  %v1117_v28 = vcombine.low %v12040_v40, %v1083_v49  ;;  %v12106_v57 = vadd.f32 %v1029_v32, %v11960_v20  ;;  %v12109_v16 = vrot.slane %v2993_v26, %v11066_v58 }
 0x144   :  { %v1045_v46 = vrot.slane %v1031_v5, %v11066_v58  ;;  %v3010_v31 = vcombine.high %v2990_v37, %v2990_v37  ;;  %v12115_v24 = vadd.f32 %v1028_v14, %v11975_v38  ;;  %v12118_v22 = vrot.slane %v2990_v37, %v11066_v58  ;;  %v3044_v5 = vld [vmem:[#allocation3 + $0x1a0] sm:$0xff] }
 0x145   :  { %v12112_v44 = vpop.permute.xlu1 %1570  ;;  %v3062_v18 = vcombine.low %v3054_v8, %v3061_v1  ;;  %v1132_v40 = vrot.slane %v1118_v0, %v11066_v58  ;;  %v1046_v32 = vcombine.high %v1038_v39, %v1038_v39  ;;  %v3071_v33 = vrot.slane %v3063_v61, %v11066_v58 }
 0x146   :  { %17271 = vst [vmem:[#allocation39_spill] sm:$0xff] %v12118_v22  ;;  %v12121_v20 = vpop.permute.xlu0 %1454  ;;  %v3078_v10 = vrot.slane %v3064_v63, %v11066_v58  ;;  %v12128_v38 = vadd.f32 %v1030_v13, %v11984_v43  ;;  %v1136_v14 = vmul.f32 %v1116_v23, %v1090_v60  ;;  %v1125_v26 = vrot.slane %v1117_v28, %v11066_v58  ;;  %v1696_v60 = vld [vmem:[#allocation3 + $0xd8] sm:$0xff] }
 0x147   :  { %v1738_v8 = vcombine.low %v12064_v11, %v12080_v2  ;;  %v1047_v9 = vcombine.high %v1045_v46, %v1045_v46  ;;  %v12137_v1 = vadd.f32 %v1038_v39, %v11997_v55  ;;  %v12140_v0 = vrot.slane %v3010_v31, %v11066_v58  ;;  %v1091_v31 = vld [vmem:[#allocation3 + $0x88] sm:$0xff] }
 0x148   :  { %v3082_v63 = vmul.f32 %v3062_v18, %v3044_v5  ;;  %v1133_v13 = vcombine.low %v1125_v26, %v1132_v40  ;;  %v1214_v11 = vsel %vm1206_vm9, %v11850_v45, %v11799_v30  ;;  %v12153_v55 = vadd.f32 %v1046_v32, %v12017_v50  ;;  %v3045_v5 = vld [vmem:[#allocation3 + $0x1a8] sm:$0xff] }
 0x149   :  { %17272 = vst [vmem:[#allocation42_spill] sm:$0xff] %v12140_v0  ;;  %v12142_v43 = vpop.permute.xlu1 %1574  ;;  %v3079_v39 = vcombine.low %v3071_v33, %v3078_v10  ;;  %v1213_v23 = vsel %vm1206_vm9, %v11799_v30, %v11748_v21  ;;  %v1211_v28 = vsel %vm1206_vm9, %v11833_v27, %v11789_v25  ;;  %v1140_v18 = vcombine.high %v1136_v14, %v1136_v14 }
 0x14a   :  { %v12150_v2 = vpop.permute.xlu0 %1568  ;;  %v1147_v40 = vrot.slane %v1136_v14, %v11066_v58  ;;  %v1212_v50 = vsel %vm1206_vm9, %v11748_v21, %v11833_v27  ;;  %v12168_v32 = vmul.f32 %v1738_v8, %v1696_v60  ;;  %v12171_v33 = vadd.f32 %v1045_v46, %v12020_v12 }
 0x14b   :  { %v12174_v30 = vadd.f32 %v1047_v9, %v12050_v48  ;;  %v1226_v26 = vcombine.low %v1214_v11, %v1213_v23  ;;  %v3086_v14 = vcombine.high %v3082_v63, %v3082_v63  ;;  %v12181_v37 = vrot.slane %v3082_v63, %v11066_v58 }
 0x14c   :  { %v1137_v49 = vmul.f32 %v1133_v13, %v1091_v31  ;;  %v12187_v12 = vmul.f32 %v3079_v39, %v3045_v5  ;;  %v1227_v48 = vcombine.low %v1212_v50, %v1211_v28  ;;  %v1207_v46 = vsel %vm1206_vm9, %v11876_v52, %v11850_v45  ;;  %v17273_v31 = vld [vmem:[#allocation27_spill] sm:$0xff] }
 0x14d   :  { %v12178_v61 = vpop.permute.xlu1 %1578  ;;  %v1208_v8 = vsel %vm1206_vm9, %v11820_v34, %v11876_v52  ;;  %v1154_v9 = vrot.slane %v1140_v18, %v11066_v58  ;;  %v1155_v60 = vcombine.high %v1147_v40, %v1147_v40  ;;  %v12199_v63 = vadd.f32 %v1147_v40, %v12092_v47 }
 0x14e   :  { %v12183_v21 = vpop.permute.xlu0 %1572  ;;  %v1762_v13 = vcombine.high %v12168_v32, %v12168_v32  ;;  %v1234_v11 = vrot.slane %v1226_v26, %v11066_v58  ;;  %v1209_v45 = vsel %vm1206_vm9, %v17273_v31, %v11820_v34  ;;  %v1210_v52 = vsel %vm1206_vm9, %v11789_v25, %v17273_v31 }
 0x14f   :  { %v1340_v47 = vsel %vm17108_vm10, %v11962_v62, %v11908_v19  ;;  %v12220_v23 = vrot.slane %v3086_v14, %v11066_v58  ;;  %v1157_v28 = vcombine.high %v1137_v49, %v1137_v49  ;;  %v1244_v18 = vcombine.low %v1208_v8, %v1207_v46 }
 0x150   :  { %v1241_v25 = vrot.slane %v1227_v48, %v11066_v58  ;;  %v1339_v5 = vsel %vm17108_vm10, %v11908_v19, %v11868_v3  ;;  %v1337_v50 = vsel %vm17108_vm10, %v11945_v15, %v11896_v54  ;;  %v1338_v26 = vsel %vm17108_vm10, %v11868_v3, %v11945_v15 }
 0x151   :  { %v12217_v39 = vpop.permute.xlu1 %1582  ;;  %17274 = vst [vmem:[#allocation17_spill] sm:$0xff] %v12220_v23  ;;  %v1164_v14 = vrot.slane %v1137_v49, %v11066_v58  ;;  %v3103_v48 = vcombine.high %v12187_v12, %v12187_v12  ;;  %v1243_v46 = vcombine.low %v1210_v52, %v1209_v45  ;;  %v1352_v8 = vcombine.low %v1340_v47, %v1339_v5  ;;  %v1216_v45 = vld [vmem:[#allocation3 + $0x90] sm:$0xff] }
 0x152   :  { %v12224_v40 = vpop.permute.xlu0 %1576  ;;  %v1156_v31 = vcombine.high %v1154_v9, %v1154_v9  ;;  %v1242_v10 = vcombine.low %v1234_v11, %v1241_v25  ;;  %v1333_v19 = vsel %vm17108_vm10, %v11994_v51, %v11962_v62  ;;  %v1334_v34 = vsel %vm17108_vm10, %v11931_v29, %v11994_v51 }
 0x153   :  { %v12253_v15 = vadd.f32 %v1155_v60, %v12106_v57  ;;  %v12256_v49 = vadd.f32 %v1154_v9, %v12115_v24  ;;  %v1258_v11 = vrot.slane %v1244_v18, %v11066_v58  ;;  %v1353_v52 = vcombine.low %v1338_v26, %v1337_v50 }
 0x154   :  { %v1171_v25 = vrot.slane %v1157_v28, %v11066_v58  ;;  %v1335_v51 = vsel %vm17108_vm10, %v11972_v17, %v11931_v29  ;;  %v1336_v57 = vsel %vm17108_vm10, %v11896_v54, %v11972_v17  ;;  %v1172_v24 = vcombine.high %v1164_v14, %v1164_v14 }
 0x155   :  { %v12250_v3 = vpop.permute.xlu1 %1797  ;;  %v1251_v9 = vrot.slane %v1243_v46, %v11066_v58  ;;  %v1360_v60 = vrot.slane %v1352_v8, %v11066_v58  ;;  %v1370_v18 = vcombine.low %v1334_v34, %v1333_v19  ;;  %v12276_v28 = vadd.f32 %v1156_v31, %v12128_v38 }
 0x156   :  { %v12259_v47 = vpop.permute.xlu0 %1580  ;;  %v12279_v5 = vadd.f32 %v1164_v14, %v12137_v1  ;;  %v12283_v29 = vrot.slane %v12187_v12, %v11066_v58  ;;  %v1262_v50 = vmul.f32 %v1242_v10, %v1216_v45  ;;  %v1367_v26 = vrot.slane %v1353_v52, %v11066_v58  ;;  %v1217_v14 = vld [vmem:[#allocation3 + $0x98] sm:$0xff] }
 0x157   :  { %v1259_v54 = vcombine.low %v1251_v9, %v1258_v11  ;;  %v1369_v46 = vcombine.low %v1336_v57, %v1335_v51  ;;  %v1466_v38 = vsel %vm17107_vm11, %v12089_v6, %v12026_v36  ;;  %v1173_v1 = vcombine.high %v1171_v25, %v1171_v25  ;;  %v1342_v57 = vld [vmem:[#allocation3 + $0xa0] sm:$0xff] }
 0x158   :  { %17275 = vst [vmem:[#allocation27_spill] sm:$0xff] %v12283_v29  ;;  %v1463_v10 = vsel %vm17107_vm11, %v12055_v4, %v12014_v59  ;;  %v1464_v12 = vsel %vm17107_vm11, %v11988_v42, %v12055_v4  ;;  %v12304_v8 = vrot.slane %v12168_v32, %v11066_v58  ;;  %v12307_v31 = vadd.f32 %v1171_v25, %v12171_v33  ;;  %v1468_v29 = vld [vmem:[#allocation3 + $0xb0] sm:$0xff] }
 0x159   :  { %v12285_v17 = vpop.permute.xlu1 %1801  ;;  %v1368_v19 = vcombine.low %v1360_v60, %v1367_v26  ;;  %v1384_v45 = vrot.slane %v1370_v18, %v11066_v58  ;;  %v1465_v11 = vsel %vm17107_vm11, %v12026_v36, %v11988_v42  ;;  %v12315_v52 = vrot.slane %v3103_v48, %v11066_v58 }
 0x15a   :  { %v12292_v34 = vpop.permute.xlu0 %1795  ;;  %v1266_v51 = vcombine.high %v1262_v50, %v1262_v50  ;;  %v1273_v4 = vrot.slane %v1262_v50, %v11066_v58  ;;  %v1478_v9 = vcombine.low %v1466_v38, %v1465_v11  ;;  %v12321_v33 = vadd.f32 %v1172_v24, %v12153_v55 }
 0x15b   :  { %17276 = vst [vmem:[#allocation47_spill] sm:$0xff] %v12315_v52  ;;  %v1263_v25 = vmul.f32 %v1259_v54, %v1217_v14  ;;  %v1377_v60 = vrot.slane %v1369_v46, %v11066_v58  ;;  %v1479_v18 = vcombine.low %v1464_v12, %v1463_v10  ;;  %v12327_v42 = vadd.f32 %v1173_v1, %v12174_v30 }
 0x15c   :  { %v12335_v48 = vrot.slane %v1762_v13, %v11066_v58  ;;  %v1388_v24 = vmul.f32 %v1368_v19, %v1342_v57  ;;  %v1459_v30 = vsel %vm17107_vm11, %v12121_v20, %v12089_v6  ;;  %v1460_v54 = vsel %vm17107_vm11, %v12052_v53, %v12121_v20  ;;  %v1343_v13 = vld [vmem:[#allocation3 + $0xa8] sm:$0xff] }
 0x15d   :  { %v12318_v62 = vpop.permute.xlu1 %1805  ;;  %v1385_v50 = vcombine.low %v1377_v60, %v1384_v45  ;;  %v1280_v46 = vrot.slane %v1266_v51, %v11066_v58  ;;  %v1281_v32 = vcombine.high %v1273_v4, %v1273_v4  ;;  %v1486_v38 = vrot.slane %v1478_v9, %v11066_v58 }
 0x15e   :  { %v12324_v26 = vpop.permute.xlu0 %1799  ;;  %v1592_v1 = vsel %vm17105_vm12, %v12217_v39, %v12150_v2  ;;  %v1283_v10 = vcombine.high %v1263_v25, %v1263_v25  ;;  %v1493_v6 = vrot.slane %v1479_v18, %v11066_v58  ;;  %v1461_v20 = vsel %vm17107_vm11, %v12096_v35, %v12052_v53 }
 0x15f   :  { %v1462_v12 = vsel %vm17107_vm11, %v12014_v59, %v12096_v35  ;;  %v1496_v45 = vcombine.low %v1460_v54, %v1459_v30  ;;  %v1591_v11 = vsel %vm17105_vm12, %v12150_v2, %v12112_v44  ;;  %v1589_v51 = vsel %vm17105_vm12, %v12183_v21, %v12142_v43 }
 0x160   :  { %v1590_v53 = vsel %vm17105_vm12, %v12112_v44, %v12183_v21  ;;  %v1392_v57 = vcombine.high %v1388_v24, %v1388_v24  ;;  %v1389_v59 = vmul.f32 %v1385_v50, %v1343_v13  ;;  %v1604_v35 = vcombine.low %v1592_v1, %v1591_v11 }
 0x161   :  { %v12353_v14 = vpop.permute.xlu1 %1809  ;;  %v1290_v18 = vrot.slane %v1263_v25, %v11066_v58  ;;  %v1494_v30 = vcombine.low %v1486_v38, %v1493_v6  ;;  %v1495_v54 = vcombine.low %v1462_v12, %v1461_v20  ;;  %v1282_v27 = vcombine.high %v1280_v46, %v1280_v46 }
 0x162   :  { %v12364_v19 = vpop.permute.xlu0 %1803  ;;  %v1297_v52 = vrot.slane %v1283_v10, %v11066_v58  ;;  %v1605_v0 = vcombine.low %v1590_v53, %v1589_v51  ;;  %v1308_v50 = vadd.f32 %v1273_v4, %v12199_v63  ;;  %v1309_v25 = vadd.f32 %v1281_v32, %v12253_v15 }
 0x163   :  { %v1399_v13 = vrot.slane %v1388_v24, %v11066_v58  ;;  %v1510_v38 = vrot.slane %v1496_v45, %v11066_v58  ;;  %v1310_v1 = vadd.f32 %v1280_v46, %v12256_v49  ;;  %v1406_v6 = vrot.slane %v1392_v57, %v11066_v58 }
 0x164   :  { %v1409_v10 = vcombine.high %v1389_v59, %v1389_v59  ;;  %v1612_v20 = vrot.slane %v1604_v35, %v11066_v58  ;;  %v1298_v12 = vcombine.high %v1290_v18, %v1290_v18  ;;  %v1416_v11 = vrot.slane %v1389_v59, %v11066_v58 }
 0x165   :  { %v12380_v2 = vpop.permute.xlu1 %1923  ;;  %v1514_v51 = vmul.f32 %v1494_v30, %v1468_v29  ;;  %v1503_v53 = vrot.slane %v1495_v54, %v11066_v58  ;;  %v1311_v15 = vadd.f32 %v1282_v27, %v12276_v28  ;;  %v1299_v4 = vcombine.high %v1297_v52, %v1297_v52  ;;  %v1594_v30 = vld [vmem:[#allocation3 + $0xc0] sm:$0xff] }
 0x166   :  { %v12386_v21 = vpop.permute.xlu0 %1807  ;;  %v1312_v49 = vadd.f32 %v1290_v18, %v12279_v5  ;;  %v1619_v24 = vrot.slane %v1605_v0, %v11066_v58  ;;  %v1407_v32 = vcombine.high %v1399_v13, %v1399_v13  ;;  %v1585_v29 = vsel %vm17105_vm12, %v12259_v47, %v12217_v39  ;;  %v1469_v0 = vld [vmem:[#allocation3 + $0xb8] sm:$0xff] }
 0x167   :  { %v1511_v45 = vcombine.low %v1503_v53, %v1510_v38  ;;  %v1586_v57 = vsel %vm17105_vm12, %v12178_v61, %v12259_v47  ;;  %v1314_v27 = vadd.f32 %v1297_v52, %v12307_v31  ;;  %v1408_v28 = vcombine.high %v1406_v6, %v1406_v6 }
 0x168   :  { %v1423_v5 = vrot.slane %v1409_v10, %v11066_v58  ;;  %v1620_v59 = vcombine.low %v1612_v20, %v1619_v24  ;;  %v1424_v35 = vcombine.high %v1416_v11, %v1416_v11  ;;  %v1518_v18 = vcombine.high %v1514_v51, %v1514_v51 }
 0x169   :  { %v12398_v63 = vpop.permute.xlu1 %1927  ;;  %v1587_v39 = vsel %vm17105_vm12, %v12224_v40, %v12178_v61  ;;  %v1588_v47 = vsel %vm17105_vm12, %v12142_v43, %v12224_v40  ;;  %v1313_v31 = vadd.f32 %v1298_v12, %v12321_v33  ;;  %v1315_v52 = vadd.f32 %v1299_v4, %v12327_v42  ;;  %v17279_v61 = vld [vmem:[#allocation7_spill] sm:$0xff] }
 0x16a   :  { %v12403_v46 = vpop.permute.xlu0 %1921  ;;  %v1525_v38 = vrot.slane %v1514_v51, %v11066_v58  ;;  %v1622_v10 = vcombine.low %v1586_v57, %v1585_v29  ;;  %v1434_v53 = vadd.f32 %v1399_v13, %v1308_v50  ;;  %v1435_v24 = vadd.f32 %v1407_v32, %v1309_v25 }
 0x16b   :  { %v1515_v55 = vmul.f32 %v1511_v45, %v1469_v0  ;;  %v3144_v60 = vrot.slane %v17279_v61, 2  ;;  %v1436_v44 = vadd.f32 %v1406_v6, %v1310_v1  ;;  %v1438_v36 = vadd.f32 %v1416_v11, %v1312_v49 }
 0x16c   :  { %v1640_v9 = vmul.f32 %v1620_v59, %v1594_v30  ;;  %v1621_v43 = vcombine.low %v1588_v47, %v1587_v39  ;;  %v1437_v40 = vadd.f32 %v1408_v28, %v1311_v15  ;;  %v1425_v23 = vcombine.high %v1423_v5, %v1423_v5 }
 0x16d   :  { %v12423_v54 = vpop.permute.xlu1 %1931  ;;  %v1439_v22 = vadd.f32 %v1424_v35, %v1313_v31  ;;  %v1532_v33 = vrot.slane %v1518_v18, %v11066_v58  ;;  %v1440_v12 = vadd.f32 %v1423_v5, %v1314_v27  ;;  %v1533_v51 = vcombine.high %v1525_v38, %v1525_v38  ;;  %v1595_v18 = vld [vmem:[#allocation3 + $0xc8] sm:$0xff] }
 0x16e   :  { %v12428_v20 = vpop.permute.xlu0 %1925  ;;  %v1636_v50 = vrot.slane %v1622_v10, %v11066_v58  ;;  %v1815_v25 = vsel %vm17106_vm13, %v12285_v17, %v12364_v19  ;;  %v1535_v1 = vcombine.high %v1515_v55, %v1515_v55  ;;  %v1542_v6 = vrot.slane %v1515_v55, %v11066_v58 }
 0x16f   :  { %v1812_v11 = vsel %vm17106_vm13, %v12386_v21, %v12353_v14  ;;  %v1813_v15 = vsel %vm17106_vm13, %v12318_v62, %v12386_v21  ;;  %v1644_v4 = vcombine.high %v1640_v9, %v1640_v9  ;;  %v1629_v49 = vrot.slane %v1621_v43, %v11066_v58 }
 0x170   :  { %v1816_v32 = vsel %vm17106_vm13, %v12324_v26, %v12285_v17  ;;  %v1817_v55 = vsel %vm17106_vm13, %v12250_v3, %v12324_v26  ;;  %v1534_v45 = vcombine.high %v1532_v33, %v1532_v33  ;;  %v1819_v29 = vsel %vm17106_vm13, %v12353_v14, %v12292_v34 }
 0x171   :  { %v12433_v42 = vpop.permute.xlu1 %1935  ;;  %v1814_v21 = vsel %vm17106_vm13, %v12364_v19, %v12318_v62  ;;  %v1832_v57 = vcombine.low %v1816_v32, %v1815_v25  ;;  %v1637_v17 = vcombine.low %v1629_v49, %v1636_v50  ;;  %v1818_v26 = vsel %vm17106_vm13, %v12292_v34, %v12250_v3 }
 0x172   :  { %v12440_v13 = vpop.permute.xlu0 %1929  ;;  %v1848_v28 = vcombine.low %v1814_v21, %v1813_v15  ;;  %v1849_v5 = vcombine.low %v1812_v11, %v1819_v29  ;;  %v1441_v59 = vadd.f32 %v1425_v23, %v1315_v52  ;;  %v1549_v14 = vrot.slane %v1535_v1, %v11066_v58 }
 0x173   :  { %v1550_v35 = vcombine.high %v1542_v6, %v1542_v6  ;;  %v1831_v30 = vcombine.low %v1818_v26, %v1817_v55  ;;  %v1560_v39 = vadd.f32 %v1525_v38, %v1434_v53  ;;  %v1561_v62 = vadd.f32 %v1533_v51, %v1435_v24 }
 0x174   :  { %v1651_v19 = vrot.slane %v1640_v9, %v11066_v58  ;;  %v1658_v47 = vrot.slane %v1644_v4, %v11066_v58  ;;  %v1562_v31 = vadd.f32 %v1532_v33, %v1436_v44  ;;  %v1563_v10 = vadd.f32 %v1534_v45, %v1437_v40  ;;  %v1822_v45 = vld [vmem:[#allocation3 + $0xe8] sm:$0xff] }
 0x175   :  { %v12468_v27 = vpop.permute.xlu1 %2049  ;;  %v1564_v3 = vadd.f32 %v1542_v6, %v1438_v36  ;;  %v1846_v34 = vrot.slane %v1832_v57, %v11066_v58  ;;  %v1641_v23 = vmul.f32 %v1637_v17, %v1595_v18  ;;  %v1856_v52 = vrot.slane %v1848_v28, %v11066_v58 }
 0x176   :  { %v1934_v0 = vpop.permute.xlu0 %1933  ;;  %v1863_v50 = vrot.slane %v1849_v5, %v11066_v58  ;;  %v1941_v9 = vsel %vm17021_vm14, %v12398_v63, %v12440_v13  ;;  %v1551_v53 = vcombine.high %v1549_v14, %v1549_v14  ;;  %v12485_v24 = vadd.f32 %v1550_v35, %v1439_v22 }
 0x177   :  { %v12487_v44 = vadd.f32 %v1549_v14, %v1440_v12  ;;  %v1839_v36 = vrot.slane %v1831_v30, %v11066_v58  ;;  %v1659_v40 = vcombine.high %v1651_v19, %v1651_v19  ;;  %v1660_v33 = vcombine.high %v1658_v47, %v1658_v47 }
 0x178   :  { %v1942_v51 = vsel %vm17021_vm14, %v12428_v20, %v12398_v63  ;;  %v1943_v25 = vsel %vm17021_vm14, %v12380_v2, %v12428_v20  ;;  %v1938_v22 = vsel %vm17021_vm14, %v1934_v0, %v12433_v42  ;;  %v1939_v12 = vsel %vm17021_vm14, %v12423_v54, %v1934_v0  ;;  %v1821_v63 = vld [vmem:[#allocation3 + $0xe0] sm:$0xff] }
 0x179   :  { %v2054_v43 = vpop.permute.xlu1 %2053  ;;  %v1847_v1 = vcombine.low %v1839_v36, %v1846_v34  ;;  %v1958_v6 = vcombine.low %v1942_v51, %v1941_v9  ;;  %v1661_v15 = vcombine.high %v1641_v23, %v1641_v23  ;;  %v1668_v4 = vrot.slane %v1641_v23, %v11066_v58 }
 0x17a   :  { %v2048_v38 = vpop.permute.xlu0 %2047  ;;  %v1864_v49 = vcombine.low %v1856_v52, %v1863_v50  ;;  %v1944_v20 = vsel %vm17021_vm14, %v12403_v46, %v12380_v2  ;;  %v1567_v55 = vadd.f32 %v1551_v53, %v1441_v59  ;;  %v1945_v21 = vsel %vm17021_vm14, %v12433_v42, %v12403_v46 }
 0x17b   :  { %v1957_v29 = vcombine.low %v1944_v20, %v1943_v25  ;;  %v1940_v57 = vsel %vm17021_vm14, %v12440_v13, %v12423_v54  ;;  %v1686_v17 = vadd.f32 %v1651_v19, %v1560_v39  ;;  %v1687_v26 = vadd.f32 %v1659_v40, %v1561_v62  ;;  %v1947_v40 = vld [vmem:[#allocation3 + $0xf0] sm:$0xff] }
 0x17c   :  { %v1974_v28 = vcombine.low %v1940_v57, %v1939_v12  ;;  %v1975_v5 = vcombine.low %v1938_v22, %v1945_v21  ;;  %v1688_v0 = vadd.f32 %v1658_v47, %v1562_v31  ;;  %v1867_v2 = vmul.f32 %v1847_v1, %v1821_v63 }
 0x17d   :  { %v2058_v11 = vpop.permute.xlu1 %2057  ;;  %v1972_v59 = vrot.slane %v1958_v6, %v11066_v58  ;;  %v1689_v18 = vadd.f32 %v1660_v33, %v1563_v10  ;;  %v1675_v46 = vrot.slane %v1661_v15, %v11066_v58  ;;  %v1676_v42 = vcombine.high %v1668_v4, %v1668_v4 }
 0x17e   :  { %v2052_v32 = vpop.permute.xlu0 %2051  ;;  %v1868_v30 = vmul.f32 %v1864_v49, %v1822_v45  ;;  %v1965_v54 = vrot.slane %v1957_v29, %v11066_v58  ;;  %v2070_v13 = vsel %vm2063_vm15, %v2048_v38, %v12468_v27  ;;  %v1982_v19 = vrot.slane %v1974_v28, %v11066_v58 }
 0x17f   :  { %v2069_v14 = vsel %vm2063_vm15, %v12468_v27, %v2052_v32  ;;  %v2068_v39 = vsel %vm2063_vm15, %v2052_v32, %v2054_v43  ;;  %v1989_v47 = vrot.slane %v1975_v5, %v11066_v58  ;;  %v1690_v23 = vadd.f32 %v1668_v4, %v1564_v3  ;;  %v1948_v32 = vld [vmem:[#allocation3 + $0xf8] sm:$0xff]  ;;  %v17280_v5 = vld [vmem:[#allocation44_spill] sm:$0xff] }
 0x180   :  { %v2083_v31 = vcombine.low %v2070_v13, %v2069_v14  ;;  %v1871_v52 = vcombine.high %v1867_v2, %v1867_v2  ;;  %v1973_v50 = vcombine.low %v1965_v54, %v1972_v59  ;;  %v1677_v53 = vcombine.high %v1675_v46, %v1675_v46 }
 0x181   :  { %v2062_v35 = vpop.permute.xlu1 %2061  ;;  %v1878_v36 = vrot.slane %v1867_v2, %v11066_v58  ;;  %v1888_v27 = vcombine.high %v1868_v30, %v1868_v30  ;;  %vm2189_vm14 = vcmp.lt.s32.totalorder %v11015_v41, 119  ;;  %v1990_v22 = vcombine.low %v1982_v19, %v1989_v47 }
 0x182   :  { %v2056_v34 = vpop.permute.xlu0 %2055  ;;  %v2071_v25 = vsel %vm2063_vm15, %v2062_v35, %v2048_v38  ;;  %v2091_v12 = vrot.slane %v2083_v31, %v11066_v58  ;;  %v1691_v63 = vadd.f32 %v1676_v42, %v12485_v24  ;;  %v1692_v49 = vadd.f32 %v1675_v46, %v12487_v44 }
 0x183   :  { %v2067_v62 = vsel %vm2063_vm15, %v2054_v43, %v2056_v34  ;;  %v10686_v43 = vmov 1   ;;  %v2066_v3 = vsel %vm2063_vm15, %v2056_v34, %v2058_v11  ;;  %v1885_v38 = vrot.slane %v1871_v52, %v11066_v58 }
 0x184   :  { %v2084_v10 = vcombine.low %v2068_v39, %v2067_v62  ;;  %10566 = vset.pattern.permute.xlu0 %v10686_v43  ;;  %v1993_v20 = vmul.f32 %v1973_v50, %v1947_v40  ;;  %v1693_v29 = vadd.f32 %v1677_v53, %v1567_v55  ;;  %v1787_v2 = vadd.f32 %v17280_v5, %v1686_v17 }
 0x185   :  { %v2176_v9 = vpop.permute.xlu1 %2175  ;;  %v17281_v59 = vcombine.high %v17280_v5, %v17280_v5  ;;  %v1895_v44 = vrot.slane %v1868_v30, %v11066_v58  ;;  %v1902_v14 = vrot.slane %v1888_v27, %v11066_v58  ;;  %v1789_v46 = vadd.f32 %v12058_v56, %v1688_v0 }
 0x186   :  { %v2098_v33 = vrot.slane %v2084_v10, %v11066_v58  ;;  %v2060_v51 = vpop.permute.xlu0 %2059  ;;  %v17282_v55 = vcombine.high %v12058_v56, %v12058_v56  ;;  %v1886_v34 = vcombine.high %v1878_v36, %v1878_v36  ;;  %v1994_v54 = vmul.f32 %v1990_v22, %v1948_v32 }
 0x187   :  { %v2064_v1 = vsel %vm2063_vm15, %v2060_v51, %v2062_v35  ;;  %v2065_v6 = vsel %vm2063_vm15, %v2058_v11, %v2060_v51  ;;  %v1788_v24 = vadd.f32 %v17281_v59, %v1687_v26  ;;  %v2073_v35 = vld [vmem:[#allocation3 + $0x100] sm:$0xff]  ;;  %v1887_v13 = vcombine.high %v1885_v38, %v1885_v38 }
 0x188   :  { %v2100_v15 = vcombine.low %v2066_v3, %v2065_v6  ;;  %v2101_v4 = vcombine.low %v2064_v1, %v2071_v25  ;;  %v2099_v21 = vcombine.low %v2091_v12, %v2098_v33  ;;  %v1790_v42 = vadd.f32 %v17282_v55, %v1689_v18 }
 0x189   :  { %v2180_v45 = vpop.permute.xlu1 %2179  ;;  %v1791_v17 = vadd.f32 %v12304_v8, %v1690_v23  ;;  %v17283_v39 = vcombine.high %v12304_v8, %v12304_v8  ;;  %v1997_v62 = vcombine.high %v1993_v20, %v1993_v20  ;;  %v1793_v19 = vadd.f32 %v12335_v48, %v1692_v49  ;;  %v2074_v23 = vld [vmem:[#allocation3 + $0x108] sm:$0xff] }
 0x18a   :  { %v2108_v57 = vrot.slane %v2100_v15, %v11066_v58  ;;  %v2115_v11 = vrot.slane %v2101_v4, %v11066_v58  ;;  %v2174_v28 = vpop.permute.xlu0 %2173  ;;  %v17284_v0 = vcombine.high %v12335_v48, %v12335_v48  ;;  %v2119_v31 = vmul.f32 %v2099_v21, %v2073_v35 }
 0x18b   :  { %v1792_v26 = vadd.f32 %v17283_v39, %v1691_v63  ;;  %v1903_v10 = vcombine.high %v1895_v44, %v1895_v44  ;;  %v1904_v52 = vcombine.high %v1902_v14, %v1902_v14  ;;  %v2004_v50 = vrot.slane %v1993_v20, %v11066_v58 }
 0x18c   :  { %v1794_v47 = vadd.f32 %v17284_v0, %v1693_v29  ;;  %v2116_v56 = vcombine.low %v2108_v57, %v2115_v11  ;;  %v1913_v53 = vadd.f32 %v1878_v36, %v1787_v2  ;;  %v1914_v27 = vadd.f32 %v1886_v34, %v1788_v24  ;;  %v2199_v34 = vld [vmem:[#allocation3 + $0x110] sm:$0xff] }
 0x18d   :  { %v2184_v30 = vpop.permute.xlu1 %2183  ;;  %v1915_v40 = vadd.f32 %v1885_v38, %v1789_v46  ;;  %v2014_v33 = vcombine.high %v1994_v54, %v1994_v54  ;;  %v1916_v51 = vadd.f32 %v1887_v13, %v1790_v42  ;;  %v2011_v43 = vrot.slane %v1997_v62, %v11066_v58 }
 0x18e   :  { %v2178_v18 = vpop.permute.xlu0 %2177  ;;  %v2021_v48 = vrot.slane %v1994_v54, %v11066_v58  ;;  %v2196_v25 = vsel %vm2189_vm14, %v2174_v28, %v2176_v9  ;;  %v1917_v3 = vadd.f32 %v1895_v44, %v1791_v17  ;;  %v2123_v1 = vcombine.high %v2119_v31, %v2119_v31 }
 0x18f   :  { %v2195_v8 = vsel %vm2189_vm14, %v2176_v9, %v2178_v18  ;;  %v2120_v6 = vmul.f32 %v2116_v56, %v2074_v23  ;;  %v1918_v15 = vadd.f32 %v1903_v10, %v1792_v26  ;;  %v1919_v4 = vadd.f32 %v1902_v14, %v1793_v19  ;;  %v2200_v10 = vld [vmem:[#allocation3 + $0x118] sm:$0xff] }
 0x190   :  { %v2209_v22 = vcombine.low %v2196_v25, %v2195_v8  ;;  %v1920_v63 = vadd.f32 %v1904_v52, %v1794_v47  ;;  %v2012_v36 = vcombine.high %v2004_v50, %v2004_v50  ;;  %v2039_v38 = vadd.f32 %v2004_v50, %v1913_v53 }
 0x191   :  { %v2188_v49 = vpop.permute.xlu1 %2187  ;;  %v2028_v20 = vrot.slane %v2014_v33, %v11066_v58  ;;  %v2194_v32 = vsel %vm2189_vm14, %v2178_v18, %v2180_v45  ;;  %v2013_v9 = vcombine.high %v2011_v43, %v2011_v43  ;;  %v2029_v21 = vcombine.high %v2021_v48, %v2021_v48 }
 0x192   :  { %v2182_v12 = vpop.permute.xlu0 %2181  ;;  %v2130_v57 = vrot.slane %v2119_v31, %v11066_v58  ;;  %v2137_v5 = vrot.slane %v2123_v1, %v11066_v58  ;;  %v2140_v2 = vcombine.high %v2120_v6, %v2120_v6  ;;  %v2217_v59 = vrot.slane %v2209_v22, %v11066_v58 }
 0x193   :  { %v2193_v29 = vsel %vm2189_vm14, %v2180_v45, %v2182_v12  ;;  %v2197_v24 = vsel %vm2189_vm14, %v2188_v49, %v2174_v28  ;;  %v2192_v14 = vsel %vm2189_vm14, %v2182_v12, %v2184_v30  ;;  %v2030_v55 = vcombine.high %v2028_v20, %v2028_v20 }
 0x194   :  { %v2210_v11 = vcombine.low %v2194_v32, %v2193_v29  ;;  %v2147_v42 = vrot.slane %v2120_v6, %v11066_v58  ;;  %v2040_v17 = vadd.f32 %v2012_v36, %v1914_v27  ;;  %v2041_v28 = vadd.f32 %v2011_v43, %v1915_v40 }
 0x195   :  { %v2138_v39 = vcombine.high %v2130_v57, %v2130_v57  ;;  %v2139_v62 = vcombine.high %v2137_v5, %v2137_v5  ;;  %v2154_v19 = vrot.slane %v2140_v2, %v11066_v58  ;;  %v2042_v31 = vadd.f32 %v2013_v9, %v1916_v51 }
 0x196   :  { %v2186_v44 = vpop.permute.xlu0 %2185  ;;  %v2224_v35 = vrot.slane %v2210_v11, %v11066_v58  ;;  %v2043_v56 = vadd.f32 %v2021_v48, %v1917_v3  ;;  %v2045_v52 = vadd.f32 %v2028_v20, %v1919_v4  ;;  %v2046_v50 = vadd.f32 %v2030_v55, %v1920_v63  ;;  %v17285_v20 = vld [vmem:[#allocation14_spill] sm:$0xff]  ;;  %v17289_v55 = vld [vmem:[#allocation16_spill] sm:$0xff] }
 0x197   :  { %v2190_v45 = vsel %vm2189_vm14, %v2186_v44, %v2188_v49  ;;  %v2191_v46 = vsel %vm2189_vm14, %v2184_v30, %v2186_v44  ;;  %v2044_v30 = vadd.f32 %v2029_v21, %v1918_v15  ;;  %v2155_v23 = vcombine.high %v2147_v42, %v2147_v42  ;;  %v17288_v44 = vld [vmem:[#allocation20_spill] sm:$0xff] }
 0x198   :  { %v2226_v54 = vcombine.low %v2192_v14, %v2191_v46  ;;  %v2227_v13 = vcombine.low %v2190_v45, %v2197_v24  ;;  %v2225_v26 = vcombine.low %v2217_v59, %v2224_v35  ;;  %v2165_v53 = vadd.f32 %v2130_v57, %v2039_v38  ;;  %v17287_v59 = vld [vmem:[#allocation15_spill] sm:$0xff] }
 0x199   :  { %v2166_v27 = vadd.f32 %v2138_v39, %v2040_v17  ;;  %v2167_v43 = vadd.f32 %v2137_v5, %v2041_v28  ;;  %v2168_v25 = vadd.f32 %v2139_v62, %v2042_v31  ;;  %v2156_v1 = vcombine.high %v2154_v19, %v2154_v19  ;;  %v17292_v28 = vld [vmem:[#allocation21_spill] sm:$0xff]  ;;  %v17295_v31 = vld [vmem:[#allocation19_spill] sm:$0xff] }
 0x19a   :  { %v2234_v0 = vrot.slane %v2226_v54, %v11066_v58  ;;  %v2241_v47 = vrot.slane %v2227_v13, %v11066_v58  ;;  %v2245_v18 = vmul.f32 %v2225_v26, %v2199_v34  ;;  %v2169_v22 = vadd.f32 %v2147_v42, %v2043_v56  ;;  %v17293_v26 = vld [vmem:[#allocation25_spill] sm:$0xff] }
 0x19b   :  { %v2170_v12 = vadd.f32 %v2155_v23, %v2044_v30  ;;  %v2171_v15 = vadd.f32 %v2154_v19, %v2045_v52  ;;  %v2172_v29 = vadd.f32 %v2156_v1, %v2046_v50  ;;  %v17286_v5 = vcombine.high %v17285_v20, %v17285_v20  ;;  %v17296_v30 = vld [vmem:[#allocation22_spill] sm:$0xff] }
 0x19c   :  { %v2242_v8 = vcombine.low %v2234_v0, %v2241_v47  ;;  %v2249_v40 = vcombine.high %v2245_v18, %v2245_v18  ;;  %v2256_v33 = vrot.slane %v2245_v18, %v11066_v58  ;;  %v17290_v34 = vcombine.high %v17287_v59, %v17287_v59 }
 0x19d   :  { %v17291_v13 = vcombine.high %v17288_v44, %v17288_v44  ;;  %v17294_v0 = vcombine.high %v17289_v55, %v17289_v55  ;;  %v17298_v50 = vcombine.high %v17293_v26, %v17293_v26 }
 0x19e   :  { %v2246_v6 = vmul.f32 %v2242_v8, %v2200_v10  ;;  %v2263_v51 = vrot.slane %v2249_v40, %v11066_v58  ;;  %v2264_v48 = vcombine.high %v2256_v33, %v2256_v33  ;;  %v2291_v3 = vadd.f32 %v2256_v33, %v2165_v53  ;;  %v17299_v8 = vld [vmem:[#allocation29_spill] sm:$0xff] }
 0x19f   :  { %v17297_v10 = vcombine.high %v17292_v28, %v17292_v28  ;;  %v17301_v33 = vcombine.high %v17295_v31, %v17295_v31 }
 0x1a0   :  { %v2266_v4 = vcombine.high %v2246_v6, %v2246_v6  ;;  %v2273_v63 = vrot.slane %v2246_v6, %v11066_v58  ;;  %v2265_v36 = vcombine.high %v2263_v51, %v2263_v51  ;;  %v2292_v49 = vadd.f32 %v2264_v48, %v2166_v27  ;;  %v17300_v27 = vld [vmem:[#allocation33_spill] sm:$0xff]  ;;  %v17303_v6 = vld [vmem:[#allocation23_spill] sm:$0xff] }
 0x1a1   :  { %v2293_v38 = vadd.f32 %v2263_v51, %v2167_v43  ;;  %v2384_v32 = vadd.f32 %v17285_v20, %v2291_v3  ;;  %v17304_v51 = vld [vmem:[#allocation30_spill] sm:$0xff]  ;;  %v17305_v3 = vcombine.high %v17299_v8, %v17299_v8  ;;  %v17309_v20 = vcombine.high %v17303_v6, %v17303_v6 }
 0x1a2   :  { %v2280_v9 = vrot.slane %v2266_v4, %v11066_v58  ;;  %v2281_v21 = vcombine.high %v2273_v63, %v2273_v63  ;;  %v2295_v57 = vadd.f32 %v2273_v63, %v2169_v22  ;;  %v2294_v11 = vadd.f32 %v2265_v36, %v2168_v25  ;;  %v17307_v63 = vld [vmem:[#allocation34_spill] sm:$0xff] }
 0x1a3   :  { %v2385_v2 = vadd.f32 %v17286_v5, %v2292_v49  ;;  %v2386_v24 = vadd.f32 %v17287_v59, %v2293_v38  ;;  %v2477_v14 = vadd.f32 %v17288_v44, %v2384_v32  ;;  %v17302_v25 = vcombine.high %v17296_v30, %v17296_v30  ;;  %v17308_v49 = vld [vmem:[#allocation37_spill] sm:$0xff] }
 0x1a4   :  { %v2282_v35 = vcombine.high %v2280_v9, %v2280_v9  ;;  %v2296_v45 = vadd.f32 %v2281_v21, %v2170_v12  ;;  %v2297_v46 = vadd.f32 %v2280_v9, %v2171_v15  ;;  %v2388_v42 = vadd.f32 %v17289_v55, %v2295_v57  ;;  %v17311_v21 = vld [vmem:[#allocation32_spill] sm:$0xff] }
 0x1a5   :  { %v2387_v54 = vadd.f32 %v17290_v34, %v2294_v11  ;;  %v2478_v17 = vadd.f32 %v17291_v13, %v2385_v2  ;;  %v2479_v39 = vadd.f32 %v17292_v28, %v2386_v24  ;;  %v2570_v62 = vadd.f32 %v17293_v26, %v2477_v14  ;;  %v17312_v11 = vld [vmem:[#allocation35_spill] sm:$0xff]  ;;  %v17315_v14 = vld [vmem:[#allocation38_spill] sm:$0xff]  ;;  %v17319_v13 = vld [vmem:[#allocation36_spill] sm:$0xff] }
 0x1a6   :  { %v2298_v19 = vadd.f32 %v2282_v35, %v2172_v29  ;;  %v2389_v47 = vadd.f32 %v17294_v0, %v2296_v45  ;;  %v2390_v56 = vadd.f32 %v17295_v31, %v2297_v46  ;;  %v2481_v18 = vadd.f32 %v17296_v30, %v2388_v42  ;;  %v17316_v45 = vld [vmem:[#allocation18_spill] sm:$0xff]  ;;  %v17320_v28 = vld [vmem:[#allocation40_spill] sm:$0xff] }
 0x1a7   :  { %v2480_v52 = vadd.f32 %v17297_v10, %v2387_v54  ;;  %v2571_v23 = vadd.f32 %v17298_v50, %v2478_v17  ;;  %v2572_v53 = vadd.f32 %v17299_v8, %v2479_v39  ;;  %v2663_v40 = vadd.f32 %v17300_v27, %v2570_v62 }
 0x1a8   :  { %v2391_v43 = vadd.f32 %v17301_v33, %v2298_v19  ;;  %v2482_v1 = vadd.f32 %v17302_v25, %v2389_v47  ;;  %v2483_v22 = vadd.f32 %v17303_v6, %v2390_v56  ;;  %v2574_v48 = vadd.f32 %v17304_v51, %v2481_v18  ;;  %v17323_v47 = vld [vmem:[#allocation24_spill] sm:$0xff]  ;;  %v17324_v56 = vld [vmem:[#allocation41_spill] sm:$0xff] }
 0x1a9   :  { %v2573_v12 = vadd.f32 %v17305_v3, %v2480_v52  ;;  %v17306_v15 = vcombine.high %v17300_v27, %v17300_v27  ;;  %v2665_v36 = vadd.f32 %v17307_v63, %v2572_v53  ;;  %v2756_v38 = vadd.f32 %v17308_v49, %v2663_v40  ;;  %v17328_v53 = vld [vmem:[#allocation28_spill] sm:$0xff] }
 0x1aa   :  { %v2484_v32 = vadd.f32 %v17309_v20, %v2391_v43  ;;  %v17310_v29 = vcombine.high %v17304_v51, %v17304_v51  ;;  %v2576_v57 = vadd.f32 %v17311_v21, %v2483_v22  ;;  %v2667_v5 = vadd.f32 %v17312_v11, %v2574_v48 }
 0x1ab   :  { %v2664_v4 = vadd.f32 %v17306_v15, %v2571_v23  ;;  %v17313_v2 = vcombine.high %v17307_v63, %v17307_v63  ;;  %v17314_v24 = vcombine.high %v17308_v49, %v17308_v49  ;;  %v2758_v35 = vadd.f32 %v17315_v14, %v2665_v36  ;;  %v17327_v23 = vld [vmem:[#allocation43_spill] sm:$0xff]  ;;  %v17334_v15 = vld [vmem:[#allocation26_spill] sm:$0xff]  ;;  %v17335_v63 = vld [vmem:[#allocation45_spill] sm:$0xff] }
 0x1ac   :  { %v2575_v9 = vadd.f32 %v17310_v29, %v2482_v1  ;;  %v2849_v46 = vadd.f32 %v17316_v45, %v2756_v38  ;;  %v17317_v55 = vcombine.high %v17311_v21, %v17311_v21  ;;  %v17318_v34 = vcombine.high %v17312_v11, %v17312_v11  ;;  %v17331_v1 = vld [vmem:[#allocation31_spill] sm:$0xff] }
 0x1ad   :  { %v2666_v59 = vadd.f32 %v17313_v2, %v2573_v12  ;;  %v2757_v44 = vadd.f32 %v17314_v24, %v2664_v4  ;;  %v2669_v17 = vadd.f32 %v17319_v13, %v2576_v57  ;;  %v2760_v39 = vadd.f32 %v17320_v28, %v2667_v5  ;;  %v17340_v2 = vld [vmem:[#allocation46_spill] sm:$0xff]  ;;  %v17341_v24 = vld [vmem:[#allocation39_spill] sm:$0xff] }
 0x1ae   :  { %v2577_v42 = vadd.f32 %v17317_v55, %v2484_v32  ;;  %v2668_v54 = vadd.f32 %v17318_v34, %v2575_v9  ;;  %v17321_v26 = vcombine.high %v17315_v14, %v17315_v14  ;;  %v17322_v19 = vcombine.high %v17316_v45, %v17316_v45 }
 0x1af   :  { %v2851_v31 = vadd.f32 %v17323_v47, %v2758_v35  ;;  %v2942_v30 = vadd.f32 %v17324_v56, %v2849_v46  ;;  %v17325_v18 = vcombine.high %v17319_v13, %v17319_v13  ;;  %v17326_v52 = vcombine.high %v17320_v28, %v17320_v28  ;;  %v17344_v46 = vld [vmem:[#allocation17_spill] sm:$0xff] }
 0x1b0   :  { %v2759_v62 = vadd.f32 %v17321_v26, %v2666_v59  ;;  %v2850_v0 = vadd.f32 %v17322_v19, %v2757_v44  ;;  %v2762_v8 = vadd.f32 %v17327_v23, %v2669_v17  ;;  %v2853_v27 = vadd.f32 %v17328_v53, %v2760_v39  ;;  %v17347_v17 = vld [vmem:[#allocation42_spill] sm:$0xff]  ;;  %v17348_v39 = vld [vmem:[#allocation27_spill] sm:$0xff]  ;;  %v17349_v26 = vld [vmem:[#allocation8_spill] sm:$0xff] }
 0x1b1   :  { %v2670_v10 = vadd.f32 %v17325_v18, %v2577_v42  ;;  %v2761_v50 = vadd.f32 %v17326_v52, %v2668_v54  ;;  %v17329_v40 = vcombine.high %v17323_v47, %v17323_v47  ;;  %v17330_v43 = vcombine.high %v17324_v56, %v17324_v56  ;;  %v17353_v56 = vld [vmem:[#allocation47_spill] sm:$0xff] }
 0x1b2   :  { %v2944_v6 = vadd.f32 %v17331_v1, %v2851_v31  ;;  %v3035_v22 = vadd.f32 %v12099_v7, %v2942_v30  ;;  %v17332_v51 = vcombine.high %v17327_v23, %v17327_v23  ;;  %v17333_v3 = vcombine.high %v17328_v53, %v17328_v53 }
 0x1b3   :  { %v2852_v33 = vadd.f32 %v17329_v40, %v2759_v62  ;;  %v2943_v25 = vadd.f32 %v17330_v43, %v2850_v0  ;;  %v2855_v4 = vadd.f32 %v17334_v15, %v2762_v8  ;;  %v2946_v36 = vadd.f32 %v17335_v63, %v2853_v27  ;;  %v17356_v8 = vld [vmem:[#allocation6_spill] sm:$0xff]  ;;  %v17358_v40 = vld [vmem:[#allocation11_spill] sm:$0xff] }
 0x1b4   :  { %v2763_v48 = vadd.f32 %v17332_v51, %v2670_v10  ;;  %v2854_v12 = vadd.f32 %v17333_v3, %v2761_v50  ;;  %v17336_v49 = vcombine.high %v17331_v1, %v17331_v1  ;;  %v17337_v20 = vcombine.high %v12099_v7, %v12099_v7  ;;  %v17359_v1 = vld [vmem:[#allocation10_spill] sm:$0xff]  ;;  %v17361_v3 = vld [vmem:[#allocation12_spill] sm:$0xff] }
 0x1b5   :  { %v3037_v29 = vadd.f32 %v12109_v16, %v2944_v6  ;;  %v3128_v9 = vadd.f32 %v12181_v37, %v3035_v22  ;;  %v17338_v21 = vcombine.high %v17334_v15, %v17334_v15  ;;  %v17339_v11 = vcombine.high %v17335_v63, %v17335_v63  ;;  %v17360_v22 = vld [vmem:[#allocation13_spill] sm:$0xff] }
 0x1b6   :  { %v2945_v38 = vadd.f32 %v17336_v49, %v2852_v33  ;;  %v3036_v32 = vadd.f32 %v17337_v20, %v2943_v25  ;;  %v2948_v59 = vadd.f32 %v17340_v2, %v2855_v4  ;;  %v3039_v44 = vadd.f32 %v17341_v24, %v2946_v36  ;;  %v3168_v36 = vld [vmem:[%s16917_s2] sm:$0x3] }
 0x1b7   :  { %v2856_v57 = vadd.f32 %v17338_v21, %v2763_v48  ;;  %v2947_v5 = vadd.f32 %v17339_v11, %v2854_v12  ;;  %v17342_v7 = vcombine.high %v12109_v16, %v12109_v16  ;;  %v17343_v35 = vcombine.high %v12181_v37, %v12181_v37  ;;  %3136 = vst [vmem:[#allocation2 + $0x30] sm:$0x3] %v3128_v9 }
 0x1b8   :  { %v3130_v55 = vadd.f32 %v17344_v46, %v3037_v29  ;;  %v12724_v42 = vadd.f32 %v3144_v60, %v3128_v9  ;;  %v17345_v34 = vcombine.high %v17340_v2, %v17340_v2  ;;  %v17346_v13 = vcombine.high %v17341_v24, %v17341_v24  ;;  %v17351_v60 = vld [vmem:[#allocation9_spill] sm:$0xff] }
 0x1b9   :  { %v3038_v14 = vadd.f32 %v17342_v7, %v2945_v38  ;;  %v3129_v45 = vadd.f32 %v17343_v35, %v3036_v32  ;;  %v3041_v28 = vadd.f32 %v17347_v17, %v2948_v59  ;;  %v3132_v37 = vadd.f32 %v17348_v39, %v3039_v44 }
 0x1ba   :  { %v2949_v54 = vadd.f32 %v17345_v34, %v2856_v57  ;;  %v3040_v16 = vadd.f32 %v17346_v13, %v2947_v5  ;;  %v3147_v62 = vrot.slane %v17349_v26, 2  ;;  %v17350_v19 = vcombine.high %v17344_v46, %v17344_v46  ;;  %3138 = vst [vmem:[#allocation2 + $0x18] sm:$0x3] %v3130_v55  ;;  %3175 = vrot.lane.b32.xlu0 %v12724_v42, %s10668_s1 }
 0x1bb   :  { %3137 = vst [vmem:[#allocation2] sm:$0x3] %v3129_v45  ;;  %v17352_v47 = vrot.slane %v17351_v60, 2  ;;  %v3119_v30 = vcombine.high %v17353_v56, %v17353_v56  ;;  %v17354_v18 = vcombine.high %v17347_v17, %v17347_v17  ;;  %v17355_v52 = vcombine.high %v17348_v39, %v17348_v39  ;;  %3140 = vst [vmem:[#allocation2 + $0x8] sm:$0x3] %v3132_v37 }
 0x1bc   :  { %v3131_v0 = vadd.f32 %v17350_v19, %v3038_v14  ;;  %v3134_v23 = vadd.f32 %v17353_v56, %v3041_v28  ;;  %v17357_v53 = vrot.slane %v17356_v8, 2  ;;  %v3148_v33 = vrot.slane %v17358_v40, 2 }
 0x1bd   :  { %v12740_v31 = vadd.f32 %v17352_v47, %v3129_v45  ;;  %v3042_v10 = vadd.f32 %v17354_v18, %v2949_v54  ;;  %v3133_v50 = vadd.f32 %v17355_v52, %v3040_v16  ;;  %v3149_v6 = vrot.slane %v17359_v1, 2 }
 0x1be   :  { %v12755_v27 = vadd.f32 %v17357_v53, %v3130_v55  ;;  %3139 = vst [vmem:[#allocation2 + $0x10] sm:$0x3] %v3131_v0  ;;  %3142 = vst [vmem:[#allocation2 + $0x28] sm:$0x3] %v3134_v23  ;;  %v12760_v25 = vadd.f32 %v3147_v62, %v3131_v0  ;;  %v3150_v51 = vrot.slane %v17360_v22, 2  ;;  %v12766_v48 = vadd.f32 %v3148_v33, %v3132_v37 }
 0x1bf   :  { %3177 = vrot.lane.b32.xlu1 %v12740_v31, %s10668_s1  ;;  %v3135_v43 = vadd.f32 %v3119_v30, %v3042_v10  ;;  %3141 = vst [vmem:[#allocation2 + $0x20] sm:$0x3] %v3133_v50  ;;  %v3151_v12 = vrot.slane %v17361_v3, 2  ;;  %v12771_v15 = vadd.f32 %v3149_v6, %v3133_v50  ;;  %v4811_v30 = vcombine.low %v12724_v42, %v12740_v31 }
 0x1c0   :  { %3179 = vrot.lane.b32.xlu0 %v12755_v27, %s10668_s1  ;;  %v12775_v4 = vadd.f32 %v3150_v51, %v3134_v23  ;;  %v4812_v47 = vcombine.low %v12755_v27, %v12760_v25  ;;  %v4801_v51 = vld [vmem:[#allocation3 + $0x280] sm:$0xff] }
 0x1c1   :  { %3143 = vst [vmem:[#allocation2 + $0x38] sm:$0x3] %v3135_v43  ;;  %v12779_v63 = vadd.f32 %v3151_v12, %v3135_v43  ;;  %v4819_v23 = vrot.slane %v4811_v30, %v11066_v58  ;;  %v4828_v53 = vcombine.low %v12766_v48, %v12771_v15 }
 0x1c2   :  { %v4826_v18 = vrot.slane %v4812_v47, %v11066_v58 }
 0x1c3   :  { %3181 = vrot.lane.b32.xlu1 %v12760_v25, %s10668_s1  ;;  %v4829_v52 = vcombine.low %v12775_v4, %v12779_v63 }
 0x1c4   :  { %3183 = vrot.lane.b32.xlu0 %v12766_v48, %s10668_s1  ;;  %v4827_v33 = vcombine.low %v4819_v23, %v4826_v18 }
 0x1c5   :  { %v4843_v12 = vrot.slane %v4829_v52, %v11066_v58 }
 0x1c6   :  { %v4847_v1 = vmul.f32 %v4827_v33, %v4801_v51 }
 0x1c7   :  { %3185 = vrot.lane.b32.xlu1 %v12771_v15, %s10668_s1 }
 0x1c8   :  { %3187 = vrot.lane.b32.xlu0 %v12775_v4, %s10668_s1  ;;  %v4851_v8 = vcombine.high %v4847_v1, %v4847_v1 }
 0x1cb   :  { %3189 = vrot.lane.b32.xlu1 %v12779_v63, %s10668_s1 }
 0x1cc   :  { %3300 = vrot.lane.b32.xlu0 %v12724_v42, %s10669_s0 }
 0x1cf   :  { %3302 = vrot.lane.b32.xlu1 %v12740_v31, %s10669_s0 }
 0x1d0   :  { %3304 = vrot.lane.b32.xlu0 %v12755_v27, %s10669_s0 }
 0x1d3   :  { %3306 = vrot.lane.b32.xlu1 %v12760_v25, %s10669_s0 }
 0x1d4   :  { %3308 = vrot.lane.b32.xlu0 %v12766_v48, %s10669_s0 }
 0x1d7   :  { %3310 = vrot.lane.b32.xlu1 %v12771_v15, %s10669_s0 }
 0x1d8   :  { %3312 = vrot.lane.b32.xlu0 %v12775_v4, %s10669_s0 }
 0x1db   :  { %3314 = vrot.lane.b32.xlu1 %v12779_v63, %s10669_s0 }
 0x1dc   :  { %3425 = vrot.lane.b32.xlu0 %v12724_v42, %s10670_s24 }
 0x1df   :  { %3427 = vrot.lane.b32.xlu1 %v12740_v31, %s10670_s24 }
 0x1e0   :  { %3429 = vrot.lane.b32.xlu0 %v12755_v27, %s10670_s24 }
 0x1e3   :  { %3431 = vrot.lane.b32.xlu1 %v12760_v25, %s10670_s24 }
 0x1e4   :  { %3433 = vrot.lane.b32.xlu0 %v12766_v48, %s10670_s24 }
 0x1e7   :  { %3435 = vrot.lane.b32.xlu1 %v12771_v15, %s10670_s24 }
 0x1e8   :  { %3437 = vrot.lane.b32.xlu0 %v12775_v4, %s10670_s24 }
 0x1eb   :  { %3439 = vrot.lane.b32.xlu1 %v12779_v63, %s10670_s24 }
 0x1ec   :  { %3550 = vrot.lane.b32.xlu0 %v12724_v42, %s10671_s25 }
 0x1ef   :  { %3552 = vrot.lane.b32.xlu1 %v12740_v31, %s10671_s25 }
 0x1f0   :  { %3554 = vrot.lane.b32.xlu0 %v12755_v27, %s10671_s25 }
 0x1f3   :  { %3556 = vrot.lane.b32.xlu1 %v12760_v25, %s10671_s25 }
 0x1f4   :  { %3558 = vrot.lane.b32.xlu0 %v12766_v48, %s10671_s25 }
 0x1f7   :  { %3560 = vrot.lane.b32.xlu1 %v12771_v15, %s10671_s25 }
 0x1f8   :  { %3562 = vrot.lane.b32.xlu0 %v12775_v4, %s10671_s25 }
 0x1fb   :  { %3564 = vrot.lane.b32.xlu1 %v12779_v63, %s10671_s25 }
 0x1fc   :  { %3675 = vrot.lane.b32.xlu0 %v12724_v42, %s10672_s26 }
 0x1ff   :  { %3677 = vrot.lane.b32.xlu1 %v12740_v31, %s10672_s26 }
 0x200   :  { %3679 = vrot.lane.b32.xlu0 %v12755_v27, %s10672_s26 }
 0x203   :  { %3681 = vrot.lane.b32.xlu1 %v12760_v25, %s10672_s26 }
 0x204   :  { %3683 = vrot.lane.b32.xlu0 %v12766_v48, %s10672_s26 }
 0x207   :  { %3685 = vrot.lane.b32.xlu1 %v12771_v15, %s10672_s26 }
 0x208   :  { %3687 = vrot.lane.b32.xlu0 %v12775_v4, %s10672_s26 }
 0x20b   :  { %3689 = vrot.lane.b32.xlu1 %v12779_v63, %s10672_s26 }
 0x20c   :  { %3171 = vperm.xlu0 %10566, %v3168_v36   ;;  %v4836_v36 = vrot.slane %v4828_v53, %v11066_v58 }
 0x20e   :  { %v4844_v33 = vcombine.low %v4836_v36, %v4843_v12  ;;  %v13090_v12 = vrot.slane %v4847_v1, %v11066_v58 }
 0x20f   :  { %3800 = vrot.lane.b32.xlu1 %v12724_v42, %s10673_s29 }
 0x210   :  { %3804 = vrot.lane.b32.xlu0 %v12755_v27, %s10673_s29  ;;  %17365 = vst [vmem:[#allocation20_spill] sm:$0xff] %v13090_v12 }
 0x213   :  { %3802 = vrot.lane.b32.xlu1 %v12740_v31, %s10673_s29 }
 0x214   :  { %3808 = vrot.lane.b32.xlu0 %v12766_v48, %s10673_s29 }
 0x217   :  { %3806 = vrot.lane.b32.xlu1 %v12760_v25, %s10673_s29 }
 0x218   :  { %3812 = vrot.lane.b32.xlu0 %v12775_v4, %s10673_s29 }
 0x21b   :  { %3810 = vrot.lane.b32.xlu1 %v12771_v15, %s10673_s29 }
 0x21c   :  { %3925 = vrot.lane.b32.xlu0 %v12724_v42, %s10674_s30 }
 0x21f   :  { %3814 = vrot.lane.b32.xlu1 %v12779_v63, %s10673_s29 }
 0x220   :  { %3929 = vrot.lane.b32.xlu0 %v12755_v27, %s10674_s30 }
 0x223   :  { %3927 = vrot.lane.b32.xlu1 %v12740_v31, %s10674_s30 }
 0x224   :  { %3933 = vrot.lane.b32.xlu0 %v12766_v48, %s10674_s30 }
 0x227   :  { %3931 = vrot.lane.b32.xlu1 %v12760_v25, %s10674_s30 }
 0x228   :  { %3937 = vrot.lane.b32.xlu0 %v12775_v4, %s10674_s30 }
 0x22b   :  { %3935 = vrot.lane.b32.xlu1 %v12771_v15, %s10674_s30 }
 0x22c   :  { %4050 = vrot.lane.b32.xlu0 %v12724_v42, %s10675_s8  ;;  %v12884_v49 = vpop.permute.xlu0 %3175 }
 0x22f   :  { %3939 = vrot.lane.b32.xlu1 %v12779_v63, %s10674_s30 }
 0x230   :  { %4054 = vrot.lane.b32.xlu0 %v12755_v27, %s10675_s8 }
 0x231   :  { %v12888_v38 = vpop.permute.xlu1 %3177 }
 0x232   :  { %v12892_v20 = vpop.permute.xlu0 %3179 }
 0x233   :  { %4052 = vrot.lane.b32.xlu1 %v12740_v31, %s10675_s8  ;;  %v3196_v47 = vsel %vm73_vm0, %v12888_v38, %v12892_v20 }
 0x234   :  { %4058 = vrot.lane.b32.xlu0 %v12766_v48, %s10675_s8 }
 0x235   :  { %v12898_v32 = vpop.permute.xlu1 %3181 }
 0x236   :  { %v12900_v29 = vpop.permute.xlu0 %3183  ;;  %v3195_v30 = vsel %vm73_vm0, %v12892_v20, %v12898_v32  ;;  %v3197_v20 = vsel %vm73_vm0, %v12884_v49, %v12888_v38 }
 0x237   :  { %4056 = vrot.lane.b32.xlu1 %v12760_v25, %s10675_s8  ;;  %v3194_v43 = vsel %vm73_vm0, %v12898_v32, %v12900_v29  ;;  %v5404_v51 = vcombine.low %v3197_v20, %v3196_v47  ;;  %v3211_v38 = vcombine.low %v3196_v47, %v3195_v30 }
 0x238   :  { %4062 = vrot.lane.b32.xlu0 %v12775_v4, %s10675_s8  ;;  %v5405_v23 = vcombine.low %v3195_v30, %v3194_v43 }
 0x239   :  { %v12906_v9 = vpop.permute.xlu1 %3185  ;;  %v5412_v47 = vrot.slane %v5404_v51, %v11066_v58 }
 0x23a   :  { %v12908_v21 = vpop.permute.xlu0 %3187  ;;  %v3193_v32 = vsel %vm73_vm0, %v12900_v29, %v12906_v9  ;;  %v5419_v29 = vrot.slane %v5405_v23, %v11066_v58 }
 0x23b   :  { %4060 = vrot.lane.b32.xlu1 %v12771_v15, %s10675_s8  ;;  %v3227_v26 = vcombine.low %v3194_v43, %v3193_v32 }
 0x23c   :  { %4175 = vrot.lane.b32.xlu0 %v12724_v42, %s10676_s9 }
 0x23d   :  { %v12914_v57 = vpop.permute.xlu1 %3189 }
 0x23e   :  { %v12916_v11 = vpop.permute.xlu0 %3300  ;;  %v3191_v18 = vsel %vm73_vm0, %v12908_v21, %v12914_v57  ;;  %v3198_v52 = vsel %vm73_vm0, %v12914_v57, %v12884_v49  ;;  %v3192_v57 = vsel %vm73_vm0, %v12906_v9, %v12908_v21  ;;  %v4802_v49 = vld [vmem:[#allocation3 + $0x288] sm:$0xff] }
 0x23f   :  { %4064 = vrot.lane.b32.xlu1 %v12779_v63, %s10675_s8  ;;  %v3210_v40 = vcombine.low %v3198_v52, %v3197_v20  ;;  %v3228_v3 = vcombine.low %v3192_v57, %v3191_v18  ;;  %v5422_v60 = vcombine.low %v3191_v18, %v3198_v52  ;;  %v13092_v36 = vmul.f32 %v4844_v33, %v4802_v49 }
 0x240   :  { %4179 = vrot.lane.b32.xlu0 %v12755_v27, %s10676_s9  ;;  %v5421_v43 = vcombine.low %v3193_v32, %v3192_v57  ;;  %v5420_v32 = vcombine.low %v5412_v47, %v5419_v29  ;;  %v3235_v57 = vrot.slane %v3227_v26, %v11066_v58 }
 0x241   :  { %v12922_v5 = vpop.permute.xlu1 %3302  ;;  %v3218_v30 = vrot.slane %v3210_v40, %v11066_v58  ;;  %v3242_v18 = vrot.slane %v3228_v3, %v11066_v58  ;;  %v3225_v3 = vrot.slane %v3211_v38, %v11066_v58 }
 0x242   :  { %v12924_v2 = vpop.permute.xlu0 %3304  ;;  %v3322_v51 = vsel %vm198_vm1, %v12916_v11, %v12922_v5 }
 0x243   :  { %4177 = vrot.lane.b32.xlu1 %v12740_v31, %s10676_s9  ;;  %v3321_v23 = vsel %vm198_vm1, %v12922_v5, %v12924_v2  ;;  %v3200_v5 = vld [vmem:[#allocation3 + $0x1b0] sm:$0xff]  ;;  %v3243_v61 = vcombine.low %v3235_v57, %v3242_v18 }
 0x244   :  { %4183 = vrot.lane.b32.xlu0 %v12766_v48, %s10676_s9  ;;  %v5497_v38 = vcombine.low %v3322_v51, %v3321_v23 }
 0x245   :  { %v12930_v59 = vpop.permute.xlu1 %3306 }
 0x246   :  { %v12932_v24 = vpop.permute.xlu0 %3308  ;;  %v3320_v1 = vsel %vm198_vm1, %v12924_v2, %v12930_v59  ;;  %v5402_v2 = vld [vmem:[#allocation3 + $0x2d0] sm:$0xff] }
 0x247   :  { %4181 = vrot.lane.b32.xlu1 %v12760_v25, %s10676_s9  ;;  %v3319_v9 = vsel %vm198_vm1, %v12930_v59, %v12932_v24  ;;  %v5436_v59 = vrot.slane %v5422_v60, %v11066_v58  ;;  %v3226_v60 = vcombine.low %v3218_v30, %v3225_v3 }
 0x248   :  { %4187 = vrot.lane.b32.xlu0 %v12775_v4, %s10676_s9  ;;  %v5498_v33 = vcombine.low %v3320_v1, %v3319_v9 }
 0x249   :  { %v12938_v44 = vpop.permute.xlu1 %3310 }
 0x24a   :  { %v12940_v7 = vpop.permute.xlu0 %3312 }
 0x24b   :  { %4185 = vrot.lane.b32.xlu1 %v12771_v15, %s10676_s9  ;;  %v3317_v49 = vsel %vm198_vm1, %v12938_v44, %v12940_v7 }
 0x24c   :  { %4300 = vrot.lane.b32.xlu0 %v12724_v42, %s10677_s10 }
 0x24d   :  { %v12946_v14 = vpop.permute.xlu1 %3314 }
 0x24e   :  { %v12948_v35 = vpop.permute.xlu0 %3425  ;;  %v3316_v20 = vsel %vm198_vm1, %v12940_v7, %v12946_v14  ;;  %v3323_v40 = vsel %vm198_vm1, %v12946_v14, %v12916_v11  ;;  %v3318_v14 = vsel %vm198_vm1, %v12932_v24, %v12938_v44  ;;  %v5429_v11 = vrot.slane %v5421_v43, %v11066_v58  ;;  %v3201_v7 = vld [vmem:[#allocation3 + $0x1b8] sm:$0xff] }
 0x24f   :  { %4189 = vrot.lane.b32.xlu1 %v12779_v63, %s10676_s9  ;;  %v3335_v29 = vcombine.low %v3323_v40, %v3322_v51  ;;  %v3353_v47 = vcombine.low %v3317_v49, %v3316_v20  ;;  %v13140_v24 = vrot.slane %v4851_v8, %v11066_v58  ;;  %v5440_v44 = vmul.f32 %v5420_v32, %v5402_v2 }
 0x250   :  { %4304 = vrot.lane.b32.xlu0 %v12755_v27, %s10677_s10  ;;  %v3352_v30 = vcombine.low %v3319_v9, %v3318_v14  ;;  %v5437_v51 = vcombine.low %v5429_v11, %v5436_v59  ;;  %v4868_v8 = vcombine.high %v13092_v36, %v13092_v36  ;;  %v3247_v32 = vmul.f32 %v3243_v61, %v3201_v7 }
 0x251   :  { %v12954_v45 = vpop.permute.xlu1 %3427  ;;  %17367 = vst [vmem:[#allocation21_spill] sm:$0xff] %v13140_v24  ;;  %v3343_v9 = vrot.slane %v3335_v29, %v11066_v58  ;;  %v13163_v2 = vrot.slane %v13092_v36, %v11066_v58  ;;  %v5444_v59 = vcombine.high %v5440_v44, %v5440_v44 }
 0x252   :  { %v12956_v46 = vpop.permute.xlu0 %3429  ;;  %v3267_v7 = vcombine.high %v3247_v32, %v3247_v32 }
 0x253   :  { %4302 = vrot.lane.b32.xlu1 %v12740_v31, %s10677_s10  ;;  %17368 = vst [vmem:[#allocation25_spill] sm:$0xff] %v13163_v2 }
 0x254   :  { %4308 = vrot.lane.b32.xlu0 %v12766_v48, %s10677_s10 }
 0x255   :  { %v12962_v55 = vpop.permute.xlu1 %3431 }
 0x256   :  { %v12964_v34 = vpop.permute.xlu0 %3433 }
 0x257   :  { %4306 = vrot.lane.b32.xlu1 %v12760_v25, %s10677_s10 }
 0x258   :  { %4312 = vrot.lane.b32.xlu0 %v12775_v4, %s10677_s10 }
 0x259   :  { %v12970_v54 = vpop.permute.xlu1 %3435 }
 0x25a   :  { %v12972_v13 = vpop.permute.xlu0 %3437 }
 0x25b   :  { %4310 = vrot.lane.b32.xlu1 %v12771_v15, %s10677_s10 }
 0x25c   :  { %4425 = vrot.lane.b32.xlu0 %v12724_v42, %s10678_s11 }
 0x25d   :  { %v12978_v16 = vpop.permute.xlu1 %3439 }
 0x25e   :  { %v12980_v17 = vpop.permute.xlu0 %3550 }
 0x25f   :  { %4314 = vrot.lane.b32.xlu1 %v12779_v63, %s10677_s10 }
 0x260   :  { %4429 = vrot.lane.b32.xlu0 %v12755_v27, %s10678_s11 }
 0x261   :  { %v12986_v28 = vpop.permute.xlu1 %3552 }
 0x262   :  { %v12988_v39 = vpop.permute.xlu0 %3554 }
 0x263   :  { %4427 = vrot.lane.b32.xlu1 %v12740_v31, %s10678_s11 }
 0x264   :  { %4433 = vrot.lane.b32.xlu0 %v12766_v48, %s10678_s11 }
 0x265   :  { %v12994_v37 = vpop.permute.xlu1 %3556 }
 0x266   :  { %v12996_v62 = vpop.permute.xlu0 %3558 }
 0x267   :  { %4431 = vrot.lane.b32.xlu1 %v12760_v25, %s10678_s11 }
 0x268   :  { %4437 = vrot.lane.b32.xlu0 %v12775_v4, %s10678_s11 }
 0x269   :  { %v13002_v19 = vpop.permute.xlu1 %3560 }
 0x26a   :  { %v13006_v0 = vpop.permute.xlu0 %3562 }
 0x26b   :  { %4435 = vrot.lane.b32.xlu1 %v12771_v15, %s10678_s11 }
 0x26c   :  { %4550 = vrot.lane.b32.xlu0 %v12724_v42, %s10680_s12 }
 0x26d   :  { %v13012_v56 = vpop.permute.xlu1 %3564 }
 0x26e   :  { %v13025_v50 = vpop.permute.xlu0 %3675 }
 0x26f   :  { %4439 = vrot.lane.b32.xlu1 %v12779_v63, %s10678_s11  ;;  %17362 = vst [vmem:[#allocation44_spill] sm:$0xff] %v13025_v50  ;;  %v5514_v50 = vcombine.low %v3318_v14, %v3317_v49 }
 0x270   :  { %4554 = vrot.lane.b32.xlu0 %v12755_v27, %s10680_s12 }
 0x271   :  { %v13021_v10 = vpop.permute.xlu1 %3677  ;;  %v5522_v29 = vrot.slane %v5514_v50, %v11066_v58 }
 0x272   :  { %v13060_v53 = vpop.permute.xlu0 %3679 }
 0x273   :  { %4552 = vrot.lane.b32.xlu1 %v12740_v31, %s10680_s12 }
 0x274   :  { %4558 = vrot.lane.b32.xlu0 %v12766_v48, %s10680_s12 }
 0x275   :  { %v13038_v6 = vpop.permute.xlu1 %3681 }
 0x276   :  { %v13097_v52 = vpop.permute.xlu0 %3683 }
 0x277   :  { %4556 = vrot.lane.b32.xlu1 %v12760_v25, %s10680_s12 }
 0x278   :  { %4562 = vrot.lane.b32.xlu0 %v12775_v4, %s10680_s12 }
 0x279   :  { %v13076_v22 = vpop.permute.xlu1 %3685 }
 0x27a   :  { %17363 = vst [vmem:[#allocation14_spill] sm:$0xff] %v13076_v22  ;;  %v5515_v22 = vcombine.low %v3316_v20, %v3323_v40  ;;  %v13143_v3 = vpop.permute.xlu0 %3687  ;;  %v5403_v20 = vld [vmem:[#allocation3 + $0x2d8] sm:$0xff]  ;;  %v3367_v40 = vrot.slane %v3353_v47, %v11066_v58  ;;  %v13174_v47 = vsel %vm324_vm2, %v12962_v55, %v12964_v34 }
 0x27b   :  { %4560 = vrot.lane.b32.xlu1 %v12771_v15, %s10680_s12  ;;  %v5441_v61 = vmul.f32 %v5437_v51, %v5403_v20  ;;  %v3326_v51 = vld [vmem:[#allocation3 + $0x1c8] sm:$0xff] }
 0x27c   :  { %4675 = vrot.lane.b32.xlu0 %v12724_v42, %s10681_s13  ;;  %v5529_v57 = vrot.slane %v5515_v22, %v11066_v58  ;;  %v5495_v22 = vld [vmem:[#allocation3 + $0x2e0] sm:$0xff] }
 0x27d   :  { %v13087_v21 = vpop.permute.xlu1 %3689 }
 0x27e   :  { %17364 = vst [vmem:[#allocation15_spill] sm:$0xff] %v13087_v21  ;;  %v3336_v21 = vcombine.low %v3321_v23, %v3320_v1  ;;  %v3246_v23 = vmul.f32 %v3226_v60, %v3200_v5  ;;  %v5505_v1 = vrot.slane %v5497_v38, %v11066_v58  ;;  %v3360_v60 = vrot.slane %v3352_v30, %v11066_v58  ;;  %v3325_v30 = vld [vmem:[#allocation3 + $0x1c0] sm:$0xff] }
 0x27f   :  { %4564 = vrot.lane.b32.xlu1 %v12779_v63, %s10680_s12  ;;  %v5530_v20 = vcombine.low %v5522_v29, %v5529_v57  ;;  %v5496_v57 = vld [vmem:[#allocation3 + $0x2e8] sm:$0xff]  ;;  %v13211_v29 = vrot.slane %v3247_v32, %v11066_v58 }
 0x280   :  { %4679 = vrot.lane.b32.xlu0 %v12755_v27, %s10681_s13  ;;  %v3350_v14 = vrot.slane %v3336_v21, %v11066_v58  ;;  %v13181_v21 = vrot.slane %v4868_v8, %v11066_v58  ;;  %v3250_v11 = vcombine.high %v3246_v23, %v3246_v23  ;;  %v3368_v50 = vcombine.low %v3360_v60, %v3367_v40 }
 0x281   :  { %v13134_v26 = vpop.permute.xlu1 %3800  ;;  %v13196_v8 = vsel %vm324_vm2, %v12956_v46, %v12962_v55  ;;  %v13214_v55 = vrot.slane %v5441_v61, %v11066_v58  ;;  %v5534_v18 = vmul.f32 %v5530_v20, %v5496_v57 }
 0x282   :  { %17366 = vst [vmem:[#allocation16_spill] sm:$0xff] %v13134_v26  ;;  %v5512_v26 = vrot.slane %v5498_v33, %v11066_v58  ;;  %17369 = vst [vmem:[#allocation19_spill] sm:$0xff] %v13181_v21  ;;  %v3351_v5 = vcombine.low %v3343_v9, %v3350_v14  ;;  %v13204_v9 = vrot.slane %v3246_v23, %v11066_v58  ;;  %v5588_v21 = vld [vmem:[#allocation3 + $0x2f0] sm:$0xff] }
 0x283   :  { %4677 = vrot.lane.b32.xlu1 %v12740_v31, %s10681_s13  ;;  %v5591_v14 = vcombine.low %v13196_v8, %v13174_v47  ;;  %17372 = vst [vmem:[#allocation33_spill] sm:$0xff] %v13214_v55  ;;  %v13220_v23 = vsel %vm324_vm2, %v12948_v35, %v12954_v45  ;;  %v13232_v33 = vrot.slane %v3267_v7, %v11066_v58 }
 0x284   :  { %4683 = vrot.lane.b32.xlu0 %v12766_v48, %s10681_s13  ;;  %v5513_v49 = vcombine.low %v5505_v1, %v5512_v26  ;;  %v13184_v26 = vrot.slane %v5440_v44, %v11066_v58  ;;  %v13190_v1 = vsel %vm324_vm2, %v12954_v45, %v12956_v46  ;;  %v13201_v44 = vrot.slane %v5444_v59, %v11066_v58 }
 0x285   :  { %v13147_v43 = vpop.permute.xlu1 %3802  ;;  %v5461_v46 = vcombine.high %v5441_v61, %v5441_v61  ;;  %v3371_v32 = vmul.f32 %v3351_v5, %v3325_v30  ;;  %v5590_v61 = vcombine.low %v13220_v23, %v13190_v1  ;;  %v5605_v7 = vrot.slane %v5591_v14, %v11066_v58 }
 0x286   :  { %17370 = vst [vmem:[#allocation22_spill] sm:$0xff] %v13184_v26  ;;  %17371 = vst [vmem:[#allocation29_spill] sm:$0xff] %v13201_v44  ;;  %v5533_v40 = vmul.f32 %v5513_v49, %v5495_v22  ;;  %v13227_v49 = vrot.slane %v3250_v11, %v11066_v58  ;;  %v3372_v22 = vmul.f32 %v3368_v50, %v3326_v51 }
 0x287   :  { %4681 = vrot.lane.b32.xlu1 %v12760_v25, %s10681_s13  ;;  %v13167_v38 = vpop.permute.xlu0 %3171  ;;  %v13252_v57 = vrot.slane %v5461_v46, %v11066_v58  ;;  %v3375_v24 = vcombine.high %v3371_v32, %v3371_v32  ;;  %v5598_v51 = vrot.slane %v5590_v61, %v11066_v58  ;;  %v5554_v44 = vcombine.high %v5534_v18, %v5534_v18 }
 0x288   :  { %4687 = vrot.lane.b32.xlu0 %v12775_v4, %s10681_s13  ;;  %v5537_v50 = vcombine.high %v5533_v40, %v5533_v40  ;;  %v3392_v45 = vcombine.high %v3372_v22, %v3372_v22  ;;  %v13266_v46 = vrot.slane %v5533_v40, %v11066_v58  ;;  %v3448_v11 = vsel %vm324_vm2, %v12978_v16, %v12948_v35 }
 0x289   :  { %v13178_v36 = vpop.permute.xlu1 %3806  ;;  %17373 = vst [vmem:[#allocation23_spill] sm:$0xff] %v13252_v57  ;;  %v13278_v61 = vrot.slane %v3371_v32, %v11066_v58  ;;  %v5606_v55 = vcombine.low %v5598_v51, %v5605_v7  ;;  %v3441_v40 = vsel %vm324_vm2, %v12972_v13, %v12978_v16  ;;  %v13287_v26 = vrot.slane %v3372_v22, %v11066_v58 }
 0x28a   :  { %17374 = vst [vmem:[#allocation30_spill] sm:$0xff] %v13266_v46  ;;  %v13275_v14 = vrot.slane %v5537_v50, %v11066_v58  ;;  %v13290_v35 = vrot.slane %v5534_v18, %v11066_v58  ;;  %v3443_v32 = vsel %vm324_vm2, %v12964_v34, %v12970_v54  ;;  %v3442_v50 = vsel %vm324_vm2, %v12970_v54, %v12972_v13  ;;  %v17385_v46 = vld [vmem:[#allocation44_spill] sm:$0xff] }
 0x28b   :  { %4685 = vrot.lane.b32.xlu1 %v12771_v15, %s10681_s13  ;;  %v13208_v60 = vpop.permute.xlu0 %3804  ;;  %v13305_v22 = vrot.slane %v3375_v24, %v11066_v58  ;;  %v13308_v18 = vrot.slane %v3392_v45, %v11066_v58  ;;  %v3461_v7 = vcombine.low %v13190_v1, %v13196_v8  ;;  %v3460_v34 = vcombine.low %v3448_v11, %v13220_v23 }
 0x28c   :  { %4901 = vrot.lane.b32.xlu0 %v12724_v42, %s10682_s14  ;;  %17375 = vst [vmem:[#allocation34_spill] sm:$0xff] %v13275_v14  ;;  %17376 = vst [vmem:[#allocation37_spill] sm:$0xff] %v13290_v35  ;;  %v13316_v54 = vrot.slane %v5554_v44, %v11066_v58  ;;  %v3478_v13 = vcombine.low %v3442_v50, %v3441_v40  ;;  %v5608_v2 = vcombine.low %v3441_v40, %v3448_v11 }
 0x28d   :  { %v13224_v59 = vpop.permute.xlu1 %3810  ;;  %v5626_v45 = vmul.f32 %v5606_v55, %v5588_v21  ;;  %v3477_v12 = vcombine.low %v13174_v47, %v3443_v32  ;;  %v5607_v1 = vcombine.low %v3443_v32, %v3442_v50  ;;  %v3475_v32 = vrot.slane %v3461_v7, %v11066_v58 }
 0x28e   :  { %17378 = vst [vmem:[#allocation35_spill] sm:$0xff] %v13316_v54  ;;  %v3468_v50 = vrot.slane %v3460_v34, %v11066_v58  ;;  %v3492_v40 = vrot.slane %v3478_v13, %v11066_v58  ;;  %v5622_v23 = vrot.slane %v5608_v2, %v11066_v58  ;;  %v3569_v24 = vsel %vm450_vm3, %v12994_v37, %v12996_v62 }
 0x28f   :  { %4689 = vrot.lane.b32.xlu1 %v12779_v63, %s10681_s13  ;;  %v13245_v30 = vpop.permute.xlu0 %3808  ;;  %v5630_v55 = vcombine.high %v5626_v45, %v5626_v45  ;;  %v3485_v7 = vrot.slane %v3477_v12, %v11066_v58  ;;  %v5615_v34 = vrot.slane %v5607_v1, %v11066_v58  ;;  %v3573_v13 = vsel %vm450_vm3, %v13012_v56, %v12980_v17 }
 0x290   :  { %4905 = vrot.lane.b32.xlu0 %v12755_v27, %s10682_s14  ;;  %v13362_v2 = vrot.slane %v5626_v45, %v11066_v58  ;;  %v3571_v11 = vsel %vm450_vm3, %v12986_v28, %v12988_v39  ;;  %v3570_v12 = vsel %vm450_vm3, %v12988_v39, %v12994_v37  ;;  %v3566_v1 = vsel %vm450_vm3, %v13006_v0, %v13012_v56 }
 0x291   :  { %v13258_v5 = vpop.permute.xlu1 %3814  ;;  %v3476_v47 = vcombine.low %v3468_v50, %v3475_v32  ;;  %v3572_v44 = vsel %vm450_vm3, %v12980_v17, %v12986_v28  ;;  %v5684_v54 = vcombine.low %v3570_v12, %v3569_v24  ;;  %v3568_v39 = vsel %vm450_vm3, %v12996_v62, %v13002_v19  ;;  %v3450_v32 = vld [vmem:[#allocation3 + $0x1d0] sm:$0xff]  ;;  %v3451_v50 = vld [vmem:[#allocation3 + $0x1d8] sm:$0xff] }
 0x292   :  { %17381 = vst [vmem:[#allocation36_spill] sm:$0xff] %v13362_v2  ;;  %v3493_v37 = vcombine.low %v3485_v7, %v3492_v40  ;;  %v5623_v35 = vcombine.low %v5615_v34, %v5622_v23  ;;  %v3567_v56 = vsel %vm450_vm3, %v13002_v19, %v13006_v0  ;;  %v3585_v57 = vcombine.low %v3573_v13, %v3572_v44  ;;  %v5589_v34 = vld [vmem:[#allocation3 + $0x2f8] sm:$0xff] }
 0x293   :  { %4903 = vrot.lane.b32.xlu1 %v12740_v31, %s10682_s14  ;;  %v13284_v20 = vpop.permute.xlu0 %3812  ;;  %v5683_v17 = vcombine.low %v3572_v44, %v3571_v11  ;;  %v3603_v28 = vcombine.low %v3567_v56, %v3566_v1  ;;  %v5701_v14 = vcombine.low %v3566_v1, %v3573_v13  ;;  %v13398_v62 = vsel %vm576_vm4, %v13038_v6, %v13097_v52 }
 0x294   :  { %4909 = vrot.lane.b32.xlu0 %v12766_v48, %s10682_s14  ;;  %v13403_v40 = vrot.slane %v5630_v55, %v11066_v58  ;;  %v3586_v0 = vcombine.low %v3571_v11, %v3570_v12  ;;  %v3602_v7 = vcombine.low %v3569_v24, %v3568_v39  ;;  %v5698_v13 = vrot.slane %v5684_v54, %v11066_v58 }
 0x295   :  { %v13302_v16 = vpop.permute.xlu1 %3927  ;;  %v5700_v1 = vcombine.low %v3568_v39, %v3567_v56  ;;  %v13416_v55 = vsel %vm576_vm4, %v13021_v10, %v13060_v53  ;;  %v13422_v24 = vsel %vm576_vm4, %v13060_v53, %v13038_v6  ;;  %v3496_v11 = vmul.f32 %v3476_v47, %v3450_v32 }
 0x296   :  { %17377 = vst [vmem:[#allocation32_spill] sm:$0xff] %v13302_v16  ;;  %17384 = vst [vmem:[#allocation41_spill] sm:$0xff] %v13403_v40  ;;  %v3497_v12 = vmul.f32 %v3493_v37, %v3451_v50  ;;  %v3593_v19 = vrot.slane %v3585_v57, %v11066_v58  ;;  %v5777_v54 = vcombine.low %v13422_v24, %v13398_v62 }
 0x297   :  { %4907 = vrot.lane.b32.xlu1 %v12760_v25, %s10682_s14  ;;  %v13323_v8 = vpop.permute.xlu0 %3925  ;;  %v5691_v39 = vrot.slane %v5683_v17, %v11066_v58  ;;  %v3617_v56 = vrot.slane %v3603_v28, %v11066_v58  ;;  %v5715_v2 = vrot.slane %v5701_v14, %v11066_v58  ;;  %v3697_v6 = vsel %vm576_vm4, %v17385_v46, %v13021_v10  ;;  %v17388_v28 = vld [vmem:[#allocation15_spill] sm:$0xff] }
 0x298   :  { %4913 = vrot.lane.b32.xlu0 %v12775_v4, %s10682_s14  ;;  %v5627_v47 = vmul.f32 %v5623_v35, %v5589_v34  ;;  %v3600_v37 = vrot.slane %v3586_v0, %v11066_v58  ;;  %v5776_v32 = vcombine.low %v3697_v6, %v13416_v55  ;;  %v3610_v17 = vrot.slane %v3602_v7, %v11066_v58  ;;  %v5681_v34 = vld [vmem:[#allocation3 + $0x300] sm:$0xff] }
 0x299   :  { %v13335_v21 = vpop.permute.xlu1 %3931  ;;  %v5699_v14 = vcombine.low %v5691_v39, %v5698_v13  ;;  %v5708_v10 = vrot.slane %v5700_v1, %v11066_v58  ;;  %v3698_v57 = vsel %vm576_vm4, %v17388_v28, %v17385_v46  ;;  %v3500_v35 = vcombine.high %v3496_v11, %v3496_v11  ;;  %v3575_v1 = vld [vmem:[#allocation3 + $0x1e0] sm:$0xff] }
 0x29a   :  { %17379 = vst [vmem:[#allocation38_spill] sm:$0xff] %v13335_v21  ;;  %v3601_v0 = vcombine.low %v3593_v19, %v3600_v37  ;;  %v5791_v40 = vrot.slane %v5777_v54, %v11066_v58  ;;  %v13460_v7 = vrot.slane %v3496_v11, %v11066_v58  ;;  %v3517_v13 = vcombine.high %v3497_v12, %v3497_v12  ;;  %v3576_v19 = vld [vmem:[#allocation3 + $0x1e8] sm:$0xff] }
 0x29b   :  { %4911 = vrot.lane.b32.xlu1 %v12771_v15, %s10682_s14  ;;  %v13359_v51 = vpop.permute.xlu0 %3929  ;;  %v3618_v39 = vcombine.low %v3610_v17, %v3617_v56  ;;  %v5716_v46 = vcombine.low %v5708_v10, %v5715_v2  ;;  %v5682_v37 = vld [vmem:[#allocation3 + $0x308] sm:$0xff]  ;;  %v5784_v54 = vrot.slane %v5776_v32, %v11066_v58  ;;  %v13478_v56 = vrot.slane %v3497_v12, %v11066_v58 }
 0x29c   :  { %17380 = vst [vmem:[#allocation18_spill] sm:$0xff] %v13359_v51  ;;  %5026 = vrot.lane.b32.xlu0 %v12724_v42, %s10683_s15  ;;  %v5647_v32 = vcombine.high %v5627_v47, %v5627_v47  ;;  %v5719_v17 = vmul.f32 %v5699_v14, %v5681_v34  ;;  %v13491_v14 = vrot.slane %v3500_v35, %v11066_v58 }
 0x29d   :  { %v13378_v45 = vpop.permute.xlu1 %3935  ;;  %v5792_v51 = vcombine.low %v5784_v54, %v5791_v40 }
 0x29e   :  { %17382 = vst [vmem:[#allocation40_spill] sm:$0xff] %v13378_v45 }
 0x29f   :  { %4915 = vrot.lane.b32.xlu1 %v12779_v63, %s10682_s14  ;;  %v13400_v23 = vpop.permute.xlu0 %3933 }
 0x2a0   :  { %17383 = vst [vmem:[#allocation24_spill] sm:$0xff] %v13400_v23  ;;  %5030 = vrot.lane.b32.xlu0 %v12755_v27, %s10683_s15  ;;  %v3710_v23 = vcombine.low %v3698_v57, %v3697_v6  ;;  %v3622_v6 = vmul.f32 %v3618_v39, %v3576_v19  ;;  %v13511_v39 = vrot.slane %v5647_v32, %v11066_v58 }
 0x2a1   :  { %v13409_v44 = vpop.permute.xlu1 %3939 }
 0x2a2   :  { %17393 = vst [vmem:[#allocation46_spill] sm:$0xff] %v13511_v39  ;;  %v17403_v39 = vcombine.high %v13227_v49, %v13227_v49 }
 0x2a3   :  { %5028 = vrot.lane.b32.xlu1 %v12740_v31, %s10683_s15  ;;  %v13436_v53 = vpop.permute.xlu0 %3937 }
 0x2a4   :  { %17386 = vst [vmem:[#allocation43_spill] sm:$0xff] %v13436_v53  ;;  %5034 = vrot.lane.b32.xlu0 %v12766_v48, %s10683_s15  ;;  %v17390_v53 = vld [vmem:[#allocation14_spill] sm:$0xff] }
 0x2a5   :  { %v13444_v50 = vpop.permute.xlu1 %4052  ;;  %v3692_v11 = vsel %vm576_vm4, %v17390_v53, %v13143_v3 }
 0x2a6   :  { %17387 = vst [vmem:[#allocation28_spill] sm:$0xff] %v13444_v50  ;;  %v3691_v50 = vsel %vm576_vm4, %v13143_v3, %v17388_v28  ;;  %v3693_v28 = vsel %vm576_vm4, %v13097_v52, %v17390_v53  ;;  %v3711_v52 = vcombine.low %v13416_v55, %v13422_v24  ;;  %v13485_v3 = vrot.slane %v5627_v47, %v11066_v58 }
 0x2a7   :  { %5032 = vrot.lane.b32.xlu1 %v12760_v25, %s10683_s15  ;;  %v13462_v45 = vpop.permute.xlu0 %4050  ;;  %v3728_v10 = vcombine.low %v3692_v11, %v3691_v50  ;;  %v5794_v21 = vcombine.low %v3691_v50, %v3698_v57  ;;  %v5720_v53 = vmul.f32 %v5716_v46, %v5682_v37  ;;  %v3727_v12 = vcombine.low %v13398_v62, %v3693_v28 }
 0x2a8   :  { %17389 = vst [vmem:[#allocation31_spill] sm:$0xff] %v13462_v45  ;;  %5038 = vrot.lane.b32.xlu0 %v12775_v4, %s10683_s15  ;;  %v3621_v45 = vmul.f32 %v3601_v0, %v3575_v1  ;;  %17392 = vst [vmem:[#allocation45_spill] sm:$0xff] %v13485_v3  ;;  %v5793_v55 = vcombine.low %v3693_v28, %v3692_v11  ;;  %v3718_v24 = vrot.slane %v3710_v23, %v11066_v58 }
 0x2a9   :  { %v13475_v2 = vpop.permute.xlu1 %4056  ;;  %v13501_v47 = vrot.slane %v3517_v13, %v11066_v58  ;;  %v5723_v50 = vcombine.high %v5719_v17, %v5719_v17  ;;  %v3742_v35 = vrot.slane %v3728_v10, %v11066_v58  ;;  %v3725_v0 = vrot.slane %v3711_v52, %v11066_v58  ;;  %v3700_v52 = vld [vmem:[#allocation3 + $0x1f0] sm:$0xff] }
 0x2aa   :  { %17391 = vst [vmem:[#allocation26_spill] sm:$0xff] %v13475_v2  ;;  %v5774_v2 = vld [vmem:[#allocation3 + $0x310] sm:$0xff]  ;;  %v3625_v34 = vcombine.high %v3621_v45, %v3621_v45  ;;  %v5808_v23 = vrot.slane %v5794_v21, %v11066_v58  ;;  %v3642_v13 = vcombine.high %v3622_v6, %v3622_v6  ;;  %v5740_v46 = vcombine.high %v5720_v53, %v5720_v53 }
 0x2ab   :  { %5036 = vrot.lane.b32.xlu1 %v12771_v15, %s10683_s15  ;;  %v13488_v16 = vpop.permute.xlu0 %4054  ;;  %v5812_v1 = vmul.f32 %v5792_v51, %v5774_v2  ;;  %v3735_v19 = vrot.slane %v3727_v12, %v11066_v58  ;;  %v13519_v28 = vrot.slane %v5719_v17, %v11066_v58  ;;  %v5801_v51 = vrot.slane %v5793_v55, %v11066_v58 }
 0x2ac   :  { %5151 = vrot.lane.b32.xlu0 %v12724_v42, %s10684_s16  ;;  %v3726_v21 = vcombine.low %v3718_v24, %v3725_v0  ;;  %v13527_v2 = vrot.slane %v5723_v50, %v11066_v58  ;;  %v13530_v32 = vrot.slane %v3621_v45, %v11066_v58  ;;  %v13533_v10 = vrot.slane %v3622_v6, %v11066_v58  ;;  %v3701_v0 = vld [vmem:[#allocation3 + $0x1f8] sm:$0xff] }
 0x2ad   :  { %v13498_v57 = vpop.permute.xlu1 %4060  ;;  %17394 = vst [vmem:[#allocation39_spill] sm:$0xff] %v13519_v28  ;;  %v3743_v17 = vcombine.low %v3735_v19, %v3742_v35  ;;  %v13536_v12 = vrot.slane %v3625_v34, %v11066_v58  ;;  %v13539_v55 = vrot.slane %v5720_v53, %v11066_v58  ;;  %v5816_v24 = vcombine.high %v5812_v1, %v5812_v1  ;;  %v5775_v53 = vld [vmem:[#allocation3 + $0x318] sm:$0xff] }
 0x2ae   :  { %17395 = vst [vmem:[#allocation17_spill] sm:$0xff] %v13527_v2  ;;  %v5809_v54 = vcombine.low %v5801_v51, %v5808_v23  ;;  %v13548_v50 = vrot.slane %v3642_v13, %v11066_v58  ;;  %v13551_v35 = vrot.slane %v5740_v46, %v11066_v58  ;;  %v13560_v51 = vrot.slane %v5812_v1, %v11066_v58  ;;  %v17402_v1 = vld [vmem:[#allocation16_spill] sm:$0xff] }
 0x2af   :  { %5040 = vrot.lane.b32.xlu1 %v12779_v63, %s10683_s15  ;;  %v13514_v37 = vpop.permute.xlu0 %4058  ;;  %17396 = vst [vmem:[#allocation42_spill] sm:$0xff] %v13539_v55  ;;  %v3746_v62 = vmul.f32 %v3726_v21, %v3700_v52  ;;  %v3747_v45 = vmul.f32 %v3743_v17, %v3701_v0  ;;  %v13577_v52 = vrot.slane %v5816_v24, %v11066_v58 }
 0x2b0   :  { %5155 = vrot.lane.b32.xlu0 %v12755_v27, %s10684_s16  ;;  %17397 = vst [vmem:[#allocation27_spill] sm:$0xff] %v13551_v35  ;;  %17398 = vst [vmem:[#allocation47_spill] sm:$0xff] %v13560_v51  ;;  %v5813_v19 = vmul.f32 %v5809_v54, %v5775_v53  ;;  %v17401_v17 = vcombine.high %v13204_v9, %v13204_v9  ;;  %v3294_v21 = vadd.f32 %v13227_v49, %v13167_v38 }
 0x2b1   :  { %v13524_v11 = vpop.permute.xlu1 %4064  ;;  %17400 = vst [vmem:[#allocation15_spill] sm:$0xff] %v13577_v52  ;;  %v3750_v53 = vcombine.high %v3746_v62, %v3746_v62  ;;  %v3822_v46 = vsel %vm702_vm5, %v17402_v1, %v13147_v43  ;;  %v3292_v23 = vadd.f32 %v13204_v9, %v13167_v38  ;;  %v13606_v6 = vrot.slane %v3746_v62, %v11066_v58 }
 0x2b2   :  { %v3293_v0 = vadd.f32 %v17401_v17, %v13167_v38  ;;  %v3767_v40 = vcombine.high %v3747_v45, %v3747_v45  ;;  %v13609_v54 = vrot.slane %v3747_v45, %v11066_v58  ;;  %v13615_v35 = vsel %vm702_vm5, %v13178_v36, %v13245_v30 }
 0x2b3   :  { %5153 = vrot.lane.b32.xlu1 %v12740_v31, %s10684_s16  ;;  %v13553_v34 = vpop.permute.xlu0 %4062  ;;  %v5833_v55 = vcombine.high %v5813_v19, %v5813_v19  ;;  %v3295_v62 = vadd.f32 %v17403_v39, %v13167_v38  ;;  %v13627_v45 = vsel %vm702_vm5, %v13258_v5, %v17402_v1  ;;  %v3820_v9 = vsel %vm702_vm5, %v13208_v60, %v13178_v36 }
 0x2b4   :  { %5159 = vrot.lane.b32.xlu0 %v12766_v48, %s10684_s16  ;;  %v3821_v49 = vsel %vm702_vm5, %v13147_v43, %v13208_v60  ;;  %v17404_v39 = vcombine.high %v13278_v61, %v13278_v61  ;;  %v3419_v1 = vadd.f32 %v13305_v22, %v3294_v21  ;;  %v13646_v2 = vrot.slane %v3750_v53, %v11066_v58 }
 0x2b5   :  { %v13564_v13 = vpop.permute.xlu1 %4177  ;;  %v13649_v3 = vrot.slane %v5813_v19, %v11066_v58  ;;  %v5870_v36 = vcombine.low %v3820_v9, %v13615_v35  ;;  %v3417_v28 = vadd.f32 %v13278_v61, %v3292_v23  ;;  %v3765_v60 = vcombine.high %v13606_v6, %v13606_v6 }
 0x2b6   :  { %17399 = vst [vmem:[#allocation44_spill] sm:$0xff] %v13564_v13  ;;  %v3418_v52 = vadd.f32 %v17404_v39, %v3293_v0  ;;  %v13660_v21 = vrot.slane %v3767_v40, %v11066_v58  ;;  %v3835_v19 = vcombine.low %v13627_v45, %v3822_v46  ;;  %v17408_v61 = vcombine.high %v13211_v29, %v13211_v29 }
 0x2b7   :  { %5157 = vrot.lane.b32.xlu1 %v12760_v25, %s10684_s16  ;;  %v13591_v24 = vpop.permute.xlu0 %4175  ;;  %17406 = vst [vmem:[#allocation16_spill] sm:$0xff] %v13649_v3  ;;  %v5869_v53 = vcombine.low %v3822_v46, %v3821_v49  ;;  %v3298_v40 = vadd.f32 %v13232_v33, %v13167_v38  ;;  %v3836_v0 = vcombine.low %v3821_v49, %v3820_v9 }
 0x2b8   :  { %5163 = vrot.lane.b32.xlu0 %v12775_v4, %s10684_s16  ;;  %v3297_v23 = vadd.f32 %v17408_v61, %v13167_v38  ;;  %v17410_v13 = vcombine.high %v13460_v7, %v13460_v7  ;;  %v3544_v46 = vadd.f32 %v13491_v14, %v3419_v1  ;;  %v13696_v9 = vsel %vm702_vm5, %v13224_v59, %v13284_v20 }
 0x2b9   :  { %v13603_v17 = vpop.permute.xlu1 %4181  ;;  %v17413_v49 = vcombine.high %v13491_v14, %v13491_v14 }
 0x2bb   :  { %5161 = vrot.lane.b32.xlu1 %v12771_v15, %s10684_s16  ;;  %v13643_v51 = vpop.permute.xlu0 %4179 }
 0x2bc   :  { %17405 = vst [vmem:[#allocation14_spill] sm:$0xff] %v13643_v51  ;;  %5276 = vrot.lane.b32.xlu0 %v12724_v42, %s10685_s17  ;;  %v17409_v42 = vcombine.high %v13305_v22, %v13305_v22  ;;  %v3543_v51 = vadd.f32 %v17410_v13, %v3418_v52  ;;  %v5884_v22 = vrot.slane %v5870_v36, %v11066_v58 }
 0x2bd   :  { %v13655_v43 = vpop.permute.xlu1 %4185  ;;  %v13703_v52 = vrot.slane %v5833_v55, %v11066_v58 }
 0x2be   :  { %17407 = vst [vmem:[#allocation48_spill] sm:$0xff] %v13655_v43  ;;  %v3420_v39 = vadd.f32 %v17409_v42, %v3295_v62  ;;  %v3296_v43 = vadd.f32 %v13211_v29, %v13167_v38  ;;  %v3542_v62 = vadd.f32 %v13460_v7, %v3417_v28  ;;  %v13690_v29 = vsel %vm702_vm5, %v13284_v20, %v13258_v5 }
 0x2bf   :  { %5165 = vrot.lane.b32.xlu1 %v12779_v63, %s10684_s16  ;;  %v13682_v61 = vpop.permute.xlu0 %4183  ;;  %17411 = vst [vmem:[#allocation49_spill] sm:$0xff] %v13703_v52  ;;  %v17412_v7 = vcombine.high %v13232_v33, %v13232_v33  ;;  %v13713_v28 = vsel %vm702_vm5, %v13245_v30, %v13224_v59  ;;  %v3843_v20 = vrot.slane %v3835_v19, %v11066_v58 }
 0x2c0   :  { %5280 = vrot.lane.b32.xlu0 %v12755_v27, %s10685_s17  ;;  %v5877_v27 = vrot.slane %v5869_v53, %v11066_v58  ;;  %v3545_v55 = vadd.f32 %v17413_v49, %v3420_v39  ;;  %v3421_v1 = vadd.f32 %v13287_v26, %v3296_v43  ;;  %v17414_v33 = vcombine.high %v13287_v26, %v13287_v26  ;;  %v5867_v39 = vld [vmem:[#allocation3 + $0x320] sm:$0xff] }
 0x2c1   :  { %v13700_v13 = vpop.permute.xlu1 %4189  ;;  %v3299_v5 = vadd.f32 %v17412_v7, %v13167_v38  ;;  %v3850_v59 = vrot.slane %v3836_v0, %v11066_v58  ;;  %v17415_v30 = vcombine.high %v13530_v32, %v13530_v32  ;;  %v3669_v19 = vadd.f32 %v13536_v12, %v3544_v46 }
 0x2c2   :  { %v3422_v38 = vadd.f32 %v17414_v33, %v3297_v23  ;;  %v3853_v14 = vcombine.low %v13696_v9, %v13690_v29  ;;  %v3852_v26 = vcombine.low %v13615_v35, %v13713_v28  ;;  %v5885_v43 = vcombine.low %v5877_v27, %v5884_v22 }
 0x2c3   :  { %5278 = vrot.lane.b32.xlu1 %v12740_v31, %s10685_s17  ;;  %v3668_v36 = vadd.f32 %v17415_v30, %v3543_v51  ;;  %v13733_v53 = vpop.permute.xlu0 %4187  ;;  %v3667_v23 = vadd.f32 %v13530_v32, %v3542_v62  ;;  %v3423_v31 = vadd.f32 %v13308_v18, %v3298_v40  ;;  %v3766_v51 = vcombine.high %v13646_v2, %v13646_v2  ;;  %v3825_v62 = vld [vmem:[#allocation3 + $0x200] sm:$0xff] }
 0x2c4   :  { %5284 = vrot.lane.b32.xlu0 %v12766_v48, %s10685_s17  ;;  %v3851_v46 = vcombine.low %v3843_v20, %v3850_v59  ;;  %v17416_v35 = vcombine.high %v13308_v18, %v13308_v18  ;;  %v3783_v32 = vcombine.high %v13660_v21, %v13660_v21  ;;  %v17417_v48 = vcombine.high %v13536_v12, %v13536_v12 }
 0x2c5   :  { %v13741_v0 = vpop.permute.xlu1 %4302  ;;  %v3546_v7 = vadd.f32 %v13478_v56, %v3421_v1  ;;  %v17418_v27 = vcombine.high %v13478_v56, %v13478_v56  ;;  %v13766_v20 = vadd.f32 %v13646_v2, %v3669_v19  ;;  %v3867_v12 = vrot.slane %v3853_v14, %v11066_v58 }
 0x2c6   :  { %v3424_v22 = vadd.f32 %v17416_v35, %v3299_v5  ;;  %v3670_v40 = vadd.f32 %v17417_v48, %v3545_v55  ;;  %v13763_v5 = vadd.f32 %v3765_v60, %v3668_v36  ;;  %v3860_v1 = vrot.slane %v3852_v26, %v11066_v58 }
 0x2c7   :  { %v3547_v49 = vadd.f32 %v17418_v27, %v3422_v38  ;;  %5282 = vrot.lane.b32.xlu1 %v12760_v25, %s10685_s17  ;;  %v13769_v55 = vpop.permute.xlu0 %4300  ;;  %v5905_v33 = vmul.f32 %v5885_v43, %v5867_v39  ;;  %v3792_v56 = vadd.f32 %v13606_v6, %v3667_v23  ;;  %v3548_v38 = vadd.f32 %v13501_v47, %v3423_v31  ;;  %v17422_v43 = vld [vmem:[#allocation38_spill] sm:$0xff]  ;;  %v17424_v39 = vld [vmem:[#allocation24_spill] sm:$0xff] }
 0x2c8   :  { %5288 = vrot.lane.b32.xlu0 %v12775_v4, %s10685_s17  ;;  %v3871_v60 = vmul.f32 %v3851_v46, %v3825_v62  ;;  %v17419_v2 = vcombine.high %v13501_v47, %v13501_v47  ;;  %v5886_v30 = vcombine.low %v13713_v28, %v13696_v9  ;;  %v13787_v6 = vsel %vm828_vm6, %v13409_v44, %v13323_v8  ;;  %v17421_v28 = vld [vmem:[#allocation32_spill] sm:$0xff]  ;;  %v17423_v23 = vld [vmem:[#allocation18_spill] sm:$0xff] }
 0x2c9   :  { %v13776_v25 = vpop.permute.xlu1 %4306  ;;  %v13789_v36 = vadd.f32 %v3766_v51, %v3670_v40  ;;  %v3671_v4 = vadd.f32 %v13533_v10, %v3546_v7  ;;  %v17420_v19 = vcombine.high %v13533_v10, %v13533_v10  ;;  %v5887_v47 = vcombine.low %v13690_v29, %v13627_v45 }
 0x2ca   :  { %v3549_v59 = vadd.f32 %v17419_v2, %v3424_v22  ;;  %v3868_v9 = vcombine.low %v3860_v1, %v3867_v12  ;;  %v3947_v26 = vsel %vm828_vm6, %v13323_v8, %v17421_v28  ;;  %v3945_v31 = vsel %vm828_vm6, %v17423_v23, %v17422_v43  ;;  %v17426_v12 = vld [vmem:[#allocation43_spill] sm:$0xff] }
 0x2cb   :  { %v3672_v14 = vadd.f32 %v17420_v19, %v3547_v49  ;;  %5286 = vrot.lane.b32.xlu1 %v12771_v15, %s10685_s17  ;;  %v3946_v10 = vsel %vm828_vm6, %v17421_v28, %v17423_v23  ;;  %v13811_v45 = vpop.permute.xlu0 %4304  ;;  %v5909_v29 = vcombine.high %v5905_v33, %v5905_v33  ;;  %v3826_v15 = vld [vmem:[#allocation3 + $0x208] sm:$0xff]  ;;  %v3673_v51 = vadd.f32 %v13548_v50, %v3548_v38  ;;  %v17427_v38 = vld [vmem:[#allocation40_spill] sm:$0xff] }
 0x2cc   :  { %v3944_v8 = vsel %vm828_vm6, %v17422_v43, %v17424_v39  ;;  %v3960_v46 = vcombine.low %v13787_v6, %v3947_v26  ;;  %v3875_v22 = vcombine.high %v3871_v60, %v3871_v60  ;;  %v3882_v48 = vrot.slane %v3871_v60, %v11066_v58 }
 0x2cd   :  { %v13819_v35 = vpop.permute.xlu1 %4310  ;;  %v17425_v40 = vcombine.high %v13548_v50, %v13548_v50  ;;  %v5894_v7 = vrot.slane %v5886_v30, %v11066_v58  ;;  %v5901_v27 = vrot.slane %v5887_v47, %v11066_v58  ;;  %v3961_v49 = vcombine.low %v3946_v10, %v3945_v31 }
 0x2ce   :  { %v3941_v1 = vsel %vm828_vm6, %v17426_v12, %v13409_v44  ;;  %v3942_v2 = vsel %vm828_vm6, %v17427_v38, %v17426_v12  ;;  %v13838_v50 = vrot.slane %v5905_v33, %v11066_v58  ;;  %v3796_v60 = vadd.f32 %v13609_v54, %v3671_v4 }
 0x2cf   :  { %v3674_v62 = vadd.f32 %v17425_v40, %v3549_v59  ;;  %5290 = vrot.lane.b32.xlu1 %v12779_v63, %s10685_s17  ;;  %v3872_v59 = vmul.f32 %v3868_v9, %v3826_v15  ;;  %v5963_v30 = vcombine.low %v3945_v31, %v3944_v8  ;;  %v13841_v19 = vpop.permute.xlu0 %4308  ;;  %v13844_v47 = vrot.slane %v5909_v29, %v11066_v58  ;;  %v5868_v40 = vld [vmem:[#allocation3 + $0x328] sm:$0xff] }
 0x2d0   :  { %v17429_v44 = vcombine.high %v13609_v54, %v13609_v54  ;;  %v3943_v63 = vsel %vm828_vm6, %v17424_v39, %v17427_v38  ;;  %v3968_v33 = vrot.slane %v3960_v46, %v11066_v58  ;;  %v13859_v9 = vadd.f32 %v13660_v21, %v3673_v51 }
 0x2d1   :  { %17428 = vst [vmem:[#allocation32_spill] sm:$0xff] %v13844_v47  ;;  %v13856_v4 = vpop.permute.xlu1 %4314  ;;  %v13861_v43 = vadd.f32 %v3783_v32, %v3674_v62  ;;  %v5962_v23 = vcombine.low %v3947_v26, %v3946_v10  ;;  %v3978_v31 = vcombine.low %v3942_v2, %v3941_v1  ;;  %v3889_v54 = vrot.slane %v3875_v22, %v11066_v58  ;;  %v4076_v47 = vld [vmem:[#allocation3 + $0x228] sm:$0xff] }
 0x2d2   :  { %v13849_v28 = vadd.f32 %v17429_v44, %v3672_v14  ;;  %v3890_v14 = vcombine.high %v3882_v48, %v3882_v48  ;;  %v5902_v29 = vcombine.low %v5894_v7, %v5901_v27  ;;  %v3975_v15 = vrot.slane %v3961_v49, %v11066_v58 }
 0x2d3   :  { %v3892_v46 = vcombine.high %v3872_v59, %v3872_v59  ;;  %v3977_v12 = vcombine.low %v3944_v8, %v3943_v63  ;;  %v5977_v38 = vrot.slane %v5963_v30, %v11066_v58  ;;  %v13868_v21 = vpop.permute.xlu0 %4312  ;;  %v5979_v10 = vcombine.low %v3943_v63, %v3942_v2  ;;  %v3950_v8 = vld [vmem:[#allocation3 + $0x210] sm:$0xff] }
 0x2d4   :  { %v3976_v26 = vcombine.low %v3968_v33, %v3975_v15  ;;  %v5980_v51 = vcombine.low %v3941_v1, %v13787_v6  ;;  %v13875_v62 = vadd.f32 %v3882_v48, %v3792_v56  ;;  %v3899_v7 = vrot.slane %v3872_v59, %v11066_v58  ;;  %v17430_v1 = vld [vmem:[#allocation31_spill] sm:$0xff] }
 0x2d5   :  { %v13873_v22 = vpop.permute.xlu1 %4427  ;;  %v5970_v27 = vrot.slane %v5962_v23, %v11066_v58  ;;  %v3992_v49 = vrot.slane %v3978_v31, %v11066_v58  ;;  %v3891_v30 = vcombine.high %v3889_v54, %v3889_v54  ;;  %v13881_v44 = vadd.f32 %v3890_v14, %v13763_v5  ;;  %v5960_v5 = vld [vmem:[#allocation3 + $0x330] sm:$0xff] }
 0x2d6   :  { %v13884_v33 = vadd.f32 %v3889_v54, %v13766_v20  ;;  %v5906_v2 = vmul.f32 %v5902_v29, %v5868_v40  ;;  %v13887_v6 = vrot.slane %v3892_v46, %v11066_v58  ;;  %v3985_v56 = vrot.slane %v3977_v12, %v11066_v58  ;;  %v17431_v54 = vld [vmem:[#allocation26_spill] sm:$0xff]  ;;  %v17432_v40 = vld [vmem:[#allocation28_spill] sm:$0xff] }
 0x2d7   :  { %v5978_v48 = vcombine.low %v5970_v27, %v5977_v38  ;;  %v13894_v59 = vsel %vm954_vm7, %v13524_v11, %v17430_v1  ;;  %v13896_v63 = vpop.permute.xlu0 %4425  ;;  %v3996_v23 = vmul.f32 %v3976_v26, %v3950_v8  ;;  %v5987_v20 = vrot.slane %v5979_v10, %v11066_v58  ;;  %v3951_v27 = vld [vmem:[#allocation3 + $0x218] sm:$0xff] }
 0x2d8   :  { %v5994_v31 = vrot.slane %v5980_v51, %v11066_v58  ;;  %v4069_v14 = vsel %vm954_vm7, %v17431_v54, %v13514_v37  ;;  %v3993_v15 = vcombine.low %v3985_v56, %v3992_v49  ;;  %v4072_v46 = vsel %vm954_vm7, %v17430_v1, %v17432_v40 }
 0x2d9   :  { %v13904_v29 = vpop.permute.xlu1 %4431  ;;  %v4070_v12 = vsel %vm954_vm7, %v13488_v16, %v17431_v54  ;;  %v4071_v38 = vsel %vm954_vm7, %v17432_v40, %v13488_v16  ;;  %v13919_v26 = vadd.f32 %v3891_v30, %v13789_v36  ;;  %v3907_v10 = vcombine.high %v3899_v7, %v3899_v7 }
 0x2da   :  { %v13921_v51 = vadd.f32 %v3899_v7, %v3796_v60  ;;  %v4085_v8 = vcombine.low %v13894_v59, %v4072_v46  ;;  %v5998_v49 = vmul.f32 %v5978_v48, %v5960_v5  ;;  %v6056_v56 = vcombine.low %v4070_v12, %v4069_v14  ;;  %v5961_v5 = vld [vmem:[#allocation3 + $0x338] sm:$0xff] }
 0x2db   :  { %v4066_v1 = vsel %vm954_vm7, %v13553_v34, %v13524_v11  ;;  %v4067_v16 = vsel %vm954_vm7, %v13498_v57, %v13553_v34  ;;  %v13932_v36 = vpop.permute.xlu0 %4429  ;;  %v5926_v30 = vcombine.high %v5906_v2, %v5906_v2  ;;  %v4000_v60 = vcombine.high %v3996_v23, %v3996_v23 }
 0x2dc   :  { %v5995_v7 = vcombine.low %v5987_v20, %v5994_v31  ;;  %v4086_v54 = vcombine.low %v4071_v38, %v4070_v12  ;;  %v13937_v48 = vrot.slane %v5906_v2, %v11066_v58  ;;  %v3997_v18 = vmul.f32 %v3993_v15, %v3951_v27 }
 0x2dd   :  { %v13934_v40 = vpop.permute.xlu1 %4435  ;;  %v6055_v32 = vcombine.low %v4072_v46, %v4071_v38  ;;  %v4068_v11 = vsel %vm954_vm7, %v13514_v37, %v13498_v57  ;;  %v3908_v34 = vcombine.high %v13887_v6, %v13887_v6  ;;  %v13946_v42 = vadd.f32 %v3907_v10, %v13849_v28 }
 0x2de   :  { %17433 = vst [vmem:[#allocation38_spill] sm:$0xff] %v13937_v48  ;;  %v4093_v20 = vrot.slane %v4085_v8, %v11066_v58  ;;  %v4103_v31 = vcombine.low %v4067_v16, %v4066_v1  ;;  %v13951_v2 = vadd.f32 %v13887_v6, %v13859_v9  ;;  %v6002_v15 = vcombine.high %v5998_v49, %v5998_v49 }
 0x2df   :  { %v4007_v46 = vrot.slane %v3996_v23, %v11066_v58  ;;  %v6070_v12 = vrot.slane %v6056_v56, %v11066_v58  ;;  %v13955_v38 = vpop.permute.xlu0 %4433  ;;  %v4014_v57 = vrot.slane %v4000_v60, %v11066_v58  ;;  %v5999_v37 = vmul.f32 %v5995_v7, %v5961_v5 }
 0x2e0   :  { %v4100_v28 = vrot.slane %v4086_v54, %v11066_v58  ;;  %v4102_v10 = vcombine.low %v4069_v14, %v4068_v11  ;;  %v4017_v8 = vcombine.high %v3997_v18, %v3997_v18  ;;  %v6063_v39 = vrot.slane %v6055_v32, %v11066_v58 }
 0x2e1   :  { %v13959_v27 = vpop.permute.xlu1 %4439  ;;  %v6072_v9 = vcombine.low %v4068_v11, %v4067_v16  ;;  %v6073_v6 = vcombine.low %v4066_v1, %v13894_v59  ;;  %v13964_v23 = vrot.slane %v5926_v30, %v11066_v58  ;;  %v13967_v56 = vrot.slane %v5998_v49, %v11066_v58  ;;  %v4075_v16 = vld [vmem:[#allocation3 + $0x220] sm:$0xff] }
 0x2e2   :  { %v4101_v52 = vcombine.low %v4093_v20, %v4100_v28  ;;  %v4117_v60 = vrot.slane %v4103_v31, %v11066_v58  ;;  %v13973_v7 = vrot.slane %v6002_v15, %v11066_v58  ;;  %v4015_v54 = vcombine.high %v4007_v46, %v4007_v46  ;;  %v6053_v30 = vld [vmem:[#allocation3 + $0x340] sm:$0xff] }
 0x2e3   :  { %17434 = vst [vmem:[#allocation18_spill] sm:$0xff] %v13964_v23  ;;  %17435 = vst [vmem:[#allocation24_spill] sm:$0xff] %v13967_v56  ;;  %v6071_v32 = vcombine.low %v6063_v39, %v6070_v12  ;;  %v13975_v5 = vpop.permute.xlu0 %4437  ;;  %v3924_v59 = vadd.f32 %v3908_v34, %v13861_v43  ;;  %v4024_v1 = vrot.slane %v3997_v18, %v11066_v58 }
 0x2e4   :  { %17436 = vst [vmem:[#allocation43_spill] sm:$0xff] %v13973_v7  ;;  %v6019_v49 = vcombine.high %v5999_v37, %v5999_v37  ;;  %v4110_v11 = vrot.slane %v4102_v10, %v11066_v58  ;;  %v4016_v31 = vcombine.high %v4014_v57, %v4014_v57  ;;  %v4031_v28 = vrot.slane %v4017_v8, %v11066_v58 }
 0x2e5   :  { %v13980_v20 = vpop.permute.xlu1 %4552  ;;  %v6080_v15 = vrot.slane %v6072_v9, %v11066_v58  ;;  %v6087_v39 = vrot.slane %v6073_v6, %v11066_v58  ;;  %v4121_v18 = vmul.f32 %v4101_v52, %v4075_v16  ;;  %v4042_v14 = vadd.f32 %v4007_v46, %v13875_v62 }
 0x2e6   :  { %v4118_v34 = vcombine.low %v4110_v11, %v4117_v60  ;;  %v4043_v48 = vadd.f32 %v4015_v54, %v13881_v44  ;;  %v6091_v8 = vmul.f32 %v6071_v32, %v6053_v30  ;;  %v4044_v6 = vadd.f32 %v4014_v57, %v13884_v33  ;;  %v17440_v32 = vld [vmem:[#allocation14_spill] sm:$0xff] }
 0x2e7   :  { %v13993_v9 = vpop.permute.xlu0 %4550  ;;  %v4032_v3 = vcombine.high %v4024_v1, %v4024_v1  ;;  %v4046_v12 = vadd.f32 %v4024_v1, %v13921_v51  ;;  %v13998_v43 = vrot.slane %v5999_v37, %v11066_v58  ;;  %v4045_v60 = vadd.f32 %v4016_v31, %v13919_v26  ;;  %v6054_v37 = vld [vmem:[#allocation3 + $0x348] sm:$0xff]  ;;  %v17441_v1 = vld [vmem:[#allocation44_spill] sm:$0xff] }
 0x2e8   :  { %v4033_v16 = vcombine.high %v4031_v28, %v4031_v28  ;;  %v14004_v62 = vrot.slane %v6019_v49, %v11066_v58  ;;  %v6088_v44 = vcombine.low %v6080_v15, %v6087_v39  ;;  %v4125_v46 = vcombine.high %v4121_v18, %v4121_v18 }
 0x2e9   :  { %17437 = vst [vmem:[#allocation40_spill] sm:$0xff] %v13998_v43  ;;  %v14000_v52 = vpop.permute.xlu1 %4556  ;;  %v4122_v54 = vmul.f32 %v4118_v34, %v4076_v47  ;;  %v14010_v33 = vsel %vm1080_vm8, %v13603_v17, %v13682_v61  ;;  %v4198_v51 = vsel %vm1080_vm8, %v13700_v13, %v13591_v24  ;;  %v6095_v57 = vcombine.high %v6091_v8, %v6091_v8 }
 0x2ea   :  { %17438 = vst [vmem:[#allocation31_spill] sm:$0xff] %v14004_v62  ;;  %v14017_v26 = vrot.slane %v6091_v8, %v11066_v58  ;;  %v4195_v47 = vsel %vm1080_vm8, %v17440_v32, %v13603_v17  ;;  %v4196_v49 = vsel %vm1080_vm8, %v17441_v1, %v17440_v32  ;;  %v4047_v11 = vadd.f32 %v4032_v3, %v13946_v42 }
 0x2eb   :  { %v14027_v30 = vpop.permute.xlu0 %4554  ;;  %v4048_v31 = vadd.f32 %v4031_v28, %v13951_v2  ;;  %v4132_v15 = vrot.slane %v4121_v18, %v11066_v58  ;;  %v4197_v39 = vsel %vm1080_vm8, %v13591_v24, %v17441_v1  ;;  %v6149_v32 = vcombine.low %v4195_v47, %v14010_v33 }
 0x2ec   :  { %17439 = vst [vmem:[#allocation26_spill] sm:$0xff] %v14017_v26  ;;  %v4210_v3 = vcombine.low %v4198_v51, %v4197_v39  ;;  %v4139_v42 = vrot.slane %v4125_v46, %v11066_v58  ;;  %v4142_v2 = vcombine.high %v4122_v54, %v4122_v54  ;;  %v6092_v28 = vmul.f32 %v6088_v44, %v6054_v37  ;;  %v17442_v44 = vld [vmem:[#allocation48_spill] sm:$0xff] }
 0x2ed   :  { %v14036_v34 = vpop.permute.xlu1 %4560  ;;  %v4211_v18 = vcombine.low %v4196_v49, %v4195_v47  ;;  %v4049_v10 = vadd.f32 %v4033_v16, %v3924_v59  ;;  %v14045_v23 = vrot.slane %v6095_v57, %v11066_v58  ;;  %v6148_v1 = vcombine.low %v4197_v39, %v4196_v49 }
 0x2ee   :  { %v4140_v43 = vcombine.high %v4132_v15, %v4132_v15  ;;  %v4149_v8 = vrot.slane %v4122_v54, %v11066_v58  ;;  %v4191_v46 = vsel %vm1080_vm8, %v13733_v53, %v13700_v13  ;;  %v4192_v59 = vsel %vm1080_vm8, %v17442_v44, %v13733_v53 }
 0x2ef   :  { %v14049_v17 = vpop.permute.xlu0 %4558  ;;  %v14062_v57 = vadd.f32 %v4132_v15, %v4042_v14  ;;  %v4193_v37 = vsel %vm1080_vm8, %v13682_v61, %v17442_v44  ;;  %v6163_v54 = vrot.slane %v6149_v32, %v11066_v58  ;;  %v4218_v47 = vrot.slane %v4210_v3, %v11066_v58  ;;  %v4200_v61 = vld [vmem:[#allocation3 + $0x230] sm:$0xff] }
 0x2f0   :  { %v4141_v49 = vcombine.high %v4139_v42, %v4139_v42  ;;  %v4156_v13 = vrot.slane %v4142_v2, %v11066_v58  ;;  %v6112_v39 = vcombine.high %v6092_v28, %v6092_v28  ;;  %v4225_v24 = vrot.slane %v4211_v18, %v11066_v58 }
 0x2f1   :  { %v14060_v16 = vpop.permute.xlu1 %4564  ;;  %v6156_v53 = vrot.slane %v6148_v1, %v11066_v58  ;;  %v4228_v62 = vcombine.low %v4192_v59, %v4191_v46  ;;  %v6165_v14 = vcombine.low %v4193_v37, %v4192_v59  ;;  %v6166_v15 = vcombine.low %v4191_v46, %v4198_v51 }
 0x2f2   :  { %v14077_v44 = vadd.f32 %v4140_v43, %v4043_v48  ;;  %v4157_v32 = vcombine.high %v4149_v8, %v4149_v8  ;;  %v4227_v3 = vcombine.low %v14010_v33, %v4193_v37  ;;  %v14082_v2 = vadd.f32 %v4139_v42, %v4044_v6  ;;  %v6146_v43 = vld [vmem:[#allocation3 + $0x350] sm:$0xff] }
 0x2f3   :  { %v14073_v26 = vpop.permute.xlu0 %4562  ;;  %v14084_v18 = vadd.f32 %v4149_v8, %v4046_v12  ;;  %v6164_v1 = vcombine.low %v6156_v53, %v6163_v54  ;;  %v4226_v56 = vcombine.low %v4218_v47, %v4225_v24  ;;  %v14086_v59 = vadd.f32 %v4141_v49, %v4045_v60 }
 0x2f4   :  { %v4158_v51 = vcombine.high %v4156_v13, %v4156_v13  ;;  %v14089_v46 = vrot.slane %v6092_v28, %v11066_v58  ;;  %v14092_v48 = vrot.slane %v6112_v39, %v11066_v58  ;;  %v4242_v33 = vrot.slane %v4228_v62, %v11066_v58 }
 0x2f5   :  { %v14080_v7 = vpop.permute.xlu1 %4677  ;;  %v6173_v6 = vrot.slane %v6165_v14, %v11066_v58  ;;  %v6180_v12 = vrot.slane %v6166_v15, %v11066_v58  ;;  %v4323_v60 = vsel %vm1206_vm9, %v13856_v4, %v13769_v55  ;;  %v14103_v42 = vadd.f32 %v4157_v32, %v4047_v11  ;;  %v17443_v15 = vld [vmem:[#allocation7_spill] sm:$0xff]  ;;  %v17444_v32 = vld [vmem:[#allocation9_spill] sm:$0xff] }
 0x2f6   :  { %v14105_v28 = vadd.f32 %v4156_v13, %v4048_v31  ;;  %v4235_v24 = vrot.slane %v4227_v3, %v11066_v58  ;;  %v4322_v62 = vsel %vm1206_vm9, %v13769_v55, %v13741_v0  ;;  %v6184_v54 = vmul.f32 %v6164_v1, %v6146_v43  ;;  %v4201_v1 = vld [vmem:[#allocation3 + $0x238] sm:$0xff] }
 0x2f7   :  { %v14101_v8 = vpop.permute.xlu0 %4675  ;;  %v4246_v47 = vmul.f32 %v4226_v56, %v4200_v61  ;;  %v4320_v49 = vsel %vm1206_vm9, %v13811_v45, %v13776_v25  ;;  %v4321_v11 = vsel %vm1206_vm9, %v13741_v0, %v13811_v45  ;;  %v14122_v31 = vadd.f32 %v4158_v51, %v4049_v10  ;;  %v6147_v43 = vld [vmem:[#allocation3 + $0x358] sm:$0xff] }
 0x2f8   :  { %v4335_v39 = vcombine.low %v4323_v60, %v4322_v62  ;;  %v4243_v56 = vcombine.low %v4235_v24, %v4242_v33  ;;  %v6181_v53 = vcombine.low %v6173_v6, %v6180_v12  ;;  %v4336_v0 = vcombine.low %v4321_v11, %v4320_v49 }
 0x2f9   :  { %v14112_v37 = vpop.permute.xlu1 %4681  ;;  %v4316_v45 = vsel %vm1206_vm9, %v13868_v21, %v13856_v4  ;;  %v4317_v10 = vsel %vm1206_vm9, %v13819_v35, %v13868_v21  ;;  %v6188_v12 = vcombine.high %v6184_v54, %v6184_v54  ;;  %v14144_v60 = vrot.slane %v6184_v54, %v11066_v58 }
 0x2fa   :  { %v4250_v24 = vcombine.high %v4246_v47, %v4246_v47  ;;  %v4257_v62 = vrot.slane %v4246_v47, %v11066_v58  ;;  %v4318_v4 = vsel %vm1206_vm9, %v13841_v19, %v13819_v35  ;;  %v4319_v21 = vsel %vm1206_vm9, %v13776_v25, %v13841_v19 }
 0x2fb   :  { %v14128_v14 = vpop.permute.xlu0 %4679  ;;  %v4343_v49 = vrot.slane %v4335_v39, %v11066_v58  ;;  %v4448_v54 = vsel %vm17108_vm10, %v13959_v27, %v13896_v63  ;;  %v4247_v11 = vmul.f32 %v4243_v56, %v4201_v1  ;;  %v6185_v6 = vmul.f32 %v6181_v53, %v6147_v43 }
 0x2fc   :  { %v4353_v47 = vcombine.low %v4317_v10, %v4316_v45  ;;  %v4350_v35 = vrot.slane %v4336_v0, %v11066_v58  ;;  %v4447_v25 = vsel %vm17108_vm10, %v13896_v63, %v13873_v22  ;;  %v4445_v19 = vsel %vm17108_vm10, %v13932_v36, %v13904_v29 }
 0x2fd   :  { %v14140_v51 = vpop.permute.xlu1 %4685  ;;  %v4446_v39 = vsel %vm17108_vm10, %v13873_v22, %v13932_v36  ;;  %v14179_v53 = vrot.slane %v6188_v12, %v11066_v58  ;;  %v4352_v43 = vcombine.low %v4319_v21, %v4318_v4  ;;  %v4460_v63 = vcombine.low %v4448_v54, %v4447_v25 }
 0x2fe   :  { %v4264_v0 = vrot.slane %v4250_v24, %v11066_v58  ;;  %v4265_v45 = vcombine.high %v4257_v62, %v4257_v62  ;;  %v14185_v10 = vadd.f32 %v4257_v62, %v14062_v57  ;;  %v4351_v13 = vcombine.low %v4343_v49, %v4350_v35  ;;  %v4325_v62 = vld [vmem:[#allocation3 + $0x240] sm:$0xff] }
 0x2ff   :  { %v14160_v55 = vpop.permute.xlu0 %4683  ;;  %v4367_v61 = vrot.slane %v4353_v47, %v11066_v58  ;;  %v4461_v22 = vcombine.low %v4446_v39, %v4445_v19  ;;  %v4441_v36 = vsel %vm17108_vm10, %v13975_v5, %v13959_v27  ;;  %v4442_v12 = vsel %vm17108_vm10, %v13934_v40, %v13975_v5 }
 0x300   :  { %v4267_v24 = vcombine.high %v4247_v11, %v4247_v11  ;;  %v4274_v57 = vrot.slane %v4247_v11, %v11066_v58  ;;  %v4443_v21 = vsel %vm17108_vm10, %v13955_v38, %v13934_v40  ;;  %v4444_v27 = vsel %vm17108_vm10, %v13904_v29, %v13955_v38 }
 0x301   :  { %v14176_v56 = vpop.permute.xlu1 %4689  ;;  %v6205_v54 = vcombine.high %v6185_v6, %v6185_v6  ;;  %v4360_v47 = vrot.slane %v4352_v43, %v11066_v58  ;;  %v4468_v11 = vrot.slane %v4460_v63, %v11066_v58  ;;  %v4266_v35 = vcombine.high %v4264_v0, %v4264_v0 }
 0x302   :  { %v14214_v25 = vadd.f32 %v4265_v45, %v14077_v44  ;;  %v4478_v40 = vcombine.low %v4442_v12, %v4441_v36  ;;  %v4573_v29 = vsel %vm17107_vm11, %v14060_v16, %v13993_v9  ;;  %v4371_v38 = vmul.f32 %v4351_v13, %v4325_v62 }
 0x303   :  { %v14196_v4 = vpop.permute.xlu0 %4687  ;;  %v4368_v19 = vcombine.low %v4360_v47, %v4367_v61  ;;  %v4475_v39 = vrot.slane %v4461_v22, %v11066_v58  ;;  %v4477_v5 = vcombine.low %v4444_v27, %v4443_v21  ;;  %v4572_v43 = vsel %vm17107_vm11, %v13993_v9, %v13980_v20  ;;  %v4326_v22 = vld [vmem:[#allocation3 + $0x248] sm:$0xff] }
 0x304   :  { %v4570_v44 = vsel %vm17107_vm11, %v14027_v30, %v14000_v52  ;;  %v4571_v13 = vsel %vm17107_vm11, %v13980_v20, %v14027_v30  ;;  %v14238_v63 = vadd.f32 %v4264_v0, %v14082_v2  ;;  %v4281_v45 = vrot.slane %v4267_v24, %v11066_v58  ;;  %v4450_v20 = vld [vmem:[#allocation3 + $0x250] sm:$0xff] }
 0x305   :  { %v14207_v49 = vpop.permute.xlu1 %4903  ;;  %v4476_v36 = vcombine.low %v4468_v11, %v4475_v39  ;;  %v4585_v9 = vcombine.low %v4573_v29, %v4572_v43  ;;  %v10687_v12 = vmov 2   ;;  %v4282_v62 = vcombine.high %v4274_v57, %v4274_v57 }
 0x306   :  { %10567 = vset.pattern.permute.xlu0 %v10687_v12  ;;  %v14242_v21 = vadd.f32 %v4274_v57, %v14084_v18  ;;  %v14245_v27 = vrot.slane %v6185_v6, %v11066_v58  ;;  %v4492_v30 = vrot.slane %v4478_v40, %v11066_v58  ;;  %v14249_v2 = vrot.slane %v6205_v54, %v11066_v58 }
 0x307   :  { %v14221_v1 = vpop.permute.xlu0 %4901  ;;  %v4375_v0 = vcombine.high %v4371_v38, %v4371_v38  ;;  %v4382_v24 = vrot.slane %v4371_v38, %v11066_v58  ;;  %v4586_v47 = vcombine.low %v4571_v13, %v4570_v44  ;;  %v4372_v29 = vmul.f32 %v4368_v19, %v4326_v22  ;;  %v4451_v44 = vld [vmem:[#allocation3 + $0x258] sm:$0xff] }
 0x308   :  { %17447 = vst [vmem:[#allocation28_spill] sm:$0xff] %v14249_v2  ;;  %v4485_v39 = vrot.slane %v4477_v5, %v11066_v58  ;;  %v4566_v18 = vsel %vm17107_vm11, %v14073_v26, %v14060_v16  ;;  %v4567_v6 = vsel %vm17107_vm11, %v14036_v34, %v14073_v26  ;;  %v4295_v54 = vadd.f32 %v4266_v35, %v14086_v59 }
 0x309   :  { %v14235_v61 = vpop.permute.xlu1 %4907  ;;  %v4283_v40 = vcombine.high %v4281_v45, %v4281_v45  ;;  %v4496_v38 = vmul.f32 %v4476_v36, %v4450_v20  ;;  %v4593_v19 = vrot.slane %v4585_v9, %v11066_v58  ;;  %v14268_v5 = vadd.f32 %v4282_v62, %v14103_v42 }
 0x30a   :  { %v4493_v43 = vcombine.low %v4485_v39, %v4492_v30  ;;  %v4568_v16 = vsel %vm17107_vm11, %v14049_v17, %v14036_v34  ;;  %v4569_v26 = vsel %vm17107_vm11, %v14000_v52, %v14049_v17  ;;  %v4298_v59 = vadd.f32 %v4281_v45, %v14105_v28 }
 0x30b   :  { %v14252_v11 = vpop.permute.xlu0 %4905  ;;  %v4600_v42 = vrot.slane %v4586_v47, %v11066_v58  ;;  %v4603_v13 = vcombine.low %v4567_v6, %v4566_v18  ;;  %v4389_v34 = vrot.slane %v4375_v0, %v11066_v58  ;;  %v4390_v9 = vcombine.high %v4382_v24, %v4382_v24  ;;  %v4575_v0 = vld [vmem:[#allocation3 + $0x260] sm:$0xff] }
 0x30c   :  { %v4392_v12 = vcombine.high %v4372_v29, %v4372_v29  ;;  %v4500_v52 = vcombine.high %v4496_v38, %v4496_v38  ;;  %v4602_v17 = vcombine.low %v4569_v26, %v4568_v16  ;;  %v4698_v45 = vsel %vm17105_vm12, %v14176_v56, %v14101_v8 }
 0x30d   :  { %v14263_v57 = vpop.permute.xlu1 %4911  ;;  %v4601_v28 = vcombine.low %v4593_v19, %v4600_v42  ;;  %v4299_v20 = vadd.f32 %v4283_v40, %v14122_v31  ;;  %v4417_v30 = vadd.f32 %v4382_v24, %v14185_v10  ;;  %v4399_v47 = vrot.slane %v4372_v29, %v11066_v58 }
 0x30e   :  { %v4497_v39 = vmul.f32 %v4493_v43, %v4451_v44  ;;  %v4617_v18 = vrot.slane %v4603_v13, %v11066_v58  ;;  %v4697_v6 = vsel %vm17105_vm12, %v14101_v8, %v14080_v7  ;;  %v4695_v19 = vsel %vm17105_vm12, %v14128_v14, %v14112_v37 }
 0x30f   :  { %v14282_v22 = vpop.permute.xlu0 %4909  ;;  %v4696_v31 = vsel %vm17105_vm12, %v14080_v7, %v14128_v14  ;;  %v4391_v24 = vcombine.high %v4389_v34, %v4389_v34  ;;  %v4418_v29 = vadd.f32 %v4390_v9, %v14214_v25  ;;  %v4406_v40 = vrot.slane %v4392_v12, %v11066_v58 }
 0x310   :  { %v4710_v43 = vcombine.low %v4698_v45, %v4697_v6  ;;  %v4507_v8 = vrot.slane %v4496_v38, %v11066_v58  ;;  %v4514_v26 = vrot.slane %v4500_v52, %v11066_v58  ;;  %v4610_v44 = vrot.slane %v4602_v17, %v11066_v58 }
 0x311   :  { %v14287_v62 = vpop.permute.xlu1 %4915  ;;  %v4621_v42 = vmul.f32 %v4601_v28, %v4575_v0  ;;  %v4517_v13 = vcombine.high %v4497_v39, %v4497_v39  ;;  %v4711_v36 = vcombine.low %v4696_v31, %v4695_v19  ;;  %v4691_v7 = vsel %vm17105_vm12, %v14196_v4, %v14176_v56  ;;  %v4576_v28 = vld [vmem:[#allocation3 + $0x268] sm:$0xff] }
 0x312   :  { %v4692_v14 = vsel %vm17105_vm12, %v14140_v51, %v14196_v4  ;;  %v4419_v25 = vadd.f32 %v4389_v34, %v14238_v63  ;;  %v4407_v38 = vcombine.high %v4399_v47, %v4399_v47  ;;  %v4524_v9 = vrot.slane %v4497_v39, %v11066_v58 }
 0x313   :  { %v4914_v10 = vpop.permute.xlu0 %4913  ;;  %v4618_v12 = vcombine.low %v4610_v44, %v4617_v18  ;;  %v4408_v17 = vcombine.high %v4406_v40, %v4406_v40  ;;  %v4693_v56 = vsel %vm17105_vm12, %v14160_v55, %v14140_v51  ;;  %v4694_v4 = vsel %vm17105_vm12, %v14112_v37, %v14160_v55 }
 0x314   :  { %v4718_v63 = vrot.slane %v4710_v43, %v11066_v58  ;;  %v4421_v45 = vadd.f32 %v4399_v47, %v14242_v21  ;;  %v4515_v39 = vcombine.high %v4507_v8, %v4507_v8  ;;  %v4625_v0 = vcombine.high %v4621_v42, %v4621_v42 }
 0x315   :  { %v14311_v16 = vpop.permute.xlu1 %5028  ;;  %v4728_v18 = vcombine.low %v4692_v14, %v4691_v7  ;;  %v4420_v6 = vadd.f32 %v4391_v24, %v4295_v54  ;;  %v4516_v19 = vcombine.high %v4514_v26, %v4514_v26  ;;  %v4531_v31 = vrot.slane %v4517_v13, %v11066_v58  ;;  %v4700_v13 = vld [vmem:[#allocation3 + $0x270] sm:$0xff] }
 0x316   :  { %v4725_v51 = vrot.slane %v4711_v36, %v11066_v58  ;;  %v4423_v44 = vadd.f32 %v4406_v40, %v4298_v59  ;;  %v4532_v35 = vcombine.high %v4524_v9, %v4524_v9  ;;  %v4622_v3 = vmul.f32 %v4618_v12, %v4576_v28 }
 0x317   :  { %v14326_v52 = vpop.permute.xlu0 %5026  ;;  %v4727_v33 = vcombine.low %v4694_v4, %v4693_v56  ;;  %v4422_v55 = vadd.f32 %v4407_v38, %v14268_v5  ;;  %v4424_v43 = vadd.f32 %v4408_v17, %v4299_v20  ;;  %v4542_v2 = vadd.f32 %v4507_v8, %v4417_v30 }
 0x318   :  { %v4726_v21 = vcombine.low %v4718_v63, %v4725_v51  ;;  %v4543_v7 = vadd.f32 %v4515_v39, %v4418_v29  ;;  %v4632_v54 = vrot.slane %v4621_v42, %v11066_v58  ;;  %v4639_v24 = vrot.slane %v4625_v0, %v11066_v58 }
 0x319   :  { %v14337_v34 = vpop.permute.xlu1 %5032  ;;  %v4742_v59 = vrot.slane %v4728_v18, %v11066_v58  ;;  %v4544_v36 = vadd.f32 %v4514_v26, %v4419_v25  ;;  %v4545_v40 = vadd.f32 %v4516_v19, %v4420_v6  ;;  %v4533_v14 = vcombine.high %v4531_v31, %v4531_v31 }
 0x31a   :  { %v4546_v12 = vadd.f32 %v4524_v9, %v4421_v45  ;;  %v4547_v28 = vadd.f32 %v4532_v35, %v4422_v55  ;;  %v4642_v56 = vcombine.high %v4622_v3, %v4622_v3  ;;  %v4649_v5 = vrot.slane %v4622_v3, %v11066_v58  ;;  %v4701_v45 = vld [vmem:[#allocation3 + $0x278] sm:$0xff] }
 0x31b   :  { %v14342_v37 = vpop.permute.xlu0 %5030  ;;  %v4735_v20 = vrot.slane %v4727_v33, %v11066_v58  ;;  %v4746_v8 = vmul.f32 %v4726_v21, %v4700_v13  ;;  %v4920_v29 = vsel %vm17106_vm13, %v14235_v61, %v14282_v22  ;;  %v4917_v26 = vsel %vm17106_vm13, %v4914_v10, %v14287_v62 }
 0x31c   :  { %v4918_v35 = vsel %vm17106_vm13, %v14263_v57, %v4914_v10  ;;  %v4548_v25 = vadd.f32 %v4531_v31, %v4423_v44  ;;  %v4640_v3 = vcombine.high %v4632_v54, %v4632_v54  ;;  %v4641_v38 = vcombine.high %v4639_v24, %v4639_v24 }
 0x31d   :  { %v14345_v47 = vpop.permute.xlu1 %5036  ;;  %v4743_v33 = vcombine.low %v4735_v20, %v4742_v59  ;;  %v4921_v9 = vsel %vm17106_vm13, %v14252_v11, %v14235_v61  ;;  %v4922_v17 = vsel %vm17106_vm13, %v14207_v49, %v14252_v11  ;;  %v4919_v10 = vsel %vm17106_vm13, %v14282_v22, %v14263_v57 }
 0x31e   :  { %v4924_v4 = vsel %vm17106_vm13, %v14287_v62, %v14221_v1  ;;  %v4549_v63 = vadd.f32 %v4533_v14, %v4424_v43  ;;  %v4937_v39 = vcombine.low %v4921_v9, %v4920_v29  ;;  %v4953_v0 = vcombine.low %v4919_v10, %v4918_v35  ;;  %v4927_v9 = vld [vmem:[#allocation3 + $0x298] sm:$0xff] }
 0x31f   :  { %v5035_v30 = vpop.permute.xlu0 %5034  ;;  %v4954_v61 = vcombine.low %v4917_v26, %v4924_v4  ;;  %v4656_v6 = vrot.slane %v4642_v56, %v11066_v58  ;;  %v4657_v19 = vcombine.high %v4649_v5, %v4649_v5  ;;  %v4750_v11 = vcombine.high %v4746_v8, %v4746_v8 }
 0x320   :  { %v4923_v57 = vsel %vm17106_vm13, %v14221_v1, %v14207_v49  ;;  %v4667_v31 = vadd.f32 %v4632_v54, %v4542_v2  ;;  %v4668_v51 = vadd.f32 %v4640_v3, %v4543_v7  ;;  %v4757_v62 = vrot.slane %v4746_v8, %v11066_v58 }
 0x321   :  { %v5041_v42 = vpop.permute.xlu1 %5040  ;;  %v4936_v44 = vcombine.low %v4923_v57, %v4922_v17  ;;  %v4669_v55 = vadd.f32 %v4639_v24, %v4544_v36  ;;  %v4670_v43 = vadd.f32 %v4641_v38, %v4545_v40  ;;  %v4671_v21 = vadd.f32 %v4649_v5, %v4546_v12 }
 0x322   :  { %v4747_v13 = vmul.f32 %v4743_v33, %v4701_v45  ;;  %v4951_v59 = vrot.slane %v4937_v39, %v11066_v58  ;;  %v4961_v14 = vrot.slane %v4953_v0, %v11066_v58  ;;  %v4968_v56 = vrot.slane %v4954_v61, %v11066_v58  ;;  %v4926_v33 = vld [vmem:[#allocation3 + $0x290] sm:$0xff] }
 0x323   :  { %v5039_v18 = vpop.permute.xlu0 %5038  ;;  %vm17448_vm12 = vcmp.lt.s32.totalorder %v11015_v41, 121  ;;  %v4658_v2 = vcombine.high %v4656_v6, %v4656_v6  ;;  %v14390_v7 = vadd.f32 %v4657_v19, %v4547_v28  ;;  %v14392_v54 = vadd.f32 %v4656_v6, %v4548_v25 }
 0x324   :  { %v5045_v1 = vsel %vm17448_vm12, %v14337_v34, %v5035_v30  ;;  %v4764_v24 = vrot.slane %v4750_v11, %v11066_v58  ;;  %v4765_v40 = vcombine.high %v4757_v62, %v4757_v62  ;;  %v4944_v12 = vrot.slane %v4936_v44, %v11066_v58  ;;  %vm17449_vm13 = vmmov %vm17448_vm12 }
 0x325   :  { %v5154_v22 = vpop.permute.xlu1 %5153  ;;  %v5046_v5 = vsel %vm17449_vm13, %v14342_v37, %v14337_v34  ;;  %v5047_v20 = vsel %vm17448_vm12, %v14311_v16, %v14342_v37  ;;  %v4767_v28 = vcombine.high %v4747_v13, %v4747_v13  ;;  %vm17450_vm11 = vmmov %vm17448_vm12  ;;  %v4774_v35 = vrot.slane %v4747_v13, %v11066_v58 }
 0x326   :  { %v5062_v8 = vcombine.low %v5046_v5, %v5045_v1  ;;  %v5042_v29 = vsel %vm17450_vm11, %v5039_v18, %v5041_v42  ;;  %vm17451_vm10 = vmmov %vm17450_vm11  ;;  %v4952_v25 = vcombine.low %v4944_v12, %v4951_v59  ;;  %v4969_v3 = vcombine.low %v4961_v14, %v4968_v56  ;;  %v5051_v5 = vld [vmem:[#allocation3 + $0x2a0] sm:$0xff] }
 0x327   :  { %v5152_v49 = vpop.permute.xlu0 %5151  ;;  %v5043_v26 = vsel %vm17451_vm10, %v14345_v47, %v5039_v18  ;;  %vm17452_vm13 = vmmov %vm17451_vm10  ;;  %v4674_v37 = vadd.f32 %v4658_v2, %v4549_v63  ;;  %v5049_v4 = vsel %vm17451_vm10, %v5041_v42, %v14326_v52  ;;  %v4766_v39 = vcombine.high %v4764_v24, %v4764_v24 }
 0x328   :  { %v5048_v34 = vsel %vm17452_vm13, %v14326_v52, %v14311_v16  ;;  %vm17453_vm11 = vmmov %vm17451_vm10  ;;  %v4792_v0 = vadd.f32 %v4757_v62, %v4667_v31  ;;  %v5079_v18 = vcombine.low %v5042_v29, %v5049_v4  ;;  %v4793_v6 = vadd.f32 %v4765_v40, %v4668_v51 }
 0x329   :  { %v5158_v36 = vpop.permute.xlu1 %5157  ;;  %v5061_v17 = vcombine.low %v5048_v34, %v5047_v20  ;;  %v5044_v10 = vsel %vm17453_vm11, %v5035_v30, %v14345_v47  ;;  %v4781_v16 = vrot.slane %v4767_v28, %v11066_v58  ;;  %v5076_v63 = vrot.slane %v5062_v8, %v11066_v58 }
 0x32a   :  { %v5078_v61 = vcombine.low %v5044_v10, %v5043_v26  ;;  %v4794_v11 = vadd.f32 %v4764_v24, %v4669_v55  ;;  %v4782_v57 = vcombine.high %v4774_v35, %v4774_v35  ;;  %v4972_v47 = vmul.f32 %v4952_v25, %v4926_v33 }
 0x32b   :  { %v5156_v38 = vpop.permute.xlu0 %5155  ;;  %v4973_v30 = vmul.f32 %v4969_v3, %v4927_v9  ;;  %v5069_v52 = vrot.slane %v5061_v17, %v11066_v58  ;;  %v5173_v42 = vsel %vm2063_vm15, %v5152_v49, %v5154_v22  ;;  %v5093_v55 = vrot.slane %v5079_v18, %v11066_v58  ;;  %v5052_v17 = vld [vmem:[#allocation3 + $0x2a8] sm:$0xff] }
 0x32c   :  { %v5172_v19 = vsel %vm2063_vm15, %v5154_v22, %v5156_v38  ;;  %v5171_v31 = vsel %vm2063_vm15, %v5156_v38, %v5158_v36  ;;  %v5086_v13 = vrot.slane %v5078_v61, %v11066_v58  ;;  %v4795_v56 = vadd.f32 %v4766_v39, %v4670_v43  ;;  %v17454_v61 = vld [vmem:[#allocation20_spill] sm:$0xff] }
 0x32d   :  { %v5162_v45 = vpop.permute.xlu1 %5161  ;;  %v5186_v59 = vcombine.low %v5173_v42, %v5172_v19  ;;  %v4783_v1 = vcombine.high %v4781_v16, %v4781_v16  ;;  %v4796_v2 = vadd.f32 %v4774_v35, %v4671_v21  ;;  %v5077_v24 = vcombine.low %v5069_v52, %v5076_v63 }
 0x32e   :  { %v4976_v40 = vcombine.high %v4972_v47, %v4972_v47  ;;  %v4983_v22 = vrot.slane %v4972_v47, %v11066_v58  ;;  %v4993_v12 = vcombine.high %v4973_v30, %v4973_v30  ;;  %v5094_v26 = vcombine.low %v5086_v13, %v5093_v55  ;;  %v17460_v13 = vld [vmem:[#allocation19_spill] sm:$0xff] }
 0x32f   :  { %v5160_v44 = vpop.permute.xlu0 %5159  ;;  %v5194_v35 = vrot.slane %v5186_v59, %v11066_v58  ;;  %v4797_v34 = vadd.f32 %v4782_v57, %v14390_v7  ;;  %v4798_v38 = vadd.f32 %v4781_v16, %v14392_v54  ;;  %v4799_v33 = vadd.f32 %v4783_v1, %v4674_v37  ;;  %v5176_v37 = vld [vmem:[#allocation3 + $0x2b0] sm:$0xff]  ;;  %v17456_v57 = vld [vmem:[#allocation21_spill] sm:$0xff] }
 0x330   :  { %v5170_v51 = vsel %vm2063_vm15, %v5158_v36, %v5160_v44  ;;  %v5169_v36 = vsel %vm2063_vm15, %v5160_v44, %v5162_v45  ;;  %v5097_v9 = vmul.f32 %v5077_v24, %v5051_v5  ;;  %v4893_v18 = vadd.f32 %v17454_v61, %v4792_v0 }
 0x331   :  { %v5166_v62 = vpop.permute.xlu1 %5165  ;;  %v5187_v14 = vcombine.low %v5171_v31, %v5170_v51  ;;  %v17455_v63 = vcombine.high %v17454_v61, %v17454_v61  ;;  %v5000_v7 = vrot.slane %v4973_v30, %v11066_v58  ;;  %v5007_v54 = vrot.slane %v4993_v12, %v11066_v58  ;;  %v17458_v51 = vld [vmem:[#allocation25_spill] sm:$0xff] }
 0x332   :  { %v5174_v8 = vsel %vm2063_vm15, %v5166_v62, %v5152_v49  ;;  %v4990_v49 = vrot.slane %v4976_v40, %v11066_v58  ;;  %v4895_v47 = vadd.f32 %v17456_v57, %v4794_v11  ;;  %v17457_v44 = vcombine.high %v17456_v57, %v17456_v57 }
 0x333   :  { %v5201_v20 = vrot.slane %v5187_v14, %v11066_v58  ;;  %v5164_v28 = vpop.permute.xlu0 %5163  ;;  %v4894_v19 = vadd.f32 %v17455_v63, %v4793_v6  ;;  %v4991_v42 = vcombine.high %v4983_v22, %v4983_v22  ;;  %v5098_v31 = vmul.f32 %v5094_v26, %v5052_v17 }
 0x334   :  { %v5167_v43 = vsel %vm2063_vm15, %v5164_v28, %v5166_v62  ;;  %v5168_v21 = vsel %vm2063_vm15, %v5162_v45, %v5164_v28  ;;  %v4896_v52 = vadd.f32 %v17457_v44, %v4795_v56  ;;  %v4897_v0 = vadd.f32 %v17458_v51, %v4796_v2  ;;  %v5177_v2 = vld [vmem:[#allocation3 + $0x2b8] sm:$0xff] }
 0x335   :  { %v5279_v29 = vpop.permute.xlu1 %5278  ;;  %v5203_v25 = vcombine.low %v5169_v36, %v5168_v21  ;;  %v5204_v3 = vcombine.low %v5167_v43, %v5174_v8  ;;  %v5202_v10 = vcombine.low %v5194_v35, %v5201_v20  ;;  %v17459_v62 = vcombine.high %v17458_v51, %v17458_v51 }
 0x336   :  { %v4899_v30 = vadd.f32 %v17460_v13, %v4798_v38  ;;  %v5101_v55 = vcombine.high %v5097_v9, %v5097_v9  ;;  %v4992_v59 = vcombine.high %v4990_v49, %v4990_v49  ;;  %v17461_v14 = vcombine.high %v17460_v13, %v17460_v13  ;;  %v5301_v13 = vld [vmem:[#allocation3 + $0x2c0] sm:$0xff] }
 0x337   :  { %v5211_v4 = vrot.slane %v5203_v25, %v11066_v58  ;;  %v5218_v45 = vrot.slane %v5204_v3, %v11066_v58  ;;  %v5277_v39 = vpop.permute.xlu0 %5276  ;;  %v4898_v6 = vadd.f32 %v17459_v62, %v4797_v34  ;;  %v5222_v1 = vmul.f32 %v5202_v10, %v5176_v37 }
 0x338   :  { %v4900_v11 = vadd.f32 %v17461_v14, %v4799_v33  ;;  %v5008_v56 = vcombine.high %v5000_v7, %v5000_v7  ;;  %v5009_v12 = vcombine.high %v5007_v54, %v5007_v54  ;;  %v5108_v5 = vrot.slane %v5097_v9, %v11066_v58 }
 0x339   :  { %v5283_v16 = vpop.permute.xlu1 %5282  ;;  %v5219_v24 = vcombine.low %v5211_v4, %v5218_v45  ;;  %v5018_v36 = vadd.f32 %v4983_v22, %v4893_v18  ;;  %v5019_v8 = vadd.f32 %v4991_v42, %v4894_v19  ;;  %v5020_v43 = vadd.f32 %v4990_v49, %v4895_v47 }
 0x33a   :  { %v5118_v21 = vcombine.high %v5098_v31, %v5098_v31  ;;  %v5022_v26 = vadd.f32 %v5000_v7, %v4897_v0  ;;  %v5115_v35 = vrot.slane %v5101_v55, %v11066_v58  ;;  %v5125_v25 = vrot.slane %v5098_v31, %v11066_v58 }
 0x33b   :  { %v5281_v40 = vpop.permute.xlu0 %5280  ;;  %v5298_v3 = vsel %vm2189_vm14, %v5277_v39, %v5279_v29  ;;  %v5021_v34 = vadd.f32 %v4992_v59, %v4896_v52  ;;  %v5226_v38 = vcombine.high %v5222_v1, %v5222_v1  ;;  %v5223_v33 = vmul.f32 %v5219_v24, %v5177_v2 }
 0x33c   :  { %v5297_v20 = vsel %vm2189_vm14, %v5279_v29, %v5281_v40  ;;  %v5023_v10 = vadd.f32 %v5008_v56, %v4898_v6  ;;  %v5024_v4 = vadd.f32 %v5007_v54, %v4899_v30  ;;  %v5025_v45 = vadd.f32 %v5009_v12, %v4900_v11 }
 0x33d   :  { %v5287_v28 = vpop.permute.xlu1 %5286  ;;  %v5311_v9 = vcombine.low %v5298_v3, %v5297_v20  ;;  %v5116_v22 = vcombine.high %v5108_v5, %v5108_v5  ;;  %v5143_v61 = vadd.f32 %v5108_v5, %v5018_v36  ;;  %v5132_v49 = vrot.slane %v5118_v21, %v11066_v58 }
 0x33e   :  { %v5296_v18 = vsel %vm2189_vm14, %v5281_v40, %v5283_v16  ;;  %v5117_v29 = vcombine.high %v5115_v35, %v5115_v35  ;;  %v5133_v7 = vcombine.high %v5125_v25, %v5125_v25  ;;  %v5233_v37 = vrot.slane %v5222_v1, %v11066_v58 }
 0x33f   :  { %v5285_v17 = vpop.permute.xlu0 %5284  ;;  %v5240_v47 = vrot.slane %v5226_v38, %v11066_v58  ;;  %v5243_v54 = vcombine.high %v5223_v33, %v5223_v33  ;;  %v5319_v44 = vrot.slane %v5311_v9, %v11066_v58  ;;  %v5134_v62 = vcombine.high %v5132_v49, %v5132_v49 }
 0x340   :  { %v5295_v63 = vsel %vm2189_vm14, %v5283_v16, %v5285_v17  ;;  %v5294_v52 = vsel %vm2189_vm14, %v5285_v17, %v5287_v28  ;;  %v5250_v6 = vrot.slane %v5223_v33, %v11066_v58  ;;  %v5144_v59 = vadd.f32 %v5116_v22, %v5019_v8 }
 0x341   :  { %v5291_v19 = vpop.permute.xlu1 %5290  ;;  %v5312_v57 = vcombine.low %v5296_v18, %v5295_v63  ;;  %v5145_v14 = vadd.f32 %v5115_v35, %v5020_v43  ;;  %v5241_v11 = vcombine.high %v5233_v37, %v5233_v37  ;;  %v5242_v24 = vcombine.high %v5240_v47, %v5240_v47 }
 0x342   :  { %v5299_v16 = vsel %vm2189_vm14, %v5291_v19, %v5277_v39  ;;  %v5257_v40 = vrot.slane %v5243_v54, %v11066_v58  ;;  %v5146_v12 = vadd.f32 %v5117_v29, %v5021_v34  ;;  %v5147_v5 = vadd.f32 %v5125_v25, %v5022_v26 }
 0x343   :  { %v5289_v42 = vpop.permute.xlu0 %5288  ;;  %v5326_v31 = vrot.slane %v5312_v57, %v11066_v58  ;;  %v5148_v2 = vadd.f32 %v5133_v7, %v5023_v10  ;;  %v5149_v36 = vadd.f32 %v5132_v49, %v5024_v4  ;;  %v5150_v21 = vadd.f32 %v5134_v62, %v5025_v45  ;;  %v17462_v7 = vld [vmem:[#allocation22_spill] sm:$0xff] }
 0x344   :  { %v5292_v51 = vsel %vm2189_vm14, %v5289_v42, %v5291_v19  ;;  %v5293_v0 = vsel %vm2189_vm14, %v5287_v28, %v5289_v42  ;;  %v5302_v28 = vld [vmem:[#allocation3 + $0x2c8] sm:$0xff]  ;;  %v5258_v3 = vcombine.high %v5250_v6, %v5250_v6  ;;  %v5268_v8 = vadd.f32 %v5233_v37, %v5143_v61 }
 0x345   :  { %v5328_v30 = vcombine.low %v5294_v52, %v5293_v0  ;;  %v5329_v55 = vcombine.low %v5292_v51, %v5299_v16  ;;  %v5327_v1 = vcombine.low %v5319_v44, %v5326_v31  ;;  %v5269_v43 = vadd.f32 %v5241_v11, %v5144_v59  ;;  %v17464_v16 = vld [vmem:[#allocation29_spill] sm:$0xff]  ;;  %v17465_v0 = vld [vmem:[#allocation30_spill] sm:$0xff] }
 0x346   :  { %v5270_v9 = vadd.f32 %v5240_v47, %v5145_v14  ;;  %v5271_v17 = vadd.f32 %v5242_v24, %v5146_v12  ;;  %v5259_v22 = vcombine.high %v5257_v40, %v5257_v40  ;;  %v5272_v63 = vadd.f32 %v5250_v6, %v5147_v5 }
 0x347   :  { %v5336_v39 = vrot.slane %v5328_v30, %v11066_v58  ;;  %v5343_v56 = vrot.slane %v5329_v55, %v11066_v58  ;;  %v5347_v20 = vmul.f32 %v5327_v1, %v5301_v13  ;;  %v5273_v10 = vadd.f32 %v5258_v3, %v5148_v2  ;;  %v17466_v55 = vld [vmem:[#allocation33_spill] sm:$0xff] }
 0x348   :  { %v5274_v19 = vadd.f32 %v5257_v40, %v5149_v36  ;;  %v5275_v57 = vadd.f32 %v5259_v22, %v5150_v21  ;;  %v17463_v42 = vcombine.high %v17462_v7, %v17462_v7  ;;  %v17467_v14 = vcombine.high %v17464_v16, %v17464_v16  ;;  %v17469_v40 = vld [vmem:[#allocation34_spill] sm:$0xff]  ;;  %v17473_v21 = vld [vmem:[#allocation37_spill] sm:$0xff] }
 0x349   :  { %v5344_v38 = vcombine.low %v5336_v39, %v5343_v56  ;;  %v5351_v35 = vcombine.high %v5347_v20, %v5347_v20  ;;  %v5358_v33 = vrot.slane %v5347_v20, %v11066_v58  ;;  %v17468_v1 = vcombine.high %v17465_v0, %v17465_v0  ;;  %v17470_v56 = vld [vmem:[#allocation36_spill] sm:$0xff] }
 0x34a   :  { %v17471_v2 = vcombine.high %v17466_v55, %v17466_v55 }
 0x34b   :  { %v5348_v18 = vmul.f32 %v5344_v38, %v5302_v28  ;;  %v5365_v34 = vrot.slane %v5351_v35, %v11066_v58  ;;  %v5366_v26 = vcombine.high %v5358_v33, %v5358_v33  ;;  %v5393_v25 = vadd.f32 %v5358_v33, %v5268_v8  ;;  %v17472_v28 = vld [vmem:[#allocation23_spill] sm:$0xff]  ;;  %v17476_v33 = vld [vmem:[#allocation41_spill] sm:$0xff] }
 0x34c   :  { %v17474_v38 = vcombine.high %v17469_v40, %v17469_v40 }
 0x34d   :  { %v5368_v4 = vcombine.high %v5348_v18, %v5348_v18  ;;  %v5375_v45 = vrot.slane %v5348_v18, %v11066_v58  ;;  %v5367_v49 = vcombine.high %v5365_v34, %v5365_v34  ;;  %v5394_v61 = vadd.f32 %v5366_v26, %v5269_v43 }
 0x34e   :  { %v5395_v29 = vadd.f32 %v5365_v34, %v5270_v9  ;;  %v5486_v37 = vadd.f32 %v17462_v7, %v5393_v25  ;;  %v17475_v43 = vcombine.high %v17470_v56, %v17470_v56  ;;  %v17478_v18 = vcombine.high %v17472_v28, %v17472_v28  ;;  %v17480_v25 = vld [vmem:[#allocation35_spill] sm:$0xff]  ;;  %v17484_v7 = vld [vmem:[#allocation17_spill] sm:$0xff] }
 0x34f   :  { %v5382_v47 = vrot.slane %v5368_v4, %v11066_v58  ;;  %v5383_v54 = vcombine.high %v5375_v45, %v5375_v45  ;;  %v5397_v44 = vadd.f32 %v5375_v45, %v5272_v63  ;;  %v5396_v52 = vadd.f32 %v5367_v49, %v5271_v17  ;;  %v17477_v17 = vld [vmem:[#allocation39_spill] sm:$0xff] }
 0x350   :  { %v5487_v31 = vadd.f32 %v17463_v42, %v5394_v61  ;;  %v5488_v51 = vadd.f32 %v17464_v16, %v5395_v29  ;;  %v5579_v62 = vadd.f32 %v17465_v0, %v5486_v37  ;;  %v17479_v34 = vcombine.high %v17473_v21, %v17473_v21 }
 0x351   :  { %v5384_v6 = vcombine.high %v5382_v47, %v5382_v47  ;;  %v5398_v13 = vadd.f32 %v5383_v54, %v5273_v10  ;;  %v5399_v30 = vadd.f32 %v5382_v47, %v5274_v19  ;;  %v5490_v59 = vadd.f32 %v17466_v55, %v5397_v44  ;;  %v17481_v19 = vld [vmem:[#allocation45_spill] sm:$0xff]  ;;  %v17492_v55 = vld [vmem:[#allocation15_spill] sm:$0xff] }
 0x352   :  { %v5489_v11 = vadd.f32 %v17467_v14, %v5396_v52  ;;  %v5580_v24 = vadd.f32 %v17468_v1, %v5487_v31  ;;  %v5581_v39 = vadd.f32 %v17469_v40, %v5488_v51  ;;  %v5672_v12 = vadd.f32 %v17470_v56, %v5579_v62  ;;  %v17488_v31 = vld [vmem:[#allocation46_spill] sm:$0xff] }
 0x353   :  { %v5400_v5 = vadd.f32 %v5384_v6, %v5275_v57  ;;  %v5491_v20 = vadd.f32 %v17471_v2, %v5398_v13  ;;  %v5492_v36 = vadd.f32 %v17472_v28, %v5399_v30  ;;  %v5583_v3 = vadd.f32 %v17473_v21, %v5490_v59  ;;  %v17485_v57 = vld [vmem:[#allocation47_spill] sm:$0xff]  ;;  %v17489_v51 = vld [vmem:[#allocation42_spill] sm:$0xff]  ;;  %v17499_v21 = vld [vmem:[#allocation32_spill] sm:$0xff] }
 0x354   :  { %v5582_v8 = vadd.f32 %v17474_v38, %v5489_v11  ;;  %v5673_v35 = vadd.f32 %v17475_v43, %v5580_v24  ;;  %v5674_v9 = vadd.f32 %v17476_v33, %v5581_v39  ;;  %v5765_v22 = vadd.f32 %v17477_v17, %v5672_v12  ;;  %v17495_v39 = vld [vmem:[#allocation27_spill] sm:$0xff]  ;;  %v17496_v12 = vld [vmem:[#allocation16_spill] sm:$0xff] }
 0x355   :  { %v5493_v63 = vadd.f32 %v17478_v18, %v5400_v5  ;;  %v5584_v26 = vadd.f32 %v17479_v34, %v5491_v20  ;;  %v5585_v10 = vadd.f32 %v17480_v25, %v5492_v36  ;;  %v5676_v4 = vadd.f32 %v17481_v19, %v5583_v3  ;;  %v17500_v38 = vld [vmem:[#allocation24_spill] sm:$0xff]  ;;  %v17504_v18 = vld [vmem:[#allocation38_spill] sm:$0xff] }
 0x356   :  { %v17482_v45 = vcombine.high %v17476_v33, %v17476_v33  ;;  %v17483_v61 = vcombine.high %v17477_v17, %v17477_v17  ;;  %v5767_v37 = vadd.f32 %v17484_v7, %v5674_v9  ;;  %v5858_v47 = vadd.f32 %v17485_v57, %v5765_v22  ;;  %v17503_v17 = vld [vmem:[#allocation49_spill] sm:$0xff] }
 0x357   :  { %v17486_v54 = vcombine.high %v17480_v25, %v17480_v25  ;;  %v17487_v52 = vcombine.high %v17481_v19, %v17481_v19  ;;  %v5678_v16 = vadd.f32 %v17488_v31, %v5585_v10  ;;  %v5769_v0 = vadd.f32 %v17489_v51, %v5676_v4  ;;  %v17507_v10 = vld [vmem:[#allocation43_spill] sm:$0xff]  ;;  %v17508_v4 = vld [vmem:[#allocation26_spill] sm:$0xff] }
 0x358   :  { %v5675_v49 = vadd.f32 %v17482_v45, %v5582_v8  ;;  %v5766_v29 = vadd.f32 %v17483_v61, %v5673_v35  ;;  %v17490_v62 = vcombine.high %v17484_v7, %v17484_v7  ;;  %v17491_v13 = vcombine.high %v17485_v57, %v17485_v57 }
 0x359   :  { %v5586_v44 = vadd.f32 %v17486_v54, %v5493_v63  ;;  %v5677_v42 = vadd.f32 %v17487_v52, %v5584_v26  ;;  %v5860_v59 = vadd.f32 %v17492_v55, %v5767_v37  ;;  %v5951_v14 = vadd.f32 %v13838_v50, %v5858_v47  ;;  %v17511_v37 = vld [vmem:[#allocation18_spill] sm:$0xff]  ;;  %v17512_v47 = vld [vmem:[#allocation40_spill] sm:$0xff] }
 0x35a   :  { %v5768_v6 = vadd.f32 %v17490_v62, %v5675_v49  ;;  %v5859_v30 = vadd.f32 %v17491_v13, %v5766_v29  ;;  %v17493_v11 = vcombine.high %v17488_v31, %v17488_v31  ;;  %v17494_v24 = vcombine.high %v17489_v51, %v17489_v51 }
 0x35b   :  { %v5771_v56 = vadd.f32 %v17495_v39, %v5678_v16  ;;  %v5862_v5 = vadd.f32 %v17496_v12, %v5769_v0  ;;  %v17497_v2 = vcombine.high %v17492_v55, %v17492_v55  ;;  %v17498_v28 = vcombine.high %v13838_v50, %v13838_v50 }
 0x35c   :  { %v5679_v1 = vadd.f32 %v17493_v11, %v5586_v44  ;;  %v5770_v40 = vadd.f32 %v17494_v24, %v5677_v42  ;;  %v5953_v3 = vadd.f32 %v17499_v21, %v5860_v59  ;;  %v6044_v8 = vadd.f32 %v17500_v38, %v5951_v14 }
 0x35d   :  { %v5861_v20 = vadd.f32 %v17497_v2, %v5768_v6  ;;  %v5952_v36 = vadd.f32 %v17498_v28, %v5859_v30  ;;  %v17501_v43 = vcombine.high %v17495_v39, %v17495_v39  ;;  %v17502_v33 = vcombine.high %v17496_v12, %v17496_v12  ;;  %v17517_v30 = vld [vmem:[#allocation31_spill] sm:$0xff] }
 0x35e   :  { %v5864_v22 = vadd.f32 %v17503_v17, %v5771_v56  ;;  %v5955_v63 = vadd.f32 %v17504_v18, %v5862_v5  ;;  %v17505_v50 = vcombine.high %v17499_v21, %v17499_v21  ;;  %v17506_v26 = vcombine.high %v17500_v38, %v17500_v38 }
 0x35f   :  { %v5772_v35 = vadd.f32 %v17501_v43, %v5679_v1  ;;  %v5863_v9 = vadd.f32 %v17502_v33, %v5770_v40  ;;  %v6046_v19 = vadd.f32 %v17507_v10, %v5953_v3  ;;  %v6137_v45 = vadd.f32 %v17508_v4, %v6044_v8  ;;  %v17525_v43 = vld [vmem:[#allocation12_spill] sm:$0xff] }
 0x360   :  { %v5954_v34 = vadd.f32 %v17505_v50, %v5861_v20  ;;  %v6045_v25 = vadd.f32 %v17506_v26, %v5952_v36  ;;  %v17509_v49 = vcombine.high %v17503_v17, %v17503_v17  ;;  %v17510_v29 = vcombine.high %v17504_v18, %v17504_v18  ;;  %v17528_v18 = vld [vmem:[#allocation28_spill] sm:$0xff] }
 0x361   :  { %v5957_v57 = vadd.f32 %v17511_v37, %v5864_v22  ;;  %v6048_v54 = vadd.f32 %v17512_v47, %v5955_v63  ;;  %v17513_v44 = vcombine.high %v17507_v10, %v17507_v10  ;;  %v17514_v42 = vcombine.high %v17508_v4, %v17508_v4 }
 0x362   :  { %v5865_v61 = vadd.f32 %v17509_v49, %v5772_v35  ;;  %v5956_v7 = vadd.f32 %v17510_v29, %v5863_v9  ;;  %v6139_v16 = vadd.f32 %v14045_v23, %v6046_v19  ;;  %v6230_v51 = vadd.f32 %v14144_v60, %v6137_v45  ;;  %v17532_v19 = vld [vmem:[#allocation8_spill] sm:$0xff] }
 0x363   :  { %v6047_v52 = vadd.f32 %v17513_v44, %v5954_v34  ;;  %v6138_v31 = vadd.f32 %v17514_v42, %v6045_v25  ;;  %v17515_v0 = vcombine.high %v17511_v37, %v17511_v37  ;;  %v17516_v6 = vcombine.high %v17512_v47, %v17512_v47  ;;  %v17537_v42 = vld [vmem:[#allocation10_spill] sm:$0xff] }
 0x364   :  { %v6050_v55 = vadd.f32 %v17517_v30, %v5957_v57  ;;  %v6141_v59 = vadd.f32 %v14089_v46, %v6048_v54  ;;  %v17518_v14 = vcombine.high %v14045_v23, %v14045_v23  ;;  %v17519_v1 = vcombine.high %v14144_v60, %v14144_v60  ;;  %v17535_v57 = vld [vmem:[#allocation11_spill] sm:$0xff]  ;;  %v17536_v54 = vld [vmem:[#allocation13_spill] sm:$0xff] }
 0x365   :  { %v5958_v62 = vadd.f32 %v17515_v0, %v5865_v61  ;;  %v6049_v13 = vadd.f32 %v17516_v6, %v5956_v7  ;;  %v6232_v40 = vadd.f32 %v14179_v53, %v6139_v16  ;;  %v6246_v39 = vrot.slane %v6230_v51, 6  ;;  %v6294_v7 = vld [vmem:[%s16917_s2] sm:$0x3] }
 0x366   :  { %v6140_v11 = vadd.f32 %v17518_v14, %v6047_v52  ;;  %v6231_v24 = vadd.f32 %v17519_v1, %v6138_v31  ;;  %v17520_v56 = vrot.slane %v17443_v15, 4  ;;  %v17521_v5 = vcombine.high %v17517_v30, %v17517_v30 }
 0x367   :  { %v17522_v20 = vcombine.high %v14089_v46, %v14089_v46  ;;  %v6143_v28 = vadd.f32 %v14092_v48, %v6050_v55  ;;  %v17523_v60 = vcombine.high %v14179_v53, %v14179_v53  ;;  %v6248_v3 = vrot.slane %v6232_v40, 6  ;;  %6262 = vst [vmem:[#allocation2 + $0x30] sm:$0xc] %v6246_v39 }
 0x368   :  { %v14624_v12 = vadd.f32 %v17520_v56, %v6230_v51  ;;  %v6051_v2 = vadd.f32 %v17521_v5, %v5958_v62  ;;  %v6247_v21 = vrot.slane %v6231_v24, 6  ;;  %v17524_v38 = vrot.slane %v17444_v32, 4 }
 0x369   :  { %v6142_v23 = vadd.f32 %v17522_v20, %v6049_v13  ;;  %v6233_v36 = vadd.f32 %v17523_v60, %v6140_v11  ;;  %v6277_v35 = vrot.slane %v17525_v43, 4  ;;  %v17526_v33 = vcombine.high %v14092_v48, %v14092_v48  ;;  %6264 = vst [vmem:[#allocation2 + $0x18] sm:$0xc] %v6248_v3  ;;  %v17529_v48 = vld [vmem:[#allocation6_spill] sm:$0xff] }
 0x36a   :  { %v14638_v8 = vadd.f32 %v17524_v38, %v6231_v24  ;;  %v14645_v9 = vadd.f32 %v14245_v27, %v6141_v59  ;;  %v17527_v53 = vcombine.high %v14245_v27, %v14245_v27  ;;  %6301 = vrot.lane.b32.xlu0 %v14624_v12, %s10668_s1  ;;  %6263 = vst [vmem:[#allocation2] sm:$0xc] %v6247_v21  ;;  %v17530_v50 = vrot.slane %v17529_v48, 4 }
 0x36b   :  { %v6144_v46 = vadd.f32 %v17526_v33, %v6051_v2  ;;  %v6249_v22 = vrot.slane %v6233_v36, 6  ;;  %v6236_v63 = vadd.f32 %v17528_v18, %v6143_v28  ;;  %v17531_v27 = vcombine.high %v17528_v18, %v17528_v18 }
 0x36c   :  { %v14650_v17 = vadd.f32 %v17527_v53, %v6142_v23  ;;  %6303 = vrot.lane.b32.xlu1 %v14638_v8, %s10668_s1  ;;  %v14659_v34 = vadd.f32 %v17530_v50, %v6232_v40  ;;  %v6250_v25 = vrot.slane %v14645_v9, 6  ;;  %v17533_v4 = vrot.slane %v17532_v19, 4 }
 0x36d   :  { %v6237_v26 = vadd.f32 %v17531_v27, %v6144_v46  ;;  %6265 = vst [vmem:[#allocation2 + $0x10] sm:$0xc] %v6249_v22  ;;  %v6252_v49 = vrot.slane %v6236_v63, 6  ;;  %v17534_v37 = vmov 0   ;;  %v6274_v47 = vrot.slane %v17535_v57, 4 }
 0x36e   :  { %v6251_v10 = vrot.slane %v14650_v17, 6  ;;  %v14668_v45 = vadd.f32 %v17533_v4, %v6233_v36  ;;  %6266 = vst [vmem:[#allocation2 + $0x8] sm:$0xc] %v6250_v25  ;;  %6305 = vrot.lane.b32.xlu0 %v14659_v34, %s10668_s1  ;;  %v6276_v44 = vrot.slane %v17536_v54, 4  ;;  %v6275_v31 = vrot.slane %v17537_v42, 4 }
 0x36f   :  { %v6253_v61 = vrot.slane %v6237_v26, 6  ;;  %v14670_v29 = vadd.f32 %v6277_v35, %v6237_v26  ;;  %6268 = vst [vmem:[#allocation2 + $0x28] sm:$0xc] %v6252_v49  ;;  %v14753_v52 = vadd.f32 %v6274_v47, %v14645_v9 }
 0x370   :  { %6267 = vst [vmem:[#allocation2 + $0x20] sm:$0xc] %v6251_v10  ;;  %6307 = vrot.lane.b32.xlu1 %v14668_v45, %s10668_s1  ;;  %v14760_v16 = vadd.f32 %v6276_v44, %v6236_v63  ;;  %v14763_v51 = vadd.f32 %v6275_v31, %v14650_v17 }
 0x371   :  { %6269 = vst [vmem:[#allocation2 + $0x38] sm:$0xc] %v6253_v61 }
 0x372   :  { %6315 = vrot.lane.b32.xlu0 %v14670_v29, %s10668_s1 }
 0x374   :  { %6426 = vrot.lane.b32.xlu1 %v14624_v12, %s10669_s0 }
 0x376   :  { %6428 = vrot.lane.b32.xlu0 %v14638_v8, %s10669_s0 }
 0x378   :  { %6430 = vrot.lane.b32.xlu1 %v14659_v34, %s10669_s0 }
 0x37a   :  { %6432 = vrot.lane.b32.xlu0 %v14668_v45, %s10669_s0 }
 0x37c   :  { %6440 = vrot.lane.b32.xlu1 %v14670_v29, %s10669_s0 }
 0x37e   :  { %6551 = vrot.lane.b32.xlu0 %v14624_v12, %s10670_s24 }
 0x380   :  { %6553 = vrot.lane.b32.xlu1 %v14638_v8, %s10670_s24 }
 0x382   :  { %6555 = vrot.lane.b32.xlu0 %v14659_v34, %s10670_s24 }
 0x384   :  { %6557 = vrot.lane.b32.xlu1 %v14668_v45, %s10670_s24 }
 0x386   :  { %6565 = vrot.lane.b32.xlu0 %v14670_v29, %s10670_s24 }
 0x388   :  { %6676 = vrot.lane.b32.xlu1 %v14624_v12, %s10671_s25 }
 0x38a   :  { %6678 = vrot.lane.b32.xlu0 %v14638_v8, %s10671_s25 }
 0x38c   :  { %6680 = vrot.lane.b32.xlu1 %v14659_v34, %s10671_s25 }
 0x38e   :  { %6682 = vrot.lane.b32.xlu0 %v14668_v45, %s10671_s25 }
 0x390   :  { %6690 = vrot.lane.b32.xlu1 %v14670_v29, %s10671_s25 }
 0x392   :  { %6297 = vperm.xlu0 %10567, %v6294_v7  }
 0x394   :  { %6801 = vrot.lane.b32.xlu1 %v14624_v12, %s10672_s26 }
 0x396   :  { %6805 = vrot.lane.b32.xlu0 %v14659_v34, %s10672_s26 }
 0x397   :  { %10569 = vset.pattern.permute.xlu0 %v17534_v37 }
 0x398   :  { %6803 = vrot.lane.b32.xlu1 %v14638_v8, %s10672_s26 }
 0x39a   :  { %6815 = vrot.lane.b32.xlu0 %v14670_v29, %s10672_s26 }
 0x39c   :  { %6807 = vrot.lane.b32.xlu1 %v14668_v45, %s10672_s26 }
 0x39e   :  { %6928 = vrot.lane.b32.xlu0 %v14638_v8, %s10673_s29 }
 0x3a0   :  { %6926 = vrot.lane.b32.xlu1 %v14624_v12, %s10673_s29 }
 0x3a2   :  { %6932 = vrot.lane.b32.xlu0 %v14668_v45, %s10673_s29 }
 0x3a4   :  { %6930 = vrot.lane.b32.xlu1 %v14659_v34, %s10673_s29 }
 0x3a6   :  { %7051 = vrot.lane.b32.xlu0 %v14624_v12, %s10674_s30 }
 0x3a8   :  { %6940 = vrot.lane.b32.xlu1 %v14670_v29, %s10673_s29 }
 0x3aa   :  { %7055 = vrot.lane.b32.xlu0 %v14659_v34, %s10674_s30 }
 0x3ac   :  { %7053 = vrot.lane.b32.xlu1 %v14638_v8, %s10674_s30 }
 0x3ae   :  { %7065 = vrot.lane.b32.xlu0 %v14670_v29, %s10674_s30 }
 0x3b0   :  { %7057 = vrot.lane.b32.xlu1 %v14668_v45, %s10674_s30 }
 0x3b2   :  { %7178 = vrot.lane.b32.xlu0 %v14638_v8, %s10675_s8 }
 0x3b4   :  { %7176 = vrot.lane.b32.xlu1 %v14624_v12, %s10675_s8 }
 0x3b6   :  { %7182 = vrot.lane.b32.xlu0 %v14668_v45, %s10675_s8 }
 0x3b8   :  { %7180 = vrot.lane.b32.xlu1 %v14659_v34, %s10675_s8 }
 0x3ba   :  { %6309 = vrot.lane.b32.xlu0 %v14753_v52, %s10668_s1 }
 0x3bc   :  { %7190 = vrot.lane.b32.xlu1 %v14670_v29, %s10675_s8 }
 0x3be   :  { %6313 = vrot.lane.b32.xlu0 %v14760_v16, %s10668_s1 }
 0x3c0   :  { %6311 = vrot.lane.b32.xlu1 %v14763_v51, %s10668_s1 }
 0x3c2   :  { %7303 = vrot.lane.b32.xlu0 %v14638_v8, %s10676_s9 }
 0x3c4   :  { %7301 = vrot.lane.b32.xlu1 %v14624_v12, %s10676_s9 }
 0x3c6   :  { %7307 = vrot.lane.b32.xlu0 %v14668_v45, %s10676_s9 }
 0x3c8   :  { %7305 = vrot.lane.b32.xlu1 %v14659_v34, %s10676_s9 }
 0x3ca   :  { %6434 = vrot.lane.b32.xlu0 %v14753_v52, %s10669_s0 }
 0x3cc   :  { %7315 = vrot.lane.b32.xlu1 %v14670_v29, %s10676_s9 }
 0x3ce   :  { %6438 = vrot.lane.b32.xlu0 %v14760_v16, %s10669_s0 }
 0x3d0   :  { %6436 = vrot.lane.b32.xlu1 %v14763_v51, %s10669_s0 }
 0x3d2   :  { %7428 = vrot.lane.b32.xlu0 %v14638_v8, %s10677_s10 }
 0x3d4   :  { %7426 = vrot.lane.b32.xlu1 %v14624_v12, %s10677_s10 }
 0x3d6   :  { %7432 = vrot.lane.b32.xlu0 %v14668_v45, %s10677_s10 }
 0x3d8   :  { %7430 = vrot.lane.b32.xlu1 %v14659_v34, %s10677_s10 }
 0x3da   :  { %6559 = vrot.lane.b32.xlu0 %v14753_v52, %s10670_s24 }
 0x3dc   :  { %7440 = vrot.lane.b32.xlu1 %v14670_v29, %s10677_s10  ;;  %v14797_v0 = vpop.permute.xlu0 %6301 }
 0x3de   :  { %v14799_v62 = vpop.permute.xlu1 %6303  ;;  %6563 = vrot.lane.b32.xlu0 %v14760_v16, %s10670_s24 }
 0x3df   :  { %v14934_v63 = vsel %vm73_vm0, %v14797_v0, %v14799_v62 }
 0x3e0   :  { %6561 = vrot.lane.b32.xlu1 %v14763_v51, %s10670_s24  ;;  %v14805_v6 = vpop.permute.xlu0 %6305  ;;  %17543 = vst [vmem:[#allocation25_spill] sm:$0xff] %v14934_v63 }
 0x3e1   :  { %v14965_v49 = vsel %vm73_vm0, %v14799_v62, %v14805_v6 }
 0x3e2   :  { %v14807_v13 = vpop.permute.xlu1 %6307  ;;  %7553 = vrot.lane.b32.xlu0 %v14638_v8, %s10678_s11  ;;  %17548 = vst [vmem:[#allocation33_spill] sm:$0xff] %v14965_v49 }
 0x3e3   :  { %v14940_v50 = vsel %vm73_vm0, %v14805_v6, %v14807_v13 }
 0x3e4   :  { %7551 = vrot.lane.b32.xlu1 %v14624_v12, %s10678_s11  ;;  %v14813_v30 = vpop.permute.xlu0 %6315  ;;  %17544 = vst [vmem:[#allocation19_spill] sm:$0xff] %v14940_v50  ;;  %v6337_v7 = vcombine.low %v14965_v49, %v14940_v50  ;;  %v7927_v49 = vld [vmem:[#allocation3 + $0x430] sm:$0xff] }
 0x3e5   :  { %v14921_v22 = vsel %vm73_vm0, %v14813_v30, %v14797_v0 }
 0x3e6   :  { %v6427_v55 = vpop.permute.xlu1 %6426  ;;  %7557 = vrot.lane.b32.xlu0 %v14668_v45, %s10678_s11  ;;  %17542 = vst [vmem:[#allocation21_spill] sm:$0xff] %v14921_v22  ;;  %v6336_v25 = vcombine.low %v14921_v22, %v14934_v63 }
 0x3e8   :  { %7555 = vrot.lane.b32.xlu1 %v14659_v34, %s10678_s11  ;;  %v14819_v59 = vpop.permute.xlu0 %6428  ;;  %v6344_v62 = vrot.slane %v6336_v25, %v11066_v58 }
 0x3e9   :  { %v14951_v10 = vsel %vm198_vm1, %v6427_v55, %v14819_v59 }
 0x3ea   :  { %v14821_v14 = vpop.permute.xlu1 %6430  ;;  %6684 = vrot.lane.b32.xlu0 %v14753_v52, %s10671_s25  ;;  %17546 = vst [vmem:[#allocation29_spill] sm:$0xff] %v14951_v10 }
 0x3eb   :  { %v14977_v37 = vsel %vm198_vm1, %v14819_v59, %v14821_v14 }
 0x3ec   :  { %7565 = vrot.lane.b32.xlu1 %v14670_v29, %s10678_s11  ;;  %v14827_v11 = vpop.permute.xlu0 %6432  ;;  %17549 = vst [vmem:[#allocation34_spill] sm:$0xff] %v14977_v37 }
 0x3ed   :  { %v14957_v4 = vsel %vm198_vm1, %v14821_v14, %v14827_v11 }
 0x3ee   :  { %v14829_v1 = vpop.permute.xlu1 %6440  ;;  %6688 = vrot.lane.b32.xlu0 %v14760_v16, %s10671_s25  ;;  %17547 = vst [vmem:[#allocation30_spill] sm:$0xff] %v14957_v4  ;;  %v6462_v44 = vcombine.low %v14977_v37, %v14957_v4 }
 0x3ef   :  { %v14928_v18 = vsel %vm198_vm1, %v14829_v1, %v6427_v55 }
 0x3f0   :  { %6686 = vrot.lane.b32.xlu1 %v14763_v51, %s10671_s25  ;;  %v14835_v24 = vpop.permute.xlu0 %6551  ;;  %v6461_v61 = vcombine.low %v14928_v18, %v14951_v10  ;;  %v6476_v54 = vrot.slane %v6462_v44, %v11066_v58 }
 0x3f2   :  { %v14837_v40 = vpop.permute.xlu1 %6553  ;;  %7678 = vrot.lane.b32.xlu0 %v14638_v8, %s10680_s12  ;;  %v6469_v59 = vrot.slane %v6461_v61, %v11066_v58 }
 0x3f3   :  { %v14996_v6 = vsel %vm324_vm2, %v14835_v24, %v14837_v40 }
 0x3f4   :  { %7676 = vrot.lane.b32.xlu1 %v14624_v12, %s10680_s12  ;;  %v14847_v56 = vpop.permute.xlu0 %6555  ;;  %17551 = vst [vmem:[#allocation23_spill] sm:$0xff] %v14996_v6 }
 0x3f5   :  { %v15016_v25 = vsel %vm324_vm2, %v14837_v40, %v14847_v56  ;;  %v6326_v40 = vld [vmem:[#allocation3 + $0x360] sm:$0xff] }
 0x3f6   :  { %v14843_v39 = vpop.permute.xlu1 %6557  ;;  %7682 = vrot.lane.b32.xlu0 %v14668_v45, %s10680_s12  ;;  %17553 = vst [vmem:[#allocation41_spill] sm:$0xff] %v15016_v25 }
 0x3f7   :  { %v15002_v55 = vsel %vm324_vm2, %v14847_v56, %v14843_v39  ;;  %v6477_v56 = vcombine.low %v6469_v59, %v6476_v54 }
 0x3f8   :  { %7680 = vrot.lane.b32.xlu1 %v14659_v34, %s10680_s12  ;;  %v14857_v2 = vpop.permute.xlu0 %6565  ;;  %17552 = vst [vmem:[#allocation37_spill] sm:$0xff] %v15002_v55  ;;  %v6587_v57 = vcombine.low %v15016_v25, %v15002_v55 }
 0x3f9   :  { %v14983_v47 = vsel %vm324_vm2, %v14857_v2, %v14835_v24  ;;  %v6351_v24 = vrot.slane %v6337_v7, %v11066_v58 }
 0x3fa   :  { %v14851_v5 = vpop.permute.xlu1 %6676  ;;  %6809 = vrot.lane.b32.xlu0 %v14753_v52, %s10672_s26  ;;  %v6586_v14 = vcombine.low %v14983_v47, %v14996_v6  ;;  %v6601_v59 = vrot.slane %v6587_v57, %v11066_v58  ;;  %v7938_v57 = vcombine.low %v14659_v34, %v14668_v45 }
 0x3fb   :  { %v6352_v42 = vcombine.low %v6344_v62, %v6351_v24  ;;  %v6451_v62 = vld [vmem:[#allocation3 + $0x370] sm:$0xff] }
 0x3fc   :  { %7690 = vrot.lane.b32.xlu1 %v14670_v29, %s10680_s12  ;;  %v14869_v28 = vpop.permute.xlu0 %6678  ;;  %v6594_v44 = vrot.slane %v6586_v14, %v11066_v58  ;;  %v6497_v55 = vmul.f32 %v6477_v56, %v6451_v62  ;;  %v7954_v62 = vcombine.low %v14753_v52, %v14763_v51 }
 0x3fd   :  { %v15038_v48 = vsel %vm450_vm3, %v14851_v5, %v14869_v28  ;;  %v6372_v19 = vmul.f32 %v6352_v42, %v6326_v40  ;;  %v7937_v40 = vcombine.low %v14624_v12, %v14638_v8 }
 0x3fe   :  { %v14859_v20 = vpop.permute.xlu1 %6680  ;;  %6813 = vrot.lane.b32.xlu0 %v14760_v16, %s10672_s26  ;;  %17555 = vst [vmem:[#allocation35_spill] sm:$0xff] %v15038_v48  ;;  %v6602_v4 = vcombine.low %v6594_v44, %v6601_v59  ;;  %v6501_v59 = vcombine.high %v6497_v55, %v6497_v55  ;;  %v6508_v25 = vrot.slane %v6497_v55, %v11066_v58 }
 0x3ff   :  { %v15136_v55 = vrot.slane %v7954_v62, %v11066_v58 }
 0x400   :  { %6811 = vrot.lane.b32.xlu1 %v14763_v51, %s10672_s26  ;;  %v14879_v36 = vpop.permute.xlu0 %6682 }
 0x401   :  { %v15044_v15 = vsel %vm450_vm3, %v14859_v20, %v14879_v36 }
 0x402   :  { %v14865_v23 = vpop.permute.xlu1 %6690  ;;  %7803 = vrot.lane.b32.xlu0 %v14638_v8, %s10681_s13  ;;  %17556 = vst [vmem:[#allocation45_spill] sm:$0xff] %v15044_v15 }
 0x403   :  { %17538 = vst [vmem:[#allocation14_spill] sm:$0xff] %v14865_v23  ;;  %v15025_v61 = vsel %vm450_vm3, %v14865_v23, %v14851_v5  ;;  %v15055_v5 = vsel %vm450_vm3, %v14869_v28, %v14859_v20  ;;  %v6576_v20 = vld [vmem:[#allocation3 + $0x380] sm:$0xff] }
 0x404   :  { %7801 = vrot.lane.b32.xlu1 %v14624_v12, %s10681_s13  ;;  %17554 = vst [vmem:[#allocation39_spill] sm:$0xff] %v15025_v61  ;;  %v6711_v54 = vcombine.low %v15025_v61, %v15038_v48  ;;  %17557 = vst [vmem:[#allocation17_spill] sm:$0xff] %v15055_v5  ;;  %v6712_v32 = vcombine.low %v15055_v5, %v15044_v15  ;;  %v6376_v15 = vcombine.high %v6372_v19, %v6372_v19 }
 0x405   :  { %v6622_v50 = vmul.f32 %v6602_v4, %v6576_v20 }
 0x406   :  { %v14873_v60 = vpop.permute.xlu1 %6801  ;;  %7807 = vrot.lane.b32.xlu0 %v14668_v45, %s10681_s13  ;;  %v6719_v28 = vrot.slane %v6711_v54, %v11066_v58  ;;  %v6726_v56 = vrot.slane %v6712_v32, %v11066_v58  ;;  %v6383_v54 = vrot.slane %v6372_v19, %v11066_v58  ;;  %v15091_v32 = vrot.slane %v7938_v57, %v11066_v58  ;;  %v6701_v57 = vld [vmem:[#allocation3 + $0x390] sm:$0xff] }
 0x407   :  { %v6390_v6 = vrot.slane %v6376_v15, %v11066_v58 }
 0x408   :  { %7805 = vrot.lane.b32.xlu1 %v14659_v34, %s10681_s13  ;;  %v6727_v48 = vcombine.low %v6719_v28, %v6726_v56  ;;  %v7945_v56 = vrot.slane %v7937_v40, %v11066_v58  ;;  %v6391_v40 = vcombine.high %v6383_v54, %v6383_v54 }
 0x40a   :  { %v14881_v21 = vpop.permute.xlu1 %6803  ;;  %6934 = vrot.lane.b32.xlu0 %v14753_v52, %s10673_s29  ;;  %v7953_v15 = vcombine.low %v7945_v56, %v15091_v32  ;;  %v6747_v10 = vmul.f32 %v6727_v48, %v6701_v57  ;;  %v6392_v57 = vcombine.high %v6390_v6, %v6390_v6 }
 0x40b   :  { %v15097_v5 = vsel %vm576_vm4, %v14873_v60, %v14881_v21 }
 0x40c   :  { %7815 = vrot.lane.b32.xlu1 %v14670_v29, %s10681_s13  ;;  %17561 = vst [vmem:[#allocation15_spill] sm:$0xff] %v15097_v5  ;;  %v15214_v61 = vmul.f32 %v7953_v15, %v7927_v49 }
 0x40d   :  { %v14887_v3 = vpop.permute.xlu0 %6297 }
 0x40e   :  { %v14889_v38 = vpop.permute.xlu1 %6807  ;;  %6938 = vrot.lane.b32.xlu0 %v14760_v16, %s10673_s29 }
 0x40f   :  { %17539 = vst [vmem:[#allocation44_spill] sm:$0xff] %v14889_v38 }
 0x410   :  { %6936 = vrot.lane.b32.xlu1 %v14763_v51, %s10673_s29 }
 0x411   :  { %v14895_v35 = vpop.permute.xlu0 %6805 }
 0x412   :  { %v14897_v33 = vpop.permute.xlu1 %6926  ;;  %7061 = vrot.lane.b32.xlu0 %v14763_v51, %s10674_s30  ;;  %v15103_v19 = vsel %vm576_vm4, %v14895_v35, %v14889_v38  ;;  %v15109_v4 = vsel %vm576_vm4, %v14881_v21, %v14895_v35  ;;  %v7955_v21 = vcombine.low %v14760_v16, %v14670_v29 }
 0x413   :  { %17562 = vst [vmem:[#allocation27_spill] sm:$0xff] %v15103_v19  ;;  %17563 = vst [vmem:[#allocation16_spill] sm:$0xff] %v15109_v4  ;;  %v6837_v35 = vcombine.low %v15109_v4, %v15103_v19  ;;  %v6420_v4 = vadd.f32 %v6390_v6, %v14887_v3  ;;  %v6751_v6 = vcombine.high %v6747_v10, %v6747_v10 }
 0x414   :  { %7059 = vrot.lane.b32.xlu1 %v14753_v52, %s10674_s30 }
 0x415   :  { %v14903_v46 = vpop.permute.xlu0 %6815  ;;  %v6851_v56 = vrot.slane %v6837_v35, %v11066_v58 }
 0x416   :  { %17540 = vst [vmem:[#allocation48_spill] sm:$0xff] %v14903_v46  ;;  %v14905_v9 = vpop.permute.xlu1 %6930  ;;  %8027 = vrot.lane.b32.xlu0 %v14624_v12, %s10682_s14  ;;  %v15081_v44 = vsel %vm576_vm4, %v14903_v46, %v14873_v60  ;;  %v6626_v46 = vcombine.high %v6622_v50, %v6622_v50 }
 0x417   :  { %17560 = vst [vmem:[#allocation42_spill] sm:$0xff] %v15081_v44  ;;  %v6836_v20 = vcombine.low %v15081_v44, %v15097_v5  ;;  %v6515_v44 = vrot.slane %v6501_v59, %v11066_v58 }
 0x418   :  { %7063 = vrot.lane.b32.xlu1 %v14760_v16, %s10674_s30  ;;  %v6640_v35 = vrot.slane %v6626_v46, %v11066_v58 }
 0x419   :  { %v14911_v53 = vpop.permute.xlu0 %6928  ;;  %v6844_v19 = vrot.slane %v6836_v20, %v11066_v58  ;;  %v6516_v20 = vcombine.high %v6508_v25, %v6508_v25  ;;  %v6517_v37 = vcombine.high %v6515_v44, %v6515_v44 }
 0x41a   :  { %v14913_v17 = vpop.permute.xlu1 %6940  ;;  %8031 = vrot.lane.b32.xlu0 %v14659_v34, %s10682_s14  ;;  %v15150_v32 = vsel %vm702_vm5, %v14897_v33, %v14911_v53  ;;  %v6642_v23 = vcombine.high %v6640_v35, %v6640_v35 }
 0x41b   :  { %17541 = vst [vmem:[#allocation20_spill] sm:$0xff] %v14913_v17  ;;  %17567 = vst [vmem:[#allocation38_spill] sm:$0xff] %v15150_v32  ;;  %v15156_v62 = vsel %vm702_vm5, %v14913_v17, %v14897_v33  ;;  %v6418_v33 = vadd.f32 %v6383_v54, %v14887_v3  ;;  %v6419_v17 = vadd.f32 %v6391_v40, %v14887_v3 }
 0x41c   :  { %8029 = vrot.lane.b32.xlu1 %v14638_v8, %s10682_s14  ;;  %17568 = vst [vmem:[#allocation43_spill] sm:$0xff] %v15156_v62  ;;  %v6633_v54 = vrot.slane %v6622_v50, %v11066_v58  ;;  %v6852_v40 = vcombine.low %v6844_v19, %v6851_v56  ;;  %v6826_v19 = vld [vmem:[#allocation3 + $0x3a0] sm:$0xff] }
 0x41d   :  { %v14942_v27 = vpop.permute.xlu0 %6932  ;;  %v6544_v56 = vadd.f32 %v6516_v20, %v6419_v17  ;;  %v6765_v20 = vrot.slane %v6751_v6, %v11066_v58 }
 0x41e   :  { %17545 = vst [vmem:[#allocation22_spill] sm:$0xff] %v14942_v27  ;;  %v14944_v26 = vpop.permute.xlu1 %7053  ;;  %8035 = vrot.lane.b32.xlu0 %v14753_v52, %s10682_s14  ;;  %v15130_v5 = vsel %vm702_vm5, %v14905_v9, %v14942_v27  ;;  %v15144_v27 = vsel %vm702_vm5, %v14911_v53, %v14905_v9  ;;  %v15167_v53 = vrot.slane %v7955_v21, %v11066_v58 }
 0x41f   :  { %17565 = vst [vmem:[#allocation24_spill] sm:$0xff] %v15130_v5  ;;  %17566 = vst [vmem:[#allocation49_spill] sm:$0xff] %v15144_v27  ;;  %v6962_v9 = vcombine.low %v15144_v27, %v15130_v5  ;;  %v6421_v5 = vadd.f32 %v6392_v57, %v14887_v3  ;;  %v6961_v27 = vcombine.low %v15156_v62, %v15150_v32 }
 0x420   :  { %8033 = vrot.lane.b32.xlu1 %v14668_v45, %s10682_s14 }
 0x421   :  { %v14987_v31 = vpop.permute.xlu0 %7051  ;;  %v6976_v57 = vrot.slane %v6962_v9, %v11066_v58  ;;  %v6543_v9 = vadd.f32 %v6508_v25, %v6418_v33  ;;  %v6969_v32 = vrot.slane %v6961_v27, %v11066_v58  ;;  %v6758_v25 = vrot.slane %v6747_v10, %v11066_v58  ;;  %v6951_v33 = vld [vmem:[#allocation3 + $0x3b0] sm:$0xff] }
 0x422   :  { %v14989_v0 = vpop.permute.xlu1 %7057  ;;  %7186 = vrot.lane.b32.xlu0 %v14763_v51, %s10675_s8  ;;  %v15193_v62 = vsel %vm828_vm6, %v14987_v31, %v14944_v26 }
 0x423   :  { %17550 = vst [vmem:[#allocation36_spill] sm:$0xff] %v14989_v0  ;;  %v6668_v10 = vadd.f32 %v6633_v54, %v6543_v9 }
 0x424   :  { %7184 = vrot.lane.b32.xlu1 %v14753_v52, %s10675_s8 }
 0x425   :  { %v15027_v43 = vpop.permute.xlu0 %7055 }
 0x426   :  { %v15029_v7 = vpop.permute.xlu1 %7176  ;;  %8152 = vrot.lane.b32.xlu0 %v14624_v12, %s10683_s15  ;;  %v15199_v50 = vsel %vm828_vm6, %v15027_v43, %v14989_v0  ;;  %v15205_v46 = vsel %vm828_vm6, %v14944_v26, %v15027_v43  ;;  %v6546_v0 = vadd.f32 %v6517_v37, %v6421_v5  ;;  %v6641_v26 = vcombine.high %v6633_v54, %v6633_v54 }
 0x427   :  { %17570 = vst [vmem:[#allocation18_spill] sm:$0xff] %v15199_v50  ;;  %v7087_v17 = vcombine.low %v15205_v46, %v15199_v50  ;;  %v6872_v37 = vmul.f32 %v6852_v40, %v6826_v19  ;;  %v6977_v5 = vcombine.low %v6969_v32, %v6976_v57  ;;  %v6767_v57 = vcombine.high %v6765_v20, %v6765_v20 }
 0x428   :  { %7188 = vrot.lane.b32.xlu1 %v14760_v16, %s10675_s8  ;;  %v6669_v49 = vadd.f32 %v6641_v26, %v6544_v56  ;;  %v6671_v6 = vadd.f32 %v6642_v23, %v6546_v0  ;;  %v15286_v26 = vadd.f32 %v6758_v25, %v6668_v10 }
 0x429   :  { %v15057_v14 = vpop.permute.xlu0 %7065  ;;  %v7101_v23 = vrot.slane %v7087_v17, %v11066_v58  ;;  %v6876_v19 = vcombine.high %v6872_v37, %v6872_v37  ;;  %v6997_v9 = vmul.f32 %v6977_v5, %v6951_v33  ;;  %v7076_v17 = vld [vmem:[#allocation3 + $0x3c0] sm:$0xff] }
 0x42a   :  { %17558 = vst [vmem:[#allocation47_spill] sm:$0xff] %v15057_v14  ;;  %v15059_v24 = vpop.permute.xlu1 %7180  ;;  %8156 = vrot.lane.b32.xlu0 %v14659_v34, %s10683_s15  ;;  %v15182_v21 = vsel %vm828_vm6, %v15057_v14, %v14987_v31  ;;  %v6545_v31 = vadd.f32 %v6515_v44, %v6420_v4 }
 0x42b   :  { %17569 = vst [vmem:[#allocation26_spill] sm:$0xff] %v15182_v21  ;;  %v7086_v14 = vcombine.low %v15182_v21, %v15193_v62 }
 0x42c   :  { %8154 = vrot.lane.b32.xlu1 %v14638_v8, %s10683_s15  ;;  %v6670_v15 = vadd.f32 %v6640_v35, %v6545_v31 }
 0x42d   :  { %v15070_v22 = vpop.permute.xlu0 %7178  ;;  %v7094_v43 = vrot.slane %v7086_v14, %v11066_v58 }
 0x42e   :  { %v15072_v42 = vpop.permute.xlu1 %7190  ;;  %8160 = vrot.lane.b32.xlu0 %v14753_v52, %s10683_s15  ;;  %v15239_v32 = vsel %vm954_vm7, %v15070_v22, %v15059_v24  ;;  %v15245_v54 = vsel %vm954_vm7, %v15029_v7, %v15070_v22  ;;  %v15294_v33 = vadd.f32 %v6765_v20, %v6670_v15  ;;  %v6890_v15 = vrot.slane %v6876_v19, %v11066_v58 }
 0x42f   :  { %17559 = vst [vmem:[#allocation46_spill] sm:$0xff] %v15072_v42  ;;  %v15251_v14 = vsel %vm954_vm7, %v15072_v42, %v15029_v7  ;;  %v6766_v7 = vcombine.high %v6758_v25, %v6758_v25  ;;  %v7102_v56 = vcombine.low %v7094_v43, %v7101_v23  ;;  %v15296_v23 = vadd.f32 %v6767_v57, %v6671_v6 }
 0x430   :  { %8158 = vrot.lane.b32.xlu1 %v14668_v45, %s10683_s15  ;;  %17573 = vst [vmem:[#allocation28_spill] sm:$0xff] %v15251_v14  ;;  %v7001_v6 = vcombine.high %v6997_v9, %v6997_v9 }
 0x431   :  { %v15113_v28 = vpop.permute.xlu0 %7182  ;;  %v15288_v43 = vadd.f32 %v6766_v7, %v6669_v49 }
 0x432   :  { %17564 = vst [vmem:[#allocation32_spill] sm:$0xff] %v15113_v28  ;;  %v15115_v60 = vpop.permute.xlu1 %6311  ;;  %7311 = vrot.lane.b32.xlu0 %v14763_v51, %s10676_s9  ;;  %v15228_v27 = vsel %vm954_vm7, %v15059_v24, %v15113_v28 }
 0x433   :  { %17572 = vst [vmem:[#allocation31_spill] sm:$0xff] %v15228_v27  ;;  %v7212_v0 = vcombine.low %v15239_v32, %v15228_v27 }
 0x434   :  { %7309 = vrot.lane.b32.xlu1 %v14753_v52, %s10676_s9 }
 0x435   :  { %v15158_v48 = vpop.permute.xlu0 %6309 }
 0x436   :  { %v15160_v59 = vpop.permute.xlu1 %7301  ;;  %8277 = vrot.lane.b32.xlu0 %v14624_v12, %s10684_s16  ;;  %v15282_v31 = vsel %vm73_vm0, %v14807_v13, %v15158_v48  ;;  %v15299_v13 = vrot.slane %v6872_v37, %v11066_v58 }
 0x438   :  { %7313 = vrot.lane.b32.xlu1 %v14760_v16, %s10676_s9  ;;  %v6891_v19 = vcombine.high %v15299_v13, %v15299_v13  ;;  %v6918_v21 = vadd.f32 %v15299_v13, %v15286_v26 }
 0x439   :  { %v6314_v38 = vpop.permute.xlu0 %6313 }
 0x43a   :  { %v15186_v63 = vpop.permute.xlu1 %7305  ;;  %8281 = vrot.lane.b32.xlu0 %v14659_v34, %s10684_s16  ;;  %v15259_v24 = vsel %vm73_vm0, %v6314_v38, %v14813_v30  ;;  %v15264_v22 = vsel %vm73_vm0, %v15115_v60, %v6314_v38  ;;  %v7211_v30 = vcombine.low %v15251_v14, %v15245_v54  ;;  %v15276_v38 = vsel %vm73_vm0, %v15158_v48, %v15115_v60 }
 0x43b   :  { %v6354_v5 = vcombine.low %v15264_v22, %v15259_v24  ;;  %v7226_v48 = vrot.slane %v7212_v0, %v11066_v58  ;;  %v6353_v49 = vcombine.low %v15282_v31, %v15276_v38  ;;  %v7122_v0 = vmul.f32 %v7102_v56, %v7076_v17 }
 0x43c   :  { %8279 = vrot.lane.b32.xlu1 %v14638_v8, %s10684_s16  ;;  %v7219_v57 = vrot.slane %v7211_v30, %v11066_v58  ;;  %v7008_v56 = vrot.slane %v6997_v9, %v11066_v58  ;;  %vm17579_vm0 = vcmp.lt.s32.totalorder %v11015_v41, 8 }
 0x43d   :  { %v7304_v44 = vpop.permute.xlu0 %7303  ;;  %v6368_v60 = vrot.slane %v6354_v5, %v11066_v58  ;;  %vm17582_vm12 = vmmov %vm17579_vm0 }
 0x43e   :  { %v15221_v4 = vpop.permute.xlu1 %7315  ;;  %8285 = vrot.lane.b32.xlu0 %v14753_v52, %s10684_s16  ;;  %v7043_v26 = vadd.f32 %v7008_v56, %v6918_v21 }
 0x43f   :  { %17571 = vst [vmem:[#allocation40_spill] sm:$0xff] %v15221_v4 }
 0x440   :  { %8283 = vrot.lane.b32.xlu1 %v14668_v45, %s10684_s16 }
 0x441   :  { %v15266_v35 = vpop.permute.xlu0 %7307 }
 0x442   :  { %17574 = vst [vmem:[#allocation50_spill] sm:$0xff] %v15266_v35  ;;  %v6437_v40 = vpop.permute.xlu1 %6436  ;;  %7436 = vrot.lane.b32.xlu0 %v14763_v51, %s10677_s10  ;;  %v15308_v7 = vsel %vm1080_vm8, %v15186_v63, %v15266_v35  ;;  %v15327_v35 = vsel %vm1080_vm8, %v7304_v44, %v15186_v63 }
 0x443   :  { %17575 = vst [vmem:[#allocation51_spill] sm:$0xff] %v15308_v7  ;;  %v7337_v63 = vcombine.low %v15327_v35, %v15308_v7 }
 0x444   :  { %7434 = vrot.lane.b32.xlu1 %v14753_v52, %s10677_s10 }
 0x445   :  { %v6435_v25 = vpop.permute.xlu0 %6434 }
 0x446   :  { %v7427_v10 = vpop.permute.xlu1 %7426  ;;  %v6444_v20 = vsel %vm198_vm1, %v6435_v25, %v6437_v40  ;;  %v15315_v37 = vsel %vm198_vm1, %v14827_v11, %v6435_v25  ;;  %8402 = vrot.lane.b32.xlu0 %v14624_v12, %s10685_s17  ;;  %v15332_v12 = vsel %vm1080_vm8, %v15160_v59, %v7304_v44  ;;  %v15338_v11 = vsel %vm1080_vm8, %v15221_v4, %v15160_v59 }
 0x447   :  { %17576 = vst [vmem:[#allocation52_spill] sm:$0xff] %v15338_v11  ;;  %v6478_v30 = vcombine.low %v15315_v37, %v6444_v20  ;;  %v7227_v44 = vcombine.low %v7219_v57, %v7226_v48  ;;  %v6361_v25 = vrot.slane %v6353_v49, %v11066_v58  ;;  %v7336_v9 = vcombine.low %v15338_v11, %v15332_v12  ;;  %v7201_v57 = vld [vmem:[#allocation3 + $0x3d0] sm:$0xff] }
 0x448   :  { %7438 = vrot.lane.b32.xlu1 %v14760_v16, %s10677_s10  ;;  %v6892_v48 = vcombine.high %v6890_v15, %v6890_v15  ;;  %v7015_v49 = vrot.slane %v7001_v6, %v11066_v58 }
 0x449   :  { %v6439_v17 = vpop.permute.xlu0 %6438  ;;  %v6369_v14 = vcombine.low %v6361_v25, %v6368_v60 }
 0x44a   :  { %v7431_v5 = vpop.permute.xlu1 %7430  ;;  %v6442_v59 = vsel %vm198_vm1, %v6439_v17, %v14829_v1  ;;  %v6443_v4 = vsel %vm198_vm1, %v6437_v40, %v6439_v17  ;;  %8406 = vrot.lane.b32.xlu0 %v14659_v34, %s10685_s17  ;;  %v7126_v1 = vcombine.high %v7122_v0, %v7122_v0  ;;  %v6327_v40 = vld [vmem:[#allocation3 + $0x368] sm:$0xff]  ;;  %v7351_v17 = vrot.slane %v7337_v63, %v11066_v58  ;;  %vm17580_vm1 = vmmov %vm17579_vm0 }
 0x44b   :  { %v6479_v7 = vcombine.low %v6443_v4, %v6442_v59  ;;  %v8640_v27 = vcombine.low %v6444_v20, %v6443_v4  ;;  %v8641_v28 = vcombine.low %v6442_v59, %v14928_v18  ;;  %v6486_v34 = vrot.slane %v6478_v30, %v11066_v58 }
 0x44c   :  { %8404 = vrot.lane.b32.xlu1 %v14638_v8, %s10685_s17  ;;  %v7016_v8 = vcombine.high %v7008_v56, %v7008_v56  ;;  %v7247_v63 = vmul.f32 %v7227_v44, %v7201_v57  ;;  %v7344_v30 = vrot.slane %v7336_v9, %v11066_v58  ;;  %v6373_v50 = vmul.f32 %v6369_v14, %v6327_v40 }
 0x44d   :  { %v6493_v11 = vrot.slane %v6479_v7, %v11066_v58  ;;  %v15364_v4 = vrot.slane %v8640_v27, %v11066_v58  ;;  %v7429_v18 = vpop.permute.xlu0 %7428  ;;  %v15369_v59 = vrot.slane %v8641_v28, %v11066_v58  ;;  %v7928_v7 = vld [vmem:[#allocation3 + $0x438] sm:$0xff]  ;;  %v7133_v27 = vrot.slane %v7122_v0, %v11066_v58 }
 0x44e   :  { %v15366_v20 = vpop.permute.xlu1 %7440  ;;  %v7447_v60 = vsel %vm1206_vm9, %v7429_v18, %v7431_v5  ;;  %v7448_v6 = vsel %vm1206_vm9, %v7427_v10, %v7429_v18  ;;  %8410 = vrot.lane.b32.xlu0 %v14753_v52, %s10685_s17  ;;  %v7017_v28 = vcombine.high %v7015_v49, %v7015_v49  ;;  %v7140_v0 = vrot.slane %v7126_v1, %v11066_v58 }
 0x44f   :  { %v6494_v25 = vcombine.low %v6486_v34, %v6493_v11  ;;  %v7449_v18 = vsel %vm1206_vm9, %v15366_v20, %v7427_v10  ;;  %v7352_v44 = vcombine.low %v7344_v30, %v7351_v17  ;;  %v6919_v57 = vadd.f32 %v6891_v19, %v15288_v43  ;;  %v7326_v34 = vld [vmem:[#allocation3 + $0x3e0] sm:$0xff]  ;;  %v6452_v17 = vld [vmem:[#allocation3 + $0x378] sm:$0xff] }
 0x450   :  { %8408 = vrot.lane.b32.xlu1 %v14668_v45, %s10685_s17  ;;  %v17577_v45 = vcombine.low %v15136_v55, %v15167_v53  ;;  %v6920_v40 = vadd.f32 %v6890_v15, %v15294_v33  ;;  %v6921_v10 = vadd.f32 %v6892_v48, %v15296_v23  ;;  %v7461_v42 = vcombine.low %v7449_v18, %v7448_v6 }
 0x451   :  { %v15389_v9 = vpop.permute.xlu0 %7432  ;;  %v7141_v13 = vcombine.high %v7133_v27, %v7133_v27  ;;  %v7251_v1 = vcombine.high %v7247_v63, %v7247_v63  ;;  %v7044_v53 = vadd.f32 %v7016_v8, %v6919_v57  ;;  %v6393_v23 = vcombine.high %v6373_v50, %v6373_v50 }
 0x452   :  { %v6562_v11 = vpop.permute.xlu1 %6561  ;;  %v15394_v14 = vmul.f32 %v17577_v45, %v7928_v7  ;;  %7561 = vrot.lane.b32.xlu0 %v14763_v51, %s10678_s11  ;;  %v7446_v55 = vsel %vm1206_vm9, %v7431_v5, %v15389_v9  ;;  %v7045_v43 = vadd.f32 %v7015_v49, %v6920_v40  ;;  %v7046_v33 = vadd.f32 %v7017_v28, %v6921_v10 }
 0x453   :  { %v7142_v15 = vcombine.high %v7140_v0, %v7140_v0  ;;  %v7258_v19 = vrot.slane %v7247_v63, %v11066_v58  ;;  %v7372_v48 = vmul.f32 %v7352_v44, %v7326_v34  ;;  %v7462_v6 = vcombine.low %v7447_v60, %v7446_v55 }
 0x454   :  { %7559 = vrot.lane.b32.xlu1 %v14753_v52, %s10678_s11  ;;  %v7168_v7 = vadd.f32 %v7133_v27, %v7043_v26  ;;  %v6498_v30 = vmul.f32 %v6494_v25, %v6452_v17  ;;  %v7169_v49 = vadd.f32 %v7141_v13, %v7044_v53  ;;  %v15417_v8 = vrot.slane %v7251_v1, %v11066_v58 }
 0x455   :  { %v6560_v21 = vpop.permute.xlu0 %6559  ;;  %v7469_v60 = vrot.slane %v7461_v42, %v11066_v58  ;;  %v7476_v27 = vrot.slane %v7462_v6, %v11066_v58  ;;  %v7170_v63 = vadd.f32 %v7140_v0, %v7045_v43  ;;  %v6400_v25 = vrot.slane %v6373_v50, %v11066_v58 }
 0x456   :  { %v7552_v56 = vpop.permute.xlu1 %7551  ;;  %v6569_v18 = vsel %vm324_vm2, %v6560_v21, %v6562_v11  ;;  %v15412_v5 = vsel %vm324_vm2, %v14843_v39, %v6560_v21  ;;  %7684 = vrot.lane.b32.xlu0 %v14753_v52, %s10680_s12  ;;  %v6407_v39 = vrot.slane %v6393_v23, %v11066_v58  ;;  %v15426_v44 = vadd.f32 %v7142_v15, %v7046_v33  ;;  %v7451_v23 = vld [vmem:[#allocation3 + $0x3f0] sm:$0xff] }
 0x457   :  { %v6603_v28 = vcombine.low %v15412_v5, %v6569_v18  ;;  %v7266_v45 = vcombine.high %v7258_v19, %v7258_v19  ;;  %v7376_v57 = vcombine.high %v7372_v48, %v7372_v48  ;;  %v7477_v40 = vcombine.low %v7469_v60, %v7476_v27 }
 0x458   :  { %7563 = vrot.lane.b32.xlu1 %v14760_v16, %s10678_s11  ;;  %v15428_v42 = vadd.f32 %v7258_v19, %v7168_v7  ;;  %v6518_v26 = vcombine.high %v6498_v30, %v6498_v30  ;;  %v6408_v53 = vcombine.high %v6400_v25, %v6400_v25  ;;  %v6409_v43 = vcombine.high %v6407_v39, %v6407_v39 }
 0x459   :  { %v6564_v10 = vpop.permute.xlu0 %6563  ;;  %v15447_v33 = vrot.slane %v7376_v57, %v11066_v58  ;;  %v6611_v15 = vrot.slane %v6603_v28, %v11066_v58  ;;  %v7294_v27 = vadd.f32 %v7266_v45, %v7169_v49  ;;  %v7295_v28 = vadd.f32 %v15417_v8, %v7170_v63 }
 0x45a   :  { %v7556_v34 = vpop.permute.xlu1 %7555  ;;  %v6567_v0 = vsel %vm324_vm2, %v6564_v10, %v14857_v2  ;;  %v6568_v50 = vsel %vm324_vm2, %v6562_v11, %v6564_v10  ;;  %7688 = vrot.lane.b32.xlu0 %v14760_v16, %s10680_s12  ;;  %v15443_v2 = vrot.slane %v7372_v48, %v11066_v58  ;;  %v6525_v11 = vrot.slane %v6498_v30, %v11066_v58  ;;  %v6577_v48 = vld [vmem:[#allocation3 + $0x388] sm:$0xff]  ;;  %vm17581_vm2 = vmmov %vm17579_vm0 }
 0x45b   :  { %v6604_v1 = vcombine.low %v6568_v50, %v6567_v0  ;;  %v8733_v17 = vcombine.low %v6569_v18, %v6568_v50  ;;  %v8734_v55 = vcombine.low %v6567_v0, %v14983_v47  ;;  %v6532_v7 = vrot.slane %v6518_v26, %v11066_v58 }
 0x45c   :  { %7686 = vrot.lane.b32.xlu1 %v14763_v51, %s10680_s12  ;;  %v6422_v57 = vadd.f32 %v6400_v25, %v14887_v3  ;;  %v6533_v26 = vcombine.high %v6525_v11, %v6525_v11  ;;  %v7497_v0 = vmul.f32 %v7477_v40, %v7451_v23  ;;  %v6424_v49 = vadd.f32 %v6407_v39, %v14887_v3 }
 0x45d   :  { %v6618_v19 = vrot.slane %v6604_v1, %v11066_v58  ;;  %v15452_v47 = vrot.slane %v8733_v17, %v11066_v58  ;;  %v7554_v6 = vpop.permute.xlu0 %7553  ;;  %v15458_v18 = vrot.slane %v8734_v55, %v11066_v58  ;;  %v6423_v17 = vadd.f32 %v6408_v53, %v14887_v3 }
 0x45e   :  { %v15454_v21 = vpop.permute.xlu1 %7565  ;;  %v7572_v30 = vsel %vm17579_vm0, %v7554_v6, %v7556_v34  ;;  %v7573_v60 = vsel %vm17580_vm1, %v7552_v56, %v7554_v6  ;;  %7811 = vrot.lane.b32.xlu0 %v14763_v51, %s10681_s13  ;;  %v6425_v63 = vadd.f32 %v6409_v43, %v14887_v3  ;;  %v7392_v40 = vcombine.high %v15447_v33, %v15447_v33 }
 0x45f   :  { %17578 = vst [vmem:[#allocation53_spill] sm:$0xff] %v15454_v21  ;;  %v6619_v10 = vcombine.low %v6611_v15, %v6618_v19  ;;  %v7574_v1 = vsel %vm17581_vm2, %v15454_v21, %v7552_v56  ;;  %v6534_v23 = vcombine.high %v6532_v7, %v6532_v7  ;;  %v6547_v56 = vadd.f32 %v6525_v11, %v6422_v57 }
 0x460   :  { %7809 = vrot.lane.b32.xlu1 %v14753_v52, %s10681_s13  ;;  %v7391_v52 = vcombine.high %v15443_v2, %v15443_v2  ;;  %v7586_v15 = vcombine.low %v7574_v1, %v7573_v60  ;;  %v6548_v43 = vadd.f32 %v6533_v26, %v6423_v17  ;;  %v6549_v19 = vadd.f32 %v6532_v7, %v6424_v49 }
 0x461   :  { %v6623_v25 = vmul.f32 %v6619_v10, %v6577_v48  ;;  %v15478_v45 = vpop.permute.xlu0 %7557  ;;  %v7501_v6 = vcombine.high %v7497_v0, %v7497_v0  ;;  %v7508_v48 = vrot.slane %v7497_v0, %v11066_v58  ;;  %v6550_v50 = vadd.f32 %v6534_v23, %v6425_v63 }
 0x462   :  { %v6687_v55 = vpop.permute.xlu1 %6686  ;;  %8037 = vrot.lane.b32.xlu0 %v14763_v51, %s10682_s14  ;;  %v7571_v3 = vsel %vm17582_vm12, %v7556_v34, %v15478_v45  ;;  %v7594_v13 = vrot.slane %v7586_v15, %v11066_v58  ;;  %v17583_v49 = vcombine.high %v15417_v8, %v15417_v8  ;;  %v7576_v15 = vld [vmem:[#allocation3 + $0x400] sm:$0xff]  ;;  %v17584_v8 = vld [vmem:[#allocation14_spill] sm:$0xff] }
 0x463   :  { %v6643_v53 = vcombine.high %v6623_v25, %v6623_v25  ;;  %v6650_v39 = vrot.slane %v6623_v25, %v11066_v58  ;;  %v7587_v11 = vcombine.low %v7572_v30, %v7571_v3  ;;  %v7516_v23 = vcombine.high %v7508_v48, %v7508_v48 }
 0x464   :  { %7813 = vrot.lane.b32.xlu1 %v14760_v16, %s10681_s13  ;;  %v7296_v63 = vadd.f32 %v17583_v49, %v15426_v44 }
 0x465   :  { %v6657_v60 = vrot.slane %v6643_v53, %v11066_v58  ;;  %v6658_v10 = vcombine.high %v6650_v39, %v6650_v39  ;;  %v15494_v1 = vadd.f32 %v6650_v39, %v6547_v56  ;;  %v6685_v57 = vpop.permute.xlu0 %6684  ;;  %v7601_v17 = vrot.slane %v7587_v11, %v11066_v58 }
 0x466   :  { %v7677_v25 = vpop.permute.xlu1 %7676  ;;  %v6694_v34 = vsel %vm450_vm3, %v6685_v57, %v6687_v55  ;;  %v15502_v7 = vsel %vm450_vm3, %v14879_v36, %v6685_v57  ;;  %8041 = vrot.lane.b32.xlu0 %v14670_v29, %s10682_s14  ;;  %v7515_v36 = vrot.slane %v7501_v6, %v11066_v58  ;;  %v7418_v53 = vadd.f32 %v15443_v2, %v15428_v42 }
 0x467   :  { %v6659_v26 = vcombine.high %v6657_v60, %v6657_v60  ;;  %v15506_v0 = vadd.f32 %v6658_v10, %v6548_v43  ;;  %v15508_v30 = vadd.f32 %v6657_v60, %v6549_v19  ;;  %v6728_v56 = vcombine.low %v15502_v7, %v6694_v34 }
 0x468   :  { %8039 = vrot.lane.b32.xlu1 %v14760_v16, %s10682_s14  ;;  %v7419_v39 = vadd.f32 %v7391_v52, %v7294_v27  ;;  %v7602_v43 = vcombine.low %v7594_v13, %v7601_v17  ;;  %v7420_v10 = vadd.f32 %v15447_v33, %v7295_v28  ;;  %v7421_v11 = vadd.f32 %v7392_v40, %v7296_v63 }
 0x469   :  { %v15521_v3 = vadd.f32 %v6659_v26, %v6550_v50  ;;  %v6689_v19 = vpop.permute.xlu0 %6688  ;;  %v17585_v50 = vld [vmem:[#allocation39_spill] sm:$0xff]  ;;  %v7517_v33 = vcombine.high %v7515_v36, %v7515_v36  ;;  %v7543_v28 = vadd.f32 %v7508_v48, %v7418_v53  ;;  %v6736_v40 = vrot.slane %v6728_v56, %v11066_v58 }
 0x46a   :  { %v7681_v60 = vpop.permute.xlu1 %7680  ;;  %v6692_v44 = vsel %vm450_vm3, %v6689_v19, %v17584_v8  ;;  %v6693_v6 = vsel %vm450_vm3, %v6687_v55, %v6689_v19  ;;  %8164 = vrot.lane.b32.xlu0 %v14760_v16, %s10683_s15  ;;  %v7622_v42 = vmul.f32 %v7602_v43, %v7576_v15  ;;  %v7544_v52 = vadd.f32 %v7516_v23, %v7419_v39  ;;  %v6702_v15 = vld [vmem:[#allocation3 + $0x398] sm:$0xff] }
 0x46b   :  { %v6729_v2 = vcombine.low %v6693_v6, %v6692_v44  ;;  %v8826_v27 = vcombine.low %v6694_v34, %v6693_v6  ;;  %v8827_v13 = vcombine.low %v6692_v44, %v17585_v50  ;;  %v7545_v63 = vadd.f32 %v7515_v36, %v7420_v10  ;;  %v17604_v10 = vld [vmem:[#allocation17_spill] sm:$0xff] }
 0x46c   :  { %8162 = vrot.lane.b32.xlu1 %v14763_v51, %s10683_s15  ;;  %v7626_v57 = vcombine.high %v7622_v42, %v7622_v42  ;;  %v7633_v26 = vrot.slane %v7622_v42, %v11066_v58  ;;  %vm17587_vm3 = vcmp.lt.s32.totalorder %v11015_v41, 7  ;;  %v7546_v36 = vadd.f32 %v7517_v33, %v7421_v11 }
 0x46d   :  { %v6743_v55 = vrot.slane %v6729_v2, %v11066_v58  ;;  %v15538_v17 = vrot.slane %v8826_v27, %v11066_v58  ;;  %v7679_v49 = vpop.permute.xlu0 %7678  ;;  %v15543_v43 = vrot.slane %v8827_v13, %v11066_v58  ;;  %vm17588_vm13 = vmmov %vm17587_vm3  ;;  %v7994_v44 = vcombine.high %v15394_v14, %v15394_v14 }
 0x46e   :  { %v15540_v34 = vpop.permute.xlu1 %7690  ;;  %v7697_v48 = vsel %vm17587_vm3, %v7679_v49, %v7681_v60  ;;  %v7698_v23 = vsel %vm17588_vm13, %v7677_v25, %v7679_v49  ;;  %8287 = vrot.lane.b32.xlu0 %v14763_v51, %s10684_s16  ;;  %v7640_v56 = vrot.slane %v7626_v57, %v11066_v58  ;;  %v7641_v53 = vcombine.high %v7633_v26, %v7633_v26  ;;  %vm17589_vm11 = vmmov %vm17587_vm3 }
 0x46f   :  { %17586 = vst [vmem:[#allocation14_spill] sm:$0xff] %v15540_v34  ;;  %v15552_v39 = vadd.f32 %v7633_v26, %v7543_v28  ;;  %v6744_v19 = vcombine.low %v6736_v40, %v6743_v55  ;;  %v7699_v8 = vsel %vm17589_vm11, %v15540_v34, %v7677_v25  ;;  %vm17591_vm10 = vmmov %vm17587_vm3  ;;  %v15581_v40 = vrot.slane %v15214_v61, %v11066_v58 }
 0x470   :  { %8166 = vrot.lane.b32.xlu1 %v14670_v29, %s10683_s15  ;;  %v7642_v6 = vcombine.high %v7640_v56, %v7640_v56  ;;  %v15563_v42 = vadd.f32 %v7641_v53, %v7544_v52  ;;  %v15565_v2 = vadd.f32 %v7640_v56, %v7545_v63  ;;  %v7711_v11 = vcombine.low %v7699_v8, %v7698_v23 }
 0x471   :  { %v6748_v27 = vmul.f32 %v6744_v19, %v6702_v15  ;;  %v15567_v50 = vpop.permute.xlu0 %7682  ;;  %v17592_v57 = vcombine.high %v15214_v61, %v15214_v61  ;;  %v15591_v55 = vrot.slane %v15394_v14, %v11066_v58  ;;  %v15594_v49 = vrot.slane %v7994_v44, %v11066_v58  ;;  %v17595_v19 = vld [vmem:[#allocation33_spill] sm:$0xff] }
 0x472   :  { %17590 = vst [vmem:[#allocation39_spill] sm:$0xff] %v15567_v50  ;;  %v6812_v13 = vpop.permute.xlu1 %6811  ;;  %8291 = vrot.lane.b32.xlu0 %v14670_v29, %s10684_s16  ;;  %v15571_v33 = vadd.f32 %v7642_v6, %v7546_v36  ;;  %v7696_v52 = vsel %vm17591_vm10, %v7681_v60, %v15567_v50  ;;  %v17596_v61 = vld [vmem:[#allocation25_spill] sm:$0xff]  ;;  %v7719_v8 = vrot.slane %v7711_v11, %v11066_v58  ;;  %v17597_v6 = vld [vmem:[#allocation44_spill] sm:$0xff]  ;;  %vm17655_vm3 = vcmp.lt.s32.totalorder %v11015_v41, 121 }
 0x473   :  { %v6768_v28 = vcombine.high %v6748_v27, %v6748_v27  ;;  %v6775_v25 = vrot.slane %v6748_v27, %v11066_v58  ;;  %v15587_v26 = vrot.slane %v17592_v57, %v11066_v58  ;;  %17593 = vst [vmem:[#allocation54_spill] sm:$0xff] %v15591_v55  ;;  %17594 = vst [vmem:[#allocation55_spill] sm:$0xff] %v15594_v49  ;;  %v7701_v57 = vld [vmem:[#allocation3 + $0x410] sm:$0xff]  ;;  %v17605_v55 = vld [vmem:[#allocation35_spill] sm:$0xff] }
 0x474   :  { %8289 = vrot.lane.b32.xlu1 %v14760_v16, %s10684_s16  ;;  %v7712_v23 = vcombine.low %v7697_v48, %v7696_v52  ;;  %v8530_v36 = vcombine.low %v17596_v61, %v17595_v19  ;;  %v17600_v61 = vld [vmem:[#allocation48_spill] sm:$0xff]  ;;  %vm17656_vm13 = vmmov %vm17655_vm3 }
 0x475   :  { %v6782_v60 = vrot.slane %v6768_v28, %v11066_v58  ;;  %v6783_v63 = vcombine.high %v6775_v25, %v6775_v25  ;;  %v15598_v15 = vadd.f32 %v6775_v25, %v15494_v1  ;;  %v6810_v56 = vpop.permute.xlu0 %6809  ;;  %v17598_v28 = vld [vmem:[#allocation34_spill] sm:$0xff]  ;;  %v17599_v25 = vld [vmem:[#allocation29_spill] sm:$0xff]  ;;  %vm17658_vm11 = vmmov %vm17655_vm3 }
 0x476   :  { %v7802_v53 = vpop.permute.xlu1 %7801  ;;  %v6819_v14 = vsel %vm576_vm4, %v6810_v56, %v6812_v13  ;;  %v15608_v44 = vsel %vm576_vm4, %v17597_v6, %v6810_v56  ;;  %8414 = vrot.lane.b32.xlu0 %v14760_v16, %s10685_s17  ;;  %v7726_v11 = vrot.slane %v7712_v23, %v11066_v58  ;;  %v8623_v52 = vcombine.low %v17599_v25, %v17598_v28  ;;  %v17601_v25 = vld [vmem:[#allocation42_spill] sm:$0xff]  ;;  %v17603_v16 = vld [vmem:[#allocation23_spill] sm:$0xff]  ;;  %vm17659_vm10 = vmmov %vm17655_vm3 }
 0x477   :  { %v6784_v1 = vcombine.high %v6782_v60, %v6782_v60  ;;  %v15613_v48 = vadd.f32 %v6783_v63, %v15506_v0  ;;  %v15616_v27 = vadd.f32 %v6782_v60, %v15508_v30  ;;  %v6853_v56 = vcombine.low %v15608_v44, %v6819_v14 }
 0x478   :  { %8412 = vrot.lane.b32.xlu1 %v14763_v51, %s10685_s17  ;;  %v7727_v63 = vcombine.low %v7719_v8, %v7726_v11  ;;  %v15634_v19 = vrot.slane %v8530_v36, %v11066_v58  ;;  %v15647_v36 = vrot.slane %v8623_v52, %v11066_v58  ;;  %v17602_v51 = vld [vmem:[#allocation41_spill] sm:$0xff]  ;;  %v17608_v52 = vld [vmem:[#allocation19_spill] sm:$0xff] }
 0x479   :  { %v15627_v0 = vadd.f32 %v6784_v1, %v15521_v3  ;;  %v6814_v30 = vpop.permute.xlu0 %6813 }
 0x47a   :  { %v7806_v60 = vpop.permute.xlu1 %7805  ;;  %v6817_v6 = vsel %vm576_vm4, %v6814_v30, %v17600_v61  ;;  %v6818_v3 = vsel %vm576_vm4, %v6812_v13, %v6814_v30  ;;  %v7747_v1 = vmul.f32 %v7727_v63, %v7701_v57  ;;  %v8716_v61 = vcombine.low %v17603_v16, %v17602_v51 }
 0x47b   :  { %v6854_v11 = vcombine.low %v6818_v3, %v6817_v6  ;;  %v8919_v28 = vcombine.low %v6819_v14, %v6818_v3  ;;  %v8920_v23 = vcombine.low %v6817_v6, %v17601_v25  ;;  %v8809_v13 = vcombine.low %v17605_v55, %v17604_v10  ;;  %v6827_v10 = vld [vmem:[#allocation3 + $0x3a8] sm:$0xff] }
 0x47c   :  { %8416 = vrot.lane.b32.xlu1 %v14670_v29, %s10685_s17  ;;  %v6861_v30 = vrot.slane %v6853_v56, %v11066_v58  ;;  %v7751_v8 = vcombine.high %v7747_v1, %v7747_v1  ;;  %v7758_v57 = vrot.slane %v7747_v1, %v11066_v58  ;;  %v8531_v3 = vcombine.low %v17608_v52, %v15282_v31  ;;  %v17611_v25 = vld [vmem:[#allocation21_spill] sm:$0xff]  ;;  %v17612_v52 = vld [vmem:[#allocation30_spill] sm:$0xff] }
 0x47d   :  { %v6868_v14 = vrot.slane %v6854_v11, %v11066_v58  ;;  %v15657_v63 = vrot.slane %v8919_v28, %v11066_v58  ;;  %v7804_v29 = vpop.permute.xlu0 %7803  ;;  %v8547_v16 = vcombine.low %v15276_v38, %v15264_v22  ;;  %v15666_v55 = vrot.slane %v8920_v23, %v11066_v58  ;;  %v17618_v38 = vld [vmem:[#allocation38_spill] sm:$0xff] }
 0x47e   :  { %v15659_v6 = vpop.permute.xlu1 %7815  ;;  %vm17610_vm4 = vcmp.lt.s32.totalorder %v11015_v41, 1  ;;  %v7765_v51 = vrot.slane %v7751_v8, %v11066_v58  ;;  %v7766_v1 = vcombine.high %v7758_v57, %v7758_v57  ;;  %v15672_v11 = vadd.f32 %v7758_v57, %v15552_v39 }
 0x47f   :  { %17606 = vst [vmem:[#allocation33_spill] sm:$0xff] %v15657_v63  ;;  %17607 = vst [vmem:[#allocation25_spill] sm:$0xff] %v15659_v6  ;;  %v7823_v56 = vsel %vm17610_vm4, %v7802_v53, %v7804_v29  ;;  %v6869_v28 = vcombine.low %v6861_v30, %v6868_v14  ;;  %v8548_v31 = vcombine.low %v15259_v24, %v17611_v25  ;;  %v17615_v14 = vld [vmem:[#allocation16_spill] sm:$0xff] }
 0x480   :  { %17609 = vst [vmem:[#allocation44_spill] sm:$0xff] %v15666_v55  ;;  %v8624_v22 = vcombine.low %v17612_v52, %v15315_v37  ;;  %vm17613_vm0 = vmmov %vm17610_vm4  ;;  %v7767_v49 = vcombine.high %v7765_v51, %v7765_v51  ;;  %v15684_v8 = vadd.f32 %v7766_v1, %v15563_v42  ;;  %v15687_v39 = vadd.f32 %v7765_v51, %v15565_v2  ;;  %v17616_v37 = vld [vmem:[#allocation15_spill] sm:$0xff]  ;;  %v17617_v52 = vld [vmem:[#allocation49_spill] sm:$0xff] }
 0x481   :  { %v7824_v23 = vsel %vm17613_vm0, %v15659_v6, %v7802_v53  ;;  %v6873_v30 = vmul.f32 %v6869_v28, %v6827_v10  ;;  %v15689_v57 = vpop.permute.xlu0 %7807  ;;  %v8902_v25 = vcombine.low %v17616_v37, %v17615_v14  ;;  %v8995_v55 = vcombine.low %v17618_v38, %v17617_v52  ;;  %vm17619_vm1 = vmmov %vm17613_vm0 }
 0x482   :  { %17614 = vst [vmem:[#allocation34_spill] sm:$0xff] %v15689_v57  ;;  %v6937_v24 = vpop.permute.xlu1 %6936  ;;  %v8545_v63 = vrot.slane %v8531_v3, %v11066_v58  ;;  %v7836_v53 = vcombine.low %v7824_v23, %v7823_v56  ;;  %v15697_v6 = vadd.f32 %v7767_v49, %v15571_v33  ;;  %v7821_v10 = vsel %vm17619_vm1, %v7806_v60, %v15689_v57  ;;  %vm17620_vm2 = vmmov %vm17613_vm0 }
 0x483   :  { %v6893_v42 = vcombine.high %v6873_v30, %v6873_v30  ;;  %v6900_v2 = vrot.slane %v6873_v30, %v11066_v58  ;;  %v8555_v51 = vrot.slane %v8547_v16, %v11066_v58  ;;  %v8562_v1 = vrot.slane %v8548_v31, %v11066_v58 }
 0x484   :  { %v8638_v28 = vrot.slane %v8624_v22, %v11066_v58  ;;  %v7822_v3 = vsel %vm17620_vm2, %v7804_v29, %v7806_v60  ;;  %v8546_v14 = vcombine.low %v15634_v19, %v8545_v63  ;;  %v7844_v16 = vrot.slane %v7836_v53, %v11066_v58  ;;  %v17621_v22 = vld [vmem:[#allocation22_spill] sm:$0xff]  ;;  %v8528_v29 = vld [vmem:[#allocation3 + $0x480] sm:$0xff] }
 0x485   :  { %v6907_v56 = vrot.slane %v6893_v42, %v11066_v58  ;;  %v6908_v33 = vcombine.high %v6900_v2, %v6900_v2  ;;  %v15710_v49 = vadd.f32 %v6900_v2, %v15598_v15  ;;  %v7837_v38 = vcombine.low %v7822_v3, %v7821_v10  ;;  %v6935_v23 = vpop.permute.xlu0 %6934  ;;  %v7826_v2 = vld [vmem:[#allocation3 + $0x420] sm:$0xff] }
 0x486   :  { %v15712_v30 = vpop.permute.xlu1 %7059  ;;  %v6944_v31 = vsel %vm702_vm5, %v6935_v23, %v6937_v24  ;;  %v15721_v60 = vsel %vm702_vm5, %v17621_v22, %v6935_v23  ;;  %v15731_v63 = vrot.slane %v8716_v61, %v11066_v58  ;;  %v9088_v53 = vcombine.low %v15193_v62, %v15205_v46  ;;  %v8621_v46 = vld [vmem:[#allocation3 + $0x490] sm:$0xff] }
 0x487   :  { %v6909_v37 = vcombine.high %v6907_v56, %v6907_v56  ;;  %v15724_v15 = vadd.f32 %v6908_v33, %v15613_v48  ;;  %v15727_v52 = vadd.f32 %v6907_v56, %v15616_v27  ;;  %v7851_v19 = vrot.slane %v7837_v38, %v11066_v58  ;;  %v8529_v48 = vld [vmem:[#allocation3 + $0x488] sm:$0xff] }
 0x488   :  { %v8563_v42 = vcombine.low %v8555_v51, %v8562_v1  ;;  %v6978_v10 = vcombine.low %v15721_v60, %v6944_v31  ;;  %v15737_v3 = vrot.slane %v8809_v13, %v11066_v58  ;;  %v8639_v33 = vcombine.low %v15647_v36, %v8638_v28  ;;  %v17622_v51 = vld [vmem:[#allocation20_spill] sm:$0xff] }
 0x489   :  { %v15741_v27 = vadd.f32 %v6909_v37, %v15627_v0  ;;  %v7852_v56 = vcombine.low %v7844_v16, %v7851_v19  ;;  %v6939_v38 = vpop.permute.xlu0 %6938  ;;  %v15744_v23 = vrot.slane %v8902_v25, %v11066_v58  ;;  %v8566_v62 = vmul.f32 %v8546_v14, %v8528_v29  ;;  %v17623_v29 = vld [vmem:[#allocation43_spill] sm:$0xff] }
 0x48a   :  { %v7064_v61 = vpop.permute.xlu1 %7063  ;;  %v6942_v1 = vsel %vm702_vm5, %v6939_v38, %v17622_v51  ;;  %v6943_v13 = vsel %vm702_vm5, %v6937_v24, %v6939_v38  ;;  %v15752_v36 = vrot.slane %v8995_v55, %v11066_v58  ;;  %v15755_v22 = vrot.slane %v9088_v53, %v11066_v58 }
 0x48b   :  { %v7872_v0 = vmul.f32 %v7852_v56, %v7826_v2  ;;  %v6979_v28 = vcombine.low %v6943_v13, %v6942_v1  ;;  %v9012_v16 = vcombine.low %v6944_v31, %v6943_v13  ;;  %v8567_v14 = vmul.f32 %v8563_v42, %v8529_v48  ;;  %v17626_v42 = vld [vmem:[#allocation37_spill] sm:$0xff]  ;;  %v6952_v13 = vld [vmem:[#allocation3 + $0x3b8] sm:$0xff] }
 0x48c   :  { %v9013_v37 = vcombine.low %v6942_v1, %v17623_v29  ;;  %v8659_v19 = vmul.f32 %v8639_v33, %v8621_v46  ;;  %v8570_v2 = vcombine.high %v8566_v62, %v8566_v62  ;;  %v6986_v31 = vrot.slane %v6978_v10, %v11066_v58 }
 0x48d   :  { %v7876_v51 = vcombine.high %v7872_v0, %v7872_v0  ;;  %v7883_v34 = vrot.slane %v7872_v0, %v11066_v58  ;;  %v6993_v24 = vrot.slane %v6979_v28, %v11066_v58  ;;  %v7062_v55 = vpop.permute.xlu0 %7061  ;;  %v15766_v53 = vrot.slane %v9012_v16, %v11066_v58  ;;  %v8622_v28 = vld [vmem:[#allocation3 + $0x498] sm:$0xff] }
 0x48e   :  { %v15762_v38 = vpop.permute.xlu1 %8029  ;;  %v15769_v56 = vrot.slane %v9013_v37, %v11066_v58  ;;  %v8717_v48 = vcombine.low %v17626_v42, %v15412_v5  ;;  %v15778_v0 = vrot.slane %v8566_v62, %v11066_v58  ;;  %v8587_v10 = vcombine.high %v8567_v14, %v8567_v14  ;;  %v17627_v42 = vld [vmem:[#allocation47_spill] sm:$0xff] }
 0x48f   :  { %17624 = vst [vmem:[#allocation29_spill] sm:$0xff] %v15766_v53  ;;  %v7890_v33 = vrot.slane %v7876_v51, %v11066_v58  ;;  %v7891_v46 = vcombine.high %v7883_v34, %v7883_v34  ;;  %v15775_v1 = vadd.f32 %v7883_v34, %v15672_v11  ;;  %v6994_v16 = vcombine.low %v6986_v31, %v6993_v24 }
 0x490   :  { %17625 = vst [vmem:[#allocation48_spill] sm:$0xff] %v15769_v56  ;;  %v8663_v37 = vcombine.high %v8659_v19, %v8659_v19  ;;  %v15793_v62 = vrot.slane %v8570_v2, %v11066_v58  ;;  %v9274_v24 = vcombine.low %v15332_v12, %v15327_v35  ;;  %v7067_v29 = vsel %vm828_vm6, %v7064_v61, %v17627_v42 }
 0x491   :  { %v7892_v25 = vcombine.high %v7890_v33, %v7890_v33  ;;  %v15783_v5 = vadd.f32 %v7891_v46, %v15684_v8  ;;  %v15786_v51 = vadd.f32 %v7890_v33, %v15687_v39  ;;  %v15788_v34 = vpop.permute.xlu0 %8027  ;;  %v6998_v31 = vmul.f32 %v6994_v16, %v6952_v13 }
 0x492   :  { %v15790_v11 = vpop.permute.xlu1 %8033  ;;  %v15801_v8 = vrot.slane %v8567_v14, %v11066_v58  ;;  %v17629_v39 = vcombine.low %v15364_v4, %v15369_v59  ;;  %v8731_v46 = vrot.slane %v8717_v48, %v11066_v58  ;;  %v15811_v56 = vrot.slane %v8587_v10, %v11066_v58  ;;  %v17631_v4 = vld [vmem:[#allocation36_spill] sm:$0xff] }
 0x493   :  { %v15808_v2 = vadd.f32 %v7892_v25, %v15697_v6  ;;  %v15814_v35 = vrot.slane %v8659_v19, %v11066_v58  ;;  %v7018_v12 = vcombine.high %v6998_v31, %v6998_v31  ;;  %v7025_v13 = vrot.slane %v6998_v31, %v11066_v58  ;;  %v17632_v6 = vld [vmem:[#allocation26_spill] sm:$0xff] }
 0x494   :  { %17628 = vst [vmem:[#allocation42_spill] sm:$0xff] %v15801_v8  ;;  %v8660_v33 = vmul.f32 %v17629_v39, %v8622_v28  ;;  %17630 = vst [vmem:[#allocation41_spill] sm:$0xff] %v15811_v56  ;;  %v15818_v14 = vrot.slane %v8663_v37, %v11066_v58  ;;  %v15824_v59 = vsel %vm828_vm6, %v17631_v4, %v15712_v30  ;;  %vm17646_vm5 = vcmp.lt.s32.totalorder %v11015_v41, 127 }
 0x495   :  { %v9106_v25 = vcombine.low %v7067_v29, %v17632_v6  ;;  %v7068_v48 = vsel %vm828_vm6, %v7062_v55, %v7064_v61  ;;  %v15829_v10 = vpop.permute.xlu0 %8031  ;;  %v7032_v28 = vrot.slane %v7018_v12, %v11066_v58  ;;  %v7033_v16 = vcombine.high %v7025_v13, %v7025_v13  ;;  %vm17653_vm12 = vmmov %vm17646_vm5 }
 0x496   :  { %v15831_v19 = vpop.permute.xlu1 %7184  ;;  %v7047_v37 = vadd.f32 %v7025_v13, %v15710_v49  ;;  %v7069_v31 = vsel %vm828_vm6, %v15712_v30, %v7062_v55  ;;  %v8680_v42 = vcombine.high %v8660_v33, %v8660_v33  ;;  %v8732_v39 = vcombine.low %v15731_v63, %v8731_v46  ;;  %v8714_v49 = vld [vmem:[#allocation3 + $0x4a0] sm:$0xff]  ;;  %v17634_v13 = vld [vmem:[#allocation45_spill] sm:$0xff]  ;;  %v17635_v46 = vld [vmem:[#allocation27_spill] sm:$0xff] }
 0x497   :  { %v7103_v4 = vcombine.low %v15824_v59, %v7069_v31  ;;  %v7104_v6 = vcombine.low %v7068_v48, %v7067_v29  ;;  %v7034_v61 = vcombine.high %v7032_v28, %v7032_v28  ;;  %v7048_v53 = vadd.f32 %v7033_v16, %v15724_v15  ;;  %vm17650_vm6 = vmmov %vm17646_vm5 }
 0x498   :  { %v7049_v57 = vadd.f32 %v7032_v28, %v15727_v52  ;;  %v9105_v50 = vcombine.low %v7069_v31, %v7068_v48  ;;  %v15843_v12 = vrot.slane %v8660_v33, %v11066_v58  ;;  %v8810_v21 = vcombine.low %v17634_v13, %v15502_v7  ;;  %v7077_v33 = vld [vmem:[#allocation3 + $0x3c8] sm:$0xff] }
 0x499   :  { %v7111_v30 = vrot.slane %v7103_v4, %v11066_v58  ;;  %v7118_v63 = vrot.slane %v7104_v6, %v11066_v58  ;;  %v15849_v55 = vpop.permute.xlu0 %8035  ;;  %v8903_v15 = vcombine.low %v17635_v46, %v15608_v44  ;;  %v7050_v52 = vadd.f32 %v7034_v61, %v15741_v27  ;;  %v8715_v61 = vld [vmem:[#allocation3 + $0x4a8] sm:$0xff] }
 0x49a   :  { %17633 = vst [vmem:[#allocation23_spill] sm:$0xff] %v15843_v12  ;;  %v7189_v29 = vpop.permute.xlu1 %7188  ;;  %v15855_v48 = vrot.slane %v9106_v25, %v11066_v58  ;;  %v15858_v28 = vrot.slane %v9105_v50, %v11066_v58  ;;  %v17638_v7 = vcombine.low %v15245_v54, %v15239_v32  ;;  %v15869_v44 = vrot.slane %v9274_v24, %v11066_v58  ;;  %v17640_v32 = vld [vmem:[#allocation46_spill] sm:$0xff] }
 0x49b   :  { %v7119_v27 = vcombine.low %v7111_v30, %v7118_v63  ;;  %v15874_v4 = vrot.slane %v8680_v42, %v11066_v58  ;;  %v8752_v50 = vmul.f32 %v8732_v39, %v8714_v49  ;;  %v8824_v49 = vrot.slane %v8810_v21, %v11066_v58 }
 0x49c   :  { %17636 = vst [vmem:[#allocation17_spill] sm:$0xff] %v15855_v48  ;;  %17637 = vst [vmem:[#allocation35_spill] sm:$0xff] %v15858_v28  ;;  %v15864_v16 = vrot.slane %v17638_v7, %v11066_v58  ;;  %v8917_v46 = vrot.slane %v8903_v15, %v11066_v58  ;;  %v17641_v39 = vcombine.low %v15452_v47, %v15458_v18  ;;  %v17642_v15 = vld [vmem:[#allocation24_spill] sm:$0xff]  ;;  %v17643_v18 = vld [vmem:[#allocation18_spill] sm:$0xff]  ;;  %vm17678_vm1 = vcmp.lt.s32.totalorder %v11015_v41, 7 }
 0x49d   :  { %17639 = vst [vmem:[#allocation19_spill] sm:$0xff] %v15874_v4  ;;  %v7123_v13 = vmul.f32 %v7119_v27, %v7077_v33  ;;  %v7187_v30 = vpop.permute.xlu0 %7186  ;;  %v7192_v33 = vsel %vm954_vm7, %v7189_v29, %v17640_v32  ;;  %v8756_v42 = vcombine.high %v8752_v50, %v8752_v50  ;;  %v8996_v24 = vcombine.low %v17642_v15, %v15721_v60  ;;  %v17644_v60 = vld [vmem:[#allocation28_spill] sm:$0xff]  ;;  %vm17680_vm2 = vmmov %vm17678_vm1 }
 0x49e   :  { %v15884_v63 = vpop.permute.xlu1 %8154  ;;  %v7193_v27 = vsel %vm954_vm7, %v7187_v30, %v7189_v29  ;;  %v8753_v21 = vmul.f32 %v17641_v39, %v8715_v61  ;;  %v8825_v6 = vcombine.low %v15737_v3, %v8824_v49  ;;  %v8918_v47 = vcombine.low %v15744_v23, %v8917_v46  ;;  %v8900_v15 = vld [vmem:[#allocation3 + $0x4c0] sm:$0xff] }
 0x49f   :  { %v7143_v7 = vcombine.high %v7123_v13, %v7123_v13  ;;  %v7150_v54 = vrot.slane %v7123_v13, %v11066_v58  ;;  %v15906_v13 = vrot.slane %v8752_v50, %v11066_v58  ;;  %v9089_v61 = vcombine.low %v17643_v18, %v15824_v59  ;;  %v8807_v50 = vld [vmem:[#allocation3 + $0x4b0] sm:$0xff]  ;;  %v17645_v59 = vld [vmem:[#allocation32_spill] sm:$0xff] }
 0x4a0   :  { %v9199_v39 = vcombine.low %v7192_v33, %v17644_v60  ;;  %v15928_v3 = vrot.slane %v8756_v42, %v11066_v58  ;;  %v8773_v23 = vcombine.high %v8753_v21, %v8753_v21  ;;  %v9010_v49 = vrot.slane %v8996_v24, %v11066_v58 }
 0x4a1   :  { %v7157_v25 = vrot.slane %v7143_v7, %v11066_v58  ;;  %v7158_v32 = vcombine.high %v7150_v54, %v7150_v54  ;;  %v15909_v31 = vadd.f32 %v7150_v54, %v7047_v37  ;;  %v15911_v29 = vpop.permute.xlu0 %8152  ;;  %v7194_v54 = vsel %vm954_vm7, %v15831_v19, %v7187_v30 }
 0x4a2   :  { %v15913_v12 = vpop.permute.xlu1 %8158  ;;  %v7195_v46 = vsel %vm954_vm7, %v17645_v59, %v15831_v19  ;;  %v8845_v56 = vmul.f32 %v8825_v6, %v8807_v50  ;;  %v15937_v30 = vmul.f32 %v8918_v47, %v8900_v15  ;;  %v9103_v42 = vrot.slane %v9089_v61, %v11066_v58  ;;  %v7202_v61 = vld [vmem:[#allocation3 + $0x3d8] sm:$0xff]  ;;  %vm17651_vm7 = vmmov %vm17646_vm5 }
 0x4a3   :  { %v7159_v4 = vcombine.high %v7157_v25, %v7157_v25  ;;  %v15920_v7 = vadd.f32 %v7158_v32, %v7048_v53  ;;  %v15922_v37 = vadd.f32 %v7157_v25, %v7049_v57  ;;  %v7228_v53 = vcombine.low %v7195_v46, %v7194_v54  ;;  %v17654_v6 = vld [vmem:[#allocation31_spill] sm:$0xff] }
 0x4a4   :  { %v7229_v57 = vcombine.low %v7193_v27, %v7192_v33  ;;  %v9198_v25 = vcombine.low %v7194_v54, %v7193_v27  ;;  %v8046_v24 = vsel %vm17646_vm5, %v15790_v11, %v15849_v55  ;;  %v15945_v48 = vrot.slane %v9199_v39, %v11066_v58  ;;  %v8993_v39 = vld [vmem:[#allocation3 + $0x4d0] sm:$0xff] }
 0x4a5   :  { %v15935_v18 = vadd.f32 %v7159_v4, %v7050_v52  ;;  %v8157_v32 = vpop.permute.xlu0 %8156  ;;  %v7236_v19 = vrot.slane %v7228_v53, %v11066_v58  ;;  %v15957_v27 = vrot.slane %v8753_v21, %v11066_v58  ;;  %v9011_v47 = vcombine.low %v15752_v36, %v9010_v49 }
 0x4a6   :  { %v7310_v60 = vpop.permute.xlu1 %7309  ;;  %17647 = vst [vmem:[#allocation21_spill] sm:$0xff] %v15945_v48  ;;  %v7243_v52 = vrot.slane %v7229_v57, %v11066_v58  ;;  %v15950_v4 = vrot.slane %v9198_v25, %v11066_v58  ;;  %v8047_v50 = vsel %vm17650_vm6, %v15829_v10, %v15790_v11  ;;  %v8048_v15 = vsel %vm17651_vm7, %v15762_v38, %v15829_v10  ;;  %vm17684_vm6 = vmmov %vm17678_vm1 }
 0x4a7   :  { %17649 = vst [vmem:[#allocation16_spill] sm:$0xff] %v15957_v27  ;;  %v15973_v36 = vrot.slane %v8773_v23, %v11066_v58  ;;  %v8849_v49 = vcombine.high %v8845_v56, %v8845_v56  ;;  %v9104_v57 = vcombine.low %v15755_v22, %v9103_v42  ;;  %v8063_v25 = vcombine.low %v8047_v50, %v8046_v24  ;;  %v17657_v50 = vld [vmem:[#allocation50_spill] sm:$0xff]  ;;  %vm17685_vm7 = vmmov %vm17678_vm1 }
 0x4a8   :  { %17648 = vst [vmem:[#allocation30_spill] sm:$0xff] %v15950_v4  ;;  %v7244_v54 = vcombine.low %v7236_v19, %v7243_v52  ;;  %v15977_v11 = vrot.slane %v8845_v56, %v11066_v58  ;;  %v8942_v10 = vcombine.high %v15937_v30, %v15937_v30  ;;  %v9086_v19 = vld [vmem:[#allocation3 + $0x4e0] sm:$0xff]  ;;  %v8049_v52 = vsel %vm17653_vm12, %v15788_v34, %v15762_v38  ;;  %v17660_v4 = vld [vmem:[#allocation51_spill] sm:$0xff] }
 0x4a9   :  { %v15970_v21 = vpop.permute.xlu0 %8160  ;;  %17652 = vst [vmem:[#allocation15_spill] sm:$0xff] %v15973_v36  ;;  %v9031_v33 = vmul.f32 %v9011_v47, %v8993_v39  ;;  %v8062_v23 = vcombine.low %v8049_v52, %v8048_v15  ;;  %v9182_v48 = vcombine.low %v17654_v6, %v7195_v46  ;;  %v8173_v24 = vsel %vm17656_vm13, %v15884_v63, %v8157_v32 }
 0x4aa   :  { %v7314_v53 = vpop.permute.xlu1 %7313  ;;  %v7248_v59 = vmul.f32 %v7244_v54, %v7202_v61  ;;  %v8171_v22 = vsel %vm17655_vm3, %v15913_v12, %v15970_v21  ;;  %v7320_v38 = vsel %vm1080_vm8, %v17657_v50, %v7310_v60  ;;  %v9124_v39 = vmul.f32 %v9104_v57, %v9086_v19 }
 0x4ab   :  { %v8077_v46 = vrot.slane %v8063_v25, %v11066_v58  ;;  %v8174_v6 = vsel %vm17658_vm11, %v15911_v29, %v15884_v63  ;;  %v8172_v15 = vsel %vm17659_vm10, %v8157_v32, %v15913_v12  ;;  %v8070_v57 = vrot.slane %v8062_v23, %v11066_v58 }
 0x4ac   :  { %v7268_v56 = vcombine.high %v7248_v59, %v7248_v59  ;;  %v7275_v42 = vrot.slane %v7248_v59, %v11066_v58  ;;  %v8188_v50 = vcombine.low %v8172_v15, %v8171_v22  ;;  %v9196_v25 = vrot.slane %v9182_v48, %v11066_v58 }
 0x4ad   :  { %v7312_v47 = vpop.permute.xlu0 %7311  ;;  %v8187_v19 = vcombine.low %v8174_v6, %v8173_v24  ;;  %v9275_v28 = vcombine.low %v17660_v4, %v7320_v38  ;;  %v16025_v23 = vrot.slane %v8849_v49, %v11066_v58  ;;  %v16029_v48 = vrot.slane %v15937_v30, %v11066_v58  ;;  %v17664_v6 = vld [vmem:[#allocation40_spill] sm:$0xff] }
 0x4ae   :  { %v8280_v61 = vpop.permute.xlu1 %8279  ;;  %v7282_v54 = vrot.slane %v7268_v56, %v11066_v58  ;;  %v7283_v59 = vcombine.high %v7275_v42, %v7275_v42  ;;  %v16007_v52 = vadd.f32 %v7275_v42, %v15909_v31  ;;  %v16020_v32 = vsel %vm1080_vm8, %v7312_v47, %v7314_v53 }
 0x4af   :  { %17661 = vst [vmem:[#allocation49_spill] sm:$0xff] %v16020_v32  ;;  %v9035_v4 = vcombine.high %v9031_v33, %v9031_v33  ;;  %v8078_v56 = vcombine.low %v8070_v57, %v8077_v46  ;;  %v8202_v24 = vrot.slane %v8188_v50, %v11066_v58  ;;  %v16042_v49 = vsel %vm1080_vm8, %v7314_v53, %v17664_v6 }
 0x4b0   :  { %v7284_v8 = vcombine.high %v7282_v54, %v7282_v54  ;;  %v16013_v63 = vadd.f32 %v7283_v59, %v15920_v7  ;;  %v16016_v12 = vadd.f32 %v7282_v54, %v15922_v37  ;;  %v16033_v7 = vsel %vm1080_vm8, %v7310_v60, %v7312_v47  ;;  %v8808_v37 = vld [vmem:[#allocation3 + $0x4b8] sm:$0xff]  ;;  %17665 = vst [vmem:[#allocation20_spill] sm:$0xff] %v16042_v49  ;;  %v8052_v54 = vld [vmem:[#allocation3 + $0x440] sm:$0xff] }
 0x4b1   :  { %v16022_v31 = vpop.permute.xlu0 %8277  ;;  %17663 = vst [vmem:[#allocation22_spill] sm:$0xff] %v16033_v7  ;;  %v16045_v30 = vrot.slane %v8942_v10, %v11066_v58  ;;  %v9128_v15 = vcombine.high %v9124_v39, %v9124_v39  ;;  %v7353_v60 = vcombine.low %v7320_v38, %v16033_v7  ;;  %v7354_v47 = vcombine.low %v16020_v32, %v16042_v49 }
 0x4b2   :  { %17662 = vst [vmem:[#allocation38_spill] sm:$0xff] %v16022_v31  ;;  %v8284_v22 = vpop.permute.xlu1 %8283  ;;  %v16036_v42 = vadd.f32 %v7284_v8, %v15935_v18  ;;  %v9197_v18 = vcombine.low %v15864_v16, %v9196_v25  ;;  %v8195_v46 = vrot.slane %v8187_v19, %v11066_v58  ;;  %v9289_v53 = vrot.slane %v9275_v28, %v11066_v58  ;;  %v9179_v16 = vld [vmem:[#allocation3 + $0x4f0] sm:$0xff] }
 0x4b3   :  { %v17666_v38 = vcombine.low %v15538_v17, %v15543_v43  ;;  %v16063_v6 = vrot.slane %v9031_v33, %v11066_v58  ;;  %v16066_v8 = vrot.slane %v9035_v4, %v11066_v58  ;;  %v16071_v25 = vrot.slane %v9124_v39, %v11066_v58  ;;  %v8177_v33 = vld [vmem:[#allocation3 + $0x450] sm:$0xff] }
 0x4b4   :  { %v8098_v19 = vmul.f32 %v8078_v56, %v8052_v54  ;;  %v8203_v10 = vcombine.low %v8195_v46, %v8202_v24  ;;  %v16076_v43 = vrot.slane %v9128_v15, %v11066_v58  ;;  %v7368_v4 = vrot.slane %v7354_v47, %v11066_v58  ;;  %v9272_v47 = vld [vmem:[#allocation3 + $0x500] sm:$0xff] }
 0x4b5   :  { %v8282_v59 = vpop.permute.xlu0 %8281  ;;  %v16060_v57 = vmul.f32 %v17666_v38, %v8808_v37  ;;  %v7361_v37 = vrot.slane %v7353_v60, %v11066_v58  ;;  %v9217_v38 = vmul.f32 %v9197_v18, %v9179_v16  ;;  %v8299_v39 = vsel %vm2063_vm15, %v16022_v31, %v8280_v61 }
 0x4b6   :  { %v7435_v50 = vpop.permute.xlu1 %7434  ;;  %v8298_v56 = vsel %vm2063_vm15, %v8280_v61, %v8282_v59  ;;  %v8223_v61 = vmul.f32 %v8203_v10, %v8177_v33  ;;  %v8297_v16 = vsel %vm2063_vm15, %v8282_v59, %v8284_v22  ;;  %v8019_v60 = vadd.f32 %v15581_v40, %v15775_v1  ;;  %v7327_v33 = vld [vmem:[#allocation3 + $0x3e8] sm:$0xff] }
 0x4b7   :  { %17667 = vst [vmem:[#allocation43_spill] sm:$0xff] %v16060_v57  ;;  %v9290_v57 = vcombine.low %v15869_v44, %v9289_v53  ;;  %v8312_v18 = vcombine.low %v8299_v39, %v8298_v56  ;;  %v8102_v53 = vcombine.high %v8098_v19, %v8098_v19  ;;  %v7369_v17 = vcombine.low %v7361_v37, %v7368_v4 }
 0x4b8   :  { %v9221_v56 = vcombine.high %v9217_v38, %v9217_v38  ;;  %v17669_v28 = vcombine.high %v15581_v40, %v15581_v40  ;;  %v8109_v46 = vrot.slane %v8098_v19, %v11066_v58  ;;  %v8227_v40 = vcombine.high %v8223_v61, %v8223_v61  ;;  %v8302_v19 = vld [vmem:[#allocation3 + $0x460] sm:$0xff] }
 0x4b9   :  { %v16086_v24 = vpop.permute.xlu0 %8285  ;;  %v9310_v10 = vmul.f32 %v9290_v57, %v9272_v47  ;;  %v8320_v59 = vrot.slane %v8312_v18, %v11066_v58  ;;  %v8116_v4 = vrot.slane %v8102_v53, %v11066_v58  ;;  %v8021_v53 = vadd.f32 %v15587_v26, %v15786_v51 }
 0x4ba   :  { %17668 = vst [vmem:[#allocation37_spill] sm:$0xff] %v16086_v24  ;;  %v7439_v54 = vpop.permute.xlu1 %7438  ;;  %v8296_v44 = vsel %vm2063_vm15, %v8284_v22, %v16086_v24  ;;  %v8020_v49 = vadd.f32 %v17669_v28, %v15783_v5  ;;  %v7445_v5 = vsel %vm1206_vm9, %v15389_v9, %v7435_v50  ;;  %v7373_v28 = vmul.f32 %v7369_v17, %v7327_v33 }
 0x4bb   :  { %v8313_v39 = vcombine.low %v8297_v16, %v8296_v44  ;;  %v7442_v57 = vsel %vm1206_vm9, %v7439_v54, %v15366_v20  ;;  %v16122_v16 = vrot.slane %v9217_v38, %v11066_v58  ;;  %v8117_v27 = vcombine.high %v8109_v46, %v8109_v46 }
 0x4bc   :  { %v8234_v20 = vrot.slane %v8223_v61, %v11066_v58  ;;  %v17671_v38 = vcombine.high %v15587_v26, %v15587_v26  ;;  %v8241_v33 = vrot.slane %v8227_v40, %v11066_v58  ;;  %v7400_v61 = vrot.slane %v7373_v28, %v11066_v58 }
 0x4bd   :  { %v7437_v36 = vpop.permute.xlu0 %7436  ;;  %v8327_v15 = vrot.slane %v8313_v39, %v11066_v58  ;;  %v9314_v39 = vcombine.high %v9310_v10, %v9310_v10  ;;  %v8144_v26 = vadd.f32 %v8109_v46, %v8019_v60  ;;  %vm17673_vm8 = vcmp.lt.s32.totalorder %v11015_v41, 8 }
 0x4be   :  { %v8405_v22 = vpop.permute.xlu1 %8404  ;;  %v7443_v1 = vsel %vm1206_vm9, %v7437_v36, %v7439_v54  ;;  %v7444_v37 = vsel %vm1206_vm9, %v7435_v50, %v7437_v36  ;;  %v16125_v36 = vrot.slane %v9221_v56, %v11066_v58  ;;  %v8118_v56 = vcombine.high %v8116_v4, %v8116_v4  ;;  %vm17675_vm9 = vmmov %vm17673_vm8 }
 0x4bf   :  { %v8328_v47 = vcombine.low %v8320_v59, %v8327_v15  ;;  %v7478_v18 = vcombine.low %v7445_v5, %v7444_v37  ;;  %v7479_v44 = vcombine.low %v7443_v1, %v7442_v57  ;;  %v8022_v15 = vadd.f32 %v17671_v38, %v15808_v2  ;;  %v7452_v59 = vld [vmem:[#allocation3 + $0x3f8] sm:$0xff]  ;;  %vm17676_vm4 = vmmov %vm17673_vm8 }
 0x4c0   :  { %v16140_v1 = vrot.slane %v9310_v10, %v11066_v58  ;;  %v7393_v37 = vcombine.high %v7373_v28, %v7373_v28  ;;  %v16148_v2 = vrot.slane %v9314_v39, %v11066_v58  ;;  %v8242_v10 = vcombine.high %v8234_v20, %v8234_v20  ;;  %vm17677_vm0 = vmmov %vm17676_vm4 }
 0x4c1   :  { %v16129_v9 = vpop.permute.xlu0 %8402  ;;  %v7486_v17 = vrot.slane %v7478_v18, %v11066_v58  ;;  %v7493_v54 = vrot.slane %v7479_v44, %v11066_v58  ;;  %v8348_v51 = vmul.f32 %v8328_v47, %v8302_v19  ;;  %v8145_v47 = vadd.f32 %v8117_v27, %v8020_v49 }
 0x4c2   :  { %17670 = vst [vmem:[#allocation47_spill] sm:$0xff] %v16129_v9  ;;  %v8409_v50 = vpop.permute.xlu1 %8408  ;;  %v8146_v44 = vadd.f32 %v8116_v4, %v8021_v53  ;;  %v8147_v31 = vadd.f32 %v8118_v56, %v8022_v15  ;;  %v8243_v24 = vcombine.high %v8241_v33, %v8241_v33  ;;  %v7407_v60 = vrot.slane %v7393_v37, %v11066_v58 }
 0x4c3   :  { %v7494_v5 = vcombine.low %v7486_v17, %v7493_v54  ;;  %v8352_v28 = vcombine.high %v8348_v51, %v8348_v51  ;;  %v7408_v46 = vcombine.high %v7400_v61, %v7400_v61  ;;  %v8424_v39 = vsel %vm2189_vm14, %v16129_v9, %v8405_v22 }
 0x4c4   :  { %v8269_v49 = vadd.f32 %v8234_v20, %v8144_v26  ;;  %v8359_v4 = vrot.slane %v8348_v51, %v11066_v58  ;;  %v8272_v18 = vadd.f32 %v8243_v24, %v8147_v31  ;;  %v7409_v26 = vcombine.high %v7407_v60, %v7407_v60 }
 0x4c5   :  { %v8407_v40 = vpop.permute.xlu0 %8406  ;;  %v7498_v38 = vmul.f32 %v7494_v5, %v7452_v59  ;;  %v8270_v59 = vadd.f32 %v8242_v10, %v8145_v47  ;;  %v8366_v27 = vrot.slane %v8352_v28, %v11066_v58  ;;  %v7422_v51 = vadd.f32 %v7400_v61, %v16007_v52  ;;  %v17674_v28 = vld [vmem:[#allocation53_spill] sm:$0xff] }
 0x4c6   :  { %v7560_v19 = vpop.permute.xlu1 %7559  ;;  %v8423_v17 = vsel %vm2189_vm14, %v8405_v22, %v8407_v40  ;;  %v8422_v37 = vsel %vm2189_vm14, %v8407_v40, %v8409_v50  ;;  %v8271_v22 = vadd.f32 %v8241_v33, %v8146_v44  ;;  %v8367_v10 = vcombine.high %v8359_v4, %v8359_v4  ;;  %v8427_v44 = vld [vmem:[#allocation3 + $0x470] sm:$0xff] }
 0x4c7   :  { %v8437_v53 = vcombine.low %v8424_v39, %v8423_v17  ;;  %v7518_v5 = vcombine.high %v7498_v38, %v7498_v38  ;;  %v7423_v17 = vadd.f32 %v7408_v46, %v16013_v63  ;;  %v7525_v47 = vrot.slane %v7498_v38, %v11066_v58 }
 0x4c8   :  { %v7570_v40 = vsel %vm17673_vm8, %v15478_v45, %v7560_v19  ;;  %v8368_v38 = vcombine.high %v8366_v27, %v8366_v27  ;;  %v8395_v57 = vadd.f32 %v8367_v10, %v8270_v59  ;;  %v8396_v32 = vadd.f32 %v8366_v27, %v8271_v22 }
 0x4c9   :  { %v16161_v15 = vpop.permute.xlu0 %8410  ;;  %v8445_v39 = vrot.slane %v8437_v53, %v11066_v58  ;;  %v7532_v33 = vrot.slane %v7518_v5, %v11066_v58  ;;  %v7424_v53 = vadd.f32 %v7407_v60, %v16016_v12  ;;  %v8394_v5 = vadd.f32 %v8359_v4, %v8269_v49 }
 0x4ca   :  { %17672 = vst [vmem:[#allocation36_spill] sm:$0xff] %v16161_v15  ;;  %v7564_v56 = vpop.permute.xlu1 %7563  ;;  %v8421_v54 = vsel %vm2189_vm14, %v8409_v50, %v16161_v15  ;;  %v7547_v59 = vadd.f32 %v7525_v47, %v7422_v51  ;;  %vm17682_vm5 = vcmp.lt.s32.totalorder %v11015_v41, 1  ;;  %vm17703_vm11 = vcmp.lt.s32.totalorder %v11015_v41, 127 }
 0x4cb   :  { %v8438_v20 = vcombine.low %v8422_v37, %v8421_v54  ;;  %v7567_v52 = vsel %vm17675_vm9, %v7564_v56, %v17674_v28  ;;  %v7425_v37 = vadd.f32 %v7409_v26, %v16036_v42  ;;  %v8397_v42 = vadd.f32 %v8368_v38, %v8272_v18  ;;  %v17683_v38 = vld [vmem:[#allocation14_spill] sm:$0xff]  ;;  %vm17688_vm12 = vmmov %vm17682_vm5 }
 0x4cc   :  { %v7549_v10 = vadd.f32 %v7532_v33, %v7424_v53  ;;  %vm17693_vm3 = vmmov %vm17682_vm5  ;;  %vm17710_vm9 = vcmp.lt.s32.totalorder %v11015_v41, 121 }
 0x4cd   :  { %v8452_v50 = vrot.slane %v8438_v20, %v11066_v58  ;;  %v7562_v31 = vpop.permute.xlu0 %7561  ;;  %v7533_v20 = vcombine.high %v7525_v47, %v7525_v47  ;;  %vm17694_vm13 = vmmov %vm17693_vm3 }
 0x4ce   :  { %v7687_v24 = vpop.permute.xlu1 %7686  ;;  %v7568_v63 = vsel %vm17676_vm4, %v7562_v31, %v7564_v56  ;;  %v7569_v61 = vsel %vm17677_vm0, %v7560_v19, %v7562_v31  ;;  %v7534_v19 = vcombine.high %v7532_v33, %v7532_v33  ;;  %v7577_v31 = vld [vmem:[#allocation3 + $0x408] sm:$0xff]  ;;  %vm17704_vm10 = vmmov %vm17703_vm11 }
 0x4cf   :  { %v8453_v54 = vcombine.low %v8445_v39, %v8452_v50  ;;  %v7603_v45 = vcombine.low %v7570_v40, %v7569_v61  ;;  %v7604_v46 = vcombine.low %v7568_v63, %v7567_v52  ;;  %v17679_v40 = vld [vmem:[#allocation39_spill] sm:$0xff]  ;;  %v7548_v26 = vadd.f32 %v7533_v20, %v7423_v17  ;;  %vm17707_vm8 = vmmov %vm17704_vm10 }
 0x4d0   :  { %vm17711_vm4 = vmmov %vm17707_vm8 }
 0x4d1   :  { %v8473_v9 = vmul.f32 %v8453_v54, %v8427_v44  ;;  %v7611_v28 = vrot.slane %v7603_v45, %v11066_v58  ;;  %v7618_v15 = vrot.slane %v7604_v46, %v11066_v58  ;;  %v7685_v56 = vpop.permute.xlu0 %7684  ;;  %v7550_v54 = vadd.f32 %v7534_v19, %v7425_v37  ;;  %v17681_v45 = vld [vmem:[#allocation34_spill] sm:$0xff]  ;;  %vm17713_vm0 = vmmov %vm17710_vm9 }
 0x4d2   :  { %v7810_v7 = vpop.permute.xlu1 %7809  ;;  %v7694_v39 = vsel %vm17678_vm1, %v7685_v56, %v7687_v24  ;;  %v7695_v12 = vsel %vm17680_vm2, %v17679_v40, %v7685_v56  ;;  %vm17714_vm1 = vmmov %vm17713_vm0 }
 0x4d3   :  { %v8477_v60 = vcombine.high %v8473_v9, %v8473_v9  ;;  %v8484_v49 = vrot.slane %v8473_v9, %v11066_v58  ;;  %v7619_v4 = vcombine.low %v7611_v28, %v7618_v15  ;;  %v7728_v50 = vcombine.low %v7695_v12, %v7694_v39  ;;  %v17687_v12 = vld [vmem:[#allocation25_spill] sm:$0xff]  ;;  %vm17715_vm2 = vmmov %vm17713_vm0 }
 0x4d4   :  { %v7820_v18 = vsel %vm17682_vm5, %v17681_v45, %v7810_v7  ;;  %v17686_v28 = vcombine.high %v15778_v0, %v15778_v0 }
 0x4d5   :  { %v8491_v27 = vrot.slane %v8477_v60, %v11066_v58  ;;  %v8492_v22 = vcombine.high %v8484_v49, %v8484_v49  ;;  %v8519_v44 = vadd.f32 %v8484_v49, %v8394_v5  ;;  %v7623_v52 = vmul.f32 %v7619_v4, %v7577_v31  ;;  %v7689_v63 = vpop.permute.xlu0 %7688 }
 0x4d6   :  { %v7814_v61 = vpop.permute.xlu1 %7813  ;;  %v7692_v9 = vsel %vm17684_vm6, %v7689_v63, %v17683_v38  ;;  %v7693_v15 = vsel %vm17685_vm7, %v7687_v24, %v7689_v63  ;;  %v7736_v37 = vrot.slane %v7728_v50, %v11066_v58  ;;  %v17690_v49 = vcombine.high %v15814_v35, %v15814_v35 }
 0x4d7   :  { %v8493_v51 = vcombine.high %v8491_v27, %v8491_v27  ;;  %v8520_v17 = vadd.f32 %v8492_v22, %v8395_v57  ;;  %v8521_v47 = vadd.f32 %v8491_v27, %v8396_v32  ;;  %v8612_v33 = vadd.f32 %v15778_v0, %v8519_v44  ;;  %v7702_v22 = vld [vmem:[#allocation3 + $0x418] sm:$0xff] }
 0x4d8   :  { %v7643_v46 = vcombine.high %v7623_v52, %v7623_v52  ;;  %v7650_v53 = vrot.slane %v7623_v52, %v11066_v58  ;;  %v7729_v5 = vcombine.low %v7693_v15, %v7692_v9  ;;  %v17689_v0 = vcombine.high %v15793_v62, %v15793_v62 }
 0x4d9   :  { %v8522_v20 = vadd.f32 %v8493_v51, %v8397_v42  ;;  %v8613_v56 = vadd.f32 %v17686_v28, %v8520_v17  ;;  %v8614_v19 = vadd.f32 %v15793_v62, %v8521_v47  ;;  %v8705_v24 = vadd.f32 %v15814_v35, %v8612_v33  ;;  %v7812_v31 = vpop.permute.xlu0 %7811 }
 0x4da   :  { %v16212_v57 = vpop.permute.xlu1 %8039  ;;  %v7657_v32 = vrot.slane %v7643_v46, %v11066_v58  ;;  %v7658_v39 = vcombine.high %v7650_v53, %v7650_v53  ;;  %v7743_v40 = vrot.slane %v7729_v5, %v11066_v58  ;;  %v7817_v42 = vsel %vm17688_vm12, %v7814_v61, %v17687_v12 }
 0x4db   :  { %v8615_v60 = vadd.f32 %v17689_v0, %v8522_v20  ;;  %v8706_v4 = vadd.f32 %v17690_v49, %v8613_v56  ;;  %v8707_v50 = vadd.f32 %v15818_v14, %v8614_v19  ;;  %v8798_v27 = vadd.f32 %v15906_v13, %v8705_v24 }
 0x4dc   :  { %v7659_v44 = vcombine.high %v7657_v32, %v7657_v32  ;;  %v7672_v52 = vadd.f32 %v7650_v53, %v7547_v59  ;;  %v7673_v63 = vadd.f32 %v7658_v39, %v7548_v26  ;;  %v7744_v45 = vcombine.low %v7736_v37, %v7743_v40 }
 0x4dd   :  { %v17691_v38 = vcombine.high %v15818_v14, %v15818_v14  ;;  %v17692_v62 = vcombine.high %v15906_v13, %v15906_v13  ;;  %v8800_v35 = vadd.f32 %v15928_v3, %v8707_v50  ;;  %v8891_v51 = vadd.f32 %v15977_v11, %v8798_v27  ;;  %v8038_v17 = vpop.permute.xlu0 %8037 }
 0x4de   :  { %v16235_v47 = vpop.permute.xlu1 %8162  ;;  %v7674_v33 = vadd.f32 %v7657_v32, %v7549_v10  ;;  %v7748_v46 = vmul.f32 %v7744_v45, %v7702_v22  ;;  %v7818_v59 = vsel %vm17693_vm3, %v7812_v31, %v7814_v61  ;;  %v7819_v14 = vsel %vm17694_vm13, %v7810_v7, %v7812_v31 }
 0x4df   :  { %v8708_v9 = vadd.f32 %v17691_v38, %v8615_v60  ;;  %v8799_v15 = vadd.f32 %v17692_v62, %v8706_v4  ;;  %v17695_v26 = vcombine.high %v15928_v3, %v15928_v3  ;;  %v17696_v53 = vcombine.high %v15977_v11, %v15977_v11  ;;  %v7827_v62 = vld [vmem:[#allocation3 + $0x428] sm:$0xff] }
 0x4e0   :  { %v8893_v5 = vadd.f32 %v16025_v23, %v8800_v35  ;;  %v8984_v20 = vadd.f32 %v16029_v48, %v8891_v51  ;;  %v7768_v10 = vcombine.high %v7748_v46, %v7748_v46  ;;  %v7775_v28 = vrot.slane %v7748_v46, %v11066_v58 }
 0x4e1   :  { %v8801_v13 = vadd.f32 %v17695_v26, %v8708_v9  ;;  %v8892_v37 = vadd.f32 %v17696_v53, %v8799_v15  ;;  %v7853_v56 = vcombine.low %v7820_v18, %v7819_v14  ;;  %v7854_v61 = vcombine.low %v7818_v59, %v7817_v42  ;;  %v8042_v32 = vpop.permute.xlu0 %8041 }
 0x4e2   :  { %v17697_v7 = vcombine.high %v16025_v23, %v16025_v23  ;;  %v17698_v3 = vcombine.high %v16029_v48, %v16029_v48  ;;  %v8986_v11 = vadd.f32 %v16045_v30, %v8893_v5  ;;  %v9077_v31 = vadd.f32 %v16063_v6, %v8984_v20  ;;  %v16258_v39 = vpop.permute.xlu1 %8166 }
 0x4e3   :  { %v7675_v40 = vadd.f32 %v7659_v44, %v7550_v54  ;;  %v7782_v12 = vrot.slane %v7768_v10, %v11066_v58  ;;  %v7783_v18 = vcombine.high %v7775_v28, %v7775_v28  ;;  %v7861_v42 = vrot.slane %v7853_v56, %v11066_v58 }
 0x4e4   :  { %v8894_v19 = vadd.f32 %v17697_v7, %v8801_v13  ;;  %v8985_v24 = vadd.f32 %v17698_v3, %v8892_v37  ;;  %v17699_v23 = vcombine.high %v16045_v30, %v16045_v30  ;;  %v17700_v48 = vcombine.high %v16063_v6, %v16063_v6 }
 0x4e5   :  { %v9079_v49 = vadd.f32 %v16066_v8, %v8986_v11  ;;  %v9170_v4 = vadd.f32 %v16071_v25, %v9077_v31  ;;  %v7784_v50 = vcombine.high %v7782_v12, %v7782_v12  ;;  %v7797_v27 = vadd.f32 %v7775_v28, %v7672_v52  ;;  %v8165_v15 = vpop.permute.xlu0 %8164 }
 0x4e6   :  { %v8987_v0 = vadd.f32 %v17699_v23, %v8894_v19  ;;  %v9078_v60 = vadd.f32 %v17700_v48, %v8985_v24  ;;  %v7798_v54 = vadd.f32 %v7783_v18, %v7673_v63  ;;  %v7868_v22 = vrot.slane %v7854_v61, %v11066_v58  ;;  %v8290_v63 = vpop.permute.xlu1 %8289 }
 0x4e7   :  { %v17701_v44 = vcombine.high %v16066_v8, %v16066_v8  ;;  %v17702_v30 = vcombine.high %v16071_v25, %v16071_v25  ;;  %v9172_v6 = vadd.f32 %v16076_v43, %v9079_v49  ;;  %v9263_v9 = vadd.f32 %v16122_v16, %v9170_v4 }
 0x4e8   :  { %v7799_v35 = vadd.f32 %v7782_v12, %v7674_v33  ;;  %v7869_v51 = vcombine.low %v7861_v42, %v7868_v22  ;;  %v8044_v52 = vsel %vm17703_vm11, %v8038_v17, %v16212_v57  ;;  %v8045_v8 = vsel %vm17704_vm10, %v15849_v55, %v8038_v17 }
 0x4e9   :  { %v9080_v45 = vadd.f32 %v17701_v44, %v8987_v0  ;;  %v9171_v38 = vadd.f32 %v17702_v30, %v9078_v60  ;;  %v17705_v25 = vcombine.high %v16076_v43, %v16076_v43  ;;  %v17706_v59 = vcombine.high %v16122_v16, %v16122_v16  ;;  %v8288_v28 = vpop.permute.xlu0 %8287  ;;  %v8053_v60 = vld [vmem:[#allocation3 + $0x448] sm:$0xff] }
 0x4ea   :  { %v9265_v33 = vadd.f32 %v16125_v36, %v9172_v6  ;;  %v9356_v26 = vadd.f32 %v16140_v1, %v9263_v9  ;;  %v7800_v13 = vadd.f32 %v7784_v50, %v7675_v40  ;;  %v7873_v53 = vmul.f32 %v7869_v51, %v7827_v62  ;;  %v8413_v18 = vpop.permute.xlu1 %8412  ;;  %v17716_v44 = vld [vmem:[#allocation49_spill] sm:$0xff] }
 0x4eb   :  { %v9173_v46 = vadd.f32 %v17705_v25, %v9080_v45  ;;  %v9264_v14 = vadd.f32 %v17706_v59, %v9171_v38  ;;  %v8079_v37 = vcombine.low %v8045_v8, %v8044_v52  ;;  %v8043_v55 = vsel %vm17707_vm8, %v16212_v57, %v8042_v32  ;;  %v17717_v45 = vld [vmem:[#allocation22_spill] sm:$0xff]  ;;  %v17719_v6 = vld [vmem:[#allocation37_spill] sm:$0xff]  ;;  %v17721_v8 = vld [vmem:[#allocation55_spill] sm:$0xff] }
 0x4ec   :  { %v17708_v17 = vcombine.high %v16125_v36, %v16125_v36  ;;  %v17709_v5 = vcombine.high %v16140_v1, %v16140_v1  ;;  %v9358_v20 = vadd.f32 %v16148_v2, %v9265_v33  ;;  %v9372_v10 = vrot.slane %v9356_v26, 4  ;;  %v17718_v38 = vld [vmem:[#allocation54_spill] sm:$0xff] }
 0x4ed   :  { %v7893_v56 = vcombine.high %v7873_v53, %v7873_v53  ;;  %v7900_v61 = vrot.slane %v7873_v53, %v11066_v58  ;;  %v8170_v57 = vsel %vm17710_vm9, %v15970_v21, %v16235_v47  ;;  %v8050_v36 = vsel %vm17711_vm4, %v8042_v32, %v15788_v34  ;;  %v8292_v42 = vpop.permute.xlu0 %8291 }
 0x4ee   :  { %v9266_v43 = vadd.f32 %v17708_v17, %v9173_v46  ;;  %v9357_v16 = vadd.f32 %v17709_v5, %v9264_v14  ;;  %v17712_v1 = vcombine.high %v16148_v2, %v16148_v2  ;;  %v9374_v3 = vrot.slane %v9358_v20, 4  ;;  %9388 = vst [vmem:[#allocation2 + $0x30] sm:$0x30] %v9372_v10  ;;  %v8178_v46 = vld [vmem:[#allocation3 + $0x458] sm:$0xff]  ;;  %v17722_v14 = vld [vmem:[#allocation38_spill] sm:$0xff]  ;;  %v8417_v26 = vpop.permute.xlu1 %8416 }
 0x4ef   :  { %v8080_v24 = vcombine.low %v8043_v55, %v8050_v36  ;;  %v7907_v11 = vrot.slane %v7893_v56, %v11066_v58  ;;  %v7908_v31 = vcombine.high %v7900_v61, %v7900_v61  ;;  %v7922_v40 = vadd.f32 %v7900_v61, %v7797_v27  ;;  %v17723_v55 = vld [vmem:[#allocation36_spill] sm:$0xff]  ;;  %v17724_v61 = vld [vmem:[#allocation47_spill] sm:$0xff] }
 0x4f0   :  { %v9359_v7 = vadd.f32 %v17712_v1, %v9266_v43  ;;  %v9373_v19 = vrot.slane %v9357_v16, 4  ;;  %v8087_v12 = vrot.slane %v8079_v37, %v11066_v58  ;;  %9390 = vst [vmem:[#allocation2 + $0x18] sm:$0x30] %v9374_v3  ;;  %v8168_v2 = vsel %vm17713_vm0, %v8165_v15, %v16258_v39 }
 0x4f1   :  { %v8094_v34 = vrot.slane %v8080_v24, %v11066_v58  ;;  %v8169_v32 = vsel %vm17714_vm1, %v16235_v47, %v8165_v15  ;;  %v7909_v23 = vcombine.high %v7907_v11, %v7907_v11  ;;  %v7923_v0 = vadd.f32 %v7908_v31, %v7798_v54 }
 0x4f2   :  { %v9375_v21 = vrot.slane %v9359_v7, 4  ;;  %9389 = vst [vmem:[#allocation2] sm:$0x30] %v9373_v19  ;;  %v7924_v48 = vadd.f32 %v7907_v11, %v7799_v35  ;;  %v8175_v49 = vsel %vm17715_vm2, %v16258_v39, %v15911_v29  ;;  %v8204_v50 = vcombine.low %v8170_v57, %v8169_v32  ;;  %v8415_v35 = vpop.permute.xlu0 %8414 }
 0x4f3   :  { %v8095_v4 = vcombine.low %v8087_v12, %v8094_v34  ;;  %v8205_v27 = vcombine.low %v8168_v2, %v8175_v49  ;;  %v8294_v22 = vsel %vm2063_vm15, %v8288_v28, %v8290_v63  ;;  %v9291_v47 = vcombine.low %v17717_v45, %v17716_v44 }
 0x4f4   :  { %9391 = vst [vmem:[#allocation2 + $0x10] sm:$0x30] %v9375_v21  ;;  %v7925_v30 = vadd.f32 %v7909_v23, %v7800_v13  ;;  %v8023_v54 = vadd.f32 %v17718_v38, %v7922_v40  ;;  %v8295_v9 = vsel %vm2063_vm15, %v17719_v6, %v8288_v28  ;;  %v8212_v29 = vrot.slane %v8204_v50, %v11066_v58 }
 0x4f5   :  { %v8099_v62 = vmul.f32 %v8095_v4, %v8053_v60  ;;  %v8219_v39 = vrot.slane %v8205_v27, %v11066_v58  ;;  %v8329_v15 = vcombine.low %v8295_v9, %v8294_v22  ;;  %v17720_v51 = vcombine.high %v17718_v38, %v17718_v38  ;;  %v16361_v36 = vld [vmem:[#allocation2 + $0x30] sm:$0xff]  ;;  %v8901_v9 = vld [vmem:[#allocation3 + $0x4c8] sm:$0xff] }
 0x4f6   :  { %v8025_v25 = vadd.f32 %v17721_v8, %v7924_v48  ;;  %v8293_v59 = vsel %vm2063_vm15, %v8290_v63, %v8292_v42  ;;  %v8300_v33 = vsel %vm2063_vm15, %v8292_v42, %v17722_v14  ;;  %v8420_v17 = vsel %vm2189_vm14, %v17723_v55, %v8413_v18  ;;  %v8428_v48 = vld [vmem:[#allocation3 + $0x478] sm:$0xff] }
 0x4f7   :  { %v8024_v52 = vadd.f32 %v17720_v51, %v7923_v0  ;;  %v8119_v13 = vcombine.high %v8099_v62, %v8099_v62  ;;  %v8126_v53 = vrot.slane %v8099_v62, %v11066_v58  ;;  %v8220_v37 = vcombine.low %v8212_v29, %v8219_v39  ;;  %v16372_v32 = vld [vmem:[#allocation2 + $0x18] sm:$0xff] }
 0x4f8   :  { %v8337_v43 = vrot.slane %v8329_v15, %v11066_v58  ;;  %v8330_v5 = vcombine.low %v8293_v59, %v8300_v33  ;;  %v8418_v16 = vsel %vm2189_vm14, %v8415_v35, %v8417_v26  ;;  %v8419_v63 = vsel %vm2189_vm14, %v8413_v18, %v8415_v35  ;;  %v8303_v18 = vld [vmem:[#allocation3 + $0x468] sm:$0xff]  ;;  %v17726_v35 = vld [vmem:[#allocation16_spill] sm:$0xff]  ;;  %v8994_v33 = vld [vmem:[#allocation3 + $0x4d8] sm:$0xff] }
 0x4f9   :  { %v16355_v20 = vld [vmem:[#allocation2] sm:$0xff]  ;;  %v8133_v10 = vrot.slane %v8119_v13, %v11066_v58  ;;  %v8134_v28 = vcombine.high %v8126_v53, %v8126_v53  ;;  %v8224_v56 = vmul.f32 %v8220_v37, %v8178_v46  ;;  %v8425_v57 = vsel %vm2189_vm14, %v8417_v26, %v17724_v61  ;;  %v17730_v55 = vld [vmem:[#allocation43_spill] sm:$0xff] }
 0x4fa   :  { %v8344_v1 = vrot.slane %v8330_v5, %v11066_v58  ;;  %v8454_v7 = vcombine.low %v8420_v17, %v8419_v63  ;;  %v8455_v19 = vcombine.low %v8418_v16, %v8425_v57  ;;  %v9412_v3 = vadd.f32 %v16355_v20, %v16361_v36  ;;  %v17729_v46 = vld [vmem:[#allocation20_spill] sm:$0xff] }
 0x4fb   :  { %v17725_v24 = vcombine.high %v17721_v8, %v17721_v8  ;;  %v8135_v31 = vcombine.high %v8133_v10, %v8133_v10  ;;  %v8148_v40 = vadd.f32 %v8126_v53, %v8023_v54  ;;  %v8244_v12 = vcombine.high %v8224_v56, %v8224_v56  ;;  %v16376_v22 = vld [vmem:[#allocation2 + $0x10] sm:$0xff]  ;;  %v17732_v5 = vld [vmem:[#allocation44_spill] sm:$0xff] }
 0x4fc   :  { %v8251_v41 = vrot.slane %v8224_v56, %v11066_v58  ;;  %v8345_v21 = vcombine.low %v8337_v43, %v8344_v1  ;;  %v8462_v34 = vrot.slane %v8454_v7, %v11066_v58  ;;  %v8469_v2 = vrot.slane %v8455_v19, %v11066_v58  ;;  %v17731_v43 = vld [vmem:[#allocation33_spill] sm:$0xff] }
 0x4fd   :  { %v8026_v11 = vadd.f32 %v17725_v24, %v7925_v30  ;;  %v8149_v42 = vadd.f32 %v8134_v28, %v8024_v52  ;;  %v8150_v23 = vadd.f32 %v8133_v10, %v8025_v25  ;;  %v8258_v0 = vrot.slane %v8244_v12, %v11066_v58  ;;  %v17727_v52 = vld [vmem:[#allocation15_spill] sm:$0xff]  ;;  %v17728_v25 = vld [vmem:[#allocation52_spill] sm:$0xff]  ;;  %v17734_v19 = vld [vmem:[#allocation29_spill] sm:$0xff] }
 0x4fe   :  { %v9413_v60 = vadd.f32 %v9412_v3, %v16372_v32  ;;  %v8259_v49 = vcombine.high %v8251_v41, %v8251_v41  ;;  %v8273_v4 = vadd.f32 %v8251_v41, %v8148_v40  ;;  %v8349_v50 = vmul.f32 %v8345_v21, %v8303_v18  ;;  %v17735_v3 = vld [vmem:[#allocation48_spill] sm:$0xff] }
 0x4ff   :  { %v8470_v27 = vcombine.low %v8462_v34, %v8469_v2  ;;  %v8151_v30 = vadd.f32 %v8135_v31, %v8026_v11  ;;  %v8260_v38 = vcombine.high %v8258_v0, %v8258_v0  ;;  %v8275_v54 = vadd.f32 %v8258_v0, %v8150_v23  ;;  %v9087_v31 = vld [vmem:[#allocation3 + $0x4e8] sm:$0xff]  ;;  %v9180_v34 = vld [vmem:[#allocation3 + $0x4f8] sm:$0xff] }
 0x500   :  { %v9414_v6 = vadd.f32 %v9413_v60, %v16376_v22  ;;  %v8274_v62 = vadd.f32 %v8259_v49, %v8149_v42  ;;  %v8369_v29 = vcombine.high %v8349_v50, %v8349_v50  ;;  %v8376_v39 = vrot.slane %v8349_v50, %v11066_v58  ;;  %v17737_v42 = vld [vmem:[#allocation42_spill] sm:$0xff]  ;;  %v17738_v0 = vld [vmem:[#allocation35_spill] sm:$0xff] }
 0x501   :  { %v8474_v15 = vmul.f32 %v8470_v27, %v8428_v48  ;;  %v8788_v51 = vcombine.high %v17726_v35, %v17726_v35  ;;  %v8789_v8 = vcombine.high %v17727_v52, %v17727_v52  ;;  %v9292_v59 = vcombine.low %v17729_v46, %v17728_v25  ;;  %v17739_v48 = vld [vmem:[#allocation17_spill] sm:$0xff]  ;;  %v17744_v25 = vld [vmem:[#allocation30_spill] sm:$0xff] }
 0x502   :  { %v8276_v14 = vadd.f32 %v8260_v38, %v8151_v30  ;;  %9415 = vadd.xlane.f32.xlu0 %v9414_v6  ;;  %v8383_v26 = vrot.slane %v8369_v29, %v11066_v58  ;;  %v8384_v13 = vcombine.high %v8376_v39, %v8376_v39  ;;  %v8398_v53 = vadd.f32 %v8376_v39, %v8273_v4  ;;  %v17741_v27 = vld [vmem:[#allocation41_spill] sm:$0xff]  ;;  %v17743_v29 = vld [vmem:[#allocation23_spill] sm:$0xff] }
 0x503   :  { %v8494_v37 = vcombine.high %v8474_v15, %v8474_v15  ;;  %v8866_v17 = vcombine.high %v17730_v55, %v17730_v55  ;;  %v17733_v16 = vcombine.low %v17731_v43, %v17732_v5  ;;  %v9299_v10 = vrot.slane %v9291_v47, %v11066_v58  ;;  %v9273_v6 = vld [vmem:[#allocation3 + $0x508] sm:$0xff] }
 0x504   :  { %v8501_v28 = vrot.slane %v8474_v15, %v11066_v58  ;;  %v8385_v56 = vcombine.high %v8383_v26, %v8383_v26  ;;  %v8399_v61 = vadd.f32 %v8384_v13, %v8274_v62  ;;  %v8400_v57 = vadd.f32 %v8383_v26, %v8275_v54  ;;  %v17745_v46 = vld [vmem:[#allocation21_spill] sm:$0xff]  ;;  %v17748_v13 = vld [vmem:[#allocation19_spill] sm:$0xff] }
 0x505   :  { %v8939_v63 = vmul.f32 %v17733_v16, %v8901_v9  ;;  %v8508_v1 = vrot.slane %v8494_v37, %v11066_v58  ;;  %v8873_v7 = vrot.slane %v17730_v55, %v11066_v58  ;;  %v17736_v24 = vcombine.low %v17734_v19, %v17735_v3 }
 0x506   :  { %v8509_v40 = vcombine.high %v8501_v28, %v8501_v28  ;;  %v8523_v12 = vadd.f32 %v8501_v28, %v8398_v53  ;;  %v9306_v44 = vrot.slane %v9292_v59, %v11066_v58  ;;  %v8401_v45 = vadd.f32 %v8385_v56, %v8276_v14 }
 0x507   :  { %v9032_v11 = vmul.f32 %v17736_v24, %v8994_v33  ;;  %v8510_v47 = vcombine.high %v8508_v1, %v8508_v1  ;;  %v8525_v18 = vadd.f32 %v8508_v1, %v8400_v57  ;;  %v8880_v41 = vrot.slane %v8866_v17, %v11066_v58 }
 0x508   :  { %v8959_v21 = vcombine.high %v8939_v63, %v8939_v63  ;;  %v8524_v2 = vadd.f32 %v8509_v40, %v8399_v61  ;;  %v8616_v23 = vadd.f32 %v17737_v42, %v8523_v12  ;;  %v17740_v60 = vcombine.low %v17738_v0, %v17739_v48 }
 0x509   :  { %v9307_v4 = vcombine.low %v9299_v10, %v9306_v44  ;;  %v8526_v50 = vadd.f32 %v8510_v47, %v8401_v45  ;;  %v8618_v30 = vadd.f32 %v17741_v27, %v8525_v18  ;;  %v8881_v38 = vcombine.high %v8873_v7, %v8873_v7 }
 0x50a   :  { %v9125_v49 = vmul.f32 %v17740_v60, %v9087_v31  ;;  %v8966_v54 = vrot.slane %v8939_v63, %v11066_v58  ;;  %v17742_v9 = vcombine.high %v17737_v42, %v17737_v42  ;;  %v8709_v39 = vadd.f32 %v17743_v29, %v8616_v23 }
 0x50b   :  { %v9052_v15 = vcombine.high %v9032_v11, %v9032_v11  ;;  %v17746_v59 = vcombine.low %v17744_v25, %v17745_v46  ;;  %v17747_v33 = vcombine.high %v17741_v27, %v17741_v27  ;;  %v8711_v53 = vadd.f32 %v17748_v13, %v8618_v30 }
 0x50c   :  { %v8617_v62 = vadd.f32 %v17742_v9, %v8524_v2  ;;  %v8882_v37 = vcombine.high %v8880_v41, %v8880_v41  ;;  %v8973_v55 = vrot.slane %v8959_v21, %v11066_v58  ;;  %v17749_v17 = vcombine.high %v17743_v29, %v17743_v29 }
 0x50d   :  { %v9218_v14 = vmul.f32 %v17746_v59, %v9180_v34  ;;  %v8619_v26 = vadd.f32 %v17747_v33, %v8526_v50  ;;  %v8802_v5 = vadd.f32 %v17726_v35, %v8709_v39  ;;  %v9145_v16 = vcombine.high %v9125_v49, %v9125_v49 }
 0x50e   :  { %v8710_v43 = vadd.f32 %v17749_v17, %v8617_v62  ;;  %v9311_v63 = vmul.f32 %v9307_v4, %v9273_v6  ;;  %v17750_v10 = vcombine.high %v17748_v13, %v17748_v13  ;;  %v8804_v56 = vadd.f32 %v17727_v52, %v8711_v53 }
 0x50f   :  { %v8974_v61 = vcombine.high %v8966_v54, %v8966_v54  ;;  %v9059_v57 = vrot.slane %v9032_v11, %v11066_v58  ;;  %v8895_v19 = vadd.f32 %v8873_v7, %v8802_v5  ;;  %v9066_v3 = vrot.slane %v9052_v15, %v11066_v58 }
 0x510   :  { %v8712_v28 = vadd.f32 %v17750_v10, %v8619_v26  ;;  %v8803_v1 = vadd.f32 %v8788_v51, %v8710_v43  ;;  %v9238_v24 = vcombine.high %v9218_v14, %v9218_v14  ;;  %v8897_v40 = vadd.f32 %v8880_v41, %v8804_v56 }
 0x511   :  { %v8975_v12 = vcombine.high %v8973_v55, %v8973_v55  ;;  %v9152_v35 = vrot.slane %v9125_v49, %v11066_v58  ;;  %v8988_v45 = vadd.f32 %v8966_v54, %v8895_v19  ;;  %v9159_v47 = vrot.slane %v9145_v16, %v11066_v58 }
 0x512   :  { %v8805_v31 = vadd.f32 %v8789_v8, %v8712_v28  ;;  %v8896_v44 = vadd.f32 %v8881_v38, %v8803_v1  ;;  %v9331_v18 = vcombine.high %v9311_v63, %v9311_v63  ;;  %v8990_v52 = vadd.f32 %v8973_v55, %v8897_v40 }
 0x513   :  { %v9067_v34 = vcombine.high %v9059_v57, %v9059_v57  ;;  %v9245_v11 = vrot.slane %v9218_v14, %v11066_v58  ;;  %v9081_v7 = vadd.f32 %v9059_v57, %v8988_v45  ;;  %v9068_v2 = vcombine.high %v9066_v3, %v9066_v3 }
 0x514   :  { %v8898_v21 = vadd.f32 %v8882_v37, %v8805_v31  ;;  %v8989_v51 = vadd.f32 %v8974_v61, %v8896_v44  ;;  %v9252_v42 = vrot.slane %v9238_v24, %v11066_v58  ;;  %v9083_v41 = vadd.f32 %v9066_v3, %v8990_v52 }
 0x515   :  { %v9160_v23 = vcombine.high %v9152_v35, %v9152_v35  ;;  %v9338_v0 = vrot.slane %v9311_v63, %v11066_v58  ;;  %v9174_v60 = vadd.f32 %v9152_v35, %v9081_v7  ;;  %v9161_v49 = vcombine.high %v9159_v47, %v9159_v47 }
 0x516   :  { %v8991_v8 = vadd.f32 %v8975_v12, %v8898_v21  ;;  %v9082_v48 = vadd.f32 %v9067_v34, %v8989_v51  ;;  %v9345_v4 = vrot.slane %v9331_v18, %v11066_v58  ;;  %v9176_v27 = vadd.f32 %v9159_v47, %v9083_v41  ;;  %v9485_v41 = vld [vmem:[%s16919_s4] sm:$0xff] }
 0x517   :  { %v9253_v30 = vcombine.high %v9245_v11, %v9245_v11  ;;  %v9267_v54 = vadd.f32 %v9245_v11, %v9174_v60  ;;  %v9254_v6 = vcombine.high %v9252_v42, %v9252_v42  ;;  %v9346_v29 = vcombine.high %v9338_v0, %v9338_v0 }
 0x518   :  { %v9084_v50 = vadd.f32 %v9068_v2, %v8991_v8  ;;  %v9175_v38 = vadd.f32 %v9160_v23, %v9082_v48  ;;  %v9269_v62 = vadd.f32 %v9252_v42, %v9176_v27  ;;  %v9347_v25 = vcombine.high %v9345_v4, %v9345_v4  ;;  %v9488_v2 = vld [vmem:[%s16919_s4 + $0x18] sm:$0xff]  ;;  %v9487_v42 = vld [vmem:[%s16919_s4 + $0x10] sm:$0xff]  ;;  %v9486_v8 = vld [vmem:[%s16919_s4 + $0x8] sm:$0xff] }
 0x519   :  { %v9360_v15 = vadd.f32 %v9338_v0, %v9267_v54  ;;  %v10168_v23 = vld [vmem:[%s16921_s6] sm:$0xff]  ;;  %v10169_v0 = vld [vmem:[%s16921_s6 + $0x8] sm:$0xff]  ;;  %vm9509_vm14 = vcmask 64512   ;;  %vm10180_vm15 = vcmask 326656  }
 0x51a   :  { %v9177_v9 = vadd.f32 %v9161_v49, %v9084_v50  ;;  %v9268_v39 = vadd.f32 %v9253_v30, %v9175_v38  ;;  %v9362_v59 = vadd.f32 %v9345_v4, %v9269_v62  ;;  %v9481_v54 = vld [vmem:[%s16918_s3] sm:$0xff]  ;;  %v9484_v62 = vld [vmem:[%s16918_s3 + $0x18] sm:$0xff] }
 0x51b   :  { %v9376_v33 = vrot.slane %v9360_v15, 4 }
 0x51c   :  { %v9270_v46 = vadd.f32 %v9254_v6, %v9177_v9  ;;  %v9361_v14 = vadd.f32 %v9346_v29, %v9268_v39  ;;  %v9378_v13 = vrot.slane %v9362_v59, 4  ;;  %v9482_v6 = vld [vmem:[%s16918_s3 + $0x8] sm:$0xff]  ;;  %v9483_v9 = vld [vmem:[%s16918_s3 + $0x10] sm:$0xff] }
 0x51d   :  { %9392 = vst [vmem:[#allocation2 + $0x8] sm:$0x30] %v9376_v33 }
 0x51e   :  { %v9363_v26 = vadd.f32 %v9347_v25, %v9270_v46  ;;  %v9377_v53 = vrot.slane %v9361_v14, 4  ;;  %9394 = vst [vmem:[#allocation2 + $0x28] sm:$0x30] %v9378_v13  ;;  %v17752_v13 = vld [vmem:[#allocation8_spill] sm:$0xff] }
 0x520   :  { %v9379_v58 = vrot.slane %v9363_v26, 4  ;;  %9393 = vst [vmem:[#allocation2 + $0x20] sm:$0x30] %v9377_v53  ;;  %v17751_v26 = vld [vmem:[#allocation9_spill] sm:$0xff]  ;;  %v17753_v53 = vld [vmem:[#allocation7_spill] sm:$0xff] }
 0x522   :  { %9395 = vst [vmem:[#allocation2 + $0x38] sm:$0x30] %v9379_v58  ;;  %v17754_v58 = vld [vmem:[#allocation6_spill] sm:$0xff] }
 0x524   :  { %v9408_v37 = vld [vmem:[#allocation2 + $0x8] sm:$0xff] }
 0x525   :  { %v9410_v43 = vld [vmem:[#allocation2 + $0x28] sm:$0xff] }
 0x527   :  { %v9409_v55 = vld [vmem:[#allocation2 + $0x20] sm:$0xff] }
 0x528   :  { %v9443_v17 = vadd.f32 %v9409_v55, %v9408_v37 }
 0x529   :  { %v9411_v16 = vld [vmem:[#allocation2 + $0x38] sm:$0xff] }
 0x52a   :  { %v9444_v5 = vadd.f32 %v9443_v17, %v9410_v43 }
 0x52c   :  { %v9445_v63 = vadd.f32 %v9444_v5, %v9411_v16 }
 0x52e   :  { %9446 = vadd.xlane.f32.xlu1 %v9445_v63 }
 0x53f   :  { %9506 = vperm.xlu1 %10568, %v9488_v2  }
 0x543   :  { %9496 = vperm.xlu1 %10568, %v9486_v8  }
 0x547   :  { %9491 = vperm.xlu1 %10568, %v9485_v41  }
 0x54b   :  { %10172 = vperm.xlu1 %10568, %v10168_v23  }
 0x54f   :  { %10177 = vperm.xlu1 %10568, %v10169_v0  }
 0x58b   :  { %v9416_v10 = vpop.xlane.xlu0 %9415 }
 0x58c   :  { %v9418_v28 = vmul.f32 0.001953125, %v9416_v10 }
 0x58e   :  { %v9419_v56 = vsub.f32 %v16361_v36, %v9418_v28  ;;  %v9420_v61 = vsub.f32 %v16355_v20, %v9418_v28  ;;  %v9421_v57 = vsub.f32 %v16372_v32, %v9418_v28  ;;  %v9422_v1 = vsub.f32 %v16376_v22, %v9418_v28 }
 0x58f   :  { %v10688_v20 = vmov 0.0  }
 0x590   :  { %v9423_v19 = vmul.f32 %v9419_v56, %v9419_v56  ;;  %v9424_v3 = vmul.f32 %v9420_v61, %v9420_v61  ;;  %v9425_v24 = vmul.f32 %v9421_v57, %v9421_v57  ;;  %v9426_v40 = vmul.f32 %v9422_v1, %v9422_v1  ;;  %9586 = vmatprep.mubr.f32.mxu0 %v10688_v20 }
 0x591   :  { %9675 = vmatprep.mubr.f32.mxu1 %v10688_v20 }
 0x592   :  { %v9427_v31 = vadd.f32 %v9424_v3, %v9423_v19 }
 0x594   :  { %v9428_v12 = vadd.f32 %v9427_v31, %v9425_v24 }
 0x596   :  { %v9429_v35 = vadd.f32 %v9428_v12, %v9426_v40 }
 0x598   :  { %9430 = vadd.xlane.f32.xlu0 %v9429_v35 }
 0x5b7   :  { %v9447_v44 = vpop.xlane.xlu1 %9446 }
 0x5b8   :  { %v9448_v45 = vmul.f32 0.001953125, %v9447_v44 }
 0x5ba   :  { %v16443_v47 = vsub.f32 %v9408_v37, %v9448_v45  ;;  %v16445_v18 = vsub.f32 %v9409_v55, %v9448_v45  ;;  %v16447_v36 = vsub.f32 %v9410_v43, %v9448_v45  ;;  %v16451_v32 = vsub.f32 %v9411_v16, %v9448_v45 }
 0x5bb   :  { %v16531_v37 = vpop.permute.xlu1 %9506 }
 0x5bc   :  { %v9453_v22 = vmul.f32 %v16443_v47, %v16443_v47  ;;  %v9454_v21 = vmul.f32 %v16445_v18, %v16445_v18  ;;  %v9455_v52 = vmul.f32 %v16447_v36, %v16447_v36  ;;  %v9456_v11 = vmul.f32 %v16451_v32, %v16451_v32 }
 0x5be   :  { %v9457_v34 = vadd.f32 %v9454_v21, %v9453_v22 }
 0x5bf   :  { %v16533_v55 = vpop.permute.xlu1 %9496 }
 0x5c0   :  { %v9458_v51 = vadd.f32 %v9457_v34, %v9455_v52 }
 0x5c2   :  { %v9459_v7 = vadd.f32 %v9458_v51, %v9456_v11 }
 0x5c3   :  { %v16535_v5 = vpop.permute.xlu1 %9491 }
 0x5c4   :  { %9460 = vadd.xlane.f32.xlu0 %v9459_v7 }
 0x5da   :  { %9501 = vperm.xlu0 %10569, %v9487_v42  }
 0x621   :  { %v9431_v48 = vpop.xlane.xlu0 %9430 }
 0x622   :  { %v9432_v60 = vmul.f32 0.001953125, %v9431_v48 }
 0x624   :  { %v9433_v49 = vadd.f32 1e-05, %v9432_v60 }
 0x626   :  { %10574 = vrsqrt.f32 %v9433_v49 }
 0x633   :  { %v10575_v4 = vpop.eup %10574 }
 0x634   :  { %v9436_v50 = vmul.f32 %v10575_v4, %v9420_v61  ;;  %v9438_v27 = vmul.f32 %v10575_v4, %v9422_v1  ;;  %v9435_v30 = vmul.f32 %v10575_v4, %v9419_v56  ;;  %v9437_v38 = vmul.f32 %v10575_v4, %v9421_v57 }
 0x636   :  { %9440 = vst [vmem:[#allocation2] sm:$0xff] %v9436_v50  ;;  %9552 = vmatprep.subr.mxu0 %v9436_v50  ;;  %9442 = vst [vmem:[#allocation2 + $0x10] sm:$0xff] %v9438_v27  ;;  %9641 = vmatprep.subr.mxu1 %v9438_v27 }
 0x637   :  { %9439 = vst [vmem:[#allocation2 + $0x30] sm:$0xff] %v9435_v30  ;;  %9441 = vst [vmem:[#allocation2 + $0x18] sm:$0xff] %v9437_v38  ;;  %9553 = vmatpush1.msra.mxu0 %v9435_v30  ;;  %9642 = vmatpush1.msra.mxu1 %v9437_v38 }
 0x638   :  { %10516 = vmatmul.mubr.msk.f32.vlgmr.msra.gmra.mxu0 %vm9509_vm14, %v9481_v54  ;;  %10520 = vmatmul.mubr.msk.f32.vlgmr.msra.gmra.mxu1 %vm9509_vm14, %v9481_v54 }
 0x639   :  { %9592 = vmatprep.mubr.f32.mxu0 %v10688_v20  ;;  %9681 = vmatprep.mubr.f32.mxu1 %v10688_v20 }
 0x63c   :  { %10517 = vmatmul.mubr.msk.f32.gmra.mxu0 %vm9509_vm14, %v9482_v6  ;;  %10521 = vmatmul.mubr.msk.f32.gmra.mxu1 %vm9509_vm14, %v9482_v6 }
 0x63d   :  { %9598 = vmatprep.mubr.f32.mxu0 %v10688_v20  ;;  %9687 = vmatprep.mubr.f32.mxu1 %v10688_v20 }
 0x640   :  { %10518 = vmatmul.mubr.msk.f32.gmra.mxu0 %vm9509_vm14, %v9483_v9  ;;  %10522 = vmatmul.mubr.msk.f32.gmra.mxu1 %vm9509_vm14, %v9483_v9 }
 0x641   :  { %9604 = vmatprep.mubr.f32.mxu0 %v10688_v20  ;;  %9693 = vmatprep.mubr.f32.mxu1 %v10688_v20 }
 0x644   :  { %10519 = vmatmul.mubr.msk.f32.gmra.mxu0 %vm9509_vm14, %v9484_v62  ;;  %10523 = vmatmul.mubr.msk.f32.gmra.mxu1 %vm9509_vm14, %v9484_v62 }
 0x645   :  { %9764 = vmatprep.mubr.f32.mxu0 %v10688_v20  ;;  %9853 = vmatprep.mubr.f32.mxu1 %v10688_v20 }
 0x64d   :  { %v9461_v29 = vpop.xlane.xlu0 %9460 }
 0x64e   :  { %v9462_v39 = vmul.f32 0.001953125, %v9461_v29 }
 0x650   :  { %v9463_v15 = vadd.f32 1e-05, %v9462_v39 }
 0x652   :  { %10576 = vrsqrt.f32 %v9463_v15 }
 0x655   :  { %v16540_v61 = vpop.permute.xlu0 %9501 }
 0x65f   :  { %v10577_v25 = vpop.eup %10576 }
 0x660   :  { %v9465_v46 = vmul.f32 %v10577_v25, %v16443_v47  ;;  %v9466_v59 = vmul.f32 %v10577_v25, %v16445_v18  ;;  %v9467_v14 = vmul.f32 %v10577_v25, %v16447_v36  ;;  %v9468_v33 = vmul.f32 %v10577_v25, %v16451_v32 }
 0x662   :  { %9469 = vst [vmem:[#allocation2 + $0x8] sm:$0xff] %v9465_v46  ;;  %9470 = vst [vmem:[#allocation2 + $0x20] sm:$0xff] %v9466_v59  ;;  %9730 = vmatprep.subr.mxu0 %v9466_v59  ;;  %9819 = vmatprep.subr.mxu1 %v9468_v33 }
 0x663   :  { %9471 = vst [vmem:[#allocation2 + $0x28] sm:$0xff] %v9467_v14  ;;  %9472 = vst [vmem:[#allocation2 + $0x38] sm:$0xff] %v9468_v33  ;;  %9731 = vmatpush1.msra.mxu0 %v9465_v46  ;;  %9820 = vmatpush1.msra.mxu1 %v9467_v14 }
 0x664   :  { %10524 = vmatmul.mubr.msk.f32.vlgmr.msra.gmra.mxu0 %vm9509_vm14, %v9481_v54  ;;  %10528 = vmatmul.mubr.msk.f32.vlgmr.msra.gmra.mxu1 %vm9509_vm14, %v9481_v54 }
 0x665   :  { %9770 = vmatprep.mubr.f32.mxu0 %v10688_v20  ;;  %9859 = vmatprep.mubr.f32.mxu1 %v10688_v20 }
 0x666   :  { %10209 = vmatprep.subr.mxu0 %v17751_v26  ;;  %10286 = vmatprep.subr.mxu1 %v17752_v13 }
 0x667   :  { %10210 = vmatpush1.msra.mxu0 %v17753_v53  ;;  %10287 = vmatpush1.msra.mxu1 %v17754_v58 }
 0x668   :  { %10525 = vmatmul.mubr.msk.f32.gmra.mxu0 %vm9509_vm14, %v9482_v6  ;;  %10529 = vmatmul.mubr.msk.f32.gmra.mxu1 %vm9509_vm14, %v9482_v6 }
 0x669   :  { %9776 = vmatprep.mubr.f32.mxu0 %v10688_v20  ;;  %9865 = vmatprep.mubr.f32.mxu1 %v10688_v20 }
 0x66c   :  { %10526 = vmatmul.mubr.msk.f32.gmra.mxu0 %vm9509_vm14, %v9483_v9  ;;  %10530 = vmatmul.mubr.msk.f32.gmra.mxu1 %vm9509_vm14, %v9483_v9 }
 0x66d   :  { %9782 = vmatprep.mubr.f32.mxu0 %v10688_v20  ;;  %9871 = vmatprep.mubr.f32.mxu1 %v10688_v20 }
 0x670   :  { %10527 = vmatmul.mubr.msk.f32.gmra.mxu0 %vm9509_vm14, %v9484_v62  ;;  %10531 = vmatmul.mubr.msk.f32.gmra.mxu1 %vm9509_vm14, %v9484_v62 }
 0x671   :  { %10251 = vmatprep.mubr.f32.mxu0 %v10688_v20  ;;  %10328 = vmatprep.mubr.f32.mxu1 %v10688_v20 }
 0x6f8   :  { %v9588_v17 = vpop.f32.mrf.mxu0  ;;  %v9677_v43 = vpop.f32.mrf.mxu1 }
 0x6f9   :  { %v16538_v56 = vadd.f32 %v9588_v17, %v16535_v5  ;;  %v16546_v3 = vadd.f32 %v9677_v43, %v16535_v5 }
 0x6fa   :  { %v9590_v16 = vpop.f32.mrf.mxu0  ;;  %v9679_v63 = vpop.f32.mrf.mxu1 }
 0x6fb   :  { %v16543_v19 = vadd.f32 %v9590_v16, %v16535_v5  ;;  %v16549_v24 = vadd.f32 %v9679_v63, %v16535_v5  ;;  %v9910_v35 = vmul.f32 0.044715, %v16538_v56  ;;  %v16581_v51 = vmul.f32 0.044715, %v16546_v3 }
 0x6fc   :  { %v9594_v10 = vpop.f32.mrf.mxu0  ;;  %v9683_v28 = vpop.f32.mrf.mxu1 }
 0x6fd   :  { %v16552_v12 = vadd.f32 %v9594_v10, %v16533_v55  ;;  %v16556_v44 = vadd.f32 %v9683_v28, %v16533_v55  ;;  %v9911_v21 = vmul.f32 0.044715, %v16543_v19  ;;  %v16578_v11 = vmul.f32 0.044715, %v16549_v24 }
 0x6fe   :  { %v9596_v57 = vpop.f32.mrf.mxu0  ;;  %v9685_v1 = vpop.f32.mrf.mxu1  ;;  %v16587_v23 = vmul.f32 %v9910_v35, %v16538_v56 }
 0x6ff   :  { %v16565_v32 = vadd.f32 %v9596_v57, %v16533_v55  ;;  %v16568_v22 = vadd.f32 %v9685_v1, %v16533_v55  ;;  %v9918_v41 = vmul.f32 0.044715, %v16552_v12  ;;  %v9920_v49 = vmul.f32 0.044715, %v16556_v44 }
 0x700   :  { %v9600_v31 = vpop.f32.mrf.mxu0  ;;  %v9689_v40 = vpop.f32.mrf.mxu1  ;;  %v9943_v54 = vmul.f32 %v9911_v21, %v16543_v19 }
 0x701   :  { %v16559_v45 = vadd.f32 %v9600_v31, %v16540_v61  ;;  %v16562_v47 = vadd.f32 %v9689_v40, %v16540_v61  ;;  %v9919_v30 = vmul.f32 0.044715, %v16565_v32  ;;  %v9921_v38 = vmul.f32 0.044715, %v16568_v22 }
 0x702   :  { %v9602_v18 = vpop.f32.mrf.mxu0  ;;  %v9691_v36 = vpop.f32.mrf.mxu1 }
 0x703   :  { %v16572_v52 = vadd.f32 %v9602_v18, %v16540_v61  ;;  %v16575_v34 = vadd.f32 %v9691_v36, %v16540_v61  ;;  %v9926_v42 = vmul.f32 0.044715, %v16559_v45  ;;  %v9928_v8 = vmul.f32 0.044715, %v16562_v47 }
 0x704   :  { %v9606_v7 = vpop.f32.mrf.mxu0  ;;  %v9695_v2 = vpop.f32.mrf.mxu1  ;;  %v9951_v58 = vmul.f32 %v9919_v30, %v16565_v32  ;;  %v9953_v17 = vmul.f32 %v9921_v38, %v16568_v22  ;;  %v9952_v38 = vmul.f32 %v9920_v49, %v16556_v44 }
 0x705   :  { %v16590_v0 = vadd.f32 %v9606_v7, %v16531_v37  ;;  %v16593_v48 = vadd.f32 %v9695_v2, %v16531_v37  ;;  %v9927_v60 = vmul.f32 0.044715, %v16572_v52  ;;  %v9929_v27 = vmul.f32 0.044715, %v16575_v34 }
 0x706   :  { %v9608_v4 = vpop.f32.mrf.mxu0  ;;  %v9697_v50 = vpop.f32.mrf.mxu1  ;;  %v9958_v25 = vmul.f32 %v9926_v42, %v16559_v45  ;;  %v9960_v46 = vmul.f32 %v9928_v8, %v16562_v47  ;;  %v9950_v42 = vmul.f32 %v9918_v41, %v16552_v12  ;;  %v9983_v30 = vmul.f32 %v9951_v58, %v16565_v32 }
 0x707   :  { %v9934_v6 = vmul.f32 0.044715, %v16590_v0  ;;  %v9936_v9 = vmul.f32 0.044715, %v16593_v48  ;;  %v16604_v62 = vadd.f32 %v9608_v4, %v16531_v37  ;;  %v16607_v29 = vadd.f32 %v9697_v50, %v16531_v37 }
 0x708   :  { %v9959_v39 = vmul.f32 %v9927_v60, %v16572_v52  ;;  %v9961_v15 = vmul.f32 %v9929_v27, %v16575_v34  ;;  %v9990_v1 = vmul.f32 %v9958_v25, %v16559_v45  ;;  %v9992_v31 = vmul.f32 %v9960_v46, %v16562_v47 }
 0x709   :  { %v9966_v59 = vmul.f32 %v9934_v6, %v16590_v0  ;;  %v9968_v14 = vmul.f32 %v9936_v9, %v16593_v48  ;;  %v9935_v33 = vmul.f32 0.044715, %v16604_v62  ;;  %v9937_v26 = vmul.f32 0.044715, %v16607_v29 }
 0x70a   :  { %v9991_v13 = vmul.f32 %v9959_v39, %v16572_v52  ;;  %v9993_v53 = vmul.f32 %v9961_v15, %v16575_v34  ;;  %v10022_v7 = vadd.f32 %v9990_v1, %v16559_v45  ;;  %v10024_v2 = vadd.f32 %v9992_v31, %v16562_v47 }
 0x70b   :  { %v9998_v43 = vmul.f32 %v9966_v59, %v16590_v0  ;;  %v10000_v16 = vmul.f32 %v9968_v14, %v16593_v48  ;;  %v9967_v63 = vmul.f32 %v9935_v33, %v16604_v62  ;;  %v9969_v10 = vmul.f32 %v9937_v26, %v16607_v29 }
 0x70c   :  { %v10023_v28 = vadd.f32 %v9991_v13, %v16572_v52  ;;  %v10025_v57 = vadd.f32 %v9993_v53, %v16575_v34  ;;  %v9985_v39 = vmul.f32 %v9953_v17, %v16568_v22  ;;  %v10054_v15 = vmul.f32 0.7978846, %v10022_v7 }
 0x70d   :  { %v10030_v40 = vadd.f32 %v9998_v43, %v16590_v0  ;;  %v10032_v35 = vadd.f32 %v10000_v16, %v16593_v48  ;;  %v9999_v18 = vmul.f32 %v9967_v63, %v16604_v62  ;;  %v10001_v36 = vmul.f32 %v9969_v10, %v16607_v29 }
 0x70e   :  { %v10055_v21 = vmul.f32 0.7978846, %v10023_v28  ;;  %v10057_v27 = vmul.f32 0.7978846, %v10025_v57  ;;  %v10015_v41 = vadd.f32 %v9983_v30, %v16565_v32  ;;  %v9945_v25 = vmul.f32 %v16578_v11, %v16549_v24 }
 0x70f   :  { %v10031_v8 = vadd.f32 %v9999_v18, %v16604_v62  ;;  %v10033_v60 = vadd.f32 %v10001_v36, %v16607_v29  ;;  %v10062_v4 = vmul.f32 0.7978846, %v10030_v40  ;;  %v10064_v50 = vmul.f32 0.7978846, %v10032_v35 }
 0x710   :  { %10578 = vtanh.f32 %v10055_v21  ;;  %v10056_v46 = vmul.f32 0.7978846, %v10024_v2  ;;  %v10017_v59 = vadd.f32 %v9985_v39, %v16568_v22  ;;  %v9982_v14 = vmul.f32 %v9950_v42, %v16552_v12 }
 0x711   :  { %v10063_v6 = vmul.f32 0.7978846, %v10031_v8  ;;  %v10065_v9 = vmul.f32 0.7978846, %v10033_v60  ;;  %10580 = vtanh.f32 %v10062_v4  ;;  %v10047_v49 = vmul.f32 0.7978846, %v10015_v41 }
 0x712   :  { %10582 = vtanh.f32 %v10064_v50  ;;  %v9984_v33 = vmul.f32 %v9952_v38, %v16556_v44  ;;  %v9944_v26 = vmul.f32 %v16581_v51, %v16546_v3  ;;  %v10049_v13 = vmul.f32 0.7978846, %v10017_v59 }
 0x713   :  { %10584 = vtanh.f32 %v10063_v6  ;;  %v9975_v53 = vmul.f32 %v9943_v54, %v16543_v19  ;;  %v9977_v11 = vmul.f32 %v9945_v25, %v16549_v24  ;;  %v10014_v58 = vadd.f32 %v9982_v14, %v16552_v12 }
 0x714   :  { %10586 = vtanh.f32 %v10065_v9  ;;  %v10016_v17 = vadd.f32 %v9984_v33, %v16556_v44  ;;  %v9974_v43 = vmul.f32 %v16587_v23, %v16538_v56  ;;  %v9976_v16 = vmul.f32 %v9944_v26, %v16546_v3 }
 0x715   :  { %10588 = vtanh.f32 %v10057_v27  ;;  %v10007_v51 = vadd.f32 %v9975_v53, %v16543_v19  ;;  %v10009_v63 = vadd.f32 %v9977_v11, %v16549_v24  ;;  %v10046_v54 = vmul.f32 0.7978846, %v10014_v58 }
 0x716   :  { %10590 = vtanh.f32 %v10054_v15  ;;  %v10048_v10 = vmul.f32 0.7978846, %v10016_v17  ;;  %v10006_v28 = vadd.f32 %v9974_v43, %v16538_v56  ;;  %v10008_v57 = vadd.f32 %v9976_v16, %v16546_v3 }
 0x717   :  { %10592 = vtanh.f32 %v10056_v46  ;;  %v10039_v31 = vmul.f32 0.7978846, %v10007_v51  ;;  %v9895_v35 = vmul.f32 0.5, %v16572_v52  ;;  %v9894_v23 = vmul.f32 0.5, %v16559_v45 }
 0x718   :  { %10594 = vtanh.f32 %v10047_v49  ;;  %v9896_v18 = vmul.f32 0.5, %v16562_v47  ;;  %v10041_v36 = vmul.f32 0.7978846, %v10009_v63  ;;  %v9903_v7 = vmul.f32 0.5, %v16604_v62 }
 0x719   :  { %10596 = vtanh.f32 %v10049_v13  ;;  %v9902_v2 = vmul.f32 0.5, %v16590_v0  ;;  %v9904_v42 = vmul.f32 0.5, %v16593_v48  ;;  %v10038_v4 = vmul.f32 0.7978846, %v10006_v28 }
 0x71a   :  { %10598 = vtanh.f32 %v10046_v54  ;;  %v10040_v50 = vmul.f32 0.7978846, %v10008_v57  ;;  %v9905_v62 = vmul.f32 0.5, %v16607_v29  ;;  %v9897_v0 = vmul.f32 0.5, %v16575_v34 }
 0x71b   :  { %10600 = vtanh.f32 %v10048_v10  ;;  %v16680_v10 = vmul.f32 0.5, %v16538_v56  ;;  %v16695_v56 = vmul.f32 0.5, %v16549_v24  ;;  %v9887_v24 = vmul.f32 0.5, %v16565_v32 }
 0x71c   :  { %10602 = vtanh.f32 %v10039_v31 }
 0x71d   :  { %v10579_v1 = vpop.eup %10578  ;;  %10604 = vtanh.f32 %v10041_v36 }
 0x71e   :  { %v10581_v40 = vpop.eup %10580  ;;  %v10119_v45 = vadd.f32 1.0, %v10579_v1  ;;  %10606 = vtanh.f32 %v10038_v4  ;;  %v9889_v4 = vmul.f32 0.5, %v16568_v22 }
 0x71f   :  { %v10583_v21 = vpop.eup %10582  ;;  %v10126_v60 = vadd.f32 1.0, %v10581_v40  ;;  %10608 = vtanh.f32 %v10040_v50 }
 0x720   :  { %v10585_v8 = vpop.eup %10584  ;;  %v10128_v30 = vadd.f32 1.0, %v10583_v21  ;;  %v10151_v53 = vmul.f32 %v10119_v45, %v9895_v35  ;;  %v16689_v35 = vmul.f32 0.5, %v16546_v3  ;;  %v16692_v21 = vmul.f32 0.5, %v16543_v19 }
 0x721   :  { %v10587_v27 = vpop.eup %10586  ;;  %v10127_v52 = vadd.f32 1.0, %v10585_v8  ;;  %v10158_v33 = vmul.f32 %v10126_v60, %v9902_v2 }
 0x722   :  { %v10589_v47 = vpop.eup %10588  ;;  %v10129_v9 = vadd.f32 1.0, %v10587_v27  ;;  %v10160_v13 = vmul.f32 %v10128_v30, %v9904_v42 }
 0x723   :  { %v10591_v48 = vpop.eup %10590  ;;  %v10159_v41 = vmul.f32 %v10127_v52, %v9903_v7  ;;  %v10121_v25 = vadd.f32 1.0, %v10589_v47  ;;  %v9886_v47 = vmul.f32 0.5, %v16552_v12 }
 0x724   :  { %v9766_v38 = vpop.f32.mrf.mxu0  ;;  %v9855_v6 = vpop.f32.mrf.mxu1  ;;  %v10161_v49 = vmul.f32 %v10129_v9, %v9905_v62  ;;  %v10118_v26 = vadd.f32 1.0, %v10591_v48 }
 0x725   :  { %v16669_v39 = vadd.f32 %v9766_v38, %v16535_v5  ;;  %v16672_v15 = vadd.f32 %v9855_v6, %v16535_v5  ;;  %v10593_v46 = vpop.eup %10592  ;;  %10211 = vmatprep.subr.mxu0 %v10159_v41  ;;  %v10153_v16 = vmul.f32 %v10121_v25, %v9897_v0  ;;  %v9888_v38 = vmul.f32 0.5, %v16556_v44 }
 0x726   :  { %v9768_v59 = vpop.f32.mrf.mxu0  ;;  %v9857_v14 = vpop.f32.mrf.mxu1  ;;  %10288 = vmatprep.subr.mxu1 %v10161_v49  ;;  %10212 = vmatpush1.msra.mxu0 %v10158_v33  ;;  %v10150_v51 = vmul.f32 %v10118_v26, %v9894_v23  ;;  %v10120_v63 = vadd.f32 1.0, %v10593_v46 }
 0x727   :  { %v10595_v29 = vpop.eup %10594  ;;  %v9914_v34 = vmul.f32 0.044715, %v16669_v39  ;;  %v9916_v58 = vmul.f32 0.044715, %v16672_v15  ;;  %v16677_v54 = vadd.f32 %v9768_v59, %v16535_v5  ;;  %10289 = vmatpush1.msra.mxu1 %v10160_v13  ;;  %10213 = vmatprep.subr.mxu0 %v10151_v53  ;;  %v16724_v25 = vadd.f32 %v9857_v14, %v16535_v5 }
 0x728   :  { %v10597_v11 = vpop.eup %10596  ;;  %v9772_v17 = vpop.f32.mrf.mxu0  ;;  %10290 = vmatprep.subr.mxu1 %v10153_v16  ;;  %10214 = vmatpush1.msra.mxu0 %v10150_v51  ;;  %v10152_v40 = vmul.f32 %v10120_v63, %v9896_v18  ;;  %v10111_v23 = vadd.f32 1.0, %v10595_v29 }
 0x729   :  { %v9861_v43 = vpop.f32.mrf.mxu1  ;;  %v16683_v28 = vadd.f32 %v9772_v17, %v16533_v55  ;;  %v10113_v36 = vadd.f32 1.0, %v10597_v11  ;;  %v9946_v7 = vmul.f32 %v9914_v34, %v16669_v39  ;;  %v9948_v2 = vmul.f32 %v9916_v58, %v16672_v15  ;;  %v10599_v50 = vpop.eup %10598 }
 0x72a   :  { %v16686_v57 = vadd.f32 %v9861_v43, %v16533_v55  ;;  %v9774_v1 = vpop.f32.mrf.mxu0  ;;  %10291 = vmatpush1.msra.mxu1 %v10152_v40  ;;  %v9915_v27 = vmul.f32 0.044715, %v16677_v54  ;;  %v10601_v6 = vpop.eup %10600  ;;  %v10143_v32 = vmul.f32 %v10111_v23, %v9887_v24  ;;  %v10110_v26 = vadd.f32 1.0, %v10599_v50 }
 0x72b   :  { %v9863_v31 = vpop.f32.mrf.mxu1  ;;  %v9922_v42 = vmul.f32 0.044715, %v16683_v28  ;;  %v16711_v52 = vadd.f32 %v9774_v1, %v16533_v55  ;;  %v10145_v0 = vmul.f32 %v10113_v36, %v9889_v4  ;;  %v10603_v22 = vpop.eup %10602  ;;  %v16718_v48 = vmul.f32 %v9946_v7, %v16669_v39 }
 0x72c   :  { %v9924_v8 = vmul.f32 0.044715, %v16686_v57  ;;  %v9778_v18 = vpop.f32.mrf.mxu0  ;;  %v16721_v41 = vmul.f32 %v9948_v2, %v16672_v15  ;;  %v10605_v46 = vpop.eup %10604  ;;  %10215 = vmatprep.subr.mxu0 %v10143_v32  ;;  %v16733_v34 = vmul.f32 %v9915_v27, %v16677_v54  ;;  %v16736_v5 = vadd.f32 %v9863_v31, %v16533_v55 }
 0x72d   :  { %v9867_v60 = vpop.f32.mrf.mxu1  ;;  %v16702_v3 = vadd.f32 %v9778_v18, %v16540_v61  ;;  %v9954_v62 = vmul.f32 %v9922_v42, %v16683_v28  ;;  %10292 = vmatprep.subr.mxu1 %v10145_v0  ;;  %v10112_v13 = vadd.f32 1.0, %v10601_v6  ;;  %v10607_v53 = vpop.eup %10606  ;;  %v9923_v58 = vmul.f32 0.044715, %v16711_v52  ;;  %v16777_v6 = vld [vmem:[%s16920_s5] sm:$0xff] }
 0x72e   :  { %v16705_v19 = vadd.f32 %v9867_v60, %v16540_v61  ;;  %v9780_v30 = vpop.f32.mrf.mxu0  ;;  %v9956_v12 = vmul.f32 %v9924_v8, %v16686_v57  ;;  %v10142_v43 = vmul.f32 %v10110_v26, %v9886_v47  ;;  %v10609_v16 = vpop.eup %10608  ;;  %v10103_v1 = vadd.f32 1.0, %v10603_v22 }
 0x72f   :  { %v9869_v45 = vpop.f32.mrf.mxu1  ;;  %v9930_v9 = vmul.f32 0.044715, %v16702_v3  ;;  %v16730_v33 = vadd.f32 %v9780_v30, %v16540_v61  ;;  %v16742_v11 = vmul.f32 %v9954_v62, %v16683_v28  ;;  %v10144_v63 = vmul.f32 %v10112_v13, %v9888_v38 }
 0x730   :  { %v9784_v44 = vpop.f32.mrf.mxu0  ;;  %v9932_v49 = vmul.f32 0.044715, %v16705_v19  ;;  %v16739_v14 = vadd.f32 %v9869_v45, %v16540_v61  ;;  %v10105_v55 = vadd.f32 1.0, %v10605_v46  ;;  %v16748_v61 = vmul.f32 %v9956_v12, %v16686_v57  ;;  %10216 = vmatpush1.msra.mxu0 %v10142_v43  ;;  %v17756_v43 = vld [vmem:[#allocation12_spill] sm:$0xff] }
 0x731   :  { %v9962_v59 = vmul.f32 %v9930_v9, %v16702_v3  ;;  %v9873_v29 = vpop.f32.mrf.mxu1  ;;  %v9931_v17 = vmul.f32 0.044715, %v16730_v33  ;;  %v16753_v36 = vadd.f32 %v9784_v44, %v16531_v37  ;;  %10293 = vmatpush1.msra.mxu1 %v10144_v63  ;;  %v10135_v42 = vmul.f32 %v10103_v1, %v16692_v21 }
 0x732   :  { %v9933_v51 = vmul.f32 0.044715, %v16739_v14  ;;  %v9786_v31 = vpop.f32.mrf.mxu0  ;;  %v9964_v23 = vmul.f32 %v9932_v49, %v16705_v19  ;;  %v10137_v8 = vmul.f32 %v10105_v55, %v16695_v56  ;;  %v16759_v18 = vadd.f32 %v9873_v29, %v16531_v37  ;;  %v16802_v29 = vld [vmem:[%s16920_s5 + $0x8] sm:$0xff] }
 0x733   :  { %v9994_v40 = vmul.f32 %v9962_v59, %v16702_v3  ;;  %v9875_v7 = vpop.f32.mrf.mxu1  ;;  %v9963_v2 = vmul.f32 %v9931_v17, %v16730_v33  ;;  %v9938_v60 = vmul.f32 0.044715, %v16753_v36  ;;  %v10102_v24 = vadd.f32 1.0, %v10607_v53  ;;  %10217 = vmatprep.subr.mxu0 %v10135_v42  ;;  %v17755_v17 = vld [vmem:[#allocation10_spill] sm:$0xff] }
 0x734   :  { %v10104_v4 = vadd.f32 1.0, %v10609_v16  ;;  %v16763_v50 = vadd.f32 %v9786_v31, %v16531_v37  ;;  %v9955_v27 = vmul.f32 %v9923_v58, %v16711_v52  ;;  %v9965_v30 = vmul.f32 %v9933_v51, %v16739_v14  ;;  %10294 = vmatprep.subr.mxu1 %v10137_v8  ;;  %v17757_v31 = vld [vmem:[#allocation11_spill] sm:$0xff] }
 0x735   :  { %v9940_v21 = vmul.f32 0.044715, %v16759_v18  ;;  %v16769_v56 = vadd.f32 %v9875_v7, %v16531_v37  ;;  %v9970_v45 = vmul.f32 %v9938_v60, %v16753_v36  ;;  %v10134_v47 = vmul.f32 %v10102_v24, %v16680_v10 }
 0x736   :  { %v10136_v38 = vmul.f32 %v10104_v4, %v16689_v35  ;;  %v9939_v62 = vmul.f32 0.044715, %v16763_v50  ;;  %v10026_v9 = vadd.f32 %v9994_v40, %v16702_v3  ;;  %v9996_v32 = vmul.f32 %v9964_v23, %v16705_v19  ;;  %v17758_v40 = vld [vmem:[#allocation13_spill] sm:$0xff] }
 0x737   :  { %v9972_v37 = vmul.f32 %v9940_v21, %v16759_v18  ;;  %v9941_v0 = vmul.f32 0.044715, %v16769_v56  ;;  %v9925_v22 = vmul.f32 0.044715, %v16736_v5  ;;  %v10002_v10 = vmul.f32 %v9970_v45, %v16753_v36  ;;  %10218 = vmatpush1.msra.mxu0 %v10134_v47 }
 0x738   :  { %10295 = vmatpush1.msra.mxu1 %v10136_v38  ;;  %v9971_v35 = vmul.f32 %v9939_v62, %v16763_v50  ;;  %v9995_v12 = vmul.f32 %v9963_v2, %v16730_v33  ;;  %v9917_v44 = vmul.f32 0.044715, %v16724_v25  ;;  %10532 = vmatmul.mubr.msk.f32.vlgmr.msra.gmra.mxu0 %vm10180_vm15, %v16777_v6  ;;  %v9997_v49 = vmul.f32 %v9965_v30, %v16739_v14 }
 0x739   :  { %v10004_v46 = vmul.f32 %v9972_v37, %v16759_v18  ;;  %10534 = vmatmul.mubr.msk.f32.vlgmr.msra.gmra.mxu1 %vm10180_vm15, %v16777_v6  ;;  %v9973_v59 = vmul.f32 %v9941_v0, %v16769_v56  ;;  %v10034_v26 = vadd.f32 %v10002_v10, %v16753_v36  ;;  %10257 = vmatprep.mubr.f32.mxu0 %v10688_v20  ;;  %v10058_v63 = vmul.f32 0.7978846, %v10026_v9 }
 0x73a   :  { %10334 = vmatprep.mubr.f32.mxu1 %v10688_v20  ;;  %v10003_v13 = vmul.f32 %v9971_v35, %v16763_v50  ;;  %v10027_v53 = vadd.f32 %v9995_v12, %v16730_v33  ;;  %10363 = vmatprep.subr.mxu0 %v17755_v17  ;;  %v10029_v51 = vadd.f32 %v9997_v49, %v16739_v14  ;;  %v9907_v17 = vmul.f32 0.5, %v16763_v50 }
 0x73b   :  { %v10036_v58 = vadd.f32 %v10004_v46, %v16759_v18  ;;  %10440 = vmatprep.subr.mxu1 %v17756_v43  ;;  %v10005_v16 = vmul.f32 %v9973_v59, %v16769_v56  ;;  %v9957_v1 = vmul.f32 %v9925_v22, %v16736_v5  ;;  %v10028_v55 = vadd.f32 %v9996_v32, %v16705_v19 }
 0x73c   :  { %10364 = vmatpush1.msra.mxu0 %v17757_v31  ;;  %10441 = vmatpush1.msra.mxu1 %v17758_v40  ;;  %v10035_v23 = vadd.f32 %v10003_v13, %v16763_v50  ;;  %v10066_v7 = vmul.f32 0.7978846, %v10034_v26  ;;  %v9949_v2 = vmul.f32 %v9917_v44, %v16724_v25  ;;  %10610 = vtanh.f32 %v10058_v63 }
 0x73d   :  { %10533 = vmatmul.mubr.msk.f32.gmra.mxu0 %vm10180_vm15, %v16802_v29  ;;  %10535 = vmatmul.mubr.msk.f32.gmra.mxu1 %vm10180_vm15, %v16802_v29  ;;  %v10037_v42 = vadd.f32 %v10005_v16, %v16769_v56  ;;  %v10068_v8 = vmul.f32 0.7978846, %v10036_v58  ;;  %v10018_v60 = vadd.f32 %v16742_v11, %v16683_v28  ;;  %v10059_v4 = vmul.f32 0.7978846, %v10027_v53 }
 0x73e   :  { %v10067_v24 = vmul.f32 0.7978846, %v10035_v23  ;;  %10612 = vtanh.f32 %v10066_v7  ;;  %10405 = vmatprep.mubr.f32.mxu0 %v10688_v20  ;;  %10482 = vmatprep.mubr.f32.mxu1 %v10688_v20  ;;  %v10061_v21 = vmul.f32 0.7978846, %v10029_v51  ;;  %v9987_v45 = vmul.f32 %v9955_v27, %v16711_v52 }
 0x73f   :  { %v10069_v30 = vmul.f32 0.7978846, %v10037_v42  ;;  %10614 = vtanh.f32 %v10068_v8  ;;  %v10020_v47 = vadd.f32 %v16748_v61, %v16686_v57  ;;  %v10060_v38 = vmul.f32 0.7978846, %v10028_v55 }
 0x740   :  { %10616 = vtanh.f32 %v10067_v24  ;;  %v9989_v62 = vmul.f32 %v9957_v1, %v16736_v5  ;;  %v10010_v11 = vadd.f32 %v16718_v48, %v16669_v39  ;;  %v10019_v9 = vadd.f32 %v9987_v45, %v16711_v52 }
 0x741   :  { %10618 = vtanh.f32 %v10069_v30  ;;  %v10012_v32 = vadd.f32 %v16721_v41, %v16672_v15  ;;  %v9979_v27 = vmul.f32 %v16733_v34, %v16677_v54  ;;  %v10050_v0 = vmul.f32 0.7978846, %v10018_v60 }
 0x742   :  { %10620 = vtanh.f32 %v10059_v4  ;;  %v10021_v37 = vadd.f32 %v9989_v62, %v16736_v5  ;;  %v10051_v61 = vmul.f32 0.7978846, %v10019_v9  ;;  %v9981_v22 = vmul.f32 %v9949_v2, %v16724_v25 }
 0x743   :  { %10622 = vtanh.f32 %v10061_v21  ;;  %v10052_v48 = vmul.f32 0.7978846, %v10020_v47  ;;  %v10011_v35 = vadd.f32 %v9979_v27, %v16677_v54  ;;  %v10042_v46 = vmul.f32 0.7978846, %v10010_v11 }
 0x744   :  { %10624 = vtanh.f32 %v10060_v38  ;;  %v10053_v10 = vmul.f32 0.7978846, %v10021_v37  ;;  %v10013_v12 = vadd.f32 %v9981_v22, %v16724_v25  ;;  %v10044_v34 = vmul.f32 0.7978846, %v10012_v32 }
 0x745   :  { %10626 = vtanh.f32 %v10051_v61  ;;  %v10043_v41 = vmul.f32 0.7978846, %v10011_v35  ;;  %v9906_v16 = vmul.f32 0.5, %v16753_v36  ;;  %v9909_v1 = vmul.f32 0.5, %v16769_v56 }
 0x746   :  { %10628 = vtanh.f32 %v10053_v10  ;;  %v10045_v44 = vmul.f32 0.7978846, %v10013_v12  ;;  %v9908_v31 = vmul.f32 0.5, %v16759_v18  ;;  %v9899_v2 = vmul.f32 0.5, %v16730_v33 }
 0x747   :  { %10630 = vtanh.f32 %v10050_v0  ;;  %v9901_v8 = vmul.f32 0.5, %v16739_v14  ;;  %v9898_v36 = vmul.f32 0.5, %v16702_v3  ;;  %v9900_v18 = vmul.f32 0.5, %v16705_v19 }
 0x748   :  { %10632 = vtanh.f32 %v10052_v48  ;;  %v9891_v14 = vmul.f32 0.5, %v16711_v52  ;;  %v9893_v3 = vmul.f32 0.5, %v16736_v5  ;;  %v9890_v27 = vmul.f32 0.5, %v16683_v28 }
 0x749   :  { %10634 = vtanh.f32 %v10043_v41  ;;  %v10611_v59 = vpop.eup %10610  ;;  %v9892_v52 = vmul.f32 0.5, %v16686_v57  ;;  %v9883_v12 = vmul.f32 0.5, %v16677_v54 }
 0x74a   :  { %10636 = vtanh.f32 %v10045_v44  ;;  %v10122_v40 = vadd.f32 1.0, %v10611_v59 }
 0x74b   :  { %v10613_v49 = vpop.eup %10612  ;;  %10638 = vtanh.f32 %v10042_v46  ;;  %v9885_v46 = vmul.f32 0.5, %v16724_v25 }
 0x74c   :  { %v10615_v26 = vpop.eup %10614  ;;  %10640 = vtanh.f32 %v10044_v34  ;;  %v10130_v53 = vadd.f32 1.0, %v10613_v49  ;;  %v10154_v38 = vmul.f32 %v10122_v40, %v9898_v36  ;;  %v9882_v49 = vmul.f32 0.5, %v16669_v39  ;;  %v10173_v39 = vpop.permute.xlu1 %10172 }
 0x74d   :  { %v10617_v13 = vpop.eup %10616  ;;  %v10132_v51 = vadd.f32 1.0, %v10615_v26 }
 0x74e   :  { %v10619_v58 = vpop.eup %10618  ;;  %v10131_v43 = vadd.f32 1.0, %v10617_v13  ;;  %v10162_v24 = vmul.f32 %v10130_v53, %v9906_v16  ;;  %v9884_v13 = vmul.f32 0.5, %v16672_v15 }
 0x74f   :  { %v10621_v63 = vpop.eup %10620  ;;  %v10133_v55 = vadd.f32 1.0, %v10619_v58  ;;  %v10164_v56 = vmul.f32 %v10132_v51, %v9908_v31 }
 0x750   :  { %v10623_v23 = vpop.eup %10622  ;;  %v10163_v7 = vmul.f32 %v10131_v43, %v9907_v17  ;;  %v10123_v42 = vadd.f32 1.0, %v10621_v63  ;;  %v10178_v63 = vpop.permute.xlu1 %10177 }
 0x751   :  { %v10625_v60 = vpop.eup %10624  ;;  %v10165_v50 = vmul.f32 %v10133_v55, %v9909_v1  ;;  %v10125_v4 = vadd.f32 1.0, %v10623_v23 }
 0x752   :  { %v10627_v30 = vpop.eup %10626  ;;  %10365 = vmatprep.subr.mxu0 %v10163_v7  ;;  %v10155_v21 = vmul.f32 %v10123_v42, %v9899_v2  ;;  %v10124_v45 = vadd.f32 1.0, %v10625_v60 }
 0x753   :  { %v10629_v47 = vpop.eup %10628  ;;  %10442 = vmatprep.subr.mxu1 %v10165_v50  ;;  %10366 = vmatpush1.msra.mxu0 %v10162_v24  ;;  %v10157_v33 = vmul.f32 %v10125_v4, %v9901_v8  ;;  %v10115_v62 = vadd.f32 1.0, %v10627_v30 }
 0x754   :  { %v10631_v11 = vpop.eup %10630  ;;  %10443 = vmatpush1.msra.mxu1 %v10164_v56  ;;  %10367 = vmatprep.subr.mxu0 %v10155_v21  ;;  %v10156_v9 = vmul.f32 %v10124_v45, %v9900_v18  ;;  %v10117_v32 = vadd.f32 1.0, %v10629_v47 }
 0x755   :  { %v10633_v37 = vpop.eup %10632  ;;  %10444 = vmatprep.subr.mxu1 %v10157_v33  ;;  %10368 = vmatpush1.msra.mxu0 %v10154_v38  ;;  %v10147_v19 = vmul.f32 %v10115_v62, %v9891_v14  ;;  %v10114_v61 = vadd.f32 1.0, %v10631_v11 }
 0x756   :  { %v10635_v0 = vpop.eup %10634  ;;  %10445 = vmatpush1.msra.mxu1 %v10156_v9  ;;  %v10149_v22 = vmul.f32 %v10117_v32, %v9893_v3  ;;  %v10116_v10 = vadd.f32 1.0, %v10633_v37 }
 0x757   :  { %v10637_v48 = vpop.eup %10636  ;;  %10369 = vmatprep.subr.mxu0 %v10147_v19  ;;  %v10146_v35 = vmul.f32 %v10114_v61, %v9890_v27  ;;  %v10107_v5 = vadd.f32 1.0, %v10635_v0 }
 0x758   :  { %v10639_v41 = vpop.eup %10638  ;;  %10446 = vmatprep.subr.mxu1 %v10149_v22  ;;  %v10148_v44 = vmul.f32 %v10116_v10, %v9892_v52  ;;  %v10109_v34 = vadd.f32 1.0, %v10637_v48 }
 0x759   :  { %v10641_v28 = vpop.eup %10640  ;;  %10370 = vmatpush1.msra.mxu0 %v10146_v35  ;;  %v10139_v59 = vmul.f32 %v10107_v5, %v9883_v12  ;;  %v10106_v26 = vadd.f32 1.0, %v10639_v41 }
 0x75a   :  { %10447 = vmatpush1.msra.mxu1 %v10148_v44  ;;  %v10141_v57 = vmul.f32 %v10109_v34, %v9885_v46  ;;  %v10108_v53 = vadd.f32 1.0, %v10641_v28 }
 0x75b   :  { %10371 = vmatprep.subr.mxu0 %v10139_v59  ;;  %v10138_v54 = vmul.f32 %v10106_v26, %v9882_v49 }
 0x75c   :  { %10448 = vmatprep.subr.mxu1 %v10141_v57  ;;  %v10140_v58 = vmul.f32 %v10108_v53, %v9884_v13 }
 0x75d   :  { %10372 = vmatpush1.msra.mxu0 %v10138_v54 }
 0x75e   :  { %10449 = vmatpush1.msra.mxu1 %v10140_v58  ;;  %10536 = vmatmul.mubr.msk.f32.vlgmr.msra.gmra.mxu0 %vm10180_vm15, %v16777_v6 }
 0x75f   :  { %10538 = vmatmul.mubr.msk.f32.vlgmr.msra.gmra.mxu1 %vm10180_vm15, %v16777_v6  ;;  %10411 = vmatprep.mubr.f32.mxu0 %v10688_v20 }
 0x760   :  { %10488 = vmatprep.mubr.f32.mxu1 %v10688_v20 }
 0x762   :  { %10537 = vmatmul.mubr.msk.f32.gmra.mxu0 %vm10180_vm15, %v16802_v29 }
 0x763   :  { %10539 = vmatmul.mubr.msk.f32.gmra.mxu1 %vm10180_vm15, %v16802_v29 }
 0x7f8   :  { %v10253_v15 = vpop.f32.mrf.mxu0 }
 0x7f9   :  { %v10330_v25 = vpop.f32.mrf.mxu1  ;;  %v10254_v17 = vadd.f32 %v10253_v15, %v10173_v39 }
 0x7fa   :  { %v10331_v43 = vadd.f32 %v10330_v25, %v10173_v39  ;;  %v10255_v16 = vpop.f32.mrf.mxu0 }
 0x7fb   :  { %v10332_v51 = vpop.f32.mrf.mxu1  ;;  %10495 = vst [vmem:[%s16922_s7] sm:$0xff] %v10254_v17  ;;  %v10256_v20 = vadd.f32 %v10255_v16, %v10173_v39 }
 0x7fc   :  { %10497 = vst [vmem:[%s16922_s7 + $0x10] sm:$0xff] %v10331_v43  ;;  %v10333_v6 = vadd.f32 %v10332_v51, %v10173_v39 }
 0x7fd   :  { %v10259_v1 = vpop.f32.mrf.mxu0  ;;  %v10336_v29 = vpop.f32.mrf.mxu1  ;;  %10496 = vst [vmem:[%s16922_s7 + $0x8] sm:$0xff] %v10256_v20 }
 0x7fe   :  { %10498 = vst [vmem:[%s16922_s7 + $0x18] sm:$0xff] %v10333_v6  ;;  %v10260_v55 = vadd.f32 %v10259_v1, %v10178_v63  ;;  %v10337_v31 = vadd.f32 %v10336_v29, %v10178_v63 }
 0x7ff   :  { %v10261_v40 = vpop.f32.mrf.mxu0  ;;  %v10338_v23 = vpop.f32.mrf.mxu1 }
 0x800   :  { %10503 = vst [vmem:[%s16922_s7 + $0x40] sm:$0xff] %v10260_v55  ;;  %10505 = vst [vmem:[%s16922_s7 + $0x50] sm:$0xff] %v10337_v31  ;;  %v10262_v7 = vadd.f32 %v10261_v40, %v10178_v63  ;;  %v10339_v2 = vadd.f32 %v10338_v23, %v10178_v63 }
 0x802   :  { %10504 = vst [vmem:[%s16922_s7 + $0x48] sm:$0xff] %v10262_v7  ;;  %10506 = vst [vmem:[%s16922_s7 + $0x58] sm:$0xff] %v10339_v2 }
 0x81e   :  { %v10407_v42 = vpop.f32.mrf.mxu0 }
 0x81f   :  { %v10408_v8 = vadd.f32 %v10407_v42, %v10173_v39  ;;  %v10484_v60 = vpop.f32.mrf.mxu1 }
 0x820   :  { %v10485_v50 = vadd.f32 %v10484_v60, %v10173_v39  ;;  %v10409_v24 = vpop.f32.mrf.mxu0 }
 0x821   :  { %10499 = vst [vmem:[%s16922_s7 + $0x20] sm:$0xff] %v10408_v8  ;;  %v10410_v4 = vadd.f32 %v10409_v24, %v10173_v39  ;;  %v10486_v36 = vpop.f32.mrf.mxu1 }
 0x822   :  { %10501 = vst [vmem:[%s16922_s7 + $0x30] sm:$0xff] %v10485_v50  ;;  %v10487_v30 = vadd.f32 %v10486_v36, %v10173_v39  ;;  %v10413_v56 = vpop.f32.mrf.mxu0 }
 0x823   :  { %10500 = vst [vmem:[%s16922_s7 + $0x28] sm:$0xff] %v10410_v4  ;;  %v10414_v21 = vadd.f32 %v10413_v56, %v10178_v63  ;;  %v10490_v18 = vpop.f32.mrf.mxu1 }
 0x824   :  { %10502 = vst [vmem:[%s16922_s7 + $0x38] sm:$0xff] %v10487_v30  ;;  %v10491_v45 = vadd.f32 %v10490_v18, %v10178_v63  ;;  %v10415_v47 = vpop.f32.mrf.mxu0 }
 0x825   :  { %10507 = vst [vmem:[%s16922_s7 + $0x60] sm:$0xff] %v10414_v21  ;;  %v10416_v33 = vadd.f32 %v10415_v47, %v10178_v63  ;;  %v10492_v38 = vpop.f32.mrf.mxu1 }
 0x826   :  { %10509 = vst [vmem:[%s16922_s7 + $0x70] sm:$0xff] %v10491_v45  ;;  %v10493_v14 = vadd.f32 %v10492_v38, %v10178_v63 }
 0x827   :  { %10508 = vst [vmem:[%s16922_s7 + $0x68] sm:$0xff] %v10416_v33 }
 0x828   :  { %10510 = vst [vmem:[%s16922_s7 + $0x78] sm:$0xff] %v10493_v14 }
 0x829   :  { %10515 = vsyncpa [#allocation4], 1 }

</bundles_post_ra>
